<compile_context>
chip_gen: v6e
topology: v6e:2x2x1
jax: 0.10.0
libtpu: 0.0.40
codegen_flags: <defaults>
</compile_context>

<pallas_src>
import jax
import jax.numpy as jnp
from jax.experimental import pallas as pl
from jax.experimental.pallas import tpu as pltpu


def se_conv_kernel(x_se_ref, w1_ref, b1_ref, x_ref, w2_ref, o_ref):
    # 1x1 conv (64 -> 1536) on the 1x1-spatial input == [1536,64] @ [64,1] matvec.
    # Weights are stored bf16 (DMA) and widened to f32 here (free VPU slot).
    gate = jax.nn.sigmoid(
        jnp.dot(
            w1_ref[...].astype(jnp.float32),
            x_se_ref[...],
            preferred_element_type=jnp.float32,
        )
        + b1_ref[...]
    )  # [C, 1] f32
    # Gate broadcasts along the lane (HW) axis; multiply kept in f32 (single rounding).
    scaled = x_ref[...] * gate  # [C, HW] f32
    # 1x1 conv (1536 -> 256, no bias) == [Cn,1536] @ [1536,49] matmul, f32 MXU acc.
    o_ref[...] = jnp.dot(
        w2_ref[...].astype(jnp.float32),
        scaled,
        preferred_element_type=jnp.float32,
    )  # [Cn, HW] f32


def se_conv_pallas(x_se, w1, b1, x_c, w2, *, cout_blocks=1):
    """Fused SE block. cout_blocks=1 on v5e/v6e (single TC); 2 on v7x to shard the
    dominant w2 DMA across both TensorCores."""
    C, HW = x_c.shape
    Cout = w2.shape[0]
    assert Cout % cout_blocks == 0
    cn = Cout // cout_blocks
    return pl.pallas_call(
        se_conv_kernel,
        out_shape=jax.ShapeDtypeStruct((Cout, HW), jnp.float32),
        grid=(cout_blocks,),
        in_specs=[
            pl.BlockSpec(x_se.shape, lambda j: (0, 0)),   # [64, 1]
            pl.BlockSpec(w1.shape, lambda j: (0, 0)),     # [1536, 64]
            pl.BlockSpec(b1.shape, lambda j: (0, 0)),     # [1536, 1]
            pl.BlockSpec(x_c.shape, lambda j: (0, 0)),    # [1536, 49]
            pl.BlockSpec((cn, C), lambda j: (j, 0)),      # [Cn, 1536]
        ],
        out_specs=pl.BlockSpec((cn, HW), lambda j: (j, 0)),
        compiler_params=pltpu.CompilerParams(
            dimension_semantics=("parallel",),
        ),
    )(x_se, w1, b1, x_c, w2)


def prepare_params(w_conv102, b_conv102, w_conv103, weight_dtype=jnp.bfloat16):
    """One-time parameter prep: zero-copy reshapes (no transposes) + bf16 storage cast."""
    C, C_se = w_conv102.shape[0], w_conv102.shape[1]       # 1536, 64
    Cout = w_conv103.shape[0]                              # 256
    w1 = w_conv102.reshape(C, C_se).astype(weight_dtype)   # [1536, 64]
    b1 = b_conv102.reshape(C, 1).astype(jnp.float32)       # [1536, 1]
    w2 = w_conv103.reshape(Cout, C).astype(weight_dtype)   # [256, 1536]
    return w1, b1, w2


@jax.jit
def module_forward(x324, x321, w1, b1, w2):
    """Mirrors M.forward. x324: [1,64,1,1], x321: [1,1536,7,7] (NCHW, f32).
    Weights come pre-reshaped (see prepare_params)."""
    N, C_se = x324.shape[0], x324.shape[1]
    _, C, H, W = x321.shape
    Cout = w2.shape[0]
    if N != 1:
        # The [C, HW] channel-major view is only a zero-copy reshape for N == 1.
        raise ValueError("se_conv kernel assumes batch size 1 (as in the module spec)")

    x_se = x324.reshape(C_se, 1)      # [64, 1]    zero-copy, stays f32
    x_c = x321.reshape(C, H * W)      # [1536, 49] zero-copy, stays f32

    out = se_conv_pallas(x_se, w1, b1, x_c, w2)   # [256, 49] f32
    return out.reshape(N, Cout, H, W)             # zero-copy back to NCHW


if __name__ == "__main__":
    key = jax.random.PRNGKey(0)
    k1, k2, k3, k4, k5 = jax.random.split(key, 5)

    # Inputs (shapes implied by the module's forward).
    x321 = jax.random.normal(k1, (1, 1536, 7, 7), dtype=jnp.float32)
    x324 = jax.random.normal(k2, (1, 64, 1, 1), dtype=jnp.float32)

    # Deterministic parameter init.
    w_conv102 = jax.random.normal(k3, (1536, 64, 1, 1), dtype=jnp.float32) * 0.05
    b_conv102 = jax.random.normal(k4, (1536,), dtype=jnp.float32) * 0.05
    w_conv103 = jax.random.normal(k5, (256, 1536, 1, 1), dtype=jnp.float32) * 0.02

    # One-time weight preparation (zero-copy reshapes, bf16 storage).
    w1, b1, w2 = prepare_params(w_conv102, b_conv102, w_conv103)

    out = module_forward(x324, x321, w1, b1, w2)
    out = jax.block_until_ready(out)
    assert out.shape == (1, 256, 7, 7), out.shape

    # Plain-JAX f32 reference (bf16 weight storage -> relaxed tolerance).
    gate_ref = jax.nn.sigmoid(
        jnp.einsum("nchw,oc->nohw", x324, w_conv102.reshape(1536, 64))
        + b_conv102.reshape(1, 1536, 1, 1)
    )
    scaled_ref = gate_ref * x321
    out_ref = jnp.einsum("nchw,oc->nohw", scaled_ref, w_conv103.reshape(256, 1536))
    max_err = float(jnp.max(jnp.abs(out - out_ref)))
    assert jnp.allclose(out, out_ref, atol=2e-2, rtol=2e-2), max_err

    print("KERNEL_OK")
</pallas_src>

<mosaic_0001>
module attributes {stable_mosaic.version = 11 : i64} {
  func.func @se_conv_kernel(%arg0: i32, %arg1: memref<64x1xf32, #tpu.memory_space<vmem>>, %arg2: memref<1536x64xbf16, #tpu.memory_space<vmem>>, %arg3: memref<1536x1xf32, #tpu.memory_space<vmem>>, %arg4: memref<1536x49xf32, #tpu.memory_space<vmem>>, %arg5: memref<256x1536xbf16, #tpu.memory_space<vmem>>, %arg6: memref<256x49xf32, #tpu.memory_space<vmem>>) attributes {dimension_semantics = [#tpu.dimension_semantics<parallel>], iteration_bounds = array<i64: 1>, scalar_prefetch = 0 : i64, scratch_operands = 0 : i64, tpu.core_type = #tpu.core_type<tc>, window_params = [{pipeline_mode = #tpu.pipeline_mode<synchronous>, transform_indices = @transform_0, window_bounds = array<i64: 64, 1>}, {pipeline_mode = #tpu.pipeline_mode<synchronous>, transform_indices = @transform_1, window_bounds = array<i64: 1536, 64>}, {pipeline_mode = #tpu.pipeline_mode<synchronous>, transform_indices = @transform_2, window_bounds = array<i64: 1536, 1>}, {pipeline_mode = #tpu.pipeline_mode<synchronous>, transform_indices = @transform_3, window_bounds = array<i64: 1536, 49>}, {transform_indices = @transform_4, window_bounds = array<i64: 256, 1536>}, {transform_indices = @transform_5, window_bounds = array<i64: 256, 49>}]} {
    %c0 = arith.constant 0 : index
    %c0_0 = arith.constant 0 : index
    %0 = vector.load %arg2[%c0, %c0_0] : memref<1536x64xbf16, #tpu.memory_space<vmem>>, vector<1536x64xbf16>
    %1 = arith.extf %0 : vector<1536x64xbf16> to vector<1536x64xf32>
    %c0_1 = arith.constant 0 : index
    %c0_2 = arith.constant 0 : index
    %2 = vector.load %arg1[%c0_1, %c0_2] : memref<64x1xf32, #tpu.memory_space<vmem>>, vector<64x1xf32>
    %cst = arith.constant dense<0.000000e+00> : vector<1536x1xf32>
    %3 = tpu.matmul %1, %2, %cst {dimension_numbers = #tpu.dot_dimension_numbers<[1], [0], [0], [1], [0, 0, 1, 1], [], []>} : vector<1536x64xf32>, vector<64x1xf32>, vector<1536x1xf32> -> vector<1536x1xf32>
    %c0_3 = arith.constant 0 : index
    %c0_4 = arith.constant 0 : index
    %4 = vector.load %arg3[%c0_3, %c0_4] : memref<1536x1xf32, #tpu.memory_space<vmem>>, vector<1536x1xf32>
    %5 = arith.addf %3, %4 : vector<1536x1xf32>
    %6 = arith.negf %5 : vector<1536x1xf32>
    %7 = math.exp %6 : vector<1536x1xf32>
    %cst_5 = arith.constant 1.000000e+00 : f32
    %8 = vector.broadcast %cst_5 : f32 to vector<1536x1xf32>
    %9 = arith.addf %8, %7 : vector<1536x1xf32>
    %10 = arith.divf %8, %9 : vector<1536x1xf32>
    %c0_6 = arith.constant 0 : index
    %c0_7 = arith.constant 0 : index
    %11 = vector.load %arg4[%c0_6, %c0_7] : memref<1536x49xf32, #tpu.memory_space<vmem>>, vector<1536x49xf32>
    %12 = vector.broadcast %10 : vector<1536x1xf32> to vector<1536x49xf32>
    %13 = arith.mulf %11, %12 : vector<1536x49xf32>
    %c0_8 = arith.constant 0 : index
    %c0_9 = arith.constant 0 : index
    %14 = vector.load %arg5[%c0_8, %c0_9] : memref<256x1536xbf16, #tpu.memory_space<vmem>>, vector<256x1536xbf16>
    %15 = arith.extf %14 : vector<256x1536xbf16> to vector<256x1536xf32>
    %cst_10 = arith.constant dense<0.000000e+00> : vector<256x49xf32>
    %16 = tpu.matmul %15, %13, %cst_10 {dimension_numbers = #tpu.dot_dimension_numbers<[1], [0], [0], [1], [0, 0, 1, 1], [], []>} : vector<256x1536xf32>, vector<1536x49xf32>, vector<256x49xf32> -> vector<256x49xf32>
    %c0_11 = arith.constant 0 : index
    %c0_12 = arith.constant 0 : index
    %17 = vector.load %arg6[%c0_11, %c0_12] : memref<256x49xf32, #tpu.memory_space<vmem>>, vector<256x49xf32>
    tpu.vector_store %arg6[%c0_11, %c0_12], %16 {strides = array<i32>} : memref<256x49xf32, #tpu.memory_space<vmem>>, vector<256x49xf32>,
    return
  }
  func.func @transform_0(%arg0: i32) -> (i32, i32) {
    %c0_i32 = arith.constant 0 : i32
    %c0_i32_0 = arith.constant 0 : i32
    %c0_i32_1 = arith.constant 0 : i32
    return %c0_i32, %c0_i32_0 : i32, i32
  }
  func.func @transform_1(%arg0: i32) -> (i32, i32) {
    %c0_i32 = arith.constant 0 : i32
    %c0_i32_0 = arith.constant 0 : i32
    %c0_i32_1 = arith.constant 0 : i32
    return %c0_i32, %c0_i32_0 : i32, i32
  }
  func.func @transform_2(%arg0: i32) -> (i32, i32) {
    %c0_i32 = arith.constant 0 : i32
    %c0_i32_0 = arith.constant 0 : i32
    %c0_i32_1 = arith.constant 0 : i32
    return %c0_i32, %c0_i32_0 : i32, i32
  }
  func.func @transform_3(%arg0: i32) -> (i32, i32) {
    %c0_i32 = arith.constant 0 : i32
    %c0_i32_0 = arith.constant 0 : i32
    %c0_i32_1 = arith.constant 0 : i32
    return %c0_i32, %c0_i32_0 : i32, i32
  }
  func.func @transform_4(%arg0: i32) -> (i32, i32) {
    %c0_i32 = arith.constant 0 : i32
    %c0_i32_0 = arith.constant 0 : i32
    return %arg0, %c0_i32 : i32, i32
  }
  func.func @transform_5(%arg0: i32) -> (i32, i32) {
    %c0_i32 = arith.constant 0 : i32
    %c0_i32_0 = arith.constant 0 : i32
    return %arg0, %c0_i32 : i32, i32
  }
}

</mosaic_0001>

<bundles_post_ra>
// kernel: module_forward.1
= control target key start
LH: loop header
LB: loop body
LE: loop exit
PB: predicated region body
PF: predicated region fallthrough
CT: control target
= control target key end

     0   :  { %vm604_vm0 = vcmask 523264   ;;  %vm6628_vm1 = vcmask 400384   ;;  %s12668_s0 = inlined_call_operand.vmem [shape: f32[64,1], index: 0, kind: input, shape index: {}]   ;;  %s12669_s1 = inlined_call_operand.vmem [shape: bf16[1536,64], index: 1, kind: input, shape index: {}]   ;;  %s12670_s2 = inlined_call_operand.vmem [shape: f32[1536,1], index: 2, kind: input, shape index: {}]   ;;  %s12671_s4 = inlined_call_operand.vmem [shape: bf16[256,1536], index: 4, kind: input, shape index: {}]   ;;  %s12672_s3 = inlined_call_operand.vmem [shape: f32[1536,49], index: 3, kind: input, shape index: {}]   ;;  %s12673_s5 = inlined_call_operand.vmem [shape: f32[256,49], index: 5, kind: output, shape index: {}]  }
   0x1   :  { %v411_v0 = vld [vmem:[%s12668_s0 + $0x38] sm:$0xff]  ;;  %v410_v1 = vld [vmem:[%s12668_s0 + $0x30] sm:$0xff]  ;;  %v409_v2 = vld [vmem:[%s12668_s0 + $0x28] sm:$0xff] }
   0x2   :  { %7728 = vmatprep.subr.mxu0 %v411_v0  ;;  %8032 = vmatprep.subr.mxu1 %v411_v0  ;;  %v7050_v3 = vld [vmem:[%s12669_s1] sm:$0xff]   ;;  %v407_v6 = vld [vmem:[%s12668_s0 + $0x18] sm:$0xff]  ;;  %v406_v7 = vld [vmem:[%s12668_s0 + $0x10] sm:$0xff] }
   0x3   :  { %7729 = vmatpush3.msra.mxu0 %v411_v0  ;;  %8040 = vmatpush3.msra.mxu1 %v411_v0  ;;  %v7051_v4 = vunpack.c.l.bf16 %v7050_v3  ;;  %v408_v5 = vld [vmem:[%s12668_s0 + $0x20] sm:$0xff]  ;;  %v405_v8 = vld [vmem:[%s12668_s0 + $0x8] sm:$0xff]  ;;  %v7052_v11 = vunpack.c.h.bf16 %v7050_v3  ;;  %v7434_v13 = vld [vmem:[%s12669_s1 + $0x10] sm:$0xff]  }
   0x4   :  { %7730 = vmatprep.subr.mxu0 %v410_v1  ;;  %8033 = vmatprep.subr.mxu1 %v410_v1  ;;  %v7433_v9 = vld [vmem:[%s12669_s1 + $0x8] sm:$0xff]   ;;  %v404_v10 = vld [vmem:[%s12668_s0] sm:$0xff]  ;;  %v7059_v15 = vunpack.c.l.bf16 %v7434_v13  ;;  %v7435_v16 = vld [vmem:[%s12669_s1 + $0x18] sm:$0xff]   ;;  %v7060_v17 = vunpack.c.h.bf16 %v7434_v13 }
   0x5   :  { %7731 = vmatpush3.msra.mxu0 %v410_v1  ;;  %8041 = vmatpush3.msra.mxu1 %v410_v1  ;;  %v7055_v12 = vunpack.c.l.bf16 %v7433_v9  ;;  %v7056_v14 = vunpack.c.h.bf16 %v7433_v9  ;;  %v7063_v18 = vunpack.c.l.bf16 %v7435_v16  ;;  %v7436_v19 = vld [vmem:[%s12669_s1 + $0x20] sm:$0xff]   ;;  %v7064_v20 = vunpack.c.h.bf16 %v7435_v16  ;;  %v7437_v22 = vld [vmem:[%s12669_s1 + $0x28] sm:$0xff]   ;;  %v7438_v25 = vld [vmem:[%s12669_s1 + $0x30] sm:$0xff]  }
   0x6   :  { %7732 = vmatprep.subr.mxu0 %v409_v2  ;;  %7744 = vmatprep.mubr.msk.f32.mxu0 %vm604_vm0, %v7051_v4  ;;  %v7067_v21 = vunpack.c.l.bf16 %v7436_v19  ;;  %v7068_v23 = vunpack.c.h.bf16 %v7436_v19  ;;  %v7071_v24 = vunpack.c.l.bf16 %v7437_v22  ;;  %v7072_v26 = vunpack.c.h.bf16 %v7437_v22  ;;  %v7439_v28 = vld [vmem:[%s12669_s1 + $0x38] sm:$0xff]   ;;  %v7440_v31 = vld [vmem:[%s12669_s1 + $0x40] sm:$0xff]   ;;  %v7441_v34 = vld [vmem:[%s12669_s1 + $0x48] sm:$0xff]  }
   0x7   :  { %7733 = vmatpush3.msra.mxu0 %v409_v2  ;;  %8034 = vmatprep.subr.mxu1 %v409_v2  ;;  %v7075_v27 = vunpack.c.l.bf16 %v7438_v25  ;;  %v7076_v29 = vunpack.c.h.bf16 %v7438_v25  ;;  %v7079_v30 = vunpack.c.l.bf16 %v7439_v28  ;;  %v7080_v32 = vunpack.c.h.bf16 %v7439_v28  ;;  %v7442_v37 = vld [vmem:[%s12669_s1 + $0x50] sm:$0xff]   ;;  %v7443_v40 = vld [vmem:[%s12669_s1 + $0x58] sm:$0xff]   ;;  %v7444_v43 = vld [vmem:[%s12669_s1 + $0x60] sm:$0xff]  }
   0x8   :  { %7734 = vmatprep.subr.mxu0 %v408_v5  ;;  %8042 = vmatpush3.msra.mxu1 %v409_v2  ;;  %v7083_v33 = vunpack.c.l.bf16 %v7440_v31  ;;  %v7084_v35 = vunpack.c.h.bf16 %v7440_v31  ;;  %v7087_v36 = vunpack.c.l.bf16 %v7441_v34  ;;  %v7088_v38 = vunpack.c.h.bf16 %v7441_v34  ;;  %v7445_v46 = vld [vmem:[%s12669_s1 + $0x68] sm:$0xff]   ;;  %v7446_v49 = vld [vmem:[%s12669_s1 + $0x70] sm:$0xff]   ;;  %v7447_v52 = vld [vmem:[%s12669_s1 + $0x78] sm:$0xff]  }
   0x9   :  { %7735 = vmatpush3.msra.mxu0 %v408_v5  ;;  %8035 = vmatprep.subr.mxu1 %v408_v5  ;;  %v7091_v39 = vunpack.c.l.bf16 %v7442_v37  ;;  %v7092_v41 = vunpack.c.h.bf16 %v7442_v37  ;;  %v7095_v42 = vunpack.c.l.bf16 %v7443_v40  ;;  %v7096_v44 = vunpack.c.h.bf16 %v7443_v40  ;;  %v7448_v55 = vld [vmem:[%s12669_s1 + $0x80] sm:$0xff]   ;;  %v7449_v58 = vld [vmem:[%s12669_s1 + $0x88] sm:$0xff]   ;;  %v7450_v61 = vld [vmem:[%s12669_s1 + $0x90] sm:$0xff]  }
   0xa   :  { %7736 = vmatprep.subr.mxu0 %v407_v6  ;;  %8043 = vmatpush3.msra.mxu1 %v408_v5  ;;  %v7099_v45 = vunpack.c.l.bf16 %v7444_v43  ;;  %v7100_v47 = vunpack.c.h.bf16 %v7444_v43  ;;  %v7103_v48 = vunpack.c.l.bf16 %v7445_v46  ;;  %v7104_v50 = vunpack.c.h.bf16 %v7445_v46  ;;  %v7451_v0 = vld [vmem:[%s12669_s1 + $0x98] sm:$0xff]   ;;  %v7452_v3 = vld [vmem:[%s12669_s1 + $0xa0] sm:$0xff]   ;;  %v7454_v9 = vld [vmem:[%s12669_s1 + $0xb0] sm:$0xff]  }
   0xb   :  { %7737 = vmatpush3.msra.mxu0 %v407_v6  ;;  %8036 = vmatprep.subr.mxu1 %v407_v6  ;;  %v7107_v51 = vunpack.c.l.bf16 %v7446_v49  ;;  %v7108_v53 = vunpack.c.h.bf16 %v7446_v49  ;;  %v7111_v54 = vunpack.c.l.bf16 %v7447_v52  ;;  %v7112_v56 = vunpack.c.h.bf16 %v7447_v52  ;;  %v7466_v46 = vld [vmem:[%s12669_s1 + $0x110] sm:$0xff]   ;;  %v7467_v49 = vld [vmem:[%s12669_s1 + $0x118] sm:$0xff]   ;;  %v7468_v52 = vld [vmem:[%s12669_s1 + $0x120] sm:$0xff]  }
   0xc   :  { %7738 = vmatprep.subr.mxu0 %v406_v7  ;;  %8044 = vmatpush3.msra.mxu1 %v407_v6  ;;  %v7115_v57 = vunpack.c.l.bf16 %v7448_v55  ;;  %v7116_v59 = vunpack.c.h.bf16 %v7448_v55  ;;  %v7119_v60 = vunpack.c.l.bf16 %v7449_v58  ;;  %v7120_v62 = vunpack.c.h.bf16 %v7449_v58  ;;  %v7453_v6 = vld [vmem:[%s12669_s1 + $0xa8] sm:$0xff]   ;;  %v7470_v58 = vld [vmem:[%s12669_s1 + $0x130] sm:$0xff]  }
   0xd   :  { %7739 = vmatpush3.msra.mxu0 %v406_v7  ;;  %8037 = vmatprep.subr.mxu1 %v406_v7  ;;  %v7123_v63 = vunpack.c.l.bf16 %v7450_v61  ;;  %v7124_v1 = vunpack.c.h.bf16 %v7450_v61  ;;  %v7127_v2 = vunpack.c.l.bf16 %v7451_v0  ;;  %v7128_v4 = vunpack.c.h.bf16 %v7451_v0  ;;  %v7469_v55 = vld [vmem:[%s12669_s1 + $0x128] sm:$0xff]   ;;  %v7471_v61 = vld [vmem:[%s12669_s1 + $0x138] sm:$0xff]   ;;  %v7472_v0 = vld [vmem:[%s12669_s1 + $0x140] sm:$0xff]  }
   0xe   :  { %7740 = vmatprep.subr.mxu0 %v405_v8  ;;  %8045 = vmatpush3.msra.mxu1 %v406_v7  ;;  %v7131_v5 = vunpack.c.l.bf16 %v7452_v3  ;;  %v7132_v7 = vunpack.c.h.bf16 %v7452_v3  ;;  %v7140_v13 = vunpack.c.h.bf16 %v7454_v9  ;;  %v8822_v43 = vmov 0   ;;  %v7473_v3 = vld [vmem:[%s12669_s1 + $0x148] sm:$0xff]  }
   0xf   :  { %7741 = vmatpush3.msra.mxu0 %v405_v8  ;;  %8038 = vmatprep.subr.mxu1 %v405_v8 }
  0x10   :  { %7742 = vmatprep.subr.mxu0 %v404_v10  ;;  %8046 = vmatpush3.msra.mxu1 %v405_v8  ;;  %v7135_v8 = vunpack.c.l.bf16 %v7453_v6 }
  0x11   :  { %7743 = vmatpush3.msra.mxu0 %v404_v10  ;;  %8039 = vmatprep.subr.mxu1 %v404_v10 }
  0x12   :  { %7745 = vmatmul.mubr.msk.f32.vlgmr.msra.gmra.mxu0 %vm604_vm0, %v7052_v11  ;;  %8047 = vmatpush3.msra.mxu1 %v404_v10  ;;  %v7136_v10 = vunpack.c.h.bf16 %v7453_v6  ;;  %v7139_v11 = vunpack.c.l.bf16 %v7454_v9  ;;  %v7512_v6 = vld [vmem:[%s12669_s1 + $0x280] sm:$0xff]  }
  0x13   :  { %7747 = vmatprep.mubr.msk.f32.mxu0 %vm604_vm0, %v7055_v12  ;;  %v7455_v12 = vld [vmem:[%s12669_s1 + $0xb8] sm:$0xff]   ;;  %8051 = vset.pattern.permute.xlu1 %v8822_v43  ;;  %v7372_v9 = vunpack.c.h.bf16 %v7512_v6 }
  0x14   :  { %v7144_v16 = vunpack.c.h.bf16 %v7455_v12  ;;  %8050 = vset.pattern.permute.xlu0 %v8822_v43  ;;  %v7480_v43 = vld [vmem:[%s12669_s1 + $0x180] sm:$0xff]  }
  0x16   :  { %7748 = vmatmul.mubr.msk.f32.gmra.mxu0 %vm604_vm0, %v7056_v14  ;;  %v7143_v14 = vunpack.c.l.bf16 %v7455_v12  ;;  %v7513_v12 = vld [vmem:[%s12669_s1 + $0x288] sm:$0xff]  }
  0x17   :  { %7750 = vmatprep.mubr.msk.f32.mxu0 %vm604_vm0, %v7059_v15  ;;  %v7456_v15 = vld [vmem:[%s12669_s1 + $0xc0] sm:$0xff]  }
  0x18   :  { %v7148_v19 = vunpack.c.h.bf16 %v7456_v15 }
  0x1a   :  { %7751 = vmatmul.mubr.msk.f32.gmra.mxu0 %vm604_vm0, %v7060_v17  ;;  %v7147_v17 = vunpack.c.l.bf16 %v7456_v15  ;;  %v7376_v15 = vunpack.c.h.bf16 %v7513_v12 }
  0x1b   :  { %7753 = vmatprep.mubr.msk.f32.mxu0 %vm604_vm0, %v7063_v18  ;;  %v7457_v18 = vld [vmem:[%s12669_s1 + $0xc8] sm:$0xff]  }
  0x1c   :  { %v7152_v22 = vunpack.c.h.bf16 %v7457_v18 }
  0x1e   :  { %7754 = vmatmul.mubr.msk.f32.gmra.mxu0 %vm604_vm0, %v7064_v20  ;;  %v7151_v20 = vunpack.c.l.bf16 %v7457_v18  ;;  %v7514_v18 = vld [vmem:[%s12669_s1 + $0x290] sm:$0xff]  }
  0x1f   :  { %7756 = vmatprep.mubr.msk.f32.mxu0 %vm604_vm0, %v7067_v21  ;;  %v7458_v21 = vld [vmem:[%s12669_s1 + $0xd0] sm:$0xff]  }
  0x20   :  { %v7156_v25 = vunpack.c.h.bf16 %v7458_v21 }
  0x22   :  { %7757 = vmatmul.mubr.msk.f32.gmra.mxu0 %vm604_vm0, %v7068_v23  ;;  %v7155_v23 = vunpack.c.l.bf16 %v7458_v21  ;;  %v7380_v21 = vunpack.c.h.bf16 %v7514_v18 }
  0x23   :  { %7759 = vmatprep.mubr.msk.f32.mxu0 %vm604_vm0, %v7071_v24  ;;  %v7459_v24 = vld [vmem:[%s12669_s1 + $0xd8] sm:$0xff]  }
  0x24   :  { %v7160_v28 = vunpack.c.h.bf16 %v7459_v24 }
  0x26   :  { %7760 = vmatmul.mubr.msk.f32.gmra.mxu0 %vm604_vm0, %v7072_v26  ;;  %v7159_v26 = vunpack.c.l.bf16 %v7459_v24  ;;  %v7515_v24 = vld [vmem:[%s12669_s1 + $0x298] sm:$0xff]  }
  0x27   :  { %7762 = vmatprep.mubr.msk.f32.mxu0 %vm604_vm0, %v7075_v27  ;;  %v7460_v27 = vld [vmem:[%s12669_s1 + $0xe0] sm:$0xff]  }
  0x28   :  { %v7164_v31 = vunpack.c.h.bf16 %v7460_v27 }
  0x2a   :  { %7763 = vmatmul.mubr.msk.f32.gmra.mxu0 %vm604_vm0, %v7076_v29  ;;  %v7163_v29 = vunpack.c.l.bf16 %v7460_v27  ;;  %v7384_v27 = vunpack.c.h.bf16 %v7515_v24 }
  0x2b   :  { %7765 = vmatprep.mubr.msk.f32.mxu0 %vm604_vm0, %v7079_v30  ;;  %v7461_v30 = vld [vmem:[%s12669_s1 + $0xe8] sm:$0xff]  }
  0x2c   :  { %v7168_v34 = vunpack.c.h.bf16 %v7461_v30 }
  0x2e   :  { %7766 = vmatmul.mubr.msk.f32.gmra.mxu0 %vm604_vm0, %v7080_v32  ;;  %v7167_v32 = vunpack.c.l.bf16 %v7461_v30  ;;  %v7516_v30 = vld [vmem:[%s12669_s1 + $0x2a0] sm:$0xff]  }
  0x2f   :  { %7768 = vmatprep.mubr.msk.f32.mxu0 %vm604_vm0, %v7083_v33  ;;  %v7462_v33 = vld [vmem:[%s12669_s1 + $0xf0] sm:$0xff]  }
  0x30   :  { %v7172_v37 = vunpack.c.h.bf16 %v7462_v33 }
  0x32   :  { %7769 = vmatmul.mubr.msk.f32.gmra.mxu0 %vm604_vm0, %v7084_v35  ;;  %v7171_v35 = vunpack.c.l.bf16 %v7462_v33  ;;  %v7388_v33 = vunpack.c.h.bf16 %v7516_v30 }
  0x33   :  { %7771 = vmatprep.mubr.msk.f32.mxu0 %vm604_vm0, %v7087_v36  ;;  %v7463_v36 = vld [vmem:[%s12669_s1 + $0xf8] sm:$0xff]  }
  0x34   :  { %v7176_v40 = vunpack.c.h.bf16 %v7463_v36 }
  0x36   :  { %7772 = vmatmul.mubr.msk.f32.gmra.mxu0 %vm604_vm0, %v7088_v38  ;;  %v7175_v38 = vunpack.c.l.bf16 %v7463_v36  ;;  %v7517_v36 = vld [vmem:[%s12669_s1 + $0x2a8] sm:$0xff]  }
  0x37   :  { %7774 = vmatprep.mubr.msk.f32.mxu0 %vm604_vm0, %v7091_v39  ;;  %v7464_v39 = vld [vmem:[%s12669_s1 + $0x100] sm:$0xff]  }
  0x3a   :  { %7775 = vmatmul.mubr.msk.f32.gmra.mxu0 %vm604_vm0, %v7092_v41  ;;  %v7179_v41 = vunpack.c.l.bf16 %v7464_v39 }
  0x3b   :  { %7777 = vmatprep.mubr.msk.f32.mxu0 %vm604_vm0, %v7095_v42  ;;  %v7465_v42 = vld [vmem:[%s12669_s1 + $0x108] sm:$0xff]  }
  0x3e   :  { %7778 = vmatmul.mubr.msk.f32.gmra.mxu0 %vm604_vm0, %v7096_v44  ;;  %v7180_v44 = vunpack.c.h.bf16 %v7464_v39  ;;  %v7392_v39 = vunpack.c.h.bf16 %v7517_v36 }
  0x3f   :  { %7780 = vmatprep.mubr.msk.f32.mxu0 %vm604_vm0, %v7099_v45  ;;  %v7183_v45 = vunpack.c.l.bf16 %v7465_v42 }
  0x42   :  { %7781 = vmatmul.mubr.msk.f32.gmra.mxu0 %vm604_vm0, %v7100_v47  ;;  %v7184_v47 = vunpack.c.h.bf16 %v7465_v42  ;;  %v7518_v42 = vld [vmem:[%s12669_s1 + $0x2b0] sm:$0xff]  }
  0x43   :  { %7783 = vmatprep.mubr.msk.f32.mxu0 %vm604_vm0, %v7103_v48  ;;  %v7187_v48 = vunpack.c.l.bf16 %v7466_v46 }
  0x46   :  { %7784 = vmatmul.mubr.msk.f32.gmra.mxu0 %vm604_vm0, %v7104_v50  ;;  %v7188_v50 = vunpack.c.h.bf16 %v7466_v46 }
  0x47   :  { %7786 = vmatprep.mubr.msk.f32.mxu0 %vm604_vm0, %v7107_v51  ;;  %v7191_v51 = vunpack.c.l.bf16 %v7467_v49 }
  0x4a   :  { %7787 = vmatmul.mubr.msk.f32.gmra.mxu0 %vm604_vm0, %v7108_v53  ;;  %v7192_v53 = vunpack.c.h.bf16 %v7467_v49  ;;  %v7481_v49 = vld [vmem:[%s12669_s1 + $0x188] sm:$0xff]  }
  0x4b   :  { %7789 = vmatprep.mubr.msk.f32.mxu0 %vm604_vm0, %v7111_v54  ;;  %v7195_v54 = vunpack.c.l.bf16 %v7468_v52 }
  0x4e   :  { %7790 = vmatmul.mubr.msk.f32.gmra.mxu0 %vm604_vm0, %v7112_v56  ;;  %v7196_v56 = vunpack.c.h.bf16 %v7468_v52  ;;  %v7244_v52 = vunpack.c.h.bf16 %v7480_v43 }
  0x4f   :  { %7792 = vmatprep.mubr.msk.f32.mxu0 %vm604_vm0, %v7115_v57  ;;  %v7199_v57 = vunpack.c.l.bf16 %v7469_v55 }
  0x52   :  { %7793 = vmatmul.mubr.msk.f32.gmra.mxu0 %vm604_vm0, %v7116_v59  ;;  %v7200_v59 = vunpack.c.h.bf16 %v7469_v55 }
  0x53   :  { %7795 = vmatprep.mubr.msk.f32.mxu0 %vm604_vm0, %v7119_v60  ;;  %v7203_v60 = vunpack.c.l.bf16 %v7470_v58 }
  0x56   :  { %7796 = vmatmul.mubr.msk.f32.gmra.mxu0 %vm604_vm0, %v7120_v62  ;;  %v7204_v62 = vunpack.c.h.bf16 %v7470_v58 }
  0x57   :  { %7798 = vmatprep.mubr.msk.f32.mxu0 %vm604_vm0, %v7123_v63  ;;  %v7207_v63 = vunpack.c.l.bf16 %v7471_v61 }
  0x5a   :  { %7799 = vmatmul.mubr.msk.f32.gmra.mxu0 %vm604_vm0, %v7124_v1  ;;  %v7208_v1 = vunpack.c.h.bf16 %v7471_v61 }
  0x5b   :  { %7801 = vmatprep.mubr.msk.f32.mxu0 %vm604_vm0, %v7127_v2  ;;  %v7211_v2 = vunpack.c.l.bf16 %v7472_v0 }
  0x5e   :  { %7802 = vmatmul.mubr.msk.f32.gmra.mxu0 %vm604_vm0, %v7128_v4  ;;  %v7212_v4 = vunpack.c.h.bf16 %v7472_v0  ;;  %v7484_v0 = vld [vmem:[%s12669_s1 + $0x1a0] sm:$0xff]  }
  0x5f   :  { %7804 = vmatprep.mubr.msk.f32.mxu0 %vm604_vm0, %v7131_v5  ;;  %v7215_v5 = vunpack.c.l.bf16 %v7473_v3 }
  0x62   :  { %7805 = vmatmul.mubr.msk.f32.gmra.mxu0 %vm604_vm0, %v7132_v7  ;;  %v7474_v7 = vld [vmem:[%s12669_s1 + $0x150] sm:$0xff]  }
  0x63   :  { %7807 = vmatprep.mubr.msk.f32.mxu0 %vm604_vm0, %v7135_v8  ;;  %v7371_v8 = vunpack.c.l.bf16 %v7512_v6 }
  0x65   :  { %7984 = vmatprep.mubr.msk.f32.mxu1 %vm604_vm0, %v7371_v8 }
  0x66   :  { %7808 = vmatmul.mubr.msk.f32.gmra.mxu0 %vm604_vm0, %v7136_v10  ;;  %v7216_v10 = vunpack.c.h.bf16 %v7473_v3  ;;  %7985 = vmatmul.mubr.msk.f32.vlgmr.msra.gmra.mxu1 %vm604_vm0, %v7372_v9  ;;  %v7259_v3 = vunpack.c.l.bf16 %v7484_v0 }
  0x67   :  { %7810 = vmatprep.mubr.msk.f32.mxu0 %vm604_vm0, %v7139_v11  ;;  %v7219_v11 = vunpack.c.l.bf16 %v7474_v7 }
  0x6a   :  { %7811 = vmatmul.mubr.msk.f32.gmra.mxu0 %vm604_vm0, %v7140_v13  ;;  %v7475_v13 = vld [vmem:[%s12669_s1 + $0x158] sm:$0xff]  }
  0x6b   :  { %7813 = vmatprep.mubr.msk.f32.mxu0 %vm604_vm0, %v7143_v14  ;;  %v7375_v14 = vunpack.c.l.bf16 %v7513_v12  ;;  %v415_v12 = vld [vmem:[%s12670_s2 + $0x18] sm:$0xff] }
  0x6d   :  { %7987 = vmatprep.mubr.msk.f32.mxu1 %vm604_vm0, %v7375_v14 }
  0x6e   :  { %7814 = vmatmul.mubr.msk.f32.gmra.mxu0 %vm604_vm0, %v7144_v16  ;;  %v7220_v16 = vunpack.c.h.bf16 %v7474_v7  ;;  %7988 = vmatmul.mubr.msk.f32.gmra.mxu1 %vm604_vm0, %v7376_v15  ;;  %v7260_v7 = vunpack.c.h.bf16 %v7484_v0  ;;  %v414_v15 = vld [vmem:[%s12670_s2 + $0x10] sm:$0xff]  ;;  %v421_v0 = vld [vmem:[%s12670_s2 + $0x48] sm:$0xff] }
  0x6f   :  { %7816 = vmatprep.mubr.msk.f32.mxu0 %vm604_vm0, %v7147_v17  ;;  %v7223_v17 = vunpack.c.l.bf16 %v7475_v13 }
  0x72   :  { %7817 = vmatmul.mubr.msk.f32.gmra.mxu0 %vm604_vm0, %v7148_v19  ;;  %v7476_v19 = vld [vmem:[%s12669_s1 + $0x160] sm:$0xff]  }
  0x73   :  { %7819 = vmatprep.mubr.msk.f32.mxu0 %vm604_vm0, %v7151_v20  ;;  %v7379_v20 = vunpack.c.l.bf16 %v7514_v18 }
  0x75   :  { %7990 = vmatprep.mubr.msk.f32.mxu1 %vm604_vm0, %v7379_v20 }
  0x76   :  { %7820 = vmatmul.mubr.msk.f32.gmra.mxu0 %vm604_vm0, %v7152_v22  ;;  %v7224_v22 = vunpack.c.h.bf16 %v7475_v13  ;;  %7991 = vmatmul.mubr.msk.f32.gmra.mxu1 %vm604_vm0, %v7380_v21 }
  0x77   :  { %7822 = vmatprep.mubr.msk.f32.mxu0 %vm604_vm0, %v7155_v23  ;;  %v7227_v23 = vunpack.c.l.bf16 %v7476_v19 }
  0x7a   :  { %7823 = vmatmul.mubr.msk.f32.gmra.mxu0 %vm604_vm0, %v7156_v25  ;;  %v7477_v25 = vld [vmem:[%s12669_s1 + $0x168] sm:$0xff]  }
  0x7b   :  { %7825 = vmatprep.mubr.msk.f32.mxu0 %vm604_vm0, %v7159_v26  ;;  %v7383_v26 = vunpack.c.l.bf16 %v7515_v24 }
  0x7d   :  { %7993 = vmatprep.mubr.msk.f32.mxu1 %vm604_vm0, %v7383_v26 }
  0x7e   :  { %7826 = vmatmul.mubr.msk.f32.gmra.mxu0 %vm604_vm0, %v7160_v28  ;;  %v7228_v28 = vunpack.c.h.bf16 %v7476_v19  ;;  %7994 = vmatmul.mubr.msk.f32.gmra.mxu1 %vm604_vm0, %v7384_v27  ;;  %v7487_v19 = vld [vmem:[%s12669_s1 + $0x1b8] sm:$0xff]   ;;  %v422_v27 = vld [vmem:[%s12670_s2 + $0x50] sm:$0xff] }
  0x7f   :  { %7828 = vmatprep.mubr.msk.f32.mxu0 %vm604_vm0, %v7163_v29  ;;  %v7231_v29 = vunpack.c.l.bf16 %v7477_v25  ;;  %v7271_v24 = vunpack.c.l.bf16 %v7487_v19 }
  0x82   :  { %7829 = vmatmul.mubr.msk.f32.gmra.mxu0 %vm604_vm0, %v7164_v31  ;;  %v7478_v31 = vld [vmem:[%s12669_s1 + $0x170] sm:$0xff]  }
  0x83   :  { %7831 = vmatprep.mubr.msk.f32.mxu0 %vm604_vm0, %v7167_v32  ;;  %v7387_v32 = vunpack.c.l.bf16 %v7516_v30 }
  0x85   :  { %7996 = vmatprep.mubr.msk.f32.mxu1 %vm604_vm0, %v7387_v32  ;;  %v417_v32 = vld [vmem:[%s12670_s2 + $0x28] sm:$0xff] }
  0x86   :  { %7832 = vmatmul.mubr.msk.f32.gmra.mxu0 %vm604_vm0, %v7168_v34  ;;  %v7232_v34 = vunpack.c.h.bf16 %v7477_v25  ;;  %7997 = vmatmul.mubr.msk.f32.gmra.mxu1 %vm604_vm0, %v7388_v33 }
  0x87   :  { %7834 = vmatprep.mubr.msk.f32.mxu0 %vm604_vm0, %v7171_v35  ;;  %v7235_v35 = vunpack.c.l.bf16 %v7478_v31 }
  0x8a   :  { %7835 = vmatmul.mubr.msk.f32.gmra.mxu0 %vm604_vm0, %v7172_v37  ;;  %v7479_v37 = vld [vmem:[%s12669_s1 + $0x178] sm:$0xff]  }
  0x8b   :  { %7837 = vmatprep.mubr.msk.f32.mxu0 %vm604_vm0, %v7175_v38  ;;  %v7391_v38 = vunpack.c.l.bf16 %v7517_v36  ;;  %v7240_v46 = vunpack.c.h.bf16 %v7479_v37 }
  0x8d   :  { %7999 = vmatprep.mubr.msk.f32.mxu1 %vm604_vm0, %v7391_v38 }
  0x8e   :  { %7838 = vmatmul.mubr.msk.f32.gmra.mxu0 %vm604_vm0, %v7176_v40  ;;  %v7236_v40 = vunpack.c.h.bf16 %v7478_v31  ;;  %8000 = vmatmul.mubr.msk.f32.gmra.mxu1 %vm604_vm0, %v7392_v39  ;;  %v7489_v39 = vld [vmem:[%s12669_s1 + $0x1c8] sm:$0xff]  }
  0x8f   :  { %7840 = vmatprep.mubr.msk.f32.mxu0 %vm604_vm0, %v7179_v41  ;;  %v7239_v41 = vunpack.c.l.bf16 %v7479_v37 }
  0x92   :  { %7841 = vmatmul.mubr.msk.f32.gmra.mxu0 %vm604_vm0, %v7180_v44  ;;  %v7395_v44 = vunpack.c.l.bf16 %v7518_v42 }
  0x93   :  { %7843 = vmatprep.mubr.msk.f32.mxu0 %vm604_vm0, %v7183_v45  ;;  %v7396_v45 = vunpack.c.h.bf16 %v7518_v42  ;;  %v427_v42 = vld [vmem:[%s12670_s2 + $0x78] sm:$0xff] }
  0x94   :  { %8002 = vmatprep.mubr.msk.f32.mxu1 %vm604_vm0, %v7395_v44  ;;  %v423_v44 = vld [vmem:[%s12670_s2 + $0x58] sm:$0xff] }
  0x95   :  { %8003 = vmatmul.mubr.msk.f32.gmra.mxu1 %vm604_vm0, %v7396_v45 }
  0x96   :  { %7844 = vmatmul.mubr.msk.f32.gmra.mxu0 %vm604_vm0, %v7184_v47  ;;  %v7243_v47 = vunpack.c.l.bf16 %v7480_v43 }
  0x97   :  { %7846 = vmatprep.mubr.msk.f32.mxu0 %vm604_vm0, %v7187_v48  ;;  %v7519_v48 = vld [vmem:[%s12669_s1 + $0x2b8] sm:$0xff]  }
  0x9a   :  { %7847 = vmatmul.mubr.msk.f32.gmra.mxu0 %vm604_vm0, %v7188_v50  ;;  %v7399_v50 = vunpack.c.l.bf16 %v7519_v48 }
  0x9b   :  { %7849 = vmatprep.mubr.msk.f32.mxu0 %vm604_vm0, %v7191_v51  ;;  %v7400_v51 = vunpack.c.h.bf16 %v7519_v48 }
  0x9c   :  { %8005 = vmatprep.mubr.msk.f32.mxu1 %vm604_vm0, %v7399_v50 }
  0x9d   :  { %8006 = vmatmul.mubr.msk.f32.gmra.mxu1 %vm604_vm0, %v7400_v51  ;;  %v7279_v51 = vunpack.c.l.bf16 %v7489_v39 }
  0x9e   :  { %7850 = vmatmul.mubr.msk.f32.gmra.mxu0 %vm604_vm0, %v7192_v53  ;;  %v7247_v53 = vunpack.c.l.bf16 %v7481_v49 }
  0x9f   :  { %7852 = vmatprep.mubr.msk.f32.mxu0 %vm604_vm0, %v7195_v54  ;;  %v7482_v54 = vld [vmem:[%s12669_s1 + $0x190] sm:$0xff]  }
  0xa0   :  { %v7252_v61 = vunpack.c.h.bf16 %v7482_v54 }
  0xa2   :  { %7853 = vmatmul.mubr.msk.f32.gmra.mxu0 %vm604_vm0, %v7196_v56  ;;  %v7248_v56 = vunpack.c.h.bf16 %v7481_v49  ;;  %v426_v49 = vld [vmem:[%s12670_s2 + $0x70] sm:$0xff] }
  0xa3   :  { %7855 = vmatprep.mubr.msk.f32.mxu0 %vm604_vm0, %v7199_v57  ;;  %v7251_v57 = vunpack.c.l.bf16 %v7482_v54 }
  0xa6   :  { %7856 = vmatmul.mubr.msk.f32.gmra.mxu0 %vm604_vm0, %v7200_v59  ;;  %v7483_v59 = vld [vmem:[%s12669_s1 + $0x198] sm:$0xff]  }
  0xa7   :  { %7858 = vmatprep.mubr.msk.f32.mxu0 %vm604_vm0, %v7203_v60 }
  0xaa   :  { %7859 = vmatmul.mubr.msk.f32.gmra.mxu0 %vm604_vm0, %v7204_v62  ;;  %v7255_v62 = vunpack.c.l.bf16 %v7483_v59 }
  0xab   :  { %7861 = vmatprep.mubr.msk.f32.mxu0 %vm604_vm0, %v7207_v63 }
  0xae   :  { %7862 = vmatmul.mubr.msk.f32.gmra.mxu0 %vm604_vm0, %v7208_v1 }
  0xaf   :  { %7864 = vmatprep.mubr.msk.f32.mxu0 %vm604_vm0, %v7211_v2  ;;  %v7256_v2 = vunpack.c.h.bf16 %v7483_v59  ;;  %v418_v59 = vld [vmem:[%s12670_s2 + $0x30] sm:$0xff] }
  0xb2   :  { %7865 = vmatmul.mubr.msk.f32.gmra.mxu0 %vm604_vm0, %v7212_v4 }
  0xb3   :  { %7867 = vmatprep.mubr.msk.f32.mxu0 %vm604_vm0, %v7215_v5  ;;  %v7485_v5 = vld [vmem:[%s12669_s1 + $0x1a8] sm:$0xff]  }
  0xb4   :  { %v7263_v8 = vunpack.c.l.bf16 %v7485_v5  ;;  %v7264_v14 = vunpack.c.h.bf16 %v7485_v5 }
  0xb6   :  { %7868 = vmatmul.mubr.msk.f32.gmra.mxu0 %vm604_vm0, %v7216_v10  ;;  %v7486_v10 = vld [vmem:[%s12669_s1 + $0x1b0] sm:$0xff]  }
  0xb7   :  { %7870 = vmatprep.mubr.msk.f32.mxu0 %vm604_vm0, %v7219_v11  ;;  %v412_v11 = vld [vmem:[%s12670_s2] sm:$0xff] }
  0xba   :  { %7871 = vmatmul.mubr.msk.f32.gmra.mxu0 %vm604_vm0, %v7220_v16  ;;  %v7267_v16 = vunpack.c.l.bf16 %v7486_v10 }
  0xbb   :  { %7873 = vmatprep.mubr.msk.f32.mxu0 %vm604_vm0, %v7223_v17 }
  0xbe   :  { %7874 = vmatmul.mubr.msk.f32.gmra.mxu0 %vm604_vm0, %v7224_v22 }
  0xbf   :  { %7876 = vmatprep.mubr.msk.f32.mxu0 %vm604_vm0, %v7227_v23  ;;  %v7268_v23 = vunpack.c.h.bf16 %v7486_v10 }
  0xc2   :  { %7877 = vmatmul.mubr.msk.f32.gmra.mxu0 %vm604_vm0, %v7228_v28  ;;  %v425_v28 = vld [vmem:[%s12670_s2 + $0x68] sm:$0xff] }
  0xc3   :  { %7879 = vmatprep.mubr.msk.f32.mxu0 %vm604_vm0, %v7231_v29  ;;  %v7488_v29 = vld [vmem:[%s12669_s1 + $0x1c0] sm:$0xff]  }
  0xc4   :  { %v7275_v38 = vunpack.c.l.bf16 %v7488_v29  ;;  %v7276_v50 = vunpack.c.h.bf16 %v7488_v29 }
  0xc6   :  { %7880 = vmatmul.mubr.msk.f32.gmra.mxu0 %vm604_vm0, %v7232_v34  ;;  %v424_v34 = vld [vmem:[%s12670_s2 + $0x60] sm:$0xff] }
  0xc7   :  { %7882 = vmatprep.mubr.msk.f32.mxu0 %vm604_vm0, %v7235_v35  ;;  %v7272_v35 = vunpack.c.h.bf16 %v7487_v19 }
  0xca   :  { %7883 = vmatmul.mubr.msk.f32.gmra.mxu0 %vm604_vm0, %v7236_v40  ;;  %v420_v40 = vld [vmem:[%s12670_s2 + $0x40] sm:$0xff] }
  0xcb   :  { %7885 = vmatprep.mubr.msk.f32.mxu0 %vm604_vm0, %v7239_v41 }
  0xce   :  { %7886 = vmatmul.mubr.msk.f32.gmra.mxu0 %vm604_vm0, %v7240_v46 }
  0xcf   :  { %7888 = vmatprep.mubr.msk.f32.mxu0 %vm604_vm0, %v7243_v47  ;;  %v416_v47 = vld [vmem:[%s12670_s2 + $0x20] sm:$0xff] }
  0xd2   :  { %v9168_v55 = vpop.f32.mrf.mxu0  ;;  %7889 = vmatmul.mubr.msk.f32.gmra.mxu0 %vm604_vm0, %v7244_v52  ;;  %v419_v52 = vld [vmem:[%s12670_s2 + $0x38] sm:$0xff] }
  0xd3   :  { %7891 = vmatprep.mubr.msk.f32.mxu0 %vm604_vm0, %v7247_v53 }
  0xd4   :  { %v1247_v58 = vpop.f32.mrf.mxu0 }
  0xd5   :  { %v1248_v17 = vadd.f32 %v1247_v58, %v412_v11  ;;  %v7490_v58 = vld [vmem:[%s12669_s1 + $0x1d0] sm:$0xff]  }
  0xd6   :  { %v7749_v60 = vpop.f32.mrf.mxu0  ;;  %7892 = vmatmul.mubr.msk.f32.gmra.mxu0 %vm604_vm0, %v7248_v56 }
  0xd7   :  { %7894 = vmatprep.mubr.msk.f32.mxu0 %vm604_vm0, %v7251_v57  ;;  %v1263_v20 = vadd.f32 %v7749_v60, %v415_v12  ;;  %v6857_v25 = vmul.f32 -1.442695, %v1248_v17  ;;  %v7520_v12 = vld [vmem:[%s12669_s1 + $0x2c0] sm:$0xff]  }
  0xd8   :  { %v1257_v63 = vpop.f32.mrf.mxu0 }
  0xd9   :  { %v1258_v21 = vadd.f32 %v1257_v63, %v414_v15  ;;  %v6860_v30 = vmul.f32 -1.442695, %v1263_v20  ;;  %8052 = vpow2.f32 %v6857_v25 }
  0xda   :  { %v7752_v1 = vpop.f32.mrf.mxu0  ;;  %7895 = vmatmul.mubr.msk.f32.gmra.mxu0 %vm604_vm0, %v7252_v61 }
  0xdb   :  { %7897 = vmatprep.mubr.msk.f32.mxu0 %vm604_vm0, %v7255_v62  ;;  %v6859_v31 = vmul.f32 -1.442695, %v1258_v21  ;;  %8054 = vpow2.f32 %v6860_v30  ;;  %v1273_v43 = vadd.f32 %v7752_v1, %v417_v32  ;;  %v7284_v21 = vunpack.c.h.bf16 %v7490_v58 }
  0xdc   :  { %v9182_v4 = vpop.f32.mrf.mxu0 }
  0xdd   :  { %8056 = vpow2.f32 %v6859_v31  ;;  %v6862_v62 = vmul.f32 -1.442695, %v1273_v43  ;;  %v1268_v63 = vadd.f32 %v9182_v4, %v416_v47 }
  0xde   :  { %v9187_v6 = vpop.f32.mrf.mxu0  ;;  %7898 = vmatmul.mubr.msk.f32.gmra.mxu0 %vm604_vm0, %v7256_v2 }
  0xdf   :  { %7900 = vmatprep.mubr.msk.f32.mxu0 %vm604_vm0, %v7259_v3  ;;  %v1283_v3 = vadd.f32 %v9187_v6, %v419_v52  ;;  %v6861_v17 = vmul.f32 -1.442695, %v1268_v63  ;;  %v7494_v52 = vld [vmem:[%s12669_s1 + $0x1f0] sm:$0xff]  }
  0xe0   :  { %v9191_v9 = vpop.f32.mrf.mxu0 }
  0xe1   :  { %v1278_v10 = vadd.f32 %v9191_v9, %v418_v59  ;;  %v7403_v9 = vunpack.c.l.bf16 %v7520_v12  ;;  %v6864_v19 = vmul.f32 -1.442695, %v1283_v3 }
  0xe2   :  { %v9202_v13 = vpop.f32.mrf.mxu0  ;;  %7901 = vmatmul.mubr.msk.f32.gmra.mxu0 %vm604_vm0, %v7260_v7  ;;  %v7280_v7 = vunpack.c.h.bf16 %v7489_v39 }
  0xe3   :  { %7903 = vmatprep.mubr.msk.f32.mxu0 %vm604_vm0, %v7263_v8  ;;  %v7283_v8 = vunpack.c.l.bf16 %v7490_v58  ;;  %v1293_v6 = vadd.f32 %v9202_v13, %v421_v0  ;;  %8008 = vmatprep.mubr.msk.f32.mxu1 %vm604_vm0, %v7403_v9  ;;  %v413_v13 = vld [vmem:[%s12670_s2 + $0x8] sm:$0xff]  ;;  %v7300_v9 = vunpack.c.h.bf16 %v7494_v52 }
  0xe4   :  { %v1287_v18 = vpop.f32.mrf.mxu0  ;;  %v1253_v32 = vadd.f32 %v9168_v55, %v413_v13 }
  0xe5   :  { %v1288_v53 = vadd.f32 %v1287_v18, %v420_v40  ;;  %v7404_v18 = vunpack.c.h.bf16 %v7520_v12  ;;  %v6866_v25 = vmul.f32 -1.442695, %v1293_v6 }
  0xe6   :  { %v7761_v22 = vpop.f32.mrf.mxu0  ;;  %7904 = vmatmul.mubr.msk.f32.gmra.mxu0 %vm604_vm0, %v7264_v14  ;;  %v8053_v29 = vpop.eup %8052 }
  0xe7   :  { %7906 = vmatprep.mubr.msk.f32.mxu0 %vm604_vm0, %v7267_v16  ;;  %v1303_v60 = vadd.f32 %v7761_v22, %v423_v44  ;;  %v6865_v11 = vmul.f32 -1.442695, %v1288_v53  ;;  %v7491_v16 = vld [vmem:[%s12669_s1 + $0x1d8] sm:$0xff]   ;;  %v6863_v22 = vmul.f32 -1.442695, %v1278_v10  ;;  %8009 = vmatmul.mubr.msk.f32.gmra.mxu1 %vm604_vm0, %v7404_v18 }
  0xe8   :  { %v1297_v26 = vpop.f32.mrf.mxu0  ;;  %v8055_v31 = vpop.eup %8054  ;;  %v9339_v10 = vld [vmem:[%s12669_s1 + $0x1f8] sm:$0xff]  }
  0xe9   :  { %v1298_v36 = vadd.f32 %v1297_v26, %v422_v27  ;;  %v6868_v14 = vmul.f32 -1.442695, %v1303_v60  ;;  %v7492_v27 = vld [vmem:[%s12669_s1 + $0x1e0] sm:$0xff]   ;;  %v2785_v59 = vadd.f32 1.0, %v8055_v31  ;;  %v7303_v13 = vunpack.c.l.bf16 %v9339_v10 }
  0xea   :  { %v7764_v33 = vpop.f32.mrf.mxu0  ;;  %7907 = vmatmul.mubr.msk.f32.gmra.mxu0 %vm604_vm0, %v7268_v23  ;;  %v7287_v23 = vunpack.c.l.bf16 %v7491_v16 }
  0xeb   :  { %v1313_v37 = vadd.f32 %v7764_v33, %v425_v28  ;;  %7909 = vmatprep.mubr.msk.f32.mxu0 %vm604_vm0, %v7271_v24  ;;  %v6867_v54 = vmul.f32 -1.442695, %v1298_v36  ;;  %v7521_v24 = vld [vmem:[%s12669_s1 + $0x2c8] sm:$0xff]   ;;  %v7291_v36 = vunpack.c.l.bf16 %v7492_v27 }
  0xec   :  { %v1307_v41 = vpop.f32.mrf.mxu0  ;;  %v7407_v28 = vunpack.c.l.bf16 %v7521_v24  ;;  %v7408_v30 = vunpack.c.h.bf16 %v7521_v24 }
  0xed   :  { %v6870_v45 = vmul.f32 -1.442695, %v1313_v37  ;;  %v1308_v46 = vadd.f32 %v1307_v41, %v424_v34  ;;  %v7288_v34 = vunpack.c.h.bf16 %v7491_v16  ;;  %v7522_v37 = vld [vmem:[%s12669_s1 + $0x2d0] sm:$0xff]  }
  0xee   :  { %v7767_v48 = vpop.f32.mrf.mxu0  ;;  %7910 = vmatmul.mubr.msk.f32.gmra.mxu0 %vm604_vm0, %v7272_v35  ;;  %8011 = vmatprep.mubr.msk.f32.mxu1 %vm604_vm0, %v7407_v28  ;;  %v8057_v35 = vpop.eup %8056  ;;  %v7411_v39 = vunpack.c.l.bf16 %v7522_v37  ;;  %v7412_v41 = vunpack.c.h.bf16 %v7522_v37  ;;  %v9361_v28 = vld [vmem:[%s12669_s1 + $0x200] sm:$0xff]  }
  0xef   :  { %v6869_v56 = vmul.f32 -1.442695, %v1308_v46  ;;  %v1323_v57 = vadd.f32 %v7767_v48, %v427_v42  ;;  %7912 = vmatprep.mubr.msk.f32.mxu0 %vm604_vm0, %v7275_v38  ;;  %8058 = vpow2.f32 %v6870_v45  ;;  %8012 = vmatmul.mubr.msk.f32.gmra.mxu1 %vm604_vm0, %v7408_v30  ;;  %v7493_v38 = vld [vmem:[%s12669_s1 + $0x1e8] sm:$0xff]   ;;  %v6858_v42 = vmul.f32 -1.442695, %v1253_v32  ;;  %v7523_v48 = vld [vmem:[%s12669_s1 + $0x2d8] sm:$0xff]  }
  0xf0   :  { %v1317_v61 = vpop.f32.mrf.mxu0  ;;  %v7292_v45 = vunpack.c.h.bf16 %v7492_v27  ;;  %8014 = vmatprep.mubr.msk.f32.mxu1 %vm604_vm0, %v7411_v39  ;;  %v7295_v47 = vunpack.c.l.bf16 %v7493_v38  ;;  %v7415_v53 = vunpack.c.l.bf16 %v7523_v48  ;;  %v2784_v12 = vadd.f32 1.0, %v8057_v35  ;;  %v441_v27 = vld [vmem:[%s12670_s2 + $0xe8] sm:$0xff]  ;;  %v440_v37 = vld [vmem:[%s12670_s2 + $0xe0] sm:$0xff] }
  0xf1   :  { %v6872_v1 = vmul.f32 -1.442695, %v1323_v57  ;;  %v1318_v2 = vadd.f32 %v1317_v61, %v426_v49  ;;  %8060 = vpow2.f32 %v6869_v56  ;;  %v2782_v56 = vadd.f32 1.0, %v8053_v29 }
  0xf2   :  { %v9265_v5 = vpop.f32.mrf.mxu0  ;;  %7913 = vmatmul.mubr.msk.f32.gmra.mxu0 %vm604_vm0, %v7276_v50  ;;  %8062 = vpow2.f32 %v6867_v54  ;;  %v7416_v57 = vunpack.c.h.bf16 %v7523_v48  ;;  %v7304_v32 = vunpack.c.h.bf16 %v9339_v10 }
  0xf3   :  { %v6871_v4 = vmul.f32 -1.442695, %v1318_v2  ;;  %7915 = vmatprep.mubr.msk.f32.mxu0 %vm604_vm0, %v7279_v51  ;;  %8064 = vpow2.f32 %v6872_v1  ;;  %8015 = vmatmul.mubr.msk.f32.gmra.mxu1 %vm604_vm0, %v7412_v41  ;;  %v7299_v1 = vunpack.c.l.bf16 %v7494_v52  ;;  %v7524_v2 = vld [vmem:[%s12669_s1 + $0x2e0] sm:$0xff]   ;;  %v7307_v41 = vunpack.c.l.bf16 %v9361_v28 }
  0xf4   :  { %v9274_v15 = vpop.f32.mrf.mxu0  ;;  %8066 = vpow2.f32 %v6862_v62  ;;  %v7296_v62 = vunpack.c.h.bf16 %v7493_v38  ;;  %8017 = vmatprep.mubr.msk.f32.mxu1 %vm604_vm0, %v7415_v53  ;;  %v7308_v52 = vunpack.c.h.bf16 %v9361_v28  ;;  %v9390_v53 = vld [vmem:[%s12669_s1 + $0x208] sm:$0xff]  }
  0xf5   :  { %8068 = vpow2.f32 %v6871_v4 }
  0xf6   :  { %v9279_v20 = vpop.f32.mrf.mxu0  ;;  %7916 = vmatmul.mubr.msk.f32.gmra.mxu0 %vm604_vm0, %v7280_v7  ;;  %8070 = vpow2.f32 %v6865_v11  ;;  %v7419_v11 = vunpack.c.l.bf16 %v7524_v2 }
  0xf7   :  { %7918 = vmatprep.mubr.msk.f32.mxu0 %vm604_vm0, %v7283_v8  ;;  %8072 = vpow2.f32 %v6868_v14  ;;  %8018 = vmatmul.mubr.msk.f32.gmra.mxu1 %vm604_vm0, %v7416_v57 }
  0xf8   :  { %v9291_v26 = vpop.f32.mrf.mxu0  ;;  %8074 = vpow2.f32 %v6861_v17  ;;  %8020 = vmatprep.mubr.msk.f32.mxu1 %vm604_vm0, %v7419_v11  ;;  %v7420_v17 = vunpack.c.h.bf16 %v7524_v2  ;;  %v7527_v2 = vld [vmem:[%s12669_s1 + $0x2f8] sm:$0xff]   ;;  %v7311_v11 = vunpack.c.l.bf16 %v9390_v53 }
  0xf9   :  { %8076 = vpow2.f32 %v6864_v19 }
  0xfa   :  { %v9297_v33 = vpop.f32.mrf.mxu0  ;;  %7919 = vmatmul.mubr.msk.f32.gmra.mxu0 %vm604_vm0, %v7284_v21  ;;  %8078 = vpow2.f32 %v6863_v22  ;;  %v431_v21 = vld [vmem:[%s12670_s2 + $0x98] sm:$0xff]  ;;  %v7525_v22 = vld [vmem:[%s12669_s1 + $0x2e8] sm:$0xff]  }
  0xfb   :  { %7921 = vmatprep.mubr.msk.f32.mxu0 %vm604_vm0, %v7287_v23  ;;  %8080 = vpow2.f32 %v6866_v25  ;;  %8021 = vmatmul.mubr.msk.f32.gmra.mxu1 %vm604_vm0, %v7420_v17  ;;  %v7423_v29 = vunpack.c.l.bf16 %v7525_v22  ;;  %v1343_v35 = vadd.f32 %v9279_v20, %v431_v21  ;;  %v7424_v38 = vunpack.c.h.bf16 %v7525_v22  ;;  %v7526_v20 = vld [vmem:[%s12669_s1 + $0x2f0] sm:$0xff]  }
  0xfc   :  { %v9306_v55 = vpop.f32.mrf.mxu0  ;;  %v8059_v40 = vpop.eup %8058  ;;  %v7312_v22 = vunpack.c.h.bf16 %v9390_v53 }
  0xfd   :  { %v2795_v43 = vadd.f32 1.0, %v8059_v40  ;;  %8023 = vmatprep.mubr.msk.f32.mxu1 %vm604_vm0, %v7423_v29  ;;  %v436_v29 = vld [vmem:[%s12670_s2 + $0xc0] sm:$0xff] }
  0xfe   :  { %v9311_v44 = vpop.f32.mrf.mxu0  ;;  %7922 = vmatmul.mubr.msk.f32.gmra.mxu0 %vm604_vm0, %v7288_v34  ;;  %v8061_v46 = vpop.eup %8060 }
  0xff   :  { %7924 = vmatprep.mubr.msk.f32.mxu0 %vm604_vm0, %v7291_v36  ;;  %v8063_v49 = vpop.eup %8062  ;;  %8082 = vrcp.f32 %v2795_v43  ;;  %v2794_v50 = vadd.f32 1.0, %v8061_v46  ;;  %v433_v43 = vld [vmem:[%s12670_s2 + $0xa8] sm:$0xff]  ;;  %v443_v46 = vld [vmem:[%s12670_s2 + $0xf8] sm:$0xff]  ;;  %8024 = vmatmul.mubr.msk.f32.gmra.mxu1 %vm604_vm0, %v7424_v38 }
 0x100   :  { %v9320_v51 = vpop.f32.mrf.mxu0  ;;  %v8065_v54 = vpop.eup %8064  ;;  %8084 = vpow2.f32 %v6858_v42  ;;  %v2792_v0 = vadd.f32 1.0, %v8063_v49  ;;  %v439_v49 = vld [vmem:[%s12670_s2 + $0xd8] sm:$0xff] }
 0x101   :  { %v8067_v58 = vpop.eup %8066  ;;  %v2797_v60 = vadd.f32 1.0, %v8065_v54  ;;  %8086 = vrcp.f32 %v2794_v50  ;;  %v6876_v54 = vmul.f32 -1.442695, %v1343_v35 }
 0x102   :  { %v9325_v61 = vpop.f32.mrf.mxu0  ;;  %7925 = vmatmul.mubr.msk.f32.gmra.mxu0 %vm604_vm0, %v7292_v45  ;;  %v8069_v63 = vpop.eup %8068  ;;  %v2787_v14 = vadd.f32 1.0, %v8067_v58  ;;  %v442_v58 = vld [vmem:[%s12670_s2 + $0xf0] sm:$0xff] }
 0x103   :  { %7927 = vmatprep.mubr.msk.f32.mxu0 %vm604_vm0, %v7295_v47  ;;  %v8071_v3 = vpop.eup %8070  ;;  %8088 = vrcp.f32 %v2797_v60  ;;  %v2796_v7 = vadd.f32 1.0, %v8069_v63  ;;  %v7427_v47 = vunpack.c.l.bf16 %v7526_v20  ;;  %v438_v63 = vld [vmem:[%s12670_s2 + $0xd0] sm:$0xff] }
 0x104   :  { %v9334_v8 = vpop.f32.mrf.mxu0  ;;  %v8073_v4 = vpop.eup %8072  ;;  %8090 = vrcp.f32 %v2782_v56  ;;  %v2790_v19 = vadd.f32 1.0, %v8071_v3  ;;  %v435_v56 = vld [vmem:[%s12670_s2 + $0xb8] sm:$0xff] }
 0x105   :  { %v8075_v6 = vpop.eup %8074  ;;  %8092 = vrcp.f32 %v2785_v59  ;;  %v2793_v24 = vadd.f32 1.0, %v8073_v4  ;;  %v7428_v59 = vunpack.c.h.bf16 %v7526_v20  ;;  %8026 = vmatprep.mubr.msk.f32.mxu1 %vm604_vm0, %v7427_v47  ;;  %v12674_v4 = vmov 0.0   ;;  %v429_v20 = vld [vmem:[%s12670_s2 + $0x88] sm:$0xff] }
 0x106   :  { %v9341_v16 = vpop.f32.mrf.mxu0  ;;  %7928 = vmatmul.mubr.msk.f32.gmra.mxu0 %vm604_vm0, %v7296_v62  ;;  %v8077_v18 = vpop.eup %8076  ;;  %8094 = vrcp.f32 %v2792_v0  ;;  %v2786_v31 = vadd.f32 1.0, %v8075_v6  ;;  %v1353_v62 = vadd.f32 %v9297_v33, %v433_v43  ;;  %v434_v33 = vld [vmem:[%s12670_s2 + $0xb0] sm:$0xff]  ;;  %5278 = vmatprep.subr.mxu1 %v12674_v4  ;;  %v1333_v53 = vadd.f32 %v9265_v5, %v429_v20 }
 0x107   :  { %7930 = vmatprep.mubr.msk.f32.mxu0 %vm604_vm0, %v7299_v1  ;;  %v8079_v23 = vpop.eup %8078  ;;  %8096 = vrcp.f32 %v2796_v7  ;;  %v2789_v34 = vadd.f32 1.0, %v8077_v18  ;;  %v1383_v7 = vadd.f32 %v9341_v16, %v439_v49  ;;  %8027 = vmatmul.mubr.msk.f32.gmra.mxu1 %vm604_vm0, %v7428_v59  ;;  %v9424_v16 = vld [vmem:[%s12669_s1 + $0x210] sm:$0xff]   ;;  %v1358_v28 = vadd.f32 %v9320_v51, %v434_v33  ;;  %v7501_v33 = vld [vmem:[%s12669_s1 + $0x228] sm:$0xff]  }
 0x108   :  { %v9353_v25 = vpop.f32.mrf.mxu0  ;;  %v8081_v30 = vpop.eup %8080  ;;  %8098 = vrcp.f32 %v2784_v12  ;;  %v2788_v39 = vadd.f32 1.0, %v8079_v23  ;;  %v7431_v12 = vunpack.c.l.bf16 %v7527_v2  ;;  %5953 = vmatprep.subr.mxu0 %v12674_v4  ;;  %v7432_v23 = vunpack.c.h.bf16 %v7527_v2 }
 0x109   :  { %8100 = vrcp.f32 %v2787_v14  ;;  %v2791_v42 = vadd.f32 1.0, %v8081_v30  ;;  %v1363_v14 = vadd.f32 %v9311_v44, %v435_v56  ;;  %v7315_v51 = vunpack.c.l.bf16 %v9424_v16 }
 0x10a   :  { %v7788_v36 = vpop.f32.mrf.mxu0  ;;  %7931 = vmatmul.mubr.msk.f32.gmra.mxu0 %vm604_vm0, %v7300_v9  ;;  %8102 = vrcp.f32 %v2790_v19  ;;  %v437_v9 = vld [vmem:[%s12670_s2 + $0xc8] sm:$0xff]  ;;  %8029 = vmatprep.mubr.msk.f32.mxu1 %vm604_vm0, %v7431_v12  ;;  %v7316_v43 = vunpack.c.h.bf16 %v9424_v16 }
 0x10b   :  { %v1393_v40 = vadd.f32 %v7788_v36, %v441_v27  ;;  %7933 = vmatprep.mubr.msk.f32.mxu0 %vm604_vm0, %v7303_v13  ;;  %8104 = vrcp.f32 %v2793_v24  ;;  %v1378_v13 = vadd.f32 %v9353_v25, %v438_v63  ;;  %v6878_v27 = vmul.f32 -1.442695, %v1353_v62  ;;  %8030 = vmatmul.mubr.msk.f32.gmra.mxu1 %vm604_vm0, %v7432_v23 }
 0x10c   :  { %v1387_v45 = vpop.f32.mrf.mxu0  ;;  %v8083_v48 = vpop.eup %8082  ;;  %8106 = vrcp.f32 %v2786_v31  ;;  %v1373_v31 = vadd.f32 %v9325_v61, %v437_v9  ;;  %v6880_v36 = vmul.f32 -1.442695, %v1363_v14  ;;  %v1368_v61 = vadd.f32 %v9334_v8, %v436_v29  ;;  %v432_v8 = vld [vmem:[%s12670_s2 + $0xa0] sm:$0xff] }
 0x10d   :  { %v1388_v50 = vadd.f32 %v1387_v45, %v440_v37  ;;  %8108 = vrcp.f32 %v2789_v34  ;;  %3617 = vperm.xlu1 %8051, %v8083_v48   ;;  %v9399_v60 = vpop.eup %8084  ;;  %v6886_v0 = vmul.f32 -1.442695, %v1393_v40  ;;  %v7499_v37 = vld [vmem:[%s12669_s1 + $0x218] sm:$0xff]   ;;  %v1348_v59 = vadd.f32 %v9306_v55, %v432_v8 }
 0x10e   :  { %v7791_v57 = vpop.f32.mrf.mxu0  ;;  %7934 = vmatmul.mubr.msk.f32.gmra.mxu0 %vm604_vm0, %v7304_v32  ;;  %8110 = vrcp.f32 %v2788_v39  ;;  %v8087_v3 = vpop.eup %8086  ;;  %v6884_v32 = vmul.f32 -1.442695, %v1383_v7  ;;  %v6883_v39 = vmul.f32 -1.442695, %v1378_v13  ;;  %v7319_v48 = vunpack.c.l.bf16 %v7499_v37 }
 0x10f   :  { %v1403_v1 = vadd.f32 %v7791_v57, %v443_v46  ;;  %7936 = vmatprep.mubr.msk.f32.mxu0 %vm604_vm0, %v7307_v41  ;;  %8112 = vrcp.f32 %v2791_v42  ;;  %v6885_v17 = vmul.f32 -1.442695, %v1388_v50  ;;  %v6879_v42 = vmul.f32 -1.442695, %v1358_v28  ;;  %v7500_v50 = vld [vmem:[%s12669_s1 + $0x220] sm:$0xff]  }
 0x110   :  { %v1397_v10 = vpop.f32.mrf.mxu0  ;;  %v8089_v6 = vpop.eup %8088  ;;  %8114 = vpow2.f32 %v6876_v54  ;;  %v6882_v46 = vmul.f32 -1.442695, %v1373_v31  ;;  %v428_v54 = vld [vmem:[%s12670_s2 + $0x80] sm:$0xff]  ;;  %v6881_v56 = vmul.f32 -1.442695, %v1368_v61  ;;  %v7320_v62 = vunpack.c.h.bf16 %v7499_v37 }
 0x111   :  { %v6888_v18 = vmul.f32 -1.442695, %v1403_v1  ;;  %v1398_v19 = vadd.f32 %v1397_v10, %v442_v58  ;;  %v9427_v21 = vpop.eup %8090  ;;  %3627 = vperm.xlu0 %8050, %v8089_v6   ;;  %3612 = vperm.xlu1 %8051, %v8087_v3   ;;  %8116 = vpow2.f32 %v6886_v0  ;;  %v2783_v5 = vadd.f32 1.0, %v9399_v60  ;;  %v430_v0 = vld [vmem:[%s12670_s2 + $0x90] sm:$0xff] }
 0x112   :  { %v9430_v44 = vpop.f32.mrf.mxu0  ;;  %v9433_v24 = vpop.eup %8092  ;;  %7937 = vmatmul.mubr.msk.f32.gmra.mxu0 %vm604_vm0, %v7308_v52  ;;  %v7323_v2 = vunpack.c.l.bf16 %v7500_v50  ;;  %v1328_v55 = vadd.f32 %v9274_v15, %v428_v54  ;;  %v6874_v7 = vmul.f32 -1.442695, %v1333_v53  ;;  %v6877_v12 = vmul.f32 -1.442695, %v1348_v59  ;;  %v456_v54 = vld [vmem:[%s12670_s2 + $0x160] sm:$0xff] }
 0x113   :  { %v6887_v30 = vmul.f32 -1.442695, %v1398_v19  ;;  %v8095_v25 = vpop.eup %8094  ;;  %8118 = vpow2.f32 %v6888_v18  ;;  %7939 = vmatprep.mubr.msk.f32.mxu0 %vm604_vm0, %v7311_v11  ;;  %v1338_v11 = vadd.f32 %v9291_v26, %v430_v0  ;;  %v7324_v6 = vunpack.c.h.bf16 %v7500_v50  ;;  %v7502_v19 = vld [vmem:[%s12669_s1 + $0x230] sm:$0xff]  }
 0x114   :  { %v9442_v34 = vpop.f32.mrf.mxu0  ;;  %v8097_v35 = vpop.eup %8096  ;;  %8120 = vpow2.f32 %v6885_v17  ;;  %v7327_v9 = vunpack.c.l.bf16 %v7501_v33  ;;  %v6873_v18 = vmul.f32 -1.442695, %v1328_v55  ;;  %v7331_v31 = vunpack.c.l.bf16 %v7502_v19  ;;  %v454_v55 = vld [vmem:[%s12670_s2 + $0x150] sm:$0xff] }
 0x115   :  { %v9450_v38 = vpop.eup %8098  ;;  %8122 = vpow2.f32 %v6887_v30  ;;  %3622 = vperm.xlu0 %8050, %v8097_v35   ;;  %3602 = vperm.xlu1 %8051, %v8095_v25   ;;  %v6875_v23 = vmul.f32 -1.442695, %v1338_v11  ;;  %v7503_v35 = vld [vmem:[%s12669_s1 + $0x238] sm:$0xff]  }
 0x116   :  { %v9453_v40 = vpop.f32.mrf.mxu0  ;;  %v9455_v41 = vpop.eup %8100  ;;  %8124 = vpow2.f32 %v6878_v27  ;;  %7940 = vmatmul.mubr.msk.f32.gmra.mxu0 %vm604_vm0, %v7312_v22  ;;  %v7328_v27 = vunpack.c.h.bf16 %v7501_v33 }
 0x117   :  { %v8103_v45 = vpop.eup %8102  ;;  %8126 = vpow2.f32 %v6884_v32  ;;  %7942 = vmatprep.mubr.msk.f32.mxu0 %vm604_vm0, %v7315_v51 }
 0x118   :  { %v9465_v47 = vpop.f32.mrf.mxu0  ;;  %v8105_v49 = vpop.eup %8104  ;;  %8128 = vpow2.f32 %v6880_v36 }
 0x119   :  { %v8107_v52 = vpop.eup %8106  ;;  %8130 = vpow2.f32 %v6883_v39  ;;  %3607 = vperm.xlu0 %8050, %v8105_v49   ;;  %3592 = vperm.xlu1 %8051, %v8103_v45   ;;  %v9519_v49 = vld [vmem:[%s12669_s1 + $0x240] sm:$0xff]  }
 0x11a   :  { %v9475_v57 = vpop.f32.mrf.mxu0  ;;  %v8109_v58 = vpop.eup %8108  ;;  %8132 = vpow2.f32 %v6879_v42  ;;  %7943 = vmatmul.mubr.msk.f32.gmra.mxu0 %vm604_vm0, %v7316_v43  ;;  %v7332_v42 = vunpack.c.h.bf16 %v7502_v19  ;;  %v7340_v19 = vunpack.c.h.bf16 %v9519_v49 }
 0x11b   :  { %v8111_v63 = vpop.eup %8110  ;;  %8134 = vpow2.f32 %v6882_v46  ;;  %7945 = vmatprep.mubr.msk.f32.mxu0 %vm604_vm0, %v7319_v48  ;;  %v457_v46 = vld [vmem:[%s12670_s2 + $0x168] sm:$0xff] }
 0x11c   :  { %v9483_v1 = vpop.f32.mrf.mxu0  ;;  %v8113_v3 = vpop.eup %8112  ;;  %8136 = vpow2.f32 %v6881_v56 }
 0x11d   :  { %3597 = vperm.xlu0 %8050, %v8113_v3   ;;  %3582 = vperm.xlu1 %8051, %v8111_v63   ;;  %v8115_v10 = vpop.eup %8114  ;;  %8138 = vrcp.f32 %v2783_v5 }
 0x11e   :  { %v9490_v60 = vpop.f32.mrf.mxu0  ;;  %7946 = vmatmul.mubr.msk.f32.gmra.mxu0 %vm604_vm0, %v7320_v62  ;;  %v8117_v14 = vpop.eup %8116  ;;  %8140 = vpow2.f32 %v6874_v7  ;;  %v2801_v51 = vadd.f32 1.0, %v8115_v10  ;;  %v7336_v62 = vunpack.c.h.bf16 %v7503_v35  ;;  %v9544_v10 = vld [vmem:[%s12669_s1 + $0x248] sm:$0xff]  }
 0x11f   :  { %7948 = vmatprep.mubr.msk.f32.mxu0 %vm604_vm0, %v7323_v2  ;;  %8142 = vpow2.f32 %v6877_v12  ;;  %v2811_v29 = vadd.f32 1.0, %v8117_v14  ;;  %v447_v2 = vld [vmem:[%s12670_s2 + $0x118] sm:$0xff] }
 0x120   :  { %v9494_v15 = vpop.f32.mrf.mxu0  ;;  %v8119_v17 = vpop.eup %8118 }
 0x121   :  { %v8121_v16 = vpop.eup %8120  ;;  %v2813_v26 = vadd.f32 1.0, %v8119_v17  ;;  %3587 = vperm.xlu0 %8050, %v8109_v58   ;;  %3572 = vperm.xlu1 %8051, %v8107_v52   ;;  %v455_v52 = vld [vmem:[%s12670_s2 + $0x158] sm:$0xff] }
 0x122   :  { %v9500_v13 = vpop.f32.mrf.mxu0  ;;  %v8123_v22 = vpop.eup %8122  ;;  %7949 = vmatmul.mubr.msk.f32.gmra.mxu0 %vm604_vm0, %v7324_v6  ;;  %v2810_v37 = vadd.f32 1.0, %v8121_v16  ;;  %v458_v6 = vld [vmem:[%s12670_s2 + $0x170] sm:$0xff] }
 0x123   :  { %v8125_v28 = vpop.eup %8124  ;;  %8144 = vrcp.f32 %v2813_v26  ;;  %v2812_v30 = vadd.f32 1.0, %v8123_v22  ;;  %7951 = vmatprep.mubr.msk.f32.mxu0 %vm604_vm0, %v7327_v9  ;;  %v453_v9 = vld [vmem:[%s12670_s2 + $0x148] sm:$0xff]  ;;  %v1423_v26 = vadd.f32 %v9453_v40, %v447_v2  ;;  %v451_v22 = vld [vmem:[%s12670_s2 + $0x138] sm:$0xff]  ;;  %v7506_v40 = vld [vmem:[%s12669_s1 + $0x250] sm:$0xff]  }
 0x124   :  { %v9503_v25 = vpop.f32.mrf.mxu0  ;;  %v8127_v32 = vpop.eup %8126  ;;  %8146 = vpow2.f32 %v6873_v18  ;;  %v2803_v20 = vadd.f32 1.0, %v8125_v28  ;;  %v7343_v28 = vunpack.c.l.bf16 %v9544_v10  ;;  %v7508_v2 = vld [vmem:[%s12669_s1 + $0x260] sm:$0xff]  }
 0x125   :  { %v8129_v36 = vpop.eup %8128  ;;  %8148 = vrcp.f32 %v2812_v30  ;;  %3577 = vperm.xlu0 %8050, %v9455_v41   ;;  %3562 = vperm.xlu1 %8051, %v9450_v38   ;;  %v2809_v45 = vadd.f32 1.0, %v8127_v32  ;;  %v7335_v41 = vunpack.c.l.bf16 %v7503_v35  ;;  %v452_v30 = vld [vmem:[%s12670_s2 + $0x140] sm:$0xff] }
 0x126   :  { %v7809_v61 = vpop.f32.mrf.mxu0  ;;  %v8131_v39 = vpop.eup %8130  ;;  %8150 = vpow2.f32 %v6875_v23  ;;  %7952 = vmatmul.mubr.msk.f32.gmra.mxu0 %vm604_vm0, %v7328_v27  ;;  %v2805_v38 = vadd.f32 1.0, %v8129_v36  ;;  %v1453_v36 = vadd.f32 %v9500_v13, %v453_v9  ;;  %v1448_v13 = vadd.f32 %v9503_v25, %v452_v30 }
 0x127   :  { %v8133_v43 = vpop.eup %8132  ;;  %8152 = vrcp.f32 %v2811_v29  ;;  %7954 = vmatprep.mubr.msk.f32.mxu0 %vm604_vm0, %v7331_v31  ;;  %v2808_v50 = vadd.f32 1.0, %v8131_v39  ;;  %v1463_v3 = vadd.f32 %v7809_v61, %v455_v52  ;;  %v7344_v61 = vunpack.c.h.bf16 %v9544_v10 }
 0x128   :  { %v1457_v8 = vpop.f32.mrf.mxu0  ;;  %v8135_v48 = vpop.eup %8134  ;;  %8154 = vrcp.f32 %v2801_v51  ;;  %v2804_v58 = vadd.f32 1.0, %v8133_v43  ;;  %v450_v43 = vld [vmem:[%s12670_s2 + $0x130] sm:$0xff]  ;;  %v6898_v25 = vmul.f32 -1.442695, %v1453_v36  ;;  %v7356_v30 = vunpack.c.h.bf16 %v7508_v2 }
 0x129   :  { %8156 = vrcp.f32 %v2810_v37  ;;  %3567 = vperm.xlu0 %8050, %v9433_v24   ;;  %3552 = vperm.xlu1 %8051, %v9427_v21   ;;  %v8137_v56 = vpop.eup %8136  ;;  %v2807_v63 = vadd.f32 1.0, %v8135_v48  ;;  %v459_v24 = vld [vmem:[%s12670_s2 + $0x178] sm:$0xff]  ;;  %v7339_v21 = vunpack.c.l.bf16 %v9519_v49  ;;  %v1458_v23 = vadd.f32 %v1457_v8, %v454_v55 }
 0x12a   :  { %v7812_v53 = vpop.f32.mrf.mxu0  ;;  %8158 = vrcp.f32 %v2803_v20  ;;  %7955 = vmatmul.mubr.msk.f32.gmra.mxu0 %vm604_vm0, %v7332_v42  ;;  %v8139_v0 = vpop.eup %8138  ;;  %v2806_v11 = vadd.f32 1.0, %v8137_v56  ;;  %v6900_v31 = vmul.f32 -1.442695, %v1463_v3  ;;  %v1443_v42 = vadd.f32 %v9490_v60, %v451_v22  ;;  %v7507_v49 = vld [vmem:[%s12669_s1 + $0x258] sm:$0xff]   ;;  %v449_v56 = vld [vmem:[%s12670_s2 + $0x128] sm:$0xff] }
 0x12b   :  { %v1473_v59 = vadd.f32 %v7812_v53, %v457_v46  ;;  %8160 = vrcp.f32 %v2809_v45  ;;  %7957 = vmatprep.mubr.msk.f32.mxu0 %vm604_vm0, %v7335_v41  ;;  %v9549_v14 = vpop.eup %8140  ;;  %v6899_v46 = vmul.f32 -1.442695, %v1458_v23  ;;  %v7347_v48 = vunpack.c.l.bf16 %v7506_v40 }
 0x12c   :  { %v1467_v5 = vpop.f32.mrf.mxu0  ;;  %8162 = vrcp.f32 %v2805_v38  ;;  %v8143_v16 = vpop.eup %8142  ;;  %v6892_v38 = vmul.f32 -1.442695, %v1423_v26  ;;  %v1438_v52 = vadd.f32 %v9494_v15, %v450_v43  ;;  %v448_v15 = vld [vmem:[%s12670_s2 + $0x120] sm:$0xff]  ;;  %v1433_v55 = vadd.f32 %v9475_v57, %v449_v56  ;;  %v445_v26 = vld [vmem:[%s12670_s2 + $0x108] sm:$0xff] }
 0x12d   :  { %v6902_v33 = vmul.f32 -1.442695, %v1473_v59  ;;  %v1468_v7 = vadd.f32 %v1467_v5, %v456_v54  ;;  %8164 = vrcp.f32 %v2808_v50  ;;  %3557 = vperm.xlu0 %8050, %v8139_v0   ;;  %v2802_v20 = vadd.f32 1.0, %v8143_v16  ;;  %v7509_v16 = vld [vmem:[%s12669_s1 + $0x268] sm:$0xff]  }
 0x12e   :  { %v7815_v12 = vpop.f32.mrf.mxu0  ;;  %8166 = vrcp.f32 %v2804_v58  ;;  %7958 = vmatmul.mubr.msk.f32.gmra.mxu0 %vm604_vm0, %v7336_v62  ;;  %v6896_v58 = vmul.f32 -1.442695, %v1443_v42  ;;  %v7348_v59 = vunpack.c.h.bf16 %v7506_v40  ;;  %v2799_v9 = vadd.f32 1.0, %v9549_v14 }
 0x12f   :  { %v6901_v17 = vmul.f32 -1.442695, %v1468_v7  ;;  %v1483_v18 = vadd.f32 %v7815_v12, %v459_v24  ;;  %8168 = vrcp.f32 %v2807_v63  ;;  %7960 = vmatprep.mubr.msk.f32.mxu0 %vm604_vm0, %v7339_v21  ;;  %v6897_v63 = vmul.f32 -1.442695, %v1448_v13 }
 0x130   :  { %v1477_v27 = vpop.f32.mrf.mxu0  ;;  %v8145_v29 = vpop.eup %8144  ;;  %8170 = vpow2.f32 %v6902_v33  ;;  %v7351_v24 = vunpack.c.l.bf16 %v7507_v49  ;;  %v6895_v33 = vmul.f32 -1.442695, %v1438_v52  ;;  %v7352_v12 = vunpack.c.h.bf16 %v7507_v49 }
 0x131   :  { %v6904_v32 = vmul.f32 -1.442695, %v1483_v18  ;;  %v1478_v51 = vadd.f32 %v1477_v27, %v458_v6  ;;  %v9568_v35 = vpop.eup %8146  ;;  %8172 = vrcp.f32 %v2806_v11  ;;  %3707 = vperm.xlu0 %8050, %v8145_v29   ;;  %v1428_v11 = vadd.f32 %v9483_v1, %v448_v15 }
 0x132   :  { %v9571_v37 = vpop.f32.mrf.mxu0  ;;  %v8149_v39 = vpop.eup %8148  ;;  %8174 = vpow2.f32 %v6901_v17  ;;  %7961 = vmatmul.mubr.msk.f32.gmra.mxu0 %vm604_vm0, %v7340_v19  ;;  %v446_v17 = vld [vmem:[%s12670_s2 + $0x110] sm:$0xff]  ;;  %v7355_v18 = vunpack.c.l.bf16 %v7508_v2  ;;  %v2798_v1 = vadd.f32 1.0, %v9568_v35  ;;  %v6894_v22 = vmul.f32 -1.442695, %v1433_v55 }
 0x133   :  { %v6903_v45 = vmul.f32 -1.442695, %v1478_v51  ;;  %v8151_v8 = vpop.eup %8150  ;;  %8176 = vpow2.f32 %v6904_v32  ;;  %3702 = vperm.xlu1 %8051, %v8149_v39   ;;  %7963 = vmatprep.mubr.msk.f32.mxu0 %vm604_vm0, %v7343_v28  ;;  %v1418_v28 = vadd.f32 %v9465_v47, %v446_v17  ;;  %v6893_v29 = vmul.f32 -1.442695, %v1428_v11  ;;  %v444_v32 = vld [vmem:[%s12670_s2 + $0x100] sm:$0xff] }
 0x134   :  { %v9580_v41 = vpop.f32.mrf.mxu0  ;;  %v8153_v60 = vpop.eup %8152  ;;  %8178 = vpow2.f32 %v6900_v31  ;;  %v2800_v0 = vadd.f32 1.0, %v8151_v8  ;;  %v7359_v40 = vunpack.c.l.bf16 %v7509_v16  ;;  %v1413_v47 = vadd.f32 %v9430_v44, %v445_v26  ;;  %v470_v26 = vld [vmem:[%s12670_s2 + $0x1d0] sm:$0xff] }
 0x135   :  { %v9586_v50 = vpop.eup %8154  ;;  %8180 = vpow2.f32 %v6903_v45  ;;  %3697 = vperm.xlu0 %8050, %v8153_v60   ;;  %v1408_v45 = vadd.f32 %v9442_v34, %v444_v32  ;;  %v6891_v8 = vmul.f32 -1.442695, %v1418_v28  ;;  %v7360_v13 = vunpack.c.h.bf16 %v7509_v16  ;;  %v7511_v34 = vld [vmem:[%s12669_s1 + $0x278] sm:$0xff]   ;;  %v4702_v28 = vld [vmem:[%s12671_s4] sm:$0xff]  ;;  %v474_v32 = vld [vmem:[%s12670_s2 + $0x1f0] sm:$0xff] }
 0x136   :  { %v9589_v53 = vpop.f32.mrf.mxu0  ;;  %v8157_v54 = vpop.eup %8156  ;;  %8182 = vrcp.f32 %v2802_v20  ;;  %7964 = vmatmul.mubr.msk.f32.gmra.mxu0 %vm604_vm0, %v7344_v61  ;;  %v7510_v61 = vld [vmem:[%s12669_s1 + $0x270] sm:$0xff]   ;;  %v6890_v52 = vmul.f32 -1.442695, %v1413_v47  ;;  %v7367_v2 = vunpack.c.l.bf16 %v7511_v34  ;;  %v469_v47 = vld [vmem:[%s12670_s2 + $0x1c8] sm:$0xff] }
 0x137   :  { %v9595_v62 = vpop.eup %8158  ;;  %8184 = vpow2.f32 %v6899_v46  ;;  %3692 = vperm.xlu1 %8051, %v8157_v54   ;;  %7966 = vmatprep.mubr.msk.f32.mxu0 %vm604_vm0, %v7347_v48  ;;  %v7364_v15 = vunpack.c.h.bf16 %v7510_v61 }
 0x138   :  { %v9600_v5 = vpop.f32.mrf.mxu0  ;;  %v8161_v21 = vpop.eup %8160  ;;  %8186 = vpow2.f32 %v6892_v38  ;;  %v7363_v38 = vunpack.c.l.bf16 %v7510_v61 }
 0x139   :  { %v8163_v3 = vpop.eup %8162  ;;  %8188 = vpow2.f32 %v6898_v25  ;;  %3687 = vperm.xlu0 %8050, %v8161_v21  }
 0x13a   :  { %v9607_v7 = vpop.f32.mrf.mxu0  ;;  %v8165_v10 = vpop.eup %8164  ;;  %8190 = vpow2.f32 %v6896_v58  ;;  %7967 = vmatmul.mubr.msk.f32.gmra.mxu0 %vm604_vm0, %v7348_v59  ;;  %v6889_v59 = vmul.f32 -1.442695, %v1408_v45 }
 0x13b   :  { %v8167_v6 = vpop.eup %8166  ;;  %8192 = vpow2.f32 %v6897_v63  ;;  %3682 = vperm.xlu1 %8051, %v8165_v10   ;;  %7969 = vmatprep.mubr.msk.f32.mxu0 %vm604_vm0, %v7351_v24  ;;  %v471_v10 = vld [vmem:[%s12670_s2 + $0x1d8] sm:$0xff] }
 0x13c   :  { %v9615_v57 = vpop.f32.mrf.mxu0  ;;  %v8169_v19 = vpop.eup %8168  ;;  %8194 = vrcp.f32 %v2800_v0  ;;  %v473_v0 = vld [vmem:[%s12670_s2 + $0x1e8] sm:$0xff] }
 0x13d   :  { %v8171_v14 = vpop.eup %8170  ;;  %8196 = vpow2.f32 %v6895_v33  ;;  %3677 = vperm.xlu0 %8050, %v8169_v19  }
 0x13e   :  { %v9625_v23 = vpop.f32.mrf.mxu0  ;;  %v8173_v27 = vpop.eup %8172  ;;  %7970 = vmatmul.mubr.msk.f32.gmra.mxu0 %vm604_vm0, %v7352_v12  ;;  %8198 = vrcp.f32 %v2799_v9  ;;  %v2827_v36 = vadd.f32 1.0, %v8171_v14  ;;  %v472_v12 = vld [vmem:[%s12670_s2 + $0x1e0] sm:$0xff] }
 0x13f   :  { %v8175_v31 = vpop.eup %8174  ;;  %3672 = vperm.xlu1 %8051, %v8173_v27   ;;  %7972 = vmatprep.mubr.msk.f32.mxu0 %vm604_vm0, %v7355_v18  ;;  %8200 = vrcp.f32 %v2798_v1  ;;  %v7368_v18 = vunpack.c.h.bf16 %v7511_v34 }
 0x140   :  { %v9632_v51 = vpop.f32.mrf.mxu0  ;;  %v8177_v35 = vpop.eup %8176  ;;  %8202 = vpow2.f32 %v6894_v22  ;;  %v2826_v46 = vadd.f32 1.0, %v8175_v31 }
 0x141   :  { %v8179_v39 = vpop.eup %8178  ;;  %v2829_v20 = vadd.f32 1.0, %v8177_v35  ;;  %3667 = vperm.xlu0 %8050, %v8163_v3   ;;  %8204 = vpow2.f32 %v6893_v29 }
 0x142   :  { %v9639_v42 = vpop.f32.mrf.mxu0  ;;  %v8181_v43 = vpop.eup %8180  ;;  %7973 = vmatmul.mubr.msk.f32.gmra.mxu0 %vm604_vm0, %v7356_v30  ;;  %v2825_v54 = vadd.f32 1.0, %v8179_v39 }
 0x143   :  { %v8183_v44 = vpop.eup %8182  ;;  %8206 = vrcp.f32 %v2829_v20  ;;  %v2828_v48 = vadd.f32 1.0, %v8181_v43  ;;  %3662 = vperm.xlu1 %8051, %v8167_v6   ;;  %7975 = vmatprep.mubr.msk.f32.mxu0 %vm604_vm0, %v7359_v40  ;;  %v4895_v40 = vunpack.c.h.bf16 %v4702_v28 }
 0x144   :  { %v9643_v60 = vpop.f32.mrf.mxu0  ;;  %v8185_v49 = vpop.eup %8184  ;;  %8208 = vrcp.f32 %v2827_v36 }
 0x145   :  { %v8187_v25 = vpop.eup %8186  ;;  %8210 = vrcp.f32 %v2828_v48  ;;  %3657 = vperm.xlu0 %8050, %v9595_v62   ;;  %v2824_v24 = vadd.f32 1.0, %v8185_v49  ;;  %5342 = vmatprep.mubr.f32.mxu1 %v4895_v40  ;;  %v1533_v49 = vadd.f32 %v9639_v42, %v469_v47  ;;  %v461_v47 = vld [vmem:[%s12670_s2 + $0x188] sm:$0xff] }
 0x146   :  { %v7833_v56 = vpop.f32.mrf.mxu0  ;;  %v8189_v58 = vpop.eup %8188  ;;  %8212 = vpow2.f32 %v6891_v8  ;;  %7976 = vmatmul.mubr.msk.f32.gmra.mxu0 %vm604_vm0, %v7360_v13  ;;  %v2817_v3 = vadd.f32 1.0, %v8187_v25  ;;  %v468_v8 = vld [vmem:[%s12670_s2 + $0x1c0] sm:$0xff] }
 0x147   :  { %v8191_v63 = vpop.eup %8190  ;;  %8214 = vrcp.f32 %v2826_v46  ;;  %3652 = vperm.xlu1 %8051, %v8183_v44   ;;  %7978 = vmatprep.mubr.msk.f32.mxu0 %vm604_vm0, %v7363_v38  ;;  %v2823_v33 = vadd.f32 1.0, %v8189_v58  ;;  %v1543_v14 = vadd.f32 %v7833_v56, %v471_v10  ;;  %v467_v38 = vld [vmem:[%s12670_s2 + $0x1b8] sm:$0xff] }
 0x148   :  { %v1537_v21 = vpop.f32.mrf.mxu0  ;;  %v8193_v62 = vpop.eup %8192  ;;  %8216 = vpow2.f32 %v6890_v52  ;;  %v2821_v9 = vadd.f32 1.0, %v8191_v63 }
 0x149   :  { %v8195_v55 = vpop.eup %8194  ;;  %8218 = vrcp.f32 %v2825_v54  ;;  %3647 = vperm.xlu0 %8050, %v9586_v50   ;;  %v2822_v19 = vadd.f32 1.0, %v8193_v62  ;;  %v475_v50 = vld [vmem:[%s12670_s2 + $0x1f8] sm:$0xff]  ;;  %v1538_v20 = vadd.f32 %v1537_v21, %v470_v26  ;;  %v6916_v13 = vmul.f32 -1.442695, %v1543_v14  ;;  %v466_v54 = vld [vmem:[%s12670_s2 + $0x1b0] sm:$0xff] }
 0x14a   :  { %v7836_v11 = vpop.f32.mrf.mxu0  ;;  %v8197_v6 = vpop.eup %8196  ;;  %8220 = vpow2.f32 %v6889_v59  ;;  %7979 = vmatmul.mubr.msk.f32.gmra.mxu0 %vm604_vm0, %v7364_v15  ;;  %v1528_v59 = vadd.f32 %v9643_v60, %v468_v8  ;;  %v1523_v21 = vadd.f32 %v9625_v23, %v467_v38  ;;  %v6914_v62 = vmul.f32 -1.442695, %v1533_v49  ;;  %v464_v23 = vld [vmem:[%s12670_s2 + $0x1a0] sm:$0xff]  ;;  %v463_v26 = vld [vmem:[%s12670_s2 + $0x198] sm:$0xff]  ;;  %v477_v49 = vld [vmem:[%s12670_s2 + $0x208] sm:$0xff] }
 0x14b   :  { %v1553_v17 = vadd.f32 %v7836_v11, %v473_v0  ;;  %8222 = vrcp.f32 %v2824_v24  ;;  %3642 = vperm.xlu1 %8051, %v8195_v55   ;;  %7981 = vmatprep.mubr.msk.f32.mxu0 %vm604_vm0, %v7367_v2  ;;  %v8199_v16 = vpop.eup %8198  ;;  %v2820_v30 = vadd.f32 1.0, %v8197_v6  ;;  %v6915_v15 = vmul.f32 -1.442695, %v1538_v20 }
 0x14c   :  { %v1547_v1 = vpop.f32.mrf.mxu0  ;;  %8224 = vrcp.f32 %v2817_v3  ;;  %v8201_v29 = vpop.eup %8200  ;;  %v1518_v2 = vadd.f32 %v9632_v51, %v466_v54  ;;  %v6913_v11 = vmul.f32 -1.442695, %v1528_v59  ;;  %v6912_v6 = vmul.f32 -1.442695, %v1523_v21 }
 0x14d   :  { %v6918_v22 = vmul.f32 -1.442695, %v1553_v17  ;;  %v1548_v27 = vadd.f32 %v1547_v1, %v472_v12  ;;  %8226 = vrcp.f32 %v2823_v33  ;;  %3637 = vperm.xlu0 %8050, %v8199_v16   ;;  %v8203_v35 = vpop.eup %8202  ;;  %v465_v33 = vld [vmem:[%s12670_s2 + $0x1a8] sm:$0xff] }
 0x14e   :  { %v7839_v31 = vpop.f32.mrf.mxu0  ;;  %8228 = vrcp.f32 %v2821_v9  ;;  %7982 = vmatmul.mubr.msk.f32.gmra.mxu0 %vm604_vm0, %v7368_v18  ;;  %v8205_v39 = vpop.eup %8204  ;;  %v2819_v25 = vadd.f32 1.0, %v8203_v35  ;;  %v1513_v17 = vadd.f32 %v9607_v7, %v465_v33  ;;  %v6911_v18 = vmul.f32 -1.442695, %v1518_v2 }
 0x14f   :  { %v6917_v36 = vmul.f32 -1.442695, %v1548_v27  ;;  %v1563_v61 = vadd.f32 %v7839_v31, %v475_v50  ;;  %8230 = vrcp.f32 %v2822_v19  ;;  %3632 = vperm.xlu1 %8051, %v8201_v29   ;;  %v2818_v24 = vadd.f32 1.0, %v8205_v39  ;;  %v462_v29 = vld [vmem:[%s12670_s2 + $0x190] sm:$0xff] }
 0x150   :  { %v1557_v43 = vpop.f32.mrf.mxu0  ;;  %v8207_v45 = vpop.eup %8206  ;;  %8232 = vpow2.f32 %v6918_v22  ;;  %v1508_v50 = vadd.f32 %v9615_v57, %v464_v23  ;;  %v1498_v39 = vadd.f32 %v9600_v5, %v462_v29 }
 0x151   :  { %v6920_v44 = vmul.f32 -1.442695, %v1563_v61  ;;  %v1558_v46 = vadd.f32 %v1557_v43, %v474_v32  ;;  %v8209_v48 = vpop.eup %8208  ;;  %8234 = vrcp.f32 %v2820_v30  ;;  %3787 = vperm.xlu0 %8050, %v8207_v45   ;;  %v6910_v30 = vmul.f32 -1.442695, %v1513_v17  ;;  %v491_v17 = vld [vmem:[%s12670_s2 + $0x278] sm:$0xff] }
 0x152   :  { %v9687_v52 = vpop.f32.mrf.mxu0  ;;  %v8211_v34 = vpop.eup %8210  ;;  %8236 = vpow2.f32 %v6917_v36  ;;  %v1503_v32 = vadd.f32 %v9589_v53, %v463_v26  ;;  %v6909_v40 = vmul.f32 -1.442695, %v1508_v50  ;;  %v460_v53 = vld [vmem:[%s12670_s2 + $0x180] sm:$0xff] }
 0x153   :  { %v6919_v56 = vmul.f32 -1.442695, %v1558_v46  ;;  %v8213_v58 = vpop.eup %8212  ;;  %8238 = vpow2.f32 %v6920_v44  ;;  %3782 = vperm.xlu1 %8051, %v8211_v34   ;;  %v1493_v44 = vadd.f32 %v9571_v37, %v461_v47  ;;  %v1488_v54 = vadd.f32 %v9580_v41, %v460_v53  ;;  %v476_v41 = vld [vmem:[%s12670_s2 + $0x200] sm:$0xff] }
 0x154   :  { %v9693_v63 = vpop.f32.mrf.mxu0  ;;  %v8215_v42 = vpop.eup %8214  ;;  %8240 = vpow2.f32 %v6916_v13  ;;  %v2816_v60 = vadd.f32 1.0, %v8213_v58  ;;  %v6908_v46 = vmul.f32 -1.442695, %v1503_v32 }
 0x155   :  { %v8217_v0 = vpop.eup %8216  ;;  %8242 = vpow2.f32 %v6919_v56  ;;  %3777 = vperm.xlu0 %8050, %v8209_v48   ;;  %v6907_v56 = vmul.f32 -1.442695, %v1498_v39 }
 0x156   :  { %v9697_v3 = vpop.f32.mrf.mxu0  ;;  %v8219_v55 = vpop.eup %8218  ;;  %8244 = vrcp.f32 %v2819_v25  ;;  %v2815_v14 = vadd.f32 1.0, %v8217_v0 }
 0x157   :  { %v8221_v10 = vpop.eup %8220  ;;  %8246 = vpow2.f32 %v6915_v15  ;;  %3772 = vperm.xlu1 %8051, %v8215_v42   ;;  %v6906_v42 = vmul.f32 -1.442695, %v1493_v44 }
 0x158   :  { %v9705_v51 = vpop.f32.mrf.mxu0  ;;  %v8223_v12 = vpop.eup %8222  ;;  %8248 = vrcp.f32 %v2818_v24  ;;  %v2814_v27 = vadd.f32 1.0, %v8221_v10  ;;  %v1573_v24 = vadd.f32 %v9687_v52, %v477_v49 }
 0x159   :  { %v9707_v9 = vpop.eup %8224  ;;  %8250 = vpow2.f32 %v6914_v62  ;;  %3767 = vperm.xlu0 %8050, %v8219_v55   ;;  %v6905_v55 = vmul.f32 -1.442695, %v1488_v54 }
 0x15a   :  { %v9710_v19 = vpop.f32.mrf.mxu0  ;;  %v8227_v1 = vpop.eup %8226  ;;  %8252 = vrcp.f32 %v2816_v60  ;;  %v6922_v23 = vmul.f32 -1.442695, %v1573_v24 }
 0x15b   :  { %v8229_v16 = vpop.eup %8228  ;;  %8254 = vpow2.f32 %v6913_v11  ;;  %3762 = vperm.xlu1 %8051, %v8223_v12   ;;  %v1568_v11 = vadd.f32 %v9693_v63, %v476_v41 }
 0x15c   :  { %v9716_v22 = vpop.f32.mrf.mxu0  ;;  %v8231_v7 = vpop.eup %8230  ;;  %8256 = vpow2.f32 %v6912_v6 }
 0x15d   :  { %v8233_v28 = vpop.eup %8232  ;;  %8258 = vpow2.f32 %v6911_v18  ;;  %3757 = vperm.xlu0 %8050, %v8227_v1   ;;  %v6921_v26 = vmul.f32 -1.442695, %v1568_v11  ;;  %v483_v11 = vld [vmem:[%s12670_s2 + $0x238] sm:$0xff] }
 0x15e   :  { %v9721_v57 = vpop.f32.mrf.mxu0  ;;  %v8235_v31 = vpop.eup %8234  ;;  %8260 = vrcp.f32 %v2815_v14  ;;  %v2843_v20 = vadd.f32 1.0, %v8233_v28 }
 0x15f   :  { %v8237_v35 = vpop.eup %8236  ;;  %3752 = vperm.xlu1 %8051, %v8231_v7   ;;  %8262 = vrcp.f32 %v2814_v27 }
 0x160   :  { %v9727_v36 = vpop.f32.mrf.mxu0  ;;  %v8239_v61 = vpop.eup %8238  ;;  %8264 = vpow2.f32 %v6910_v30  ;;  %v2842_v38 = vadd.f32 1.0, %v8237_v35 }
 0x161   :  { %v8241_v43 = vpop.eup %8240  ;;  %v2845_v45 = vadd.f32 1.0, %v8239_v61  ;;  %3747 = vperm.xlu0 %8050, %v8229_v16   ;;  %8266 = vpow2.f32 %v6909_v40  ;;  %v478_v61 = vld [vmem:[%s12670_s2 + $0x210] sm:$0xff] }
 0x162   :  { %v9733_v8 = vpop.f32.mrf.mxu0  ;;  %v8243_v13 = vpop.eup %8242  ;;  %v2841_v37 = vadd.f32 1.0, %v8241_v43 }
 0x163   :  { %v8245_v48 = vpop.eup %8244  ;;  %8268 = vrcp.f32 %v2845_v45  ;;  %v2844_v5 = vadd.f32 1.0, %v8243_v13  ;;  %3742 = vperm.xlu1 %8051, %v8235_v31   ;;  %v1578_v13 = vadd.f32 %v9705_v51, %v478_v61 }
 0x164   :  { %v9739_v34 = vpop.f32.mrf.mxu0  ;;  %v8247_v25 = vpop.eup %8246  ;;  %8270 = vrcp.f32 %v2843_v20 }
 0x165   :  { %v8249_v58 = vpop.eup %8248  ;;  %8272 = vrcp.f32 %v2844_v5  ;;  %3737 = vperm.xlu0 %8050, %v8245_v48   ;;  %v2840_v0 = vadd.f32 1.0, %v8247_v25  ;;  %v481_v48 = vld [vmem:[%s12670_s2 + $0x228] sm:$0xff]  ;;  %v6923_v51 = vmul.f32 -1.442695, %v1578_v13 }
 0x166   :  { %v9742_v59 = vpop.f32.mrf.mxu0  ;;  %v8251_v15 = vpop.eup %8250  ;;  %8274 = vpow2.f32 %v6908_v46 }
 0x167   :  { %v8253_v21 = vpop.eup %8252  ;;  %8276 = vrcp.f32 %v2842_v38  ;;  %3732 = vperm.xlu1 %8051, %v8249_v58   ;;  %v2839_v33 = vadd.f32 1.0, %v8251_v15  ;;  %v1593_v58 = vadd.f32 %v9710_v19, %v481_v48 }
 0x168   :  { %v9748_v2 = vpop.f32.mrf.mxu0  ;;  %v8255_v62 = vpop.eup %8254  ;;  %8278 = vpow2.f32 %v6907_v56 }
 0x169   :  { %v8257_v60 = vpop.eup %8256  ;;  %8280 = vrcp.f32 %v2841_v37  ;;  %3727 = vperm.xlu0 %8050, %v9707_v9   ;;  %v2838_v12 = vadd.f32 1.0, %v8255_v62  ;;  %v479_v9 = vld [vmem:[%s12670_s2 + $0x218] sm:$0xff]  ;;  %v6926_v19 = vmul.f32 -1.442695, %v1593_v58 }
 0x16a   :  { %v9751_v10 = vpop.f32.mrf.mxu0  ;;  %v8259_v52 = vpop.eup %8258  ;;  %8282 = vpow2.f32 %v6906_v42  ;;  %v2837_v1 = vadd.f32 1.0, %v8257_v60  ;;  %v1583_v28 = vadd.f32 %v9697_v3, %v479_v9  ;;  %v480_v42 = vld [vmem:[%s12670_s2 + $0x220] sm:$0xff] }
 0x16b   :  { %8284 = vrcp.f32 %v2840_v0  ;;  %3722 = vperm.xlu1 %8051, %v8253_v21   ;;  %v8261_v18 = vpop.eup %8260  ;;  %v2836_v16 = vadd.f32 1.0, %v8259_v52  ;;  %v1588_v60 = vadd.f32 %v9716_v22, %v480_v42  ;;  %v1603_v22 = vadd.f32 %v9721_v57, %v483_v11 }
 0x16c   :  { %v9754_v6 = vpop.f32.mrf.mxu0  ;;  %8286 = vpow2.f32 %v6905_v55  ;;  %v8263_v50 = vpop.eup %8262  ;;  %v6924_v3 = vmul.f32 -1.442695, %v1583_v28  ;;  %v485_v28 = vld [vmem:[%s12670_s2 + $0x248] sm:$0xff] }
 0x16d   :  { %8288 = vrcp.f32 %v2839_v33  ;;  %3717 = vperm.xlu0 %8050, %v8261_v18   ;;  %v8265_v14 = vpop.eup %8264  ;;  %v1613_v61 = vadd.f32 %v9733_v8, %v485_v28  ;;  %v3373_v8 = vld [vmem:[%s12672_s3 + $0x78] sm:$0xff] }
 0x16e   :  { %v7863_v63 = vpop.f32.mrf.mxu0  ;;  %8290 = vpow2.f32 %v6922_v23  ;;  %v8267_v27 = vpop.eup %8266  ;;  %v2835_v47 = vadd.f32 1.0, %v8265_v14  ;;  %v511_v28 = vld [vmem:[%s12670_s2 + $0x318] sm:$0xff] }
 0x16f   :  { %v1643_v7 = vadd.f32 %v7863_v63, %v491_v17  ;;  %8292 = vrcp.f32 %v2838_v12  ;;  %3712 = vperm.xlu1 %8051, %v8263_v50   ;;  %v2834_v45 = vadd.f32 1.0, %v8267_v27  ;;  %v6928_v27 = vmul.f32 -1.442695, %v1603_v22  ;;  %v508_v22 = vld [vmem:[%s12670_s2 + $0x300] sm:$0xff] }
 0x170   :  { %v9763_v29 = vpop.f32.mrf.mxu0  ;;  %v8269_v30 = vpop.eup %8268  ;;  %8294 = vrcp.f32 %v2837_v1  ;;  %v6925_v1 = vmul.f32 -1.442695, %v1588_v60 }
 0x171   :  { %v6936_v31 = vmul.f32 -1.442695, %v1643_v7  ;;  %v8271_v32 = vpop.eup %8270  ;;  %8296 = vrcp.f32 %v2836_v16  ;;  %3867 = vperm.xlu0 %8050, %v8269_v30   ;;  %v482_v16 = vld [vmem:[%s12670_s2 + $0x230] sm:$0xff] }
 0x172   :  { %v9765_v40 = vpop.f32.mrf.mxu0  ;;  %v8273_v35 = vpop.eup %8272  ;;  %8298 = vpow2.f32 %v6921_v26  ;;  %v1598_v57 = vadd.f32 %v9727_v36, %v482_v16  ;;  %v484_v36 = vld [vmem:[%s12670_s2 + $0x240] sm:$0xff]  ;;  %v489_v16 = vld [vmem:[%s12670_s2 + $0x268] sm:$0xff] }
 0x173   :  { %v8275_v39 = vpop.eup %8274  ;;  %8300 = vpow2.f32 %v6936_v31  ;;  %3862 = vperm.xlu1 %8051, %v8273_v35  }
 0x174   :  { %v9770_v20 = vpop.f32.mrf.mxu0  ;;  %v8277_v43 = vpop.eup %8276  ;;  %8302 = vrcp.f32 %v2835_v47  ;;  %v2833_v5 = vadd.f32 1.0, %v8275_v39 }
 0x175   :  { %v8279_v53 = vpop.eup %8278  ;;  %3857 = vperm.xlu0 %8050, %v8271_v32   ;;  %8304 = vpow2.f32 %v6924_v3 }
 0x176   :  { %v9773_v44 = vpop.f32.mrf.mxu0  ;;  %v8281_v46 = vpop.eup %8280  ;;  %v2832_v54 = vadd.f32 1.0, %v8279_v53  ;;  %8306 = vrcp.f32 %v2834_v45  ;;  %v487_v53 = vld [vmem:[%s12670_s2 + $0x258] sm:$0xff] }
 0x177   :  { %v8283_v38 = vpop.eup %8282  ;;  %3852 = vperm.xlu1 %8051, %v8277_v43   ;;  %8308 = vrcp.f32 %v2833_v5  ;;  %v6927_v43 = vmul.f32 -1.442695, %v1598_v57  ;;  %v6930_v5 = vmul.f32 -1.442695, %v1613_v61  ;;  %v3369_v61 = vld [vmem:[%s12672_s3 + $0x58] sm:$0xff] }
 0x178   :  { %v9778_v49 = vpop.f32.mrf.mxu0  ;;  %v8285_v25 = vpop.eup %8284  ;;  %v2831_v21 = vadd.f32 1.0, %v8283_v38  ;;  %8310 = vrcp.f32 %v2832_v54  ;;  %v486_v54 = vld [vmem:[%s12670_s2 + $0x250] sm:$0xff] }
 0x179   :  { %v8287_v56 = vpop.eup %8286  ;;  %3847 = vperm.xlu0 %8050, %v8281_v46   ;;  %8312 = vpow2.f32 %v6923_v51  ;;  %v1608_v46 = vadd.f32 %v9739_v34, %v484_v36 }
 0x17a   :  { %v9781_v37 = vpop.f32.mrf.mxu0  ;;  %v8289_v15 = vpop.eup %8288  ;;  %v2830_v62 = vadd.f32 1.0, %v8287_v56  ;;  %8314 = vrcp.f32 %v2831_v21  ;;  %v3372_v21 = vld [vmem:[%s12672_s3 + $0x70] sm:$0xff] }
 0x17b   :  { %v8291_v24 = vpop.eup %8290  ;;  %3842 = vperm.xlu1 %8051, %v8285_v25   ;;  %v1623_v25 = vadd.f32 %v9742_v59, %v487_v53  ;;  %v6929_v59 = vmul.f32 -1.442695, %v1608_v46 }
 0x17c   :  { %v9786_v0 = vpop.f32.mrf.mxu0  ;;  %v8293_v41 = vpop.eup %8292  ;;  %v2847_v23 = vadd.f32 1.0, %v8291_v24  ;;  %8316 = vrcp.f32 %v2830_v62  ;;  %v1618_v62 = vadd.f32 %v9748_v2, %v486_v54 }
 0x17d   :  { %v8295_v55 = vpop.eup %8294  ;;  %3837 = vperm.xlu0 %8050, %v8289_v15   ;;  %8318 = vpow2.f32 %v6926_v19  ;;  %v509_v19 = vld [vmem:[%s12670_s2 + $0x308] sm:$0xff] }
 0x17e   :  { %v9789_v33 = vpop.f32.mrf.mxu0  ;;  %v8297_v52 = vpop.eup %8296  ;;  %8320 = vrcp.f32 %v2847_v23  ;;  %v3371_v23 = vld [vmem:[%s12672_s3 + $0x68] sm:$0xff] }
 0x17f   :  { %v8299_v12 = vpop.eup %8298  ;;  %3832 = vperm.xlu1 %8051, %v8293_v41  }
 0x180   :  { %v9794_v17 = vpop.f32.mrf.mxu0  ;;  %v8301_v18 = vpop.eup %8300  ;;  %v2846_v14 = vadd.f32 1.0, %v8299_v12 }
 0x181   :  { %v2861_v9 = vadd.f32 1.0, %v8301_v18  ;;  %3827 = vperm.xlu0 %8050, %v8295_v55   ;;  %v8303_v63 = vpop.eup %8302 }
 0x182   :  { %v9797_v50 = vpop.f32.mrf.mxu0  ;;  %v8305_v7 = vpop.eup %8304 }
 0x183   :  { %8322 = vrcp.f32 %v2861_v9  ;;  %3822 = vperm.xlu1 %8051, %v8297_v52   ;;  %v8307_v31 = vpop.eup %8306  ;;  %v2849_v32 = vadd.f32 1.0, %v8305_v7  ;;  %v6932_v52 = vmul.f32 -1.442695, %v1623_v25  ;;  %v6931_v7 = vmul.f32 -1.442695, %v1618_v62 }
 0x184   :  { %v9802_v26 = vpop.f32.mrf.mxu0  ;;  %8324 = vpow2.f32 %v6925_v1  ;;  %v8309_v47 = vpop.eup %8308 }
 0x185   :  { %3817 = vperm.xlu0 %8050, %v8303_v63   ;;  %8326 = vrcp.f32 %v2846_v14  ;;  %v8311_v3 = vpop.eup %8310  ;;  %v3370_v63 = vld [vmem:[%s12672_s3 + $0x60] sm:$0xff] }
 0x186   :  { %v9808_v30 = vpop.f32.mrf.mxu0  ;;  %8328 = vpow2.f32 %v6928_v27  ;;  %v8313_v13 = vpop.eup %8312 }
 0x187   :  { %3812 = vperm.xlu1 %8051, %v8307_v31   ;;  %8330 = vrcp.f32 %v2849_v32  ;;  %v8315_v38 = vpop.eup %8314  ;;  %v2848_v15 = vadd.f32 1.0, %v8313_v13 }
 0x188   :  { %v9810_v35 = vpop.f32.mrf.mxu0  ;;  %v3618_v39 = vpop.permute.xlu1 %3617  ;;  %8332 = vpow2.f32 %v6927_v43  ;;  %v1633_v43 = vadd.f32 %v9751_v10, %v489_v16  ;;  %v488_v10 = vld [vmem:[%s12670_s2 + $0x260] sm:$0xff] }
 0x189   :  { %3807 = vperm.xlu0 %8050, %v8309_v47   ;;  %v8317_v58 = vpop.eup %8316  ;;  %8334 = vpow2.f32 %v6930_v5  ;;  %v4523_v27 = vmul.f32 %v3618_v39, %v3371_v23  ;;  %v512_v23 = vld [vmem:[%s12670_s2 + $0x320] sm:$0xff] }
 0x18a   :  { %v9819_v45 = vpop.f32.mrf.mxu0  ;;  %v8319_v34 = vpop.eup %8318  ;;  %8336 = vrcp.f32 %v2848_v15  ;;  %v490_v15 = vld [vmem:[%s12670_s2 + $0x270] sm:$0xff] }
 0x18b   :  { %3802 = vperm.xlu1 %8051, %v8311_v3   ;;  %v8321_v41 = vpop.eup %8320  ;;  %v2851_v2 = vadd.f32 1.0, %v8319_v34  ;;  %8338 = vpow2.f32 %v6929_v59  ;;  %v3367_v34 = vld [vmem:[%s12672_s3 + $0x48] sm:$0xff] }
 0x18c   :  { %v9825_v48 = vpop.f32.mrf.mxu0  ;;  %v3628_v56 = vpop.permute.xlu0 %3627  ;;  %8340 = vpow2.f32 %v6932_v52 }
 0x18d   :  { %v3613_v51 = vpop.permute.xlu1 %3612  ;;  %v4525_v42 = vmul.f32 %v3628_v56, %v3373_v8  ;;  %3797 = vperm.xlu0 %8050, %v8315_v38   ;;  %8342 = vrcp.f32 %v2851_v2  ;;  %v510_v8 = vld [vmem:[%s12670_s2 + $0x310] sm:$0xff]  ;;  %v1628_v2 = vadd.f32 %v9754_v6, %v488_v10  ;;  %v3365_v6 = vld [vmem:[%s12672_s3 + $0x38] sm:$0xff] }
 0x18e   :  { %v9831_v24 = vpop.f32.mrf.mxu0  ;;  %v4522_v53 = vmul.f32 %v3613_v51, %v3370_v63  ;;  %v3368_v38 = vld [vmem:[%s12672_s3 + $0x50] sm:$0xff]  ;;  %v513_v51 = vld [vmem:[%s12670_s2 + $0x328] sm:$0xff] }
 0x18f   :  { %5279 = vmatpush1.msra.mxu1 %v4525_v42  ;;  %3792 = vperm.xlu1 %8051, %v8317_v58  }
 0x190   :  { %v9837_v55 = vpop.f32.mrf.mxu0  ;;  %v8323_v60 = vpop.eup %8322  ;;  %5280 = vmatprep.subr.mxu1 %v12674_v4 }
 0x191   :  { %v3623_v11 = vpop.permute.xlu0 %3622  ;;  %v3603_v12 = vpop.permute.xlu1 %3602  ;;  %3947 = vperm.xlu0 %8050, %v8323_v60  }
 0x192   :  { %v4524_v18 = vmul.f32 %v3623_v11, %v3372_v21  ;;  %v7890_v1 = vpop.f32.mrf.mxu0  ;;  %v8325_v9 = vpop.eup %8324  ;;  %v4520_v60 = vmul.f32 %v3603_v12, %v3368_v38  ;;  %v1638_v12 = vadd.f32 %v9763_v29, %v490_v15  ;;  %v514_v15 = vld [vmem:[%s12670_s2 + $0x330] sm:$0xff] }
 0x193   :  { %v1733_v14 = vadd.f32 %v7890_v1, %v509_v19  ;;  %3877 = vperm.xlu1 %8051, %v8321_v41   ;;  %v8327_v31 = vpop.eup %8326  ;;  %v2850_v39 = vadd.f32 1.0, %v8325_v9  ;;  %v6934_v19 = vmul.f32 -1.442695, %v1633_v43 }
 0x194   :  { %5281 = vmatpush1.msra.mxu1 %v4524_v18  ;;  %v1727_v57 = vpop.f32.mrf.mxu0  ;;  %v8329_v46 = vpop.eup %8328  ;;  %v3366_v18 = vld [vmem:[%s12672_s3 + $0x40] sm:$0xff] }
 0x195   :  { %v6954_v32 = vmul.f32 -1.442695, %v1733_v14  ;;  %v1728_v47 = vadd.f32 %v1727_v57, %v508_v22  ;;  %5282 = vmatprep.subr.mxu1 %v12674_v4  ;;  %v3608_v36 = vpop.permute.xlu0 %3607  ;;  %v3593_v3 = vpop.permute.xlu1 %3592  ;;  %v2853_v62 = vadd.f32 1.0, %v8329_v46  ;;  %v3363_v46 = vld [vmem:[%s12672_s3 + $0x28] sm:$0xff] }
 0x196   :  { %5283 = vmatpush1.msra.mxu1 %v4523_v27  ;;  %v7893_v13 = vpop.f32.mrf.mxu0  ;;  %v4521_v54 = vmul.f32 %v3608_v36, %v3369_v61  ;;  %v8331_v58 = vpop.eup %8330  ;;  %v515_v27 = vld [vmem:[%s12670_s2 + $0x338] sm:$0xff]  ;;  %v3364_v61 = vld [vmem:[%s12672_s3 + $0x30] sm:$0xff] }
 0x197   :  { %8344 = vpow2.f32 %v6954_v32  ;;  %v6953_v5 = vmul.f32 -1.442695, %v1728_v47  ;;  %5284 = vmatprep.subr.mxu1 %v12674_v4  ;;  %v1743_v25 = vadd.f32 %v7893_v13, %v511_v28  ;;  %3872 = vperm.xlu1 %8051, %v8327_v31   ;;  %v8333_v11 = vpop.eup %8332  ;;  %v4518_v28 = vmul.f32 %v3593_v3, %v3366_v18  ;;  %v499_v3 = vld [vmem:[%s12670_s2 + $0x2b8] sm:$0xff] }
 0x198   :  { %8346 = vpow2.f32 %v6931_v7  ;;  %5285 = vmatpush1.msra.mxu1 %v4522_v53  ;;  %v1737_v56 = vpop.f32.mrf.mxu0  ;;  %v8335_v57 = vpop.eup %8334  ;;  %v2852_v29 = vadd.f32 1.0, %v8333_v11  ;;  %v6933_v47 = vmul.f32 -1.442695, %v1628_v2 }
 0x199   :  { %8348 = vpow2.f32 %v6953_v5  ;;  %v6956_v42 = vmul.f32 -1.442695, %v1743_v25  ;;  %v3598_v21 = vpop.permute.xlu0 %3597  ;;  %5286 = vmatprep.subr.mxu1 %v12674_v4  ;;  %v3583_v41 = vpop.permute.xlu1 %3582  ;;  %v1738_v59 = vadd.f32 %v1737_v56, %v510_v8  ;;  %v2855_v10 = vadd.f32 1.0, %v8335_v57 }
 0x19a   :  { %8350 = vrcp.f32 %v2850_v39  ;;  %5287 = vmatpush1.msra.mxu1 %v4521_v54  ;;  %v7896_v52 = vpop.f32.mrf.mxu0  ;;  %v4519_v9 = vmul.f32 %v3598_v21, %v3367_v34  ;;  %v8337_v32 = vpop.eup %8336  ;;  %v6935_v39 = vmul.f32 -1.442695, %v1638_v12  ;;  %v4516_v54 = vmul.f32 %v3583_v41, %v3364_v61 }
 0x19b   :  { %8352 = vpow2.f32 %v6956_v42  ;;  %v6955_v1 = vmul.f32 -1.442695, %v1738_v59  ;;  %5288 = vmatprep.subr.mxu1 %v12674_v4  ;;  %v1753_v22 = vadd.f32 %v7896_v52, %v513_v51  ;;  %3887 = vperm.xlu1 %8051, %v8331_v58   ;;  %v8339_v8 = vpop.eup %8338  ;;  %v3362_v58 = vld [vmem:[%s12672_s3 + $0x20] sm:$0xff]  ;;  %v1683_v34 = vadd.f32 %v9789_v33, %v499_v3 }
 0x19c   :  { %5289 = vmatpush1.msra.mxu1 %v4520_v60  ;;  %v1747_v16 = vpop.f32.mrf.mxu0  ;;  %v8341_v25 = vpop.eup %8340  ;;  %v2854_v2 = vadd.f32 1.0, %v8339_v8  ;;  %v3358_v8 = vld [vmem:[%s12672_s3] sm:$0xff] }
 0x19d   :  { %8354 = vpow2.f32 %v6955_v1  ;;  %v3588_v63 = vpop.permute.xlu0 %3587  ;;  %5290 = vmatprep.subr.mxu1 %v12674_v4  ;;  %v6958_v14 = vmul.f32 -1.442695, %v1753_v22  ;;  %v1748_v7 = vadd.f32 %v1747_v16, %v512_v23  ;;  %v3573_v36 = vpop.permute.xlu1 %3572  ;;  %v3361_v23 = vld [vmem:[%s12672_s3 + $0x18] sm:$0xff] }
 0x19e   :  { %8356 = vrcp.f32 %v2853_v62  ;;  %5291 = vmatpush1.msra.mxu1 %v4519_v9  ;;  %v7899_v31 = vpop.f32.mrf.mxu0  ;;  %v4517_v43 = vmul.f32 %v3588_v63, %v3365_v6  ;;  %v8343_v51 = vpop.eup %8342  ;;  %v4514_v18 = vmul.f32 %v3573_v36, %v3362_v58  ;;  %v2857_v9 = vadd.f32 1.0, %v8341_v25  ;;  %v3360_v6 = vld [vmem:[%s12672_s3 + $0x10] sm:$0xff]  ;;  %v517_v63 = vld [vmem:[%s12670_s2 + $0x348] sm:$0xff]  ;;  %v3389_v58 = vld [vmem:[%s12672_s3 + $0xf8] sm:$0xff] }
 0x19f   :  { %8358 = vpow2.f32 %v6934_v19  ;;  %5292 = vmatprep.subr.mxu1 %v12674_v4  ;;  %3882 = vperm.xlu1 %8051, %v8337_v32   ;;  %v1763_v53 = vadd.f32 %v7899_v31, %v515_v27  ;;  %v6957_v5 = vmul.f32 -1.442695, %v1748_v7  ;;  %v501_v19 = vld [vmem:[%s12670_s2 + $0x2c8] sm:$0xff]  ;;  %v6944_v7 = vmul.f32 -1.442695, %v1683_v34 }
 0x1a0   :  { %5293 = vmatpush1.msra.mxu1 %v4518_v28  ;;  %v1757_v13 = vpop.f32.mrf.mxu0  ;;  %8360 = vpow2.f32 %v6958_v14  ;;  %v1693_v27 = vadd.f32 %v9797_v50, %v501_v19  ;;  %v500_v28 = vld [vmem:[%s12670_s2 + $0x2c0] sm:$0xff]  ;;  %v3359_v32 = vld [vmem:[%s12672_s3 + $0x8] sm:$0xff] }
 0x1a1   :  { %v3578_v38 = vpop.permute.xlu0 %3577  ;;  %5294 = vmatprep.subr.mxu1 %v12674_v4  ;;  %8362 = vrcp.f32 %v2852_v29  ;;  %v6960_v41 = vmul.f32 -1.442695, %v1763_v53  ;;  %v3563_v52 = vpop.permute.xlu1 %3562  ;;  %v1758_v1 = vadd.f32 %v1757_v13, %v514_v15  ;;  %v1688_v25 = vadd.f32 %v9802_v26, %v500_v28 }
 0x1a2   :  { %5295 = vmatpush1.msra.mxu1 %v4517_v43  ;;  %v7902_v56 = vpop.f32.mrf.mxu0  ;;  %8364 = vpow2.f32 %v6933_v47  ;;  %v4515_v21 = vmul.f32 %v3578_v38, %v3363_v46  ;;  %v4512_v61 = vmul.f32 %v3563_v52, %v3360_v6  ;;  %v516_v46 = vld [vmem:[%s12670_s2 + $0x340] sm:$0xff] }
 0x1a3   :  { %5296 = vmatprep.subr.mxu1 %v12674_v4  ;;  %8366 = vpow2.f32 %v6935_v39  ;;  %3897 = vperm.xlu1 %8051, %v8343_v51   ;;  %v6959_v36 = vmul.f32 -1.442695, %v1758_v1  ;;  %v1773_v39 = vadd.f32 %v7902_v56, %v517_v63  ;;  %v503_v56 = vld [vmem:[%s12670_s2 + $0x2d8] sm:$0xff] }
 0x1a4   :  { %v8345_v42 = vpop.eup %8344  ;;  %5297 = vmatpush1.msra.mxu1 %v4516_v54  ;;  %v9918_v59 = vpop.f32.mrf.mxu0  ;;  %8368 = vpow2.f32 %v6957_v5  ;;  %v6946_v5 = vmul.f32 -1.442695, %v1693_v27 }
 0x1a5   :  { %v8347_v62 = vpop.eup %8346  ;;  %v2879_v60 = vadd.f32 1.0, %v8345_v42  ;;  %v3568_v11 = vpop.permute.xlu0 %3567  ;;  %5298 = vmatprep.subr.mxu1 %v12674_v4  ;;  %8370 = vrcp.f32 %v2855_v10  ;;  %v6962_v34 = vmul.f32 -1.442695, %v1773_v39 }
 0x1a6   :  { %v8349_v33 = vpop.eup %8348  ;;  %5299 = vmatpush1.msra.mxu1 %v4515_v21  ;;  %v9927_v22 = vpop.f32.mrf.mxu0  ;;  %v4513_v57 = vmul.f32 %v3568_v11, %v3361_v23  ;;  %v2856_v13 = vadd.f32 1.0, %v8347_v62  ;;  %v1768_v21 = vadd.f32 %v9918_v59, %v516_v46  ;;  %v519_v23 = vld [vmem:[%s12670_s2 + $0x358] sm:$0xff]  ;;  %v1703_v59 = vadd.f32 %v9808_v30, %v503_v56  ;;  %v518_v30 = vld [vmem:[%s12670_s2 + $0x350] sm:$0xff] }
 0x1a7   :  { %v8351_v12 = vpop.eup %8350  ;;  %8372 = vrcp.f32 %v2879_v60  ;;  %v2878_v16 = vadd.f32 1.0, %v8349_v33  ;;  %5300 = vmatprep.subr.mxu1 %v12674_v4  ;;  %v3553_v3 = vpop.permute.xlu1 %3552  ;;  %v3388_v60 = vld [vmem:[%s12672_s3 + $0xf0] sm:$0xff]  ;;  %v6945_v33 = vmul.f32 -1.442695, %v1688_v25  ;;  %v1783_v27 = vadd.f32 %v9927_v22, %v519_v23  ;;  %v505_v22 = vld [vmem:[%s12670_s2 + $0x2e8] sm:$0xff] }
 0x1a8   :  { %v8353_v14 = vpop.eup %8352  ;;  %5301 = vmatpush1.msra.mxu1 %v4514_v18  ;;  %3892 = vperm.xlu1 %8051, %v8351_v12   ;;  %8374 = vpow2.f32 %v6960_v41  ;;  %v9937_v29 = vpop.f32.mrf.mxu0  ;;  %v4510_v26 = vmul.f32 %v3553_v3, %v3358_v8  ;;  %v3385_v3 = vld [vmem:[%s12672_s3 + $0xd8] sm:$0xff] }
 0x1a9   :  { %8376 = vrcp.f32 %v2878_v16  ;;  %v2881_v31 = vadd.f32 1.0, %v8353_v14  ;;  %v3558_v47 = vpop.permute.xlu0 %3557  ;;  %5302 = vmatprep.subr.mxu1 %v12674_v4  ;;  %v3387_v16 = vld [vmem:[%s12672_s3 + $0xe8] sm:$0xff]  ;;  %v6964_v25 = vmul.f32 -1.442695, %v1783_v27 }
 0x1aa   :  { %v8355_v50 = vpop.eup %8354  ;;  %8378 = vrcp.f32 %v2854_v2  ;;  %5303 = vmatpush1.msra.mxu1 %v4513_v57  ;;  %v9946_v43 = vpop.f32.mrf.mxu0  ;;  %v4511_v10 = vmul.f32 %v3558_v47, %v3359_v32  ;;  %v502_v2 = vld [vmem:[%s12670_s2 + $0x2d0] sm:$0xff]  ;;  %v3386_v47 = vld [vmem:[%s12672_s3 + $0xe0] sm:$0xff] }
 0x1ab   :  { %v8357_v53 = vpop.eup %8356  ;;  %8380 = vrcp.f32 %v2857_v9  ;;  %5304 = vmatprep.subr.mxu1 %v12674_v4  ;;  %v2880_v51 = vadd.f32 1.0, %v8355_v50  ;;  %v1698_v32 = vadd.f32 %v9810_v35, %v502_v2 }
 0x1ac   :  { %v8359_v38 = vpop.eup %8358  ;;  %8382 = vpow2.f32 %v6944_v7  ;;  %5305 = vmatpush1.msra.mxu1 %v4512_v61  ;;  %3907 = vperm.xlu1 %8051, %v8357_v53   ;;  %v9956_v54 = vpop.f32.mrf.mxu0  ;;  %v6961_v7 = vmul.f32 -1.442695, %v1768_v21  ;;  %v1778_v53 = vadd.f32 %v9937_v29, %v518_v30  ;;  %v521_v29 = vld [vmem:[%s12670_s2 + $0x368] sm:$0xff] }
 0x1ad   :  { %8384 = vrcp.f32 %v2881_v31  ;;  %v3708_v15 = vpop.permute.xlu0 %3707  ;;  %5306 = vmatprep.subr.mxu1 %v12674_v4  ;;  %v8361_v42 = vpop.eup %8360  ;;  %v2859_v19 = vadd.f32 1.0, %v8359_v38 }
 0x1ae   :  { %8386 = vpow2.f32 %v6959_v36  ;;  %5307 = vmatpush1.msra.mxu1 %v4511_v10  ;;  %v9966_v41 = vpop.f32.mrf.mxu0  ;;  %v8363_v62 = vpop.eup %8362  ;;  %v4541_v18 = vmul.f32 %v3708_v15, %v3389_v58  ;;  %v2883_v9 = vadd.f32 1.0, %v8361_v42  ;;  %v6948_v36 = vmul.f32 -1.442695, %v1703_v59  ;;  %v3384_v15 = vld [vmem:[%s12672_s3 + $0xd0] sm:$0xff] }
 0x1af   :  { %8388 = vrcp.f32 %v2856_v13  ;;  %5308 = vmatprep.subr.mxu1 %v12674_v4  ;;  %v3703_v52 = vpop.permute.xlu1 %3702  ;;  %v8365_v11 = vpop.eup %8364  ;;  %v1713_v58 = vadd.f32 %v9819_v45, %v505_v22 }
 0x1b0   :  { %8390 = vpow2.f32 %v6946_v5  ;;  %3902 = vperm.xlu1 %8051, %v8363_v62   ;;  %5309 = vmatpush1.msra.mxu1 %v4510_v26  ;;  %v9979_v1 = vpop.f32.mrf.mxu0  ;;  %v9981_v12 = vpop.eup %8366  ;;  %v4540_v14 = vmul.f32 %v3703_v52, %v3388_v60  ;;  %v2858_v31 = vadd.f32 1.0, %v8365_v11  ;;  %v6963_v62 = vmul.f32 -1.442695, %v1778_v53  ;;  %v3383_v52 = vld [vmem:[%s12672_s3 + $0xc8] sm:$0xff] }
 0x1b1   :  { %8392 = vrcp.f32 %v2880_v51  ;;  %v3698_v6 = vpop.permute.xlu0 %3697  ;;  %5310 = vmatprep.subr.mxu1 %v12674_v4  ;;  %v8369_v63 = vpop.eup %8368  ;;  %v6947_v51 = vmul.f32 -1.442695, %v1698_v32  ;;  %v1793_v11 = vadd.f32 %v9946_v43, %v521_v29  ;;  %v2860_v59 = vadd.f32 1.0, %v9981_v12  ;;  %v3382_v43 = vld [vmem:[%s12672_s3 + $0xc0] sm:$0xff] }
 0x1b2   :  { %8394 = vpow2.f32 %v6962_v34  ;;  %5311 = vmatpush2.msra.mxu1 %v4541_v18  ;;  %v9991_v57 = vpop.f32.mrf.mxu0  ;;  %v8371_v28 = vpop.eup %8370  ;;  %v4539_v39 = vmul.f32 %v3698_v6, %v3387_v16  ;;  %v2882_v8 = vadd.f32 1.0, %v8369_v63  ;;  %v504_v34 = vld [vmem:[%s12670_s2 + $0x2e0] sm:$0xff]  ;;  %v6950_v6 = vmul.f32 -1.442695, %v1713_v58 }
 0x1b3   :  { %8396 = vrcp.f32 %v2859_v19  ;;  %5312 = vmatprep.subr.mxu1 %v12674_v4  ;;  %v3693_v50 = vpop.permute.xlu1 %3692  ;;  %v520_v18 = vld [vmem:[%s12670_s2 + $0x360] sm:$0xff]  ;;  %v1708_v30 = vadd.f32 %v9825_v48, %v504_v34 }
 0x1b4   :  { %v8373_v61 = vpop.eup %8372  ;;  %8398 = vpow2.f32 %v6945_v33  ;;  %3917 = vperm.xlu1 %8051, %v8371_v28   ;;  %5313 = vmatpush2.msra.mxu1 %v4540_v14  ;;  %v10002_v35 = vpop.f32.mrf.mxu0  ;;  %v4538_v5 = vmul.f32 %v3693_v50, %v3386_v47  ;;  %v1788_v32 = vadd.f32 %v9956_v54, %v520_v18  ;;  %v3381_v47 = vld [vmem:[%s12672_s3 + $0xb8] sm:$0xff] }
 0x1b5   :  { %v8375_v13 = vpop.eup %8374  ;;  %8400 = vrcp.f32 %v2883_v9  ;;  %v3688_v46 = vpop.permute.xlu0 %3687  ;;  %5314 = vmatprep.subr.mxu1 %v12674_v4  ;;  %4037 = vperm.xlu0 %8050, %v8373_v61  }
 0x1b6   :  { %v8377_v38 = vpop.eup %8376  ;;  %8402 = vpow2.f32 %v6961_v7  ;;  %5315 = vmatpush2.msra.mxu1 %v4539_v39  ;;  %v10011_v10 = vpop.f32.mrf.mxu0  ;;  %v4537_v21 = vmul.f32 %v3688_v46, %v3385_v3  ;;  %v2885_v60 = vadd.f32 1.0, %v8375_v13  ;;  %v507_v7 = vld [vmem:[%s12670_s2 + $0x2f8] sm:$0xff]  ;;  %v6949_v13 = vmul.f32 -1.442695, %v1708_v30  ;;  %v3380_v3 = vld [vmem:[%s12672_s3 + $0xb0] sm:$0xff] }
 0x1b7   :  { %v8379_v56 = vpop.eup %8378  ;;  %8404 = vrcp.f32 %v2858_v31  ;;  %5316 = vmatprep.subr.mxu1 %v12674_v4  ;;  %v3683_v42 = vpop.permute.xlu1 %3682  ;;  %v6966_v31 = vmul.f32 -1.442695, %v1793_v11  ;;  %v523_v39 = vld [vmem:[%s12670_s2 + $0x378] sm:$0xff] }
 0x1b8   :  { %v8381_v26 = vpop.eup %8380  ;;  %8406 = vpow2.f32 %v6948_v36  ;;  %3912 = vperm.xlu1 %8051, %v8379_v56   ;;  %5317 = vmatpush2.msra.mxu1 %v4538_v5  ;;  %v10021_v19 = vpop.f32.mrf.mxu0  ;;  %v4536_v2 = vmul.f32 %v3683_v42, %v3384_v15  ;;  %v1803_v58 = vadd.f32 %v9966_v41, %v523_v39  ;;  %v3379_v15 = vld [vmem:[%s12672_s3 + $0xa8] sm:$0xff] }
 0x1b9   :  { %v8383_v45 = vpop.eup %8382  ;;  %8408 = vrcp.f32 %v2882_v8  ;;  %v3678_v23 = vpop.permute.xlu0 %3677  ;;  %5318 = vmatprep.subr.mxu1 %v12674_v4  ;;  %4032 = vperm.xlu0 %8050, %v8377_v38   ;;  %v1723_v8 = vadd.f32 %v9831_v24, %v507_v7 }
 0x1ba   :  { %v8385_v33 = vpop.eup %8384  ;;  %8410 = vpow2.f32 %v6964_v25  ;;  %5319 = vmatpush2.msra.mxu1 %v4537_v21  ;;  %v10032_v9 = vpop.f32.mrf.mxu0  ;;  %v2869_v14 = vadd.f32 1.0, %v8383_v45  ;;  %v4535_v27 = vmul.f32 %v3678_v23, %v3383_v52  ;;  %v506_v25 = vld [vmem:[%s12670_s2 + $0x2f0] sm:$0xff]  ;;  %v3378_v23 = vld [vmem:[%s12672_s3 + $0xa0] sm:$0xff] }
 0x1bb   :  { %v8387_v16 = vpop.eup %8386  ;;  %8412 = vpow2.f32 %v6947_v51  ;;  %5320 = vmatprep.subr.mxu1 %v12674_v4  ;;  %v3673_v12 = vpop.permute.xlu1 %3672  ;;  %v6965_v51 = vmul.f32 -1.442695, %v1788_v32  ;;  %v6952_v41 = vmul.f32 -1.442695, %v1723_v8  ;;  %v1718_v52 = vadd.f32 %v9837_v55, %v506_v25  ;;  %v3376_v32 = vld [vmem:[%s12672_s3 + $0x90] sm:$0xff]  ;;  %v3375_v8 = vld [vmem:[%s12672_s3 + $0x88] sm:$0xff] }
 0x1bc   :  { %v8389_v63 = vpop.eup %8388  ;;  %8414 = vpow2.f32 %v6963_v62  ;;  %3927 = vperm.xlu1 %8051, %v8381_v26   ;;  %5321 = vmatpush2.msra.mxu1 %v4536_v2  ;;  %v10042_v28 = vpop.f32.mrf.mxu0  ;;  %v2884_v36 = vadd.f32 1.0, %v8387_v16  ;;  %v4534_v22 = vmul.f32 %v3673_v12, %v3382_v43  ;;  %v522_v62 = vld [vmem:[%s12670_s2 + $0x370] sm:$0xff]  ;;  %v3377_v43 = vld [vmem:[%s12672_s3 + $0x98] sm:$0xff] }
 0x1bd   :  { %v8391_v48 = vpop.eup %8390  ;;  %8416 = vrcp.f32 %v2885_v60  ;;  %v3668_v50 = vpop.permute.xlu0 %3667  ;;  %5322 = vmatprep.subr.mxu1 %v12674_v4  ;;  %4047 = vperm.xlu0 %8050, %v8385_v33   ;;  %v1798_v30 = vadd.f32 %v9979_v1, %v522_v62  ;;  %v6951_v1 = vmul.f32 -1.442695, %v1718_v52 }
 0x1be   :  { %v8393_v61 = vpop.eup %8392  ;;  %8418 = vrcp.f32 %v2860_v59  ;;  %5323 = vmatpush2.msra.mxu1 %v4535_v27  ;;  %v10052_v53 = vpop.f32.mrf.mxu0  ;;  %v2871_v5 = vadd.f32 1.0, %v8391_v48  ;;  %v4533_v29 = vmul.f32 %v3668_v50, %v3381_v47  ;;  %v498_v59 = vld [vmem:[%s12670_s2 + $0x2b0] sm:$0xff]  ;;  %v533_v50 = vld [vmem:[%s12670_s2 + $0x3c8] sm:$0xff] }
 0x1bf   :  { %v8395_v54 = vpop.eup %8394  ;;  %8420 = vpow2.f32 %v6950_v6  ;;  %5324 = vmatprep.subr.mxu1 %v12674_v4  ;;  %v3663_v46 = vpop.permute.xlu1 %3662  ;;  %v6968_v6 = vmul.f32 -1.442695, %v1803_v58 }
 0x1c0   :  { %v8397_v38 = vpop.eup %8396  ;;  %8422 = vrcp.f32 %v2869_v14  ;;  %3922 = vperm.xlu1 %8051, %v8389_v63   ;;  %5325 = vmatpush2.msra.mxu1 %v4534_v22  ;;  %v10062_v56 = vpop.f32.mrf.mxu0  ;;  %v2887_v34 = vadd.f32 1.0, %v8395_v54  ;;  %v4532_v21 = vmul.f32 %v3663_v46, %v3380_v3 }
 0x1c1   :  { %v8399_v24 = vpop.eup %8398  ;;  %8424 = vpow2.f32 %v6966_v31  ;;  %v3658_v42 = vpop.permute.xlu0 %3657  ;;  %5326 = vmatprep.subr.mxu1 %v12674_v4  ;;  %4042 = vperm.xlu0 %8050, %v8393_v61   ;;  %v1678_v31 = vadd.f32 %v9794_v17, %v498_v59  ;;  %v8820_v59 = vld [vmem:[%s12671_s4] sm:$0xff] }
 0x1c2   :  { %v8401_v26 = vpop.eup %8400  ;;  %8426 = vrcp.f32 %v2884_v36  ;;  %5327 = vmatpush2.msra.mxu1 %v4533_v29  ;;  %v7926_v45 = vpop.f32.mrf.mxu0  ;;  %v2870_v2 = vadd.f32 1.0, %v8399_v24  ;;  %v4531_v18 = vmul.f32 %v3658_v42, %v3379_v15  ;;  %v497_v36 = vld [vmem:[%s12670_s2 + $0x2a8] sm:$0xff]  ;;  %v3374_v15 = vld [vmem:[%s12672_s3 + $0x80] sm:$0xff] }
 0x1c3   :  { %v8403_v60 = vpop.eup %8402  ;;  %8428 = vpow2.f32 %v6949_v13  ;;  %5328 = vmatprep.subr.mxu1 %v12674_v4  ;;  %v3653_v11 = vpop.permute.xlu1 %3652  ;;  %v6967_v13 = vmul.f32 -1.442695, %v1798_v30  ;;  %v1853_v25 = vadd.f32 %v7926_v45, %v533_v50  ;;  %v6943_v58 = vmul.f32 -1.442695, %v1678_v31 }
 0x1c4   :  { %v8405_v33 = vpop.eup %8404  ;;  %8430 = vrcp.f32 %v2871_v5  ;;  %3937 = vperm.xlu1 %8051, %v8397_v38   ;;  %5329 = vmatpush2.msra.mxu1 %v4532_v21  ;;  %v10080_v16 = vpop.f32.mrf.mxu0  ;;  %v2886_v14 = vadd.f32 1.0, %v8403_v60  ;;  %v4530_v7 = vmul.f32 %v3653_v11, %v3378_v23  ;;  %v10124_v60 = vld [vmem:[%s12671_s4 + $0x30] sm:$0xff]  ;;  %v3405_v11 = vld [vmem:[%s12672_s3 + $0x178] sm:$0xff] }
 0x1c5   :  { %v8407_v55 = vpop.eup %8406  ;;  %8432 = vpow2.f32 %v6965_v51  ;;  %v3648_v12 = vpop.permute.xlu0 %3647  ;;  %5330 = vmatprep.subr.mxu1 %v12674_v4  ;;  %4057 = vperm.xlu0 %8050, %v8401_v26   ;;  %v1673_v51 = vadd.f32 %v9781_v37, %v497_v36  ;;  %v532_v26 = vld [vmem:[%s12670_s2 + $0x3c0] sm:$0xff]  ;;  %v4907_v31 = vunpack.c.h.bf16 %v10124_v60 }
 0x1c6   :  { %v8409_v63 = vpop.eup %8408  ;;  %8434 = vrcp.f32 %v2887_v34  ;;  %5331 = vmatpush2.msra.mxu1 %v4531_v18  ;;  %v10087_v27 = vpop.f32.mrf.mxu0  ;;  %v2873_v17 = vadd.f32 1.0, %v8407_v55  ;;  %v4529_v22 = vmul.f32 %v3648_v12, %v3377_v43  ;;  %v496_v37 = vld [vmem:[%s12670_s2 + $0x2a0] sm:$0xff]  ;;  %v1848_v30 = vadd.f32 %v10080_v16, %v532_v26  ;;  %v535_v16 = vld [vmem:[%s12670_s2 + $0x3d8] sm:$0xff]  ;;  %v534_v26 = vld [vmem:[%s12670_s2 + $0x3d0] sm:$0xff] }
 0x1c7   :  { %v8411_v48 = vpop.eup %8410  ;;  %8436 = vpow2.f32 %v6952_v41  ;;  %5332 = vmatprep.subr.mxu1 %v12674_v4  ;;  %v3643_v47 = vpop.permute.xlu1 %3642 }
 0x1c8   :  { %v8413_v61 = vpop.eup %8412  ;;  %8438 = vrcp.f32 %v2870_v2  ;;  %3932 = vperm.xlu1 %8051, %v8405_v33   ;;  %5333 = vmatpush2.msra.mxu1 %v4530_v7  ;;  %v10100_v39 = vpop.f32.mrf.mxu0  ;;  %v2889_v38 = vadd.f32 1.0, %v8411_v48  ;;  %v4528_v5 = vmul.f32 %v3643_v47, %v3376_v32  ;;  %v4894_v2 = vunpack.c.l.bf16 %v8820_v59  ;;  %v3404_v7 = vld [vmem:[%s12672_s3 + $0x170] sm:$0xff] }
 0x1c9   :  { %v8415_v54 = vpop.eup %8414  ;;  %8440 = vpow2.f32 %v6968_v6  ;;  %v3638_v3 = vpop.permute.xlu0 %3637  ;;  %5334 = vmatprep.subr.mxu1 %v12674_v4  ;;  %4052 = vperm.xlu0 %8050, %v8409_v63   ;;  %v2872_v62 = vadd.f32 1.0, %v8413_v61  ;;  %v6978_v6 = vmul.f32 -1.442695, %v1853_v25  ;;  %v6942_v63 = vmul.f32 -1.442695, %v1673_v51  ;;  %v10155_v61 = vld [vmem:[%s12671_s4 + $0x60] sm:$0xff] }
 0x1ca   :  { %v8417_v46 = vpop.eup %8416  ;;  %8442 = vrcp.f32 %v2886_v14  ;;  %5335 = vmatpush2.msra.mxu1 %v4529_v22  ;;  %v10106_v29 = vpop.f32.mrf.mxu0  ;;  %v4527_v45 = vmul.f32 %v3638_v3, %v3375_v8  ;;  %v2888_v23 = vadd.f32 1.0, %v8415_v54  ;;  %v1668_v14 = vadd.f32 %v9786_v0, %v496_v37  ;;  %v495_v0 = vld [vmem:[%s12670_s2 + $0x298] sm:$0xff]  ;;  %v3403_v54 = vld [vmem:[%s12672_s3 + $0x168] sm:$0xff] }
 0x1cb   :  { %v8419_v24 = vpop.eup %8418  ;;  %8444 = vpow2.f32 %v6951_v1  ;;  %5336 = vmatprep.subr.mxu1 %v12674_v4  ;;  %v3633_v42 = vpop.permute.xlu1 %3632  ;;  %v4906_v8 = vunpack.c.l.bf16 %v10124_v60  ;;  %v4918_v59 = vunpack.c.l.bf16 %v10155_v61 }
 0x1cc   :  { %v10116_v34 = vpop.f32.mrf.mxu1  ;;  %v8421_v21 = vpop.eup %8420  ;;  %8446 = vrcp.f32 %v2873_v17  ;;  %3942 = vperm.xlu1 %8051, %v8419_v24   ;;  %5337 = vmatpush2.msra.mxu1 %v4528_v5  ;;  %v4526_v55 = vmul.f32 %v3633_v42, %v3374_v15  ;;  %v1863_v5 = vadd.f32 %v10087_v27, %v535_v16  ;;  %v1663_v24 = vadd.f32 %v9773_v44, %v495_v0  ;;  %v494_v44 = vld [vmem:[%s12670_s2 + $0x290] sm:$0xff] }
 0x1cd   :  { %v10126_v41 = vpop.f32.mrf.mxu0  ;;  %v8423_v52 = vpop.eup %8422  ;;  %8448 = vpow2.f32 %v6967_v13  ;;  %5338 = vmatprep.subr.mxu1 %v12674_v4  ;;  %4067 = vperm.xlu0 %8050, %v8417_v46   ;;  %v2875_v47 = vadd.f32 1.0, %v8421_v21  ;;  %v6941_v51 = vmul.f32 -1.442695, %v1668_v14  ;;  %v4919_v42 = vunpack.c.h.bf16 %v10155_v61 }
 0x1ce   :  { %v3788_v33 = vpop.permute.xlu0 %3787  ;;  %v8425_v18 = vpop.eup %8424  ;;  %8450 = vrcp.f32 %v2889_v38  ;;  %5339 = vmatpush2.msra.mxu1 %v4527_v45  ;;  %v6977_v38 = vmul.f32 -1.442695, %v1848_v30  ;;  %v10182_v45 = vld [vmem:[%s12671_s4 + $0x90] sm:$0xff]  ;;  %v1658_v14 = vadd.f32 %v9778_v49, %v494_v44  ;;  %v493_v49 = vld [vmem:[%s12670_s2 + $0x288] sm:$0xff] }
 0x1cf   :  { %v10136_v43 = vpop.f32.mrf.mxu0  ;;  %v8427_v12 = vpop.eup %8426  ;;  %8452 = vpow2.f32 %v6943_v58  ;;  %5340 = vmatprep.subr.mxu1 %v12674_v4  ;;  %v4557_v50 = vmul.f32 %v3788_v33, %v3405_v11  ;;  %v2891_v22 = vadd.f32 1.0, %v8425_v18  ;;  %v3402_v58 = vld [vmem:[%s12672_s3 + $0x160] sm:$0xff]  ;;  %v3401_v11 = vld [vmem:[%s12672_s3 + $0x158] sm:$0xff] }
 0x1d0   :  { %v3783_v48 = vpop.permute.xlu1 %3782  ;;  %v10147_v1 = vpop.f32.mrf.mxu1  ;;  %8454 = vrcp.f32 %v2872_v62  ;;  %3987 = vperm.xlu1 %8051, %v8423_v52   ;;  %5341 = vmatpush2.msra.mxu1 %v4526_v55  ;;  %v6980_v55 = vmul.f32 -1.442695, %v1863_v5 }
 0x1d1   :  { %v8429_v32 = vpop.eup %8428  ;;  %v10157_v36 = vpop.f32.mrf.mxu0  ;;  %8456 = vrcp.f32 %v2888_v23  ;;  %5343 = vmatmul.mubr.f32.vlgmr.msra.gmra.mxu1 %v4894_v2  ;;  %5503 = vmatprep.subr.mxu1 %v12674_v4  ;;  %v4556_v46 = vmul.f32 %v3783_v48, %v3404_v7  ;;  %v3400_v7 = vld [vmem:[%s12672_s3 + $0x150] sm:$0xff] }
 0x1d2   :  { %v8431_v17 = vpop.eup %8430  ;;  %v3778_v13 = vpop.permute.xlu0 %3777  ;;  %4062 = vperm.xlu0 %8050, %v8427_v12   ;;  %5504 = vmatpush1.msra.mxu1 %v4557_v50  ;;  %8458 = vpow2.f32 %v6978_v6  ;;  %v2874_v37 = vadd.f32 1.0, %v8429_v32  ;;  %v1858_v6 = vadd.f32 %v10100_v39, %v534_v26  ;;  %v537_v39 = vld [vmem:[%s12670_s2 + $0x3e8] sm:$0xff]  ;;  %v10211_v50 = vld [vmem:[%s12671_s4 + $0xc0] sm:$0xff] }
 0x1d3   :  { %v8433_v3 = vpop.eup %8432  ;;  %8460 = vpow2.f32 %v6942_v63  ;;  %5505 = vmatprep.subr.mxu1 %v12674_v4  ;;  %5347 = vmatprep.mubr.f32.mxu1 %v4907_v31  ;;  %v10174_v27 = vpop.f32.mrf.mxu1  ;;  %v4555_v62 = vmul.f32 %v3778_v13, %v3403_v54  ;;  %v6940_v63 = vmul.f32 -1.442695, %v1663_v24  ;;  %v4931_v31 = vunpack.c.h.bf16 %v10182_v45  ;;  %v3399_v54 = vld [vmem:[%s12672_s3 + $0x148] sm:$0xff] }
 0x1d4   :  { %v8435_v25 = vpop.eup %8434  ;;  %v3773_v15 = vpop.permute.xlu1 %3772  ;;  %8462 = vrcp.f32 %v2875_v47  ;;  %3997 = vperm.xlu1 %8051, %v8431_v17   ;;  %5506 = vmatpush1.msra.mxu1 %v4556_v46  ;;  %v2890_v23 = vadd.f32 1.0, %v8433_v3  ;;  %v1873_v5 = vadd.f32 %v10106_v29, %v537_v39  ;;  %v4943_v29 = vunpack.c.h.bf16 %v10211_v50 }
 0x1d5   :  { %v8437_v21 = vpop.eup %8436  ;;  %v10184_v60 = vpop.f32.mrf.mxu0  ;;  %8464 = vrcp.f32 %v2891_v22  ;;  %5348 = vmatmul.mubr.f32.gmra.mxu1 %v4906_v8  ;;  %5507 = vmatprep.subr.mxu1 %v12674_v4  ;;  %v4554_v18 = vmul.f32 %v3773_v15, %v3402_v58  ;;  %v4930_v8 = vunpack.c.l.bf16 %v10182_v45  ;;  %v1653_v58 = vadd.f32 %v9765_v40, %v493_v49  ;;  %v10240_v45 = vld [vmem:[%s12671_s4 + $0xf0] sm:$0xff] }
 0x1d6   :  { %v8439_v52 = vpop.eup %8438  ;;  %v3768_v33 = vpop.permute.xlu0 %3767  ;;  %4077 = vperm.xlu0 %8050, %v8435_v25   ;;  %5508 = vmatpush1.msra.mxu1 %v4555_v62  ;;  %8466 = vpow2.f32 %v6977_v38  ;;  %v2877_v0 = vadd.f32 1.0, %v8437_v21  ;;  %v6979_v38 = vmul.f32 -1.442695, %v1858_v6  ;;  %v536_v25 = vld [vmem:[%s12670_s2 + $0x3e0] sm:$0xff]  ;;  %v6939_v15 = vmul.f32 -1.442695, %v1658_v14 }
 0x1d7   :  { %v8441_v2 = vpop.eup %8440  ;;  %v10192_v30 = vpop.f32.mrf.mxu0  ;;  %8468 = vpow2.f32 %v6941_v51  ;;  %5509 = vmatprep.subr.mxu1 %v12674_v4  ;;  %5352 = vmatprep.mubr.f32.mxu1 %v4919_v42  ;;  %v4553_v47 = vmul.f32 %v3768_v33, %v3401_v11  ;;  %v3398_v42 = vld [vmem:[%s12672_s3 + $0x140] sm:$0xff]  ;;  %v3397_v33 = vld [vmem:[%s12672_s3 + $0x138] sm:$0xff] }
 0x1d8   :  { %v8443_v12 = vpop.eup %8442  ;;  %v3763_v48 = vpop.permute.xlu1 %3762  ;;  %8470 = vrcp.f32 %v2874_v37  ;;  %3992 = vperm.xlu1 %8051, %v8439_v52   ;;  %5510 = vmatpush1.msra.mxu1 %v4554_v18  ;;  %v2893_v22 = vadd.f32 1.0, %v8441_v2  ;;  %v492_v37 = vld [vmem:[%s12670_s2 + $0x280] sm:$0xff]  ;;  %v4942_v2 = vunpack.c.l.bf16 %v10211_v50  ;;  %v1868_v18 = vadd.f32 %v10126_v41, %v536_v25  ;;  %v3396_v41 = vld [vmem:[%s12672_s3 + $0x130] sm:$0xff] }
 0x1d9   :  { %v10203_v16 = vpop.f32.mrf.mxu1  ;;  %v8445_v32 = vpop.eup %8444  ;;  %8472 = vrcp.f32 %v2890_v23  ;;  %5353 = vmatmul.mubr.f32.gmra.mxu1 %v4918_v59  ;;  %5511 = vmatprep.subr.mxu1 %v12674_v4  ;;  %v4552_v46 = vmul.f32 %v3763_v48, %v3400_v7  ;;  %v6938_v48 = vmul.f32 -1.442695, %v1653_v58  ;;  %v538_v58 = vld [vmem:[%s12670_s2 + $0x3f0] sm:$0xff] }
 0x1da   :  { %v10213_v61 = vpop.f32.mrf.mxu0  ;;  %v8447_v17 = vpop.eup %8446  ;;  %4072 = vperm.xlu0 %8050, %v8443_v12   ;;  %5512 = vmatpush1.msra.mxu1 %v4553_v47  ;;  %8474 = vpow2.f32 %v6980_v55  ;;  %v2876_v40 = vadd.f32 1.0, %v8445_v32  ;;  %v6982_v12 = vmul.f32 -1.442695, %v1873_v5  ;;  %v4955_v32 = vunpack.c.h.bf16 %v10240_v45 }
 0x1db   :  { %v3758_v13 = vpop.permute.xlu0 %3757  ;;  %v8449_v3 = vpop.eup %8448  ;;  %8476 = vpow2.f32 %v6940_v63  ;;  %5513 = vmatprep.subr.mxu1 %v12674_v4  ;;  %5357 = vmatprep.mubr.f32.mxu1 %v4931_v31  ;;  %v539_v63 = vld [vmem:[%s12670_s2 + $0x3f8] sm:$0xff]  ;;  %v1648_v31 = vadd.f32 %v9770_v20, %v492_v37  ;;  %v10266_v20 = vld [vmem:[%s12671_s4 + $0x120] sm:$0xff] }
 0x1dc   :  { %v10224_v24 = vpop.f32.mrf.mxu0  ;;  %v8451_v51 = vpop.eup %8450  ;;  %8478 = vrcp.f32 %v2877_v0  ;;  %v4551_v62 = vmul.f32 %v3758_v13, %v3399_v54  ;;  %4007 = vperm.xlu1 %8051, %v8447_v17   ;;  %5514 = vmatpush1.msra.mxu1 %v4552_v46  ;;  %v2892_v11 = vadd.f32 1.0, %v8449_v3  ;;  %v524_v54 = vld [vmem:[%s12670_s2 + $0x380] sm:$0xff]  ;;  %v3395_v13 = vld [vmem:[%s12672_s3 + $0x128] sm:$0xff]  ;;  %v4954_v3 = vunpack.c.l.bf16 %v10240_v45 }
 0x1dd   :  { %v3753_v26 = vpop.permute.xlu1 %3752  ;;  %v10232_v21 = vpop.f32.mrf.mxu1  ;;  %8480 = vrcp.f32 %v2893_v22  ;;  %5358 = vmatmul.mubr.f32.gmra.mxu1 %v4930_v8  ;;  %5515 = vmatprep.subr.mxu1 %v12674_v4  ;;  %v6981_v46 = vmul.f32 -1.442695, %v1868_v18  ;;  %v1808_v45 = vadd.f32 %v10002_v35, %v524_v54  ;;  %v4966_v35 = vunpack.c.l.bf16 %v10266_v20  ;;  %v10321_v54 = vld [vmem:[%s12671_s4 + $0x180] sm:$0xff] }
 0x1de   :  { %v8453_v44 = vpop.eup %8452  ;;  %v10242_v52 = vpop.f32.mrf.mxu0  ;;  %v4550_v6 = vmul.f32 %v3753_v26, %v3398_v42  ;;  %4087 = vperm.xlu0 %8050, %v8451_v51   ;;  %5516 = vmatpush1.msra.mxu1 %v4551_v62  ;;  %8482 = vpow2.f32 %v6979_v38  ;;  %v1883_v38 = vadd.f32 %v10136_v43, %v539_v63  ;;  %v6937_v26 = vmul.f32 -1.442695, %v1648_v31  ;;  %v3394_v43 = vld [vmem:[%s12672_s3 + $0x120] sm:$0xff] }
 0x1df   :  { %v8455_v23 = vpop.eup %8454  ;;  %v3748_v59 = vpop.permute.xlu0 %3747  ;;  %8484 = vpow2.f32 %v6939_v15  ;;  %5517 = vmatprep.subr.mxu1 %v12674_v4  ;;  %5362 = vmatprep.mubr.f32.mxu1 %v4943_v29  ;;  %v2868_v47 = vadd.f32 1.0, %v8453_v44  ;;  %v4967_v44 = vunpack.c.h.bf16 %v10266_v20  ;;  %v6969_v20 = vmul.f32 -1.442695, %v1808_v45 }
 0x1e0   :  { %v8457_v55 = vpop.eup %8456  ;;  %v10253_v14 = vpop.f32.mrf.mxu0  ;;  %8486 = vrcp.f32 %v2876_v40  ;;  %v4549_v50 = vmul.f32 %v3748_v59, %v3397_v33  ;;  %4002 = vperm.xlu1 %8051, %v8455_v23   ;;  %5518 = vmatpush1.msra.mxu1 %v4550_v6  ;;  %v1878_v6 = vadd.f32 %v10157_v36, %v538_v58  ;;  %v3392_v36 = vld [vmem:[%s12672_s3 + $0x110] sm:$0xff] }
 0x1e1   :  { %v8459_v7 = vpop.eup %8458  ;;  %v3743_v39 = vpop.permute.xlu1 %3742  ;;  %8488 = vrcp.f32 %v2892_v11  ;;  %5363 = vmatmul.mubr.f32.gmra.mxu1 %v4942_v2  ;;  %5519 = vmatprep.subr.mxu1 %v12674_v4  ;;  %v10295_v11 = vld [vmem:[%s12671_s4 + $0x150] sm:$0xff]  ;;  %v3393_v2 = vld [vmem:[%s12672_s3 + $0x118] sm:$0xff] }
 0x1e2   :  { %v10261_v49 = vpop.f32.mrf.mxu1  ;;  %v8461_v0 = vpop.eup %8460  ;;  %v2903_v25 = vadd.f32 1.0, %v8459_v7  ;;  %v4548_v51 = vmul.f32 %v3743_v39, %v3396_v41  ;;  %4082 = vperm.xlu0 %8050, %v8457_v55   ;;  %5520 = vmatpush1.msra.mxu1 %v4549_v50  ;;  %8490 = vpow2.f32 %v6982_v12  ;;  %v6984_v55 = vmul.f32 -1.442695, %v1883_v38  ;;  %v541_v12 = vld [vmem:[%s12670_s2 + $0x408] sm:$0xff]  ;;  %v531_v7 = vld [vmem:[%s12670_s2 + $0x3b8] sm:$0xff] }
 0x1e3   :  { %v10268_v17 = vpop.f32.mrf.mxu0  ;;  %v8463_v22 = vpop.eup %8462  ;;  %8492 = vpow2.f32 %v6938_v48  ;;  %5521 = vmatprep.subr.mxu1 %v12674_v4  ;;  %5367 = vmatprep.mubr.f32.mxu1 %v4955_v32  ;;  %v2867_v62 = vadd.f32 1.0, %v8461_v0  ;;  %v4979_v0 = vunpack.c.h.bf16 %v10295_v11  ;;  %v3391_v38 = vld [vmem:[%s12672_s3 + $0x108] sm:$0xff] }
 0x1e4   :  { %v3738_v8 = vpop.permute.xlu0 %3737  ;;  %v8465_v5 = vpop.eup %8464  ;;  %8494 = vrcp.f32 %v2868_v47  ;;  %4017 = vperm.xlu1 %8051, %v8463_v22   ;;  %5522 = vmatpush1.msra.mxu1 %v4548_v51  ;;  %v6983_v51 = vmul.f32 -1.442695, %v1878_v6 }
 0x1e5   :  { %v10282_v15 = vpop.f32.mrf.mxu0  ;;  %v8467_v42 = vpop.eup %8466  ;;  %v4547_v23 = vmul.f32 %v3738_v8, %v3395_v13  ;;  %5368 = vmatmul.mubr.f32.gmra.mxu1 %v4954_v3  ;;  %5523 = vmatprep.subr.mxu1 %v12674_v4  ;;  %8496 = vpow2.f32 %v6981_v46  ;;  %v1893_v13 = vadd.f32 %v10184_v60, %v541_v12  ;;  %v1843_v46 = vadd.f32 %v10052_v53, %v531_v7  ;;  %v540_v60 = vld [vmem:[%s12670_s2 + $0x400] sm:$0xff]  ;;  %v530_v53 = vld [vmem:[%s12670_s2 + $0x3b0] sm:$0xff]  ;;  %v3421_v7 = vld [vmem:[%s12672_s3 + $0x1f8] sm:$0xff] }
 0x1e6   :  { %v3733_v29 = vpop.permute.xlu1 %3732  ;;  %v10289_v37 = vpop.f32.mrf.mxu1  ;;  %8498 = vrcp.f32 %v2903_v25  ;;  %v2902_v48 = vadd.f32 1.0, %v8467_v42  ;;  %4097 = vperm.xlu0 %8050, %v8465_v5   ;;  %5372 = vmatprep.mubr.f32.mxu1 %v4967_v44  ;;  %v4978_v25 = vunpack.c.l.bf16 %v10295_v11  ;;  %v3390_v44 = vld [vmem:[%s12672_s3 + $0x100] sm:$0xff] }
 0x1e7   :  { %v8469_v40 = vpop.eup %8468  ;;  %v10297_v33 = vpop.f32.mrf.mxu0  ;;  %v4546_v31 = vmul.f32 %v3733_v29, %v3394_v43  ;;  %5524 = vmatpush1.msra.mxu1 %v4547_v23  ;;  %8500 = vpow2.f32 %v6937_v26  ;;  %v6976_v12 = vmul.f32 -1.442695, %v1843_v46 }
 0x1e8   :  { %v8471_v59 = vpop.eup %8470  ;;  %v3728_v18 = vpop.permute.xlu0 %3727  ;;  %v2866_v39 = vadd.f32 1.0, %v8469_v40  ;;  %5525 = vmatprep.subr.mxu1 %v12674_v4  ;;  %8502 = vrcp.f32 %v2867_v62  ;;  %v4991_v62 = vunpack.c.h.bf16 %v10321_v54 }
 0x1e9   :  { %v8473_v63 = vpop.eup %8472  ;;  %v10316_v47 = vpop.f32.mrf.mxu1  ;;  %v4545_v22 = vmul.f32 %v3728_v18, %v3393_v2  ;;  %4012 = vperm.xlu1 %8051, %v8471_v59   ;;  %5526 = vmatpush1.msra.mxu1 %v4546_v31  ;;  %8504 = vpow2.f32 %v6984_v55  ;;  %v6986_v59 = vmul.f32 -1.442695, %v1893_v13  ;;  %v10348_v2 = vld [vmem:[%s12671_s4 + $0x1b0] sm:$0xff]  ;;  %v1888_v18 = vadd.f32 %v10192_v30, %v540_v60 }
 0x1ea   :  { %v8475_v41 = vpop.eup %8474  ;;  %v3723_v32 = vpop.permute.xlu1 %3722  ;;  %5373 = vmatmul.mubr.f32.gmra.mxu1 %v4966_v35  ;;  %5527 = vmatprep.subr.mxu1 %v12674_v4  ;;  %8506 = vrcp.f32 %v2902_v48  ;;  %v543_v35 = vld [vmem:[%s12670_s2 + $0x418] sm:$0xff]  ;;  %v4990_v30 = vunpack.c.l.bf16 %v10321_v54 }
 0x1eb   :  { %v8477_v50 = vpop.eup %8476  ;;  %v10324_v8 = vpop.f32.mrf.mxu0  ;;  %v2905_v42 = vadd.f32 1.0, %v8475_v41  ;;  %v4544_v26 = vmul.f32 %v3723_v32, %v3392_v36  ;;  %4092 = vperm.xlu0 %8050, %v8473_v63   ;;  %5528 = vmatpush1.msra.mxu1 %v4545_v22  ;;  %8508 = vrcp.f32 %v2866_v39  ;;  %v1838_v63 = vadd.f32 %v10062_v56, %v530_v53  ;;  %v529_v41 = vld [vmem:[%s12670_s2 + $0x3a8] sm:$0xff] }
 0x1ec   :  { %v8479_v3 = vpop.eup %8478  ;;  %v3718_v5 = vpop.permute.xlu0 %3717  ;;  %v2865_v29 = vadd.f32 1.0, %v8477_v50  ;;  %5529 = vmatprep.subr.mxu1 %v12674_v4  ;;  %5377 = vmatprep.mubr.f32.mxu1 %v4979_v0  ;;  %8510 = vpow2.f32 %v6969_v20  ;;  %v3420_v0 = vld [vmem:[%s12672_s3 + $0x1f0] sm:$0xff]  ;;  %v5003_v20 = vunpack.c.h.bf16 %v10348_v2  ;;  %v1903_v22 = vadd.f32 %v10213_v61, %v543_v35 }
 0x1ed   :  { %v8481_v58 = vpop.eup %8480  ;;  %v10343_v45 = vpop.f32.mrf.mxu1  ;;  %v4543_v11 = vmul.f32 %v3718_v5, %v3391_v38  ;;  %4027 = vperm.xlu1 %8051, %v8479_v3   ;;  %5530 = vmatpush1.msra.mxu1 %v4544_v26  ;;  %8512 = vpow2.f32 %v6983_v51  ;;  %v6985_v46 = vmul.f32 -1.442695, %v1888_v18  ;;  %v10376_v38 = vld [vmem:[%s12671_s4 + $0x1e0] sm:$0xff]  ;;  %v542_v5 = vld [vmem:[%s12670_s2 + $0x410] sm:$0xff]  ;;  %v1833_v51 = vadd.f32 %v10032_v9, %v529_v41  ;;  %v3417_v41 = vld [vmem:[%s12672_s3 + $0x1d8] sm:$0xff] }
 0x1ee   :  { %v8483_v43 = vpop.eup %8482  ;;  %v3713_v40 = vpop.permute.xlu1 %3712  ;;  %5378 = vmatmul.mubr.f32.gmra.mxu1 %v4978_v25  ;;  %5531 = vmatprep.subr.mxu1 %v12674_v4  ;;  %8514 = vrcp.f32 %v2905_v42  ;;  %v6975_v60 = vmul.f32 -1.442695, %v1838_v63  ;;  %v5002_v42 = vunpack.c.l.bf16 %v10348_v2  ;;  %v545_v63 = vld [vmem:[%s12670_s2 + $0x428] sm:$0xff] }
 0x1ef   :  { %v8485_v23 = vpop.eup %8484  ;;  %v10354_v55 = vpop.f32.mrf.mxu0  ;;  %v2904_v39 = vadd.f32 1.0, %v8483_v43  ;;  %v4542_v36 = vmul.f32 %v3713_v40, %v3390_v44  ;;  %4107 = vperm.xlu0 %8050, %v8481_v58   ;;  %5532 = vmatpush1.msra.mxu1 %v4543_v11  ;;  %8516 = vrcp.f32 %v2865_v29  ;;  %v3419_v58 = vld [vmem:[%s12672_s3 + $0x1e8] sm:$0xff]  ;;  %v528_v43 = vld [vmem:[%s12670_s2 + $0x3a0] sm:$0xff]  ;;  %v6988_v11 = vmul.f32 -1.442695, %v1903_v22 }
 0x1f0   :  { %v8487_v6 = vpop.eup %8486  ;;  %v3868_v48 = vpop.permute.xlu0 %3867  ;;  %v2864_v32 = vadd.f32 1.0, %v8485_v23  ;;  %5533 = vmatprep.subr.mxu1 %v12674_v4  ;;  %5382 = vmatprep.mubr.f32.mxu1 %v4991_v62  ;;  %8518 = vpow2.f32 %v6986_v59  ;;  %v3418_v40 = vld [vmem:[%s12672_s3 + $0x1e0] sm:$0xff]  ;;  %v5015_v23 = vunpack.c.h.bf16 %v10376_v38  ;;  %v1898_v59 = vadd.f32 %v10224_v24, %v542_v5 }
 0x1f1   :  { %v8489_v31 = vpop.eup %8488  ;;  %v10371_v54 = vpop.f32.mrf.mxu1  ;;  %v4573_v3 = vmul.f32 %v3868_v48, %v3421_v7  ;;  %4022 = vperm.xlu1 %8051, %v8487_v6   ;;  %5534 = vmatpush1.msra.mxu1 %v4542_v36  ;;  %8520 = vpow2.f32 %v6976_v12  ;;  %v10403_v12 = vld [vmem:[%s12671_s4 + $0x210] sm:$0xff]  ;;  %v527_v48 = vld [vmem:[%s12670_s2 + $0x398] sm:$0xff]  ;;  %v5014_v36 = vunpack.c.l.bf16 %v10376_v38 }
 0x1f2   :  { %v8491_v56 = vpop.eup %8490  ;;  %v3863_v50 = vpop.permute.xlu1 %3862  ;;  %5383 = vmatmul.mubr.f32.gmra.mxu1 %v4990_v30  ;;  %5535 = vmatprep.subr.mxu1 %v12674_v4  ;;  %8522 = vrcp.f32 %v2904_v39  ;;  %v6974_v30 = vmul.f32 -1.442695, %v1833_v51  ;;  %v5027_v22 = vunpack.c.h.bf16 %v10403_v12 }
 0x1f3   :  { %v8493_v13 = vpop.eup %8492  ;;  %v10381_v25 = vpop.f32.mrf.mxu0  ;;  %v2907_v29 = vadd.f32 1.0, %v8491_v56  ;;  %v4572_v9 = vmul.f32 %v3863_v50, %v3420_v0  ;;  %4102 = vperm.xlu0 %8050, %v8489_v31   ;;  %5536 = vmatpush2.msra.mxu1 %v4573_v3  ;;  %8524 = vrcp.f32 %v2864_v32  ;;  %v1828_v31 = vadd.f32 %v10042_v28, %v528_v43  ;;  %v3416_v28 = vld [vmem:[%s12672_s3 + $0x1d0] sm:$0xff] }
 0x1f4   :  { %v8495_v61 = vpop.eup %8494  ;;  %v3858_v53 = vpop.permute.xlu0 %3857  ;;  %5537 = vmatprep.subr.mxu1 %v12674_v4  ;;  %5387 = vmatprep.mubr.f32.mxu1 %v5003_v20  ;;  %v2863_v35 = vadd.f32 1.0, %v8493_v13  ;;  %8526 = vpow2.f32 %v6985_v46  ;;  %v6987_v13 = vmul.f32 -1.442695, %v1898_v59  ;;  %v1913_v3 = vadd.f32 %v10242_v52, %v545_v63 }
 0x1f5   :  { %v8497_v26 = vpop.eup %8496  ;;  %v10398_v2 = vpop.f32.mrf.mxu1  ;;  %v4571_v6 = vmul.f32 %v3858_v53, %v3419_v58  ;;  %3982 = vperm.xlu1 %8051, %v8495_v61   ;;  %5538 = vmatpush2.msra.mxu1 %v4572_v9  ;;  %8528 = vpow2.f32 %v6975_v60  ;;  %v1823_v61 = vadd.f32 %v10011_v10, %v527_v48  ;;  %v10431_v60 = vld [vmem:[%s12671_s4 + $0x240] sm:$0xff]  ;;  %v3415_v10 = vld [vmem:[%s12672_s3 + $0x1c8] sm:$0xff]  ;;  %v5026_v43 = vunpack.c.l.bf16 %v10403_v12  ;;  %v526_v9 = vld [vmem:[%s12670_s2 + $0x390] sm:$0xff] }
 0x1f6   :  { %v8499_v44 = vpop.eup %8498  ;;  %v3853_v62 = vpop.permute.xlu1 %3852  ;;  %5388 = vmatmul.mubr.f32.gmra.mxu1 %v5002_v42  ;;  %5539 = vmatprep.subr.mxu1 %v12674_v4  ;;  %8530 = vrcp.f32 %v2907_v29  ;;  %v2906_v32 = vadd.f32 1.0, %v8497_v26  ;;  %v544_v58 = vld [vmem:[%s12670_s2 + $0x420] sm:$0xff]  ;;  %v6973_v42 = vmul.f32 -1.442695, %v1828_v31  ;;  %v5039_v59 = vunpack.c.h.bf16 %v10431_v60  ;;  %v10457_v48 = vld [vmem:[%s12671_s4 + $0x270] sm:$0xff] }
 0x1f7   :  { %v8501_v18 = vpop.eup %8500  ;;  %v10408_v7 = vpop.f32.mrf.mxu0  ;;  %v4570_v0 = vmul.f32 %v3853_v62, %v3418_v40  ;;  %4157 = vperm.xlu0 %8050, %v8499_v44   ;;  %5540 = vmatpush2.msra.mxu1 %v4571_v6  ;;  %8532 = vpow2.f32 %v6988_v11  ;;  %v6972_v63 = vmul.f32 -1.442695, %v1823_v61 }
 0x1f8   :  { %v8503_v24 = vpop.eup %8502  ;;  %v3848_v39 = vpop.permute.xlu0 %3847  ;;  %5541 = vmatprep.subr.mxu1 %v12674_v4  ;;  %5392 = vmatprep.mubr.f32.mxu1 %v5015_v23  ;;  %8534 = vrcp.f32 %v2863_v35  ;;  %v2862_v5 = vadd.f32 1.0, %v8501_v18  ;;  %v3414_v23 = vld [vmem:[%s12672_s3 + $0x1c0] sm:$0xff]  ;;  %v6990_v18 = vmul.f32 -1.442695, %v1913_v3  ;;  %v1908_v35 = vadd.f32 %v10253_v14, %v544_v58 }
 0x1f9   :  { %v8505_v56 = vpop.eup %8504  ;;  %v10425_v46 = vpop.f32.mrf.mxu1  ;;  %v4569_v51 = vmul.f32 %v3848_v39, %v3417_v41  ;;  %3977 = vperm.xlu1 %8051, %v8503_v24   ;;  %5542 = vmatpush2.msra.mxu1 %v4570_v0  ;;  %8536 = vpow2.f32 %v6974_v30  ;;  %v547_v30 = vld [vmem:[%s12670_s2 + $0x438] sm:$0xff]  ;;  %v1818_v39 = vadd.f32 %v10021_v19, %v526_v9  ;;  %v5051_v3 = vunpack.c.h.bf16 %v10457_v48 }
 0x1fa   :  { %v8507_v50 = vpop.eup %8506  ;;  %v3843_v20 = vpop.permute.xlu1 %3842  ;;  %5393 = vmatmul.mubr.f32.gmra.mxu1 %v5014_v36  ;;  %5543 = vmatprep.subr.mxu1 %v12674_v4  ;;  %8538 = vrcp.f32 %v2906_v32  ;;  %v2909_v44 = vadd.f32 1.0, %v8505_v56  ;;  %v3413_v36 = vld [vmem:[%s12672_s3 + $0x1b8] sm:$0xff]  ;;  %v5038_v32 = vunpack.c.l.bf16 %v10431_v60  ;;  %v5050_v9 = vunpack.c.l.bf16 %v10457_v48 }
 0x1fb   :  { %v8509_v38 = vpop.eup %8508  ;;  %v10436_v52 = vpop.f32.mrf.mxu0  ;;  %v4568_v40 = vmul.f32 %v3843_v20, %v3416_v28  ;;  %4152 = vperm.xlu0 %8050, %v8507_v50   ;;  %5544 = vmatpush2.msra.mxu1 %v4569_v51  ;;  %8540 = vpow2.f32 %v6987_v13  ;;  %v525_v50 = vld [vmem:[%s12670_s2 + $0x388] sm:$0xff] }
 0x1fc   :  { %v8511_v53 = vpop.eup %8510  ;;  %v3838_v26 = vpop.permute.xlu0 %3837  ;;  %5545 = vmatprep.subr.mxu1 %v12674_v4  ;;  %5397 = vmatprep.mubr.f32.mxu1 %v5027_v22  ;;  %8542 = vrcp.f32 %v2862_v5  ;;  %v3412_v22 = vld [vmem:[%s12672_s3 + $0x1b0] sm:$0xff]  ;;  %v1923_v5 = vadd.f32 %v10268_v17, %v547_v30  ;;  %v6971_v17 = vmul.f32 -1.442695, %v1818_v39 }
 0x1fd   :  { %v8513_v29 = vpop.eup %8512  ;;  %v10452_v6 = vpop.f32.mrf.mxu1  ;;  %v4567_v24 = vmul.f32 %v3838_v26, %v3415_v10  ;;  %3972 = vperm.xlu1 %8051, %v8509_v38   ;;  %5546 = vmatpush2.msra.mxu1 %v4568_v40  ;;  %v2894_v41 = vadd.f32 1.0, %v8511_v53  ;;  %8544 = vpow2.f32 %v6973_v42  ;;  %v6989_v38 = vmul.f32 -1.442695, %v1908_v35  ;;  %v10484_v53 = vld [vmem:[%s12671_s4 + $0x2a0] sm:$0xff] }
 0x1fe   :  { %v8515_v62 = vpop.eup %8514  ;;  %v3833_v11 = vpop.permute.xlu1 %3832  ;;  %5398 = vmatmul.mubr.f32.gmra.mxu1 %v5026_v43  ;;  %5547 = vmatprep.subr.mxu1 %v12674_v4  ;;  %8546 = vrcp.f32 %v2909_v44  ;;  %v2908_v28 = vadd.f32 1.0, %v8513_v29  ;;  %v1813_v26 = vadd.f32 %v9991_v57, %v525_v50  ;;  %v3411_v43 = vld [vmem:[%s12672_s3 + $0x1a8] sm:$0xff]  ;;  %v546_v44 = vld [vmem:[%s12670_s2 + $0x430] sm:$0xff]  ;;  %v6992_v35 = vmul.f32 -1.442695, %v1923_v5 }
 0x1ff   :  { %v8517_v12 = vpop.eup %8516  ;;  %v10462_v31 = vpop.f32.mrf.mxu0  ;;  %v4566_v20 = vmul.f32 %v3833_v11, %v3414_v23  ;;  %4167 = vperm.xlu0 %8050, %v8515_v62   ;;  %5548 = vmatpush2.msra.mxu1 %v4567_v24  ;;  %8548 = vpow2.f32 %v6990_v18  ;;  %v3410_v11 = vld [vmem:[%s12672_s3 + $0x1a0] sm:$0xff]  ;;  %v5063_v18 = vunpack.c.h.bf16 %v10484_v53  ;;  %v5062_v50 = vunpack.c.l.bf16 %v10484_v53 }
 0x200   :  { %v8519_v14 = vpop.eup %8518  ;;  %v3828_v56 = vpop.permute.xlu0 %3827  ;;  %5549 = vmatprep.subr.mxu1 %v12674_v4  ;;  %5402 = vmatprep.mubr.f32.mxu1 %v5039_v59  ;;  %8550 = vpow2.f32 %v6972_v63 }
 0x201   :  { %v8521_v0 = vpop.eup %8520  ;;  %v10479_v61 = vpop.f32.mrf.mxu1  ;;  %v2911_v60 = vadd.f32 1.0, %v8519_v14  ;;  %v4565_v58 = vmul.f32 %v3828_v56, %v3413_v36  ;;  %3967 = vperm.xlu1 %8051, %v8517_v12   ;;  %5550 = vmatpush2.msra.mxu1 %v4566_v20  ;;  %8552 = vrcp.f32 %v2894_v41  ;;  %v587_v12 = vld [vmem:[%s12670_s2 + $0x578] sm:$0xff]  ;;  %v10508_v14 = vld [vmem:[%s12671_s4 + $0x2d0] sm:$0xff]  ;;  %v1918_v41 = vadd.f32 %v10282_v15, %v546_v44 }
 0x202   :  { %v8523_v19 = vpop.eup %8522  ;;  %v3823_v13 = vpop.permute.xlu1 %3822  ;;  %5403 = vmatmul.mubr.f32.gmra.mxu1 %v5038_v32  ;;  %5551 = vmatprep.subr.mxu1 %v12674_v4  ;;  %v2901_v62 = vadd.f32 1.0, %v8521_v0  ;;  %8554 = vrcp.f32 %v2908_v28  ;;  %v6970_v56 = vmul.f32 -1.442695, %v1813_v26  ;;  %v3409_v32 = vld [vmem:[%s12672_s3 + $0x198] sm:$0xff]  ;;  %v549_v28 = vld [vmem:[%s12670_s2 + $0x448] sm:$0xff] }
 0x203   :  { %v8525_v51 = vpop.eup %8524  ;;  %v10486_v42 = vpop.f32.mrf.mxu0  ;;  %v4564_v57 = vmul.f32 %v3823_v13, %v3412_v22  ;;  %4162 = vperm.xlu0 %8050, %v8523_v19   ;;  %5552 = vmatpush2.msra.mxu1 %v4565_v58  ;;  %8556 = vpow2.f32 %v6989_v38  ;;  %v3408_v38 = vld [vmem:[%s12672_s3 + $0x190] sm:$0xff]  ;;  %v6991_v26 = vmul.f32 -1.442695, %v1918_v41 }
 0x204   :  { %v8527_v10 = vpop.eup %8526  ;;  %v3818_v29 = vpop.permute.xlu0 %3817  ;;  %5553 = vmatprep.subr.mxu1 %v12674_v4  ;;  %5407 = vmatprep.mubr.f32.mxu1 %v5051_v3  ;;  %8558 = vrcp.f32 %v2911_v60  ;;  %v586_v58 = vld [vmem:[%s12670_s2 + $0x570] sm:$0xff] }
 0x205   :  { %v8529_v40 = vpop.eup %8528  ;;  %v8007_v63 = vpop.f32.mrf.mxu1  ;;  %v2910_v48 = vadd.f32 1.0, %v8527_v10  ;;  %v4563_v30 = vmul.f32 %v3818_v29, %v3411_v43  ;;  %3962 = vperm.xlu1 %8051, %v8525_v51   ;;  %5554 = vmatpush2.msra.mxu1 %v4564_v57  ;;  %8560 = vpow2.f32 %v6971_v17  ;;  %v5075_v51 = vunpack.c.h.bf16 %v10508_v14  ;;  %v10532_v17 = vld [vmem:[%s12671_s4 + $0x300] sm:$0xff] }
 0x206   :  { %v8531_v23 = vpop.eup %8530  ;;  %v3813_v59 = vpop.permute.xlu1 %3812  ;;  %5408 = vmatmul.mubr.f32.gmra.mxu1 %v5050_v9  ;;  %5555 = vmatprep.subr.mxu1 %v12674_v4  ;;  %8562 = vrcp.f32 %v2901_v62  ;;  %v2900_v20 = vadd.f32 1.0, %v8529_v40  ;;  %v2123_v22 = vadd.f32 %v8007_v63, %v587_v12  ;;  %v1933_v43 = vadd.f32 %v10297_v33, %v549_v28  ;;  %v3407_v40 = vld [vmem:[%s12672_s3 + $0x188] sm:$0xff] }
 0x207   :  { %v8533_v24 = vpop.eup %8532  ;;  %v10511_v39 = vpop.f32.mrf.mxu0  ;;  %v4562_v19 = vmul.f32 %v3813_v59, %v3410_v11  ;;  %4177 = vperm.xlu0 %8050, %v8531_v23   ;;  %5556 = vmatpush2.msra.mxu1 %v4563_v30  ;;  %8564 = vpow2.f32 %v6992_v35  ;;  %v5074_v57 = vunpack.c.l.bf16 %v10508_v14  ;;  %v548_v23 = vld [vmem:[%s12670_s2 + $0x440] sm:$0xff]  ;;  %v585_v59 = vld [vmem:[%s12670_s2 + $0x568] sm:$0xff]  ;;  %v5087_v30 = vunpack.c.h.bf16 %v10532_v17  ;;  %v10556_v14 = vld [vmem:[%s12671_s4 + $0x330] sm:$0xff] }
 0x208   :  { %v8535_v36 = vpop.eup %8534  ;;  %v3808_v0 = vpop.permute.xlu0 %3807  ;;  %v2913_v3 = vadd.f32 1.0, %v8533_v24  ;;  %5557 = vmatprep.subr.mxu1 %v12674_v4  ;;  %5412 = vmatprep.mubr.f32.mxu1 %v5063_v18  ;;  %8566 = vrcp.f32 %v2910_v48  ;;  %v7032_v18 = vmul.f32 -1.442695, %v2123_v22  ;;  %v3406_v24 = vld [vmem:[%s12672_s3 + $0x180] sm:$0xff] }
 0x209   :  { %v8537_v15 = vpop.eup %8536  ;;  %v2117_v60 = vpop.f32.mrf.mxu1  ;;  %v4561_v10 = vmul.f32 %v3808_v0, %v3409_v32  ;;  %3957 = vperm.xlu1 %8051, %v8535_v36   ;;  %5558 = vmatpush2.msra.mxu1 %v4562_v19  ;;  %8568 = vpow2.f32 %v6970_v56  ;;  %v6994_v56 = vmul.f32 -1.442695, %v1933_v43  ;;  %v1928_v32 = vadd.f32 %v10324_v8, %v548_v23  ;;  %v551_v19 = vld [vmem:[%s12670_s2 + $0x458] sm:$0xff] }
 0x20a   :  { %v8539_v13 = vpop.eup %8538  ;;  %v3803_v5 = vpop.permute.xlu1 %3802  ;;  %v2899_v44 = vadd.f32 1.0, %v8537_v15  ;;  %5413 = vmatmul.mubr.f32.gmra.mxu1 %v5062_v50  ;;  %5559 = vmatprep.subr.mxu1 %v12674_v4  ;;  %8570 = vrcp.f32 %v2900_v20  ;;  %v2118_v35 = vadd.f32 %v2117_v60, %v586_v58  ;;  %v2113_v15 = vadd.f32 %v10452_v6, %v585_v59  ;;  %v10577_v60 = vld [vmem:[%s12671_s4 + $0x360] sm:$0xff]  ;;  %v583_v59 = vld [vmem:[%s12670_s2 + $0x558] sm:$0xff] }
 0x20b   :  { %v8541_v53 = vpop.eup %8540  ;;  %v10535_v29 = vpop.f32.mrf.mxu0  ;;  %v4560_v11 = vmul.f32 %v3803_v5, %v3408_v38  ;;  %4172 = vperm.xlu0 %8050, %v8539_v13   ;;  %5560 = vmatpush2.msra.mxu1 %v4561_v10  ;;  %8572 = vrcp.f32 %v2913_v3  ;;  %v5086_v20 = vunpack.c.l.bf16 %v10532_v17  ;;  %v5099_v3 = vunpack.c.h.bf16 %v10556_v14  ;;  %v584_v5 = vld [vmem:[%s12670_s2 + $0x560] sm:$0xff] }
 0x20c   :  { %v8543_v9 = vpop.eup %8542  ;;  %v3798_v62 = vpop.permute.xlu0 %3797  ;;  %v2912_v63 = vadd.f32 1.0, %v8541_v53  ;;  %5561 = vmatprep.subr.mxu1 %v12674_v4  ;;  %5417 = vmatprep.mubr.f32.mxu1 %v5075_v51  ;;  %8574 = vpow2.f32 %v6991_v26  ;;  %v7031_v8 = vmul.f32 -1.442695, %v2118_v35  ;;  %v6993_v53 = vmul.f32 -1.442695, %v1928_v32  ;;  %v582_v32 = vld [vmem:[%s12670_s2 + $0x550] sm:$0xff] }
 0x20d   :  { %v8545_v33 = vpop.eup %8544  ;;  %v4559_v36 = vmul.f32 %v3798_v62, %v3407_v40  ;;  %3952 = vperm.xlu1 %8051, %v8543_v9   ;;  %5562 = vmatpush2.msra.mxu1 %v4560_v11  ;;  %v10559_v0 = vpop.f32.mrf.mxu0  ;;  %8576 = vrcp.f32 %v2899_v44  ;;  %v1943_v10 = vadd.f32 %v10354_v55, %v551_v19  ;;  %v5098_v9 = vunpack.c.l.bf16 %v10556_v14  ;;  %v550_v44 = vld [vmem:[%s12670_s2 + $0x450] sm:$0xff] }
 0x20e   :  { %v8547_v12 = vpop.eup %8546  ;;  %v3793_v48 = vpop.permute.xlu1 %3792  ;;  %v2898_v28 = vadd.f32 1.0, %v8545_v33  ;;  %5418 = vmatmul.mubr.f32.gmra.mxu1 %v5074_v57  ;;  %5563 = vmatprep.subr.mxu1 %v12674_v4  ;;  %8578 = vpow2.f32 %v7032_v18  ;;  %v7030_v62 = vmul.f32 -1.442695, %v2113_v15  ;;  %v2108_v57 = vadd.f32 %v10479_v61, %v584_v5  ;;  %v10599_v61 = vld [vmem:[%s12671_s4 + $0x390] sm:$0xff] }
 0x20f   :  { %v8549_v41 = vpop.eup %8548  ;;  %v4558_v13 = vmul.f32 %v3793_v48, %v3406_v24  ;;  %4187 = vperm.xlu0 %8050, %v8547_v12   ;;  %5564 = vmatpush2.msra.mxu1 %v4559_v36  ;;  %8580 = vrcp.f32 %v2912_v63  ;;  %v10580_v26 = vpop.f32.mrf.mxu0  ;;  %v5111_v55 = vunpack.c.h.bf16 %v10577_v60  ;;  %v6996_v12 = vmul.f32 -1.442695, %v1943_v10  ;;  %v553_v24 = vld [vmem:[%s12670_s2 + $0x468] sm:$0xff] }
 0x210   :  { %v8551_v50 = vpop.eup %8550  ;;  %v2915_v6 = vadd.f32 1.0, %v8549_v41  ;;  %5565 = vmatprep.subr.mxu1 %v12674_v4  ;;  %5422 = vmatprep.mubr.f32.mxu1 %v5087_v30  ;;  %8582 = vpow2.f32 %v6994_v56  ;;  %v10589_v23 = vpop.f32.mrf.mxu1  ;;  %v1938_v63 = vadd.f32 %v10381_v25, %v550_v44  ;;  %v5110_v41 = vunpack.c.l.bf16 %v10577_v60 }
 0x211   :  { %v8553_v22 = vpop.eup %8552  ;;  %5566 = vmatpush2.msra.mxu1 %v4558_v13  ;;  %v2897_v43 = vadd.f32 1.0, %v8551_v50  ;;  %8584 = vrcp.f32 %v2898_v28  ;;  %12676 = vst [vmem:[#allocation2_spill] sm:$0xff] %v10589_v23  ;;  %v10605_v48 = vpop.f32.mrf.mxu0  ;;  %v2103_v56 = vadd.f32 %v10398_v2, %v583_v59  ;;  %v7029_v25 = vmul.f32 -1.442695, %v2108_v57  ;;  %v10621_v2 = vld [vmem:[%s12671_s4 + $0x3c0] sm:$0xff] }
 0x212   :  { %v8555_v38 = vpop.eup %8554  ;;  %v10572_v51 = vpop.permute.xlu1 %3877  ;;  %4112 = vperm.xlu1 %8051, %v8553_v22   ;;  %5423 = vmatmul.mubr.f32.gmra.mxu1 %v5086_v20  ;;  %8586 = vpow2.f32 %v7031_v8  ;;  %v5123_v50 = vunpack.c.h.bf16 %v10599_v61  ;;  %v1953_v22 = vadd.f32 %v10408_v7, %v553_v24  ;;  %v6995_v8 = vmul.f32 -1.442695, %v1938_v63  ;;  %v580_v63 = vld [vmem:[%s12670_s2 + $0x540] sm:$0xff] }
 0x213   :  { %v8557_v58 = vpop.eup %8556  ;;  %5728 = vmatprep.subr.mxu1 %v12674_v4  ;;  %4182 = vperm.xlu0 %8050, %v8555_v38   ;;  %8588 = vrcp.f32 %v2915_v6  ;;  %v10613_v28 = vpop.f32.mrf.mxu1  ;;  %v2098_v7 = vadd.f32 %v10425_v46, %v582_v32  ;;  %v5122_v60 = vunpack.c.l.bf16 %v10599_v61  ;;  %v7028_v10 = vmul.f32 -1.442695, %v2103_v56  ;;  %v4834_v32 = vld [vmem:[%s12671_s4 + $0x420] sm:$0xff] }
 0x214   :  { %v8559_v17 = vpop.eup %8558  ;;  %5427 = vmatprep.mubr.f32.mxu1 %v5099_v3  ;;  %v2914_v11 = vadd.f32 1.0, %v8557_v58  ;;  %8590 = vpow2.f32 %v6993_v53  ;;  %v552_v3 = vld [vmem:[%s12670_s2 + $0x460] sm:$0xff]  ;;  %v10626_v38 = vpop.f32.mrf.mxu0  ;;  %v581_v53 = vld [vmem:[%s12670_s2 + $0x548] sm:$0xff]  ;;  %v6998_v44 = vmul.f32 -1.442695, %v1953_v22 }
 0x215   :  { %v8561_v40 = vpop.eup %8560  ;;  %8592 = vrcp.f32 %v2897_v43  ;;  %v10634_v43 = vpop.f32.mrf.mxu1  ;;  %v1948_v46 = vadd.f32 %v10436_v52, %v552_v3  ;;  %v2093_v52 = vadd.f32 %v10343_v45, %v581_v53  ;;  %v7027_v61 = vmul.f32 -1.442695, %v2098_v7  ;;  %v579_v3 = vld [vmem:[%s12670_s2 + $0x538] sm:$0xff]  ;;  %v10678_v53 = vld [vmem:[%s12671_s4 + $0x450] sm:$0xff] }
 0x216   :  { %v8563_v33 = vpop.eup %8562  ;;  %v10594_v18 = vpop.permute.xlu1 %3872  ;;  %4197 = vperm.xlu1 %8051, %v8559_v17   ;;  %v2896_v14 = vadd.f32 1.0, %v8561_v40  ;;  %5428 = vmatmul.mubr.f32.gmra.mxu1 %v5098_v9  ;;  %8594 = vpow2.f32 %v7030_v62  ;;  %v5135_v17 = vunpack.c.h.bf16 %v10621_v2  ;;  %12677 = vst [vmem:[#allocation3_spill] sm:$0xff] %v10634_v43  ;;  %v10642_v62 = vld [vmem:[%s12671_s4 + $0x3f0] sm:$0xff] }
 0x217   :  { %v8565_v35 = vpop.eup %8564  ;;  %4147 = vperm.xlu0 %8050, %v8563_v33   ;;  %5432 = vmatprep.mubr.f32.mxu1 %v5111_v55  ;;  %8596 = vrcp.f32 %v2914_v11  ;;  %v554_v33 = vld [vmem:[%s12670_s2 + $0x470] sm:$0xff]  ;;  %v7971_v11 = vpop.f32.mrf.mxu0  ;;  %v6997_v45 = vmul.f32 -1.442695, %v1948_v46 }
 0x218   :  { %v8567_v30 = vpop.eup %8566  ;;  %v2917_v20 = vadd.f32 1.0, %v8565_v35  ;;  %8598 = vpow2.f32 %v6996_v12  ;;  %v5134_v35 = vunpack.c.l.bf16 %v10621_v2  ;;  %v7026_v2 = vmul.f32 -1.442695, %v2093_v52 }
 0x219   :  { %v8569_v36 = vpop.eup %8568  ;;  %8600 = vrcp.f32 %v2896_v14  ;;  %v10653_v14 = vpop.f32.mrf.mxu1 }
 0x21a   :  { %v8571_v15 = vpop.eup %8570  ;;  %v10615_v19 = vpop.permute.xlu1 %3887  ;;  %4192 = vperm.xlu1 %8051, %v8567_v30   ;;  %v2895_v5 = vadd.f32 1.0, %v8569_v36  ;;  %5433 = vmatmul.mubr.f32.gmra.mxu1 %v5110_v41  ;;  %8602 = vpow2.f32 %v7029_v25  ;;  %v5147_v30 = vunpack.c.h.bf16 %v10642_v62  ;;  %12678 = vst [vmem:[#allocation4_spill] sm:$0xff] %v10653_v14  ;;  %v1958_v36 = vadd.f32 %v10486_v42, %v554_v33 }
 0x21b   :  { %v8573_v13 = vpop.eup %8572  ;;  %4142 = vperm.xlu0 %8050, %v8571_v15   ;;  %5437 = vmatprep.mubr.f32.mxu1 %v5123_v50  ;;  %8604 = vrcp.f32 %v2917_v20  ;;  %v563_v15 = vld [vmem:[%s12670_s2 + $0x4b8] sm:$0xff]  ;;  %v10664_v20 = vpop.f32.mrf.mxu0  ;;  %v2088_v42 = vadd.f32 %v10371_v54, %v580_v63  ;;  %v5158_v33 = vunpack.c.l.bf16 %v4834_v32 }
 0x21c   :  { %v8575_v6 = vpop.eup %8574  ;;  %8606 = vpow2.f32 %v6995_v8  ;;  %v10671_v7 = vpop.f32.mrf.mxu1 }
 0x21d   :  { %v8577_v58 = vpop.eup %8576  ;;  %v2916_v55 = vadd.f32 1.0, %v8575_v6  ;;  %8608 = vrcp.f32 %v2895_v5  ;;  %v5159_v5 = vunpack.c.h.bf16 %v4834_v32  ;;  %v7974_v46 = vpop.f32.mrf.mxu0 }
 0x21e   :  { %v8579_v9 = vpop.eup %8578  ;;  %v10637_v40 = vpop.permute.xlu1 %3882  ;;  %4207 = vperm.xlu1 %8051, %v8573_v13   ;;  %5438 = vmatmul.mubr.f32.gmra.mxu1 %v5122_v60  ;;  %8610 = vpow2.f32 %v7028_v10  ;;  %v5146_v13 = vunpack.c.l.bf16 %v10642_v62  ;;  %v2003_v10 = vadd.f32 %v7971_v11, %v563_v15  ;;  %v578_v11 = vld [vmem:[%s12670_s2 + $0x530] sm:$0xff] }
 0x21f   :  { %v8581_v57 = vpop.eup %8580  ;;  %v2957_v24 = vadd.f32 1.0, %v8579_v9  ;;  %4137 = vperm.xlu0 %8050, %v8577_v58   ;;  %5442 = vmatprep.mubr.f32.mxu1 %v5135_v17  ;;  %8612 = vpow2.f32 %v6998_v44  ;;  %v6999_v58 = vmul.f32 -1.442695, %v1958_v36  ;;  %v565_v44 = vld [vmem:[%s12670_s2 + $0x4c8] sm:$0xff]  ;;  %v2007_v15 = vpop.f32.mrf.mxu0 }
 0x220   :  { %v8583_v59 = vpop.eup %8582  ;;  %8614 = vrcp.f32 %v2916_v55  ;;  %v7025_v55 = vmul.f32 -1.442695, %v2088_v42  ;;  %v7008_v63 = vmul.f32 -1.442695, %v2003_v10  ;;  %v577_v42 = vld [vmem:[%s12670_s2 + $0x528] sm:$0xff] }
 0x221   :  { %v8585_v12 = vpop.eup %8584  ;;  %v2919_v50 = vadd.f32 1.0, %v8583_v59  ;;  %8616 = vpow2.f32 %v7027_v61  ;;  %v5171_v61 = vunpack.c.h.bf16 %v10678_v53 }
 0x222   :  { %v8587_v41 = vpop.eup %8586  ;;  %v10656_v56 = vpop.permute.xlu1 %3897  ;;  %4202 = vperm.xlu1 %8051, %v8581_v57   ;;  %5443 = vmatmul.mubr.f32.gmra.mxu1 %v5134_v35  ;;  %8618 = vrcp.f32 %v2957_v24  ;;  %v2083_v57 = vadd.f32 %v10289_v37, %v579_v3  ;;  %v10695_v24 = vld [vmem:[%s12671_s4 + $0x480] sm:$0xff] }
 0x223   :  { %v8589_v25 = vpop.eup %8588  ;;  %v2956_v6 = vadd.f32 1.0, %v8587_v41  ;;  %4132 = vperm.xlu0 %8050, %v8585_v12   ;;  %5447 = vmatprep.mubr.f32.mxu1 %v5147_v30  ;;  %8620 = vpow2.f32 %v6997_v45  ;;  %v10688_v35 = vpop.f32.mrf.mxu1  ;;  %v2013_v30 = vadd.f32 %v7974_v46, %v565_v44  ;;  %v2073_v44 = vadd.f32 %v10232_v21, %v577_v42 }
 0x224   :  { %v8591_v22 = vpop.eup %8590  ;;  %8622 = vrcp.f32 %v2919_v50  ;;  %v7024_v32 = vmul.f32 -1.442695, %v2083_v57  ;;  %v5170_v50 = vunpack.c.l.bf16 %v10678_v53  ;;  %v10715_v53 = vpop.permute.xlu0 %3947  ;;  %v567_v57 = vld [vmem:[%s12670_s2 + $0x4d8] sm:$0xff] }
 0x225   :  { %v8593_v8 = vpop.eup %8592  ;;  %v2918_v9 = vadd.f32 1.0, %v8591_v22  ;;  %8624 = vpow2.f32 %v7026_v2  ;;  %v564_v22 = vld [vmem:[%s12670_s2 + $0x4c0] sm:$0xff] }
 0x226   :  { %v8595_v60 = vpop.eup %8594  ;;  %v10673_v54 = vpop.permute.xlu1 %3892  ;;  %4217 = vperm.xlu1 %8051, %v8589_v25   ;;  %5448 = vmatmul.mubr.f32.gmra.mxu1 %v5146_v13  ;;  %8626 = vrcp.f32 %v2956_v6  ;;  %v2078_v25 = vadd.f32 %v10316_v47, %v578_v11  ;;  %v5183_v47 = vunpack.c.h.bf16 %v10695_v24 }
 0x227   :  { %v8597_v17 = vpop.eup %8596  ;;  %v2955_v52 = vadd.f32 1.0, %v8595_v60  ;;  %4127 = vperm.xlu0 %8050, %v8593_v8   ;;  %5452 = vmatprep.mubr.f32.mxu1 %v5159_v5  ;;  %8628 = vpow2.f32 %v6999_v58  ;;  %v10706_v8 = vpop.f32.mrf.mxu1  ;;  %v7010_v5 = vmul.f32 -1.442695, %v2013_v30  ;;  %v10713_v60 = vld [vmem:[%s12671_s4 + $0x4b0] sm:$0xff] }
 0x228   :  { %v8599_v62 = vpop.eup %8598  ;;  %8630 = vrcp.f32 %v2918_v9  ;;  %v7023_v46 = vmul.f32 -1.442695, %v2078_v25  ;;  %v5195_v21 = vunpack.c.h.bf16 %v10713_v60  ;;  %v7022_v25 = vmul.f32 -1.442695, %v2073_v44 }
 0x229   :  { %v8601_v59 = vpop.eup %8600  ;;  %v2921_v45 = vadd.f32 1.0, %v8599_v62  ;;  %8632 = vpow2.f32 %v7025_v55  ;;  %v5182_v62 = vunpack.c.l.bf16 %v10695_v24  ;;  %v7977_v55 = vpop.f32.mrf.mxu0  ;;  %v10733_v24 = vld [vmem:[%s12671_s4 + $0x4e0] sm:$0xff] }
 0x22a   :  { %v8603_v12 = vpop.eup %8602  ;;  %v10690_v37 = vpop.permute.xlu1 %3907  ;;  %4212 = vperm.xlu1 %8051, %v8597_v17   ;;  %5453 = vmatmul.mubr.f32.gmra.mxu1 %v5158_v33  ;;  %8634 = vrcp.f32 %v2955_v52  ;;  %v2008_v17 = vadd.f32 %v2007_v15, %v564_v22  ;;  %v5194_v15 = vunpack.c.l.bf16 %v10713_v60 }
 0x22b   :  { %v8605_v41 = vpop.eup %8604  ;;  %v2954_v13 = vadd.f32 1.0, %v8603_v12  ;;  %4122 = vperm.xlu0 %8050, %v8601_v59   ;;  %5457 = vmatprep.mubr.f32.mxu1 %v5171_v61  ;;  %8636 = vpow2.f32 %v7008_v63  ;;  %v576_v59 = vld [vmem:[%s12670_s2 + $0x520] sm:$0xff]  ;;  %v10726_v52 = vpop.f32.mrf.mxu1 }
 0x22c   :  { %v8607_v36 = vpop.eup %8606  ;;  %8638 = vrcp.f32 %v2921_v45  ;;  %v7009_v45 = vmul.f32 -1.442695, %v2008_v17  ;;  %v2017_v22 = vpop.f32.mrf.mxu0 }
 0x22d   :  { %v8609_v2 = vpop.eup %8608  ;;  %v2920_v10 = vadd.f32 1.0, %v8607_v36  ;;  %8640 = vpow2.f32 %v7024_v32  ;;  %v2023_v36 = vadd.f32 %v7977_v55, %v567_v57 }
 0x22e   :  { %v8611_v3 = vpop.eup %8610  ;;  %v10708_v6 = vpop.permute.xlu1 %3902  ;;  %4227 = vperm.xlu1 %8051, %v8605_v41   ;;  %5458 = vmatmul.mubr.f32.gmra.mxu1 %v5170_v50  ;;  %8642 = vrcp.f32 %v2954_v13  ;;  %v2068_v50 = vadd.f32 %v10261_v49, %v576_v59  ;;  %v575_v13 = vld [vmem:[%s12670_s2 + $0x518] sm:$0xff]  ;;  %v5207_v49 = vunpack.c.h.bf16 %v10733_v24  ;;  %v569_v59 = vld [vmem:[%s12670_s2 + $0x4e8] sm:$0xff] }
 0x22f   :  { %v8613_v58 = vpop.eup %8612  ;;  %v2953_v11 = vadd.f32 1.0, %v8611_v3  ;;  %4117 = vperm.xlu0 %8050, %v8609_v2   ;;  %5462 = vmatprep.mubr.f32.mxu1 %v5183_v47  ;;  %8644 = vpow2.f32 %v7010_v5  ;;  %v566_v2 = vld [vmem:[%s12670_s2 + $0x4d0] sm:$0xff]  ;;  %v10746_v3 = vpop.f32.mrf.mxu1  ;;  %v7012_v44 = vmul.f32 -1.442695, %v2023_v36  ;;  %v2063_v57 = vadd.f32 %v10174_v27, %v575_v13 }
 0x230   :  { %v8615_v9 = vpop.eup %8614  ;;  %v2923_v12 = vadd.f32 1.0, %v8613_v58  ;;  %8646 = vrcp.f32 %v2920_v10  ;;  %v10735_v41 = vpop.permute.xlu0 %4037  ;;  %v10753_v10 = vld [vmem:[%s12671_s4 + $0x510] sm:$0xff]  ;;  %v7021_v55 = vmul.f32 -1.442695, %v2068_v50 }
 0x231   :  { %v8617_v33 = vpop.eup %8616  ;;  %12679 = vst [vmem:[#allocation5_spill] sm:$0xff] %v10735_v41  ;;  %8648 = vpow2.f32 %v7023_v46  ;;  %v2018_v46 = vadd.f32 %v2017_v22, %v566_v2  ;;  %v5219_v27 = vunpack.c.h.bf16 %v10753_v10 }
 0x232   :  { %v8619_v61 = vpop.eup %8618  ;;  %v10728_v63 = vpop.permute.xlu1 %3917  ;;  %4222 = vperm.xlu1 %8051, %v8615_v9   ;;  %5463 = vmatmul.mubr.f32.gmra.mxu1 %v5182_v62  ;;  %8650 = vrcp.f32 %v2953_v11  ;;  %v2952_v47 = vadd.f32 1.0, %v8617_v33  ;;  %v5206_v33 = vunpack.c.l.bf16 %v10733_v24 }
 0x233   :  { %v8621_v30 = vpop.eup %8620  ;;  %4427 = vperm.xlu0 %8050, %v8619_v61   ;;  %5467 = vmatprep.mubr.f32.mxu1 %v5195_v21  ;;  %8652 = vrcp.f32 %v2923_v12  ;;  %v7980_v11 = vpop.f32.mrf.mxu0  ;;  %v574_v61 = vld [vmem:[%s12670_s2 + $0x510] sm:$0xff] }
 0x234   :  { %v8623_v32 = vpop.eup %8622  ;;  %v2922_v60 = vadd.f32 1.0, %v8621_v30  ;;  %8654 = vpow2.f32 %v7009_v45  ;;  %v10755_v9 = vpop.permute.xlu0 %4032  ;;  %v2033_v22 = vadd.f32 %v7980_v11, %v569_v59  ;;  %v2058_v13 = vadd.f32 %v10203_v16, %v574_v61  ;;  %v573_v16 = vld [vmem:[%s12670_s2 + $0x508] sm:$0xff] }
 0x235   :  { %v8625_v42 = vpop.eup %8624  ;;  %12680 = vst [vmem:[#allocation6_spill] sm:$0xff] %v10755_v9  ;;  %8656 = vpow2.f32 %v7022_v25  ;;  %v10766_v30 = vpop.f32.mrf.mxu1 }
 0x236   :  { %v8627_v5 = vpop.eup %8626  ;;  %v10748_v58 = vpop.permute.xlu1 %3912  ;;  %4237 = vperm.xlu1 %8051, %v8623_v32   ;;  %5468 = vmatmul.mubr.f32.gmra.mxu1 %v5194_v15  ;;  %v2951_v12 = vadd.f32 1.0, %v8625_v42  ;;  %8658 = vrcp.f32 %v2952_v47  ;;  %v10773_v32 = vld [vmem:[%s12671_s4 + $0x540] sm:$0xff]  ;;  %v7011_v15 = vmul.f32 -1.442695, %v2018_v46  ;;  %v7020_v42 = vmul.f32 -1.442695, %v2063_v57 }
 0x237   :  { %v8629_v17 = vpop.eup %8628  ;;  %4422 = vperm.xlu0 %8050, %v8627_v5   ;;  %5472 = vmatprep.mubr.f32.mxu1 %v5207_v49  ;;  %8660 = vrcp.f32 %v2922_v60  ;;  %v5218_v47 = vunpack.c.l.bf16 %v10753_v10  ;;  %v2027_v49 = vpop.f32.mrf.mxu0  ;;  %v568_v5 = vld [vmem:[%s12670_s2 + $0x4e0] sm:$0xff]  ;;  %v7014_v11 = vmul.f32 -1.442695, %v2033_v22 }
 0x238   :  { %v8631_v62 = vpop.eup %8630  ;;  %v2924_v24 = vadd.f32 1.0, %v8629_v17  ;;  %8662 = vpow2.f32 %v7012_v44  ;;  %v10775_v50 = vpop.permute.xlu0 %4047  ;;  %v5231_v44 = vunpack.c.h.bf16 %v10773_v32 }
 0x239   :  { %v8633_v21 = vpop.eup %8632  ;;  %12681 = vst [vmem:[#allocation7_spill] sm:$0xff] %v10775_v50  ;;  %8664 = vpow2.f32 %v7021_v55  ;;  %v10783_v46 = vpop.f32.mrf.mxu1  ;;  %v4876_v55 = vld [vmem:[%s12671_s4 + $0x570] sm:$0xff] }
 0x23a   :  { %v8635_v45 = vpop.eup %8634  ;;  %v10768_v36 = vpop.permute.xlu1 %3927  ;;  %4232 = vperm.xlu1 %8051, %v8631_v62   ;;  %5473 = vmatmul.mubr.f32.gmra.mxu1 %v5206_v33  ;;  %8666 = vrcp.f32 %v2951_v12  ;;  %v2950_v17 = vadd.f32 1.0, %v8633_v21  ;;  %v2028_v21 = vadd.f32 %v2027_v49, %v568_v5  ;;  %v7019_v12 = vmul.f32 -1.442695, %v2058_v13  ;;  %v4882_v49 = vld [vmem:[%s12671_s4 + $0x5a0] sm:$0xff] }
 0x23b   :  { %v8637_v25 = vpop.eup %8636  ;;  %4417 = vperm.xlu0 %8050, %v8635_v45   ;;  %5477 = vmatprep.mubr.f32.mxu1 %v5219_v27  ;;  %8668 = vrcp.f32 %v2924_v24  ;;  %v5230_v27 = vunpack.c.l.bf16 %v10773_v32  ;;  %v2053_v24 = vadd.f32 %v10116_v34, %v573_v16  ;;  %v5243_v4 = vunpack.c.h.bf16 %v4876_v55  ;;  %v7983_v22 = vpop.f32.mrf.mxu0  ;;  %v555_v34 = vld [vmem:[%s12670_s2 + $0x478] sm:$0xff] }
 0x23c   :  { %v8639_v2 = vpop.eup %8638  ;;  %v2933_v10 = vadd.f32 1.0, %v8637_v25  ;;  %8670 = vpow2.f32 %v7011_v15  ;;  %v10793_v59 = vpop.permute.xlu0 %4042  ;;  %v571_v15 = vld [vmem:[%s12670_s2 + $0x4f8] sm:$0xff]  ;;  %v5242_v16 = vunpack.c.l.bf16 %v4876_v55  ;;  %v1963_v41 = vadd.f32 %v10462_v31, %v555_v34  ;;  %v4888_v55 = vld [vmem:[%s12671_s4 + $0x5d0] sm:$0xff] }
 0x23d   :  { %v8641_v60 = vpop.eup %8640  ;;  %12682 = vst [vmem:[#allocation8_spill] sm:$0xff] %v10793_v59  ;;  %8672 = vpow2.f32 %v7020_v42  ;;  %v4705_v42 = vld [vmem:[%s12671_s4 + $0x18] sm:$0xff]  ;;  %v2043_v9 = vadd.f32 %v7983_v22, %v571_v15  ;;  %v5254_v15 = vunpack.c.l.bf16 %v4882_v49 }
 0x23e   :  { %v8643_v62 = vpop.eup %8642  ;;  %v10788_v57 = vpop.permute.xlu1 %3922  ;;  %4247 = vperm.xlu1 %8051, %v8639_v2   ;;  %5478 = vmatmul.mubr.f32.gmra.mxu1 %v5218_v47  ;;  %v2949_v25 = vadd.f32 1.0, %v8641_v60  ;;  %8674 = vrcp.f32 %v2950_v17  ;;  %v4901_v5 = vunpack.c.h.bf16 %v4705_v42  ;;  %v5255_v42 = vunpack.c.h.bf16 %v4882_v49 }
 0x23f   :  { %v8645_v33 = vpop.eup %8644  ;;  %4412 = vperm.xlu0 %8050, %v8643_v62   ;;  %5482 = vmatprep.mubr.f32.mxu1 %v5231_v44  ;;  %v10800_v2 = vpop.f32.mrf.mxu1  ;;  %8676 = vrcp.f32 %v2933_v10  ;;  %v7013_v44 = vmul.f32 -1.442695, %v2028_v21  ;;  %v7000_v34 = vmul.f32 -1.442695, %v1963_v41  ;;  %v562_v41 = vld [vmem:[%s12670_s2 + $0x4b0] sm:$0xff] }
 0x240   :  { %v8647_v61 = vpop.eup %8646  ;;  %v2935_v13 = vadd.f32 1.0, %v8645_v33  ;;  %8678 = vpow2.f32 %v7014_v11  ;;  %v10813_v17 = vpop.permute.xlu0 %4057  ;;  %6017 = vmatprep.mubr.f32.mxu0 %v4901_v5  ;;  %v7018_v33 = vmul.f32 -1.442695, %v2053_v24 }
 0x241   :  { %v8649_v45 = vpop.eup %8648  ;;  %8680 = vpow2.f32 %v7019_v12  ;;  %v10816_v23 = vpop.f32.mrf.mxu1 }
 0x242   :  { %v8651_v32 = vpop.eup %8650  ;;  %v10808_v47 = vpop.permute.xlu1 %3937  ;;  %4242 = vperm.xlu1 %8051, %v8647_v61   ;;  %5483 = vmatmul.mubr.f32.gmra.mxu1 %v5230_v27  ;;  %8682 = vrcp.f32 %v2949_v25  ;;  %v2948_v61 = vadd.f32 1.0, %v8649_v45  ;;  %v570_v27 = vld [vmem:[%s12670_s2 + $0x4f0] sm:$0xff]  ;;  %v7016_v45 = vmul.f32 -1.442695, %v2043_v9  ;;  %v4703_v9 = vld [vmem:[%s12671_s4 + $0x8] sm:$0xff] }
 0x243   :  { %v8653_v60 = vpop.eup %8652  ;;  %4407 = vperm.xlu0 %8050, %v8651_v32   ;;  %5487 = vmatprep.mubr.f32.mxu1 %v5243_v4  ;;  %8684 = vrcp.f32 %v2935_v13  ;;  %v2037_v12 = vpop.f32.mrf.mxu0  ;;  %v572_v32 = vld [vmem:[%s12670_s2 + $0x500] sm:$0xff]  ;;  %v5267_v13 = vunpack.c.h.bf16 %v4888_v55  ;;  %v4897_v59 = vunpack.c.h.bf16 %v4703_v9 }
 0x244   :  { %v8655_v62 = vpop.eup %8654  ;;  %8686 = vpow2.f32 %v7013_v44  ;;  %v10826_v4 = vpop.permute.xlu0 %4052  ;;  %v2038_v5 = vadd.f32 %v2037_v12, %v570_v27 }
 0x245   :  { %v8657_v10 = vpop.eup %8656  ;;  %v2934_v24 = vadd.f32 1.0, %v8655_v62  ;;  %8688 = vpow2.f32 %v7018_v33  ;;  %v10836_v49 = vpop.f32.mrf.mxu1 }
 0x246   :  { %v8659_v11 = vpop.eup %8658  ;;  %v10818_v21 = vpop.permute.xlu1 %3932  ;;  %4257 = vperm.xlu1 %8051, %v8653_v60   ;;  %5488 = vmatmul.mubr.f32.gmra.mxu1 %v5242_v16  ;;  %v2947_v60 = vadd.f32 1.0, %v8657_v10  ;;  %8690 = vrcp.f32 %v2948_v61  ;;  %v5266_v61 = vunpack.c.l.bf16 %v4888_v55  ;;  %v7015_v27 = vmul.f32 -1.442695, %v2038_v5 }
 0x247   :  { %v8661_v31 = vpop.eup %8660  ;;  %4402 = vperm.xlu0 %8050, %v8659_v11   ;;  %5492 = vmatprep.mubr.f32.mxu1 %v5255_v42  ;;  %8692 = vrcp.f32 %v2934_v24  ;;  %v2048_v11 = vadd.f32 %v10147_v1, %v572_v32  ;;  %v1998_v24 = vadd.f32 %v10664_v20, %v562_v41  ;;  %v603_v1 = vld [vmem:[%s12670_s2 + $0x5f8] sm:$0xff] }
 0x248   :  { %v8663_v25 = vpop.eup %8662  ;;  %v10841_v42 = vpop.permute.xlu0 %4067  ;;  %8694 = vpow2.f32 %v7016_v45  ;;  %v3437_v20 = vld [vmem:[%s12672_s3 + $0x278] sm:$0xff] }
 0x249   :  { %v8665_v22 = vpop.eup %8664  ;;  %v2937_v33 = vadd.f32 1.0, %v8663_v25  ;;  %8696 = vpow2.f32 %v7000_v34  ;;  %v8031_v25 = vpop.f32.mrf.mxu1  ;;  %v7017_v34 = vmul.f32 -1.442695, %v2048_v11 }
 0x24a   :  { %v8667_v62 = vpop.eup %8666  ;;  %v10831_v44 = vpop.permute.xlu1 %3942  ;;  %4252 = vperm.xlu1 %8051, %v8661_v31   ;;  %5493 = vmatmul.mubr.f32.gmra.mxu1 %v5254_v15  ;;  %8698 = vrcp.f32 %v2947_v60  ;;  %v2946_v50 = vadd.f32 1.0, %v8665_v22  ;;  %v4709_v15 = vld [vmem:[%s12671_s4 + $0x38] sm:$0xff]  ;;  %v561_v60 = vld [vmem:[%s12670_s2 + $0x4a8] sm:$0xff] }
 0x24b   :  { %v8669_v16 = vpop.eup %8668  ;;  %4397 = vperm.xlu0 %8050, %v8667_v62   ;;  %5497 = vmatprep.mubr.f32.mxu1 %v5267_v13  ;;  %8700 = vrcp.f32 %v2937_v33  ;;  %v4896_v13 = vunpack.c.l.bf16 %v4703_v9  ;;  %v7007_v33 = vmul.f32 -1.442695, %v1998_v24  ;;  %v4909_v9 = vunpack.c.h.bf16 %v4709_v15 }
 0x24c   :  { %v8671_v10 = vpop.eup %8670  ;;  %8702 = vpow2.f32 %v7015_v27  ;;  %v3435_v27 = vld [vmem:[%s12672_s3 + $0x268] sm:$0xff] }
 0x24d   :  { %v8673_v12 = vpop.eup %8672  ;;  %v2936_v55 = vadd.f32 1.0, %v8671_v10  ;;  %v10856_v22 = vpop.permute.xlu0 %4062  ;;  %8704 = vrcp.f32 %v2946_v50  ;;  %v3436_v10 = vld [vmem:[%s12672_s3 + $0x270] sm:$0xff] }
 0x24e   :  { %v8675_v14 = vpop.eup %8674  ;;  %v10845_v31 = vpop.permute.xlu1 %3987  ;;  %4262 = vperm.xlu1 %8051, %v8669_v16   ;;  %5498 = vmatmul.mubr.f32.gmra.mxu1 %v5266_v61  ;;  %v2945_v62 = vadd.f32 1.0, %v8673_v12  ;;  %v2203_v16 = vadd.f32 %v8031_v25, %v603_v1  ;;  %v4589_v12 = vmul.f32 %v10715_v53, %v3437_v20  ;;  %v4908_v53 = vunpack.c.l.bf16 %v4709_v15  ;;  %v602_v25 = vld [vmem:[%s12670_s2 + $0x5f0] sm:$0xff] }
 0x24f   :  { %v8677_v45 = vpop.eup %8676  ;;  %4392 = vperm.xlu0 %8050, %v8675_v14   ;;  %5567 = vmatprep.mubr.f32.mxu1 %v4897_v59  ;;  %8706 = vrcp.f32 %v2936_v55  ;;  %v10870_v14 = vld [vmem:[%s12671_s4 + $0x68] sm:$0xff]  ;;  %v1993_v59 = vadd.f32 %v10605_v48, %v561_v60  ;;  %v2197_v1 = vpop.f32.mrf.mxu1  ;;  %v12683_v20 = vmov 0.0   ;;  %v4587_v60 = vmul.f32 %v10808_v47, %v3435_v27 }
 0x250   :  { %v8679_v32 = vpop.eup %8678  ;;  %8708 = vpow2.f32 %v7017_v34  ;;  %v7048_v55 = vmul.f32 -1.442695, %v2203_v16  ;;  %v3434_v34 = vld [vmem:[%s12672_s3 + $0x260] sm:$0xff]  ;;  %v2198_v16 = vadd.f32 %v2197_v1, %v602_v25 }
 0x251   :  { %v8681_v5 = vpop.eup %8680  ;;  %v2939_v43 = vadd.f32 1.0, %v8679_v32  ;;  %v10876_v24 = vpop.permute.xlu0 %4077  ;;  %8710 = vrcp.f32 %v2945_v62 }
 0x252   :  { %v8683_v41 = vpop.eup %8682  ;;  %v10864_v11 = vpop.permute.xlu1 %3997  ;;  %4307 = vperm.xlu1 %8051, %v8677_v45   ;;  %5568 = vmatmul.mubr.f32.vlgmr.msra.gmra.mxu1 %v4896_v13  ;;  %v4588_v45 = vmul.f32 %v10831_v44, %v3436_v10  ;;  %v2944_v32 = vadd.f32 1.0, %v8681_v5  ;;  %8712 = vpow2.f32 %v7007_v33  ;;  %v4921_v13 = vunpack.c.h.bf16 %v10870_v14  ;;  %v560_v44 = vld [vmem:[%s12670_s2 + $0x4a0] sm:$0xff] }
 0x253   :  { %v8685_v61 = vpop.eup %8684  ;;  %5729 = vmatpush1.msra.mxu1 %v4589_v12  ;;  %4387 = vperm.xlu0 %8050, %v8683_v41   ;;  %8714 = vrcp.f32 %v2939_v43  ;;  %v10896_v41 = vld [vmem:[%s12671_s4 + $0x98] sm:$0xff]  ;;  %v7006_v10 = vmul.f32 -1.442695, %v1993_v59  ;;  %v4920_v43 = vunpack.c.l.bf16 %v10870_v14  ;;  %v1988_v1 = vadd.f32 %v10626_v38, %v560_v44  ;;  %v10921_v38 = vld [vmem:[%s12671_s4 + $0xc8] sm:$0xff] }
 0x254   :  { %v8687_v50 = vpop.eup %8686  ;;  %5730 = vmatprep.subr.mxu1 %v12683_v20  ;;  %5572 = vmatprep.mubr.f32.mxu1 %v4909_v9  ;;  %v3433_v9 = vld [vmem:[%s12672_s3 + $0x258] sm:$0xff]  ;;  %8716 = vpow2.f32 %v7048_v55  ;;  %v7047_v55 = vmul.f32 -1.442695, %v2198_v16 }
 0x255   :  { %v8689_v48 = vpop.eup %8688  ;;  %v2938_v5 = vadd.f32 1.0, %v8687_v50  ;;  %5731 = vmatpush1.msra.mxu1 %v4588_v45  ;;  %v10902_v12 = vpop.permute.xlu0 %4072  ;;  %v601_v50 = vld [vmem:[%s12670_s2 + $0x5e8] sm:$0xff]  ;;  %8718 = vrcp.f32 %v2944_v32  ;;  %v4585_v45 = vmul.f32 %v10768_v36, %v3433_v9 }
 0x256   :  { %v10886_v15 = vpop.permute.xlu1 %3992  ;;  %v8691_v62 = vpop.eup %8690  ;;  %4317 = vperm.xlu1 %8051, %v8685_v61   ;;  %5732 = vmatprep.subr.mxu1 %v12683_v20  ;;  %v4586_v61 = vmul.f32 %v10818_v21, %v3434_v34  ;;  %v2943_v27 = vadd.f32 1.0, %v8689_v48  ;;  %v4933_v21 = vunpack.c.h.bf16 %v10896_v41  ;;  %v3431_v32 = vld [vmem:[%s12672_s3 + $0x248] sm:$0xff] }
 0x257   :  { %v8693_v33 = vpop.eup %8692  ;;  %5573 = vmatmul.mubr.f32.gmra.mxu1 %v4908_v53  ;;  %4382 = vperm.xlu0 %8050, %v8691_v62   ;;  %v3432_v53 = vld [vmem:[%s12672_s3 + $0x250] sm:$0xff]  ;;  %8720 = vrcp.f32 %v2938_v5  ;;  %v4932_v62 = vunpack.c.l.bf16 %v10896_v41  ;;  %v4945_v41 = vunpack.c.h.bf16 %v10921_v38 }
 0x258   :  { %v8695_v47 = vpop.eup %8694  ;;  %5733 = vmatpush1.msra.mxu1 %v4587_v60  ;;  %5577 = vmatprep.mubr.f32.mxu1 %v4921_v13  ;;  %8722 = vpow2.f32 %v7006_v10  ;;  %v2193_v13 = vadd.f32 %v10816_v23, %v601_v50  ;;  %v559_v60 = vld [vmem:[%s12670_s2 + $0x498] sm:$0xff]  ;;  %v4584_v5 = vmul.f32 %v10788_v57, %v3432_v53  ;;  %v3430_v23 = vld [vmem:[%s12672_s3 + $0x240] sm:$0xff] }
 0x259   :  { %v8697_v59 = vpop.eup %8696  ;;  %5734 = vmatprep.subr.mxu1 %v12683_v20  ;;  %v2941_v34 = vadd.f32 1.0, %v8695_v47  ;;  %v10928_v36 = vpop.permute.xlu0 %4087  ;;  %8724 = vrcp.f32 %v2943_v27  ;;  %v10946_v57 = vld [vmem:[%s12671_s4 + $0xf8] sm:$0xff] }
 0x25a   :  { %v10914_v14 = vpop.permute.xlu1 %4007  ;;  %v8699_v25 = vpop.eup %8698  ;;  %5735 = vmatpush1.msra.mxu1 %v4586_v61  ;;  %4312 = vperm.xlu1 %8051, %v8693_v33   ;;  %v2925_v44 = vadd.f32 1.0, %v8697_v59  ;;  %v7005_v33 = vmul.f32 -1.442695, %v1988_v1  ;;  %8726 = vpow2.f32 %v7047_v55  ;;  %v1983_v61 = vadd.f32 %v10559_v0, %v559_v60  ;;  %v3429_v50 = vld [vmem:[%s12672_s3 + $0x238] sm:$0xff] }
 0x25b   :  { %v8701_v48 = vpop.eup %8700  ;;  %5736 = vmatprep.subr.mxu1 %v12683_v20  ;;  %5578 = vmatmul.mubr.f32.gmra.mxu1 %v4920_v43  ;;  %v4583_v43 = vmul.f32 %v10728_v63, %v3431_v32  ;;  %8728 = vrcp.f32 %v2941_v34  ;;  %v7046_v59 = vmul.f32 -1.442695, %v2193_v13  ;;  %v600_v63 = vld [vmem:[%s12670_s2 + $0x5e0] sm:$0xff]  ;;  %v4944_v1 = vunpack.c.l.bf16 %v10921_v38  ;;  %v10975_v13 = vld [vmem:[%s12671_s4 + $0x128] sm:$0xff] }
 0x25c   :  { %5737 = vmatpush1.msra.mxu1 %v4585_v45  ;;  %4377 = vperm.xlu0 %8050, %v8699_v25   ;;  %v8703_v16 = vpop.eup %8702  ;;  %8730 = vrcp.f32 %v2925_v44  ;;  %v4582_v0 = vmul.f32 %v10748_v58, %v3430_v23  ;;  %v3428_v45 = vld [vmem:[%s12672_s3 + $0x230] sm:$0xff]  ;;  %v4957_v38 = vunpack.c.h.bf16 %v10946_v57  ;;  %v4581_v32 = vmul.f32 %v10690_v37, %v3429_v50  ;;  %v3427_v44 = vld [vmem:[%s12672_s3 + $0x228] sm:$0xff] }
 0x25d   :  { %5738 = vmatprep.subr.mxu1 %v12683_v20  ;;  %5582 = vmatprep.mubr.f32.mxu1 %v4933_v21  ;;  %v8705_v9 = vpop.eup %8704  ;;  %v10956_v27 = vpop.permute.xlu0 %4082  ;;  %v2940_v21 = vadd.f32 1.0, %v8703_v16  ;;  %8732 = vpow2.f32 %v7005_v33  ;;  %v558_v58 = vld [vmem:[%s12670_s2 + $0x490] sm:$0xff]  ;;  %v2188_v34 = vadd.f32 %v10836_v49, %v600_v63  ;;  %v7004_v60 = vmul.f32 -1.442695, %v1983_v61  ;;  %v599_v33 = vld [vmem:[%s12670_s2 + $0x5d8] sm:$0xff] }
 0x25e   :  { %v10939_v10 = vpop.permute.xlu1 %4002  ;;  %5739 = vmatpush1.msra.mxu1 %v4584_v5  ;;  %4327 = vperm.xlu1 %8051, %v8701_v48   ;;  %v8707_v47 = vpop.eup %8706  ;;  %8734 = vpow2.f32 %v7046_v59  ;;  %v4956_v37 = vunpack.c.l.bf16 %v10946_v57  ;;  %v4580_v16 = vmul.f32 %v10708_v6, %v3428_v45  ;;  %v4969_v6 = vunpack.c.h.bf16 %v10975_v13  ;;  %v11000_v59 = vld [vmem:[%s12671_s4 + $0x158] sm:$0xff] }
 0x25f   :  { %5740 = vmatprep.subr.mxu1 %v12683_v20  ;;  %5583 = vmatmul.mubr.f32.gmra.mxu1 %v4932_v62  ;;  %v8709_v53 = vpop.eup %8708  ;;  %8736 = vrcp.f32 %v2940_v21  ;;  %v4579_v61 = vmul.f32 %v10656_v56, %v3427_v44  ;;  %v7045_v50 = vmul.f32 -1.442695, %v2188_v34  ;;  %v3425_v63 = vld [vmem:[%s12672_s3 + $0x218] sm:$0xff]  ;;  %v4968_v56 = vunpack.c.l.bf16 %v10975_v13  ;;  %v557_v21 = vld [vmem:[%s12670_s2 + $0x488] sm:$0xff] }
 0x260   :  { %5741 = vmatpush1.msra.mxu1 %v4583_v43  ;;  %4372 = vperm.xlu0 %8050, %v8705_v9   ;;  %v8711_v25 = vpop.eup %8710  ;;  %v2942_v49 = vadd.f32 1.0, %v8709_v53  ;;  %v1978_v9 = vadd.f32 %v10580_v26, %v558_v58  ;;  %8738 = vpow2.f32 %v7004_v60  ;;  %v3469_v58 = vld [vmem:[%s12672_s3 + $0x378] sm:$0xff]  ;;  %v4577_v34 = vmul.f32 %v10615_v19, %v3425_v63  ;;  %v11033_v19 = vld [vmem:[%s12671_s4 + $0x188] sm:$0xff] }
 0x261   :  { %5742 = vmatprep.subr.mxu1 %v12683_v20  ;;  %5587 = vmatprep.mubr.f32.mxu1 %v4945_v41  ;;  %v8713_v48 = vpop.eup %8712  ;;  %v10981_v5 = vpop.permute.xlu0 %4097  ;;  %v3426_v41 = vld [vmem:[%s12672_s3 + $0x220] sm:$0xff] }
 0x262   :  { %v10964_v55 = vpop.permute.xlu1 %4017  ;;  %5743 = vmatpush1.msra.mxu1 %v4582_v0  ;;  %4322 = vperm.xlu1 %8051, %v8707_v47   ;;  %v8715_v62 = vpop.eup %8714  ;;  %v2932_v43 = vadd.f32 1.0, %v8713_v48  ;;  %8740 = vrcp.f32 %v2942_v49 }
 0x263   :  { %5744 = vmatprep.subr.mxu1 %v12683_v20  ;;  %5588 = vmatmul.mubr.f32.gmra.mxu1 %v4944_v1  ;;  %v8717_v23 = vpop.eup %8716  ;;  %v2183_v1 = vadd.f32 %v10783_v46, %v599_v33  ;;  %v3424_v46 = vld [vmem:[%s12672_s3 + $0x210] sm:$0xff] }
 0x264   :  { %5745 = vmatpush1.msra.mxu1 %v4581_v32  ;;  %4367 = vperm.xlu0 %8050, %v8711_v25   ;;  %v8719_v47 = vpop.eup %8718  ;;  %v4578_v25 = vmul.f32 %v10673_v54, %v3426_v41  ;;  %v2973_v45 = vadd.f32 1.0, %v8717_v23  ;;  %8742 = vrcp.f32 %v2932_v43  ;;  %v4981_v54 = vunpack.c.h.bf16 %v11000_v59 }
 0x265   :  { %5746 = vmatprep.subr.mxu1 %v12683_v20  ;;  %5592 = vmatprep.mubr.f32.mxu1 %v4957_v38  ;;  %v8721_v26 = vpop.eup %8720  ;;  %v7003_v38 = vmul.f32 -1.442695, %v1978_v9  ;;  %8744 = vpow2.f32 %v7045_v50  ;;  %v7044_v60 = vmul.f32 -1.442695, %v2183_v1  ;;  %v4576_v33 = vmul.f32 %v10637_v40, %v3424_v46  ;;  %v3422_v40 = vld [vmem:[%s12672_s3 + $0x200] sm:$0xff]  ;;  %v3453_v46 = vld [vmem:[%s12672_s3 + $0x2f8] sm:$0xff] }
 0x266   :  { %v10993_v57 = vpop.permute.xlu1 %4012  ;;  %5747 = vmatpush1.msra.mxu1 %v4580_v16  ;;  %4337 = vperm.xlu1 %8051, %v8715_v62   ;;  %v11007_v53 = vpop.permute.xlu0 %4092  ;;  %v1973_v62 = vadd.f32 %v10511_v39, %v557_v21  ;;  %v3423_v39 = vld [vmem:[%s12672_s3 + $0x208] sm:$0xff]  ;;  %8746 = vrcp.f32 %v2973_v45  ;;  %v4980_v41 = vunpack.c.l.bf16 %v11000_v59  ;;  %v4993_v59 = vunpack.c.h.bf16 %v11033_v19  ;;  %v556_v1 = vld [vmem:[%s12670_s2 + $0x480] sm:$0xff] }
 0x267   :  { %5748 = vmatprep.subr.mxu1 %v12683_v20  ;;  %5593 = vmatmul.mubr.f32.gmra.mxu1 %v4956_v37  ;;  %v8723_v0 = vpop.eup %8722  ;;  %v598_v37 = vld [vmem:[%s12670_s2 + $0x5d0] sm:$0xff]  ;;  %8748 = vpow2.f32 %v7003_v38 }
 0x268   :  { %5749 = vmatpush1.msra.mxu1 %v4579_v61  ;;  %4362 = vperm.xlu0 %8050, %v8719_v47   ;;  %v8725_v32 = vpop.eup %8724  ;;  %v2931_v44 = vadd.f32 1.0, %v8723_v0  ;;  %v2178_v61 = vadd.f32 %v10800_v2, %v598_v37  ;;  %v7002_v63 = vmul.f32 -1.442695, %v1973_v62  ;;  %v3466_v37 = vld [vmem:[%s12672_s3 + $0x360] sm:$0xff] }
 0x269   :  { %5750 = vmatprep.subr.mxu1 %v12683_v20  ;;  %5597 = vmatprep.mubr.f32.mxu1 %v4969_v6  ;;  %v8727_v13 = vpop.eup %8726  ;;  %v3468_v6 = vld [vmem:[%s12672_s3 + $0x370] sm:$0xff] }
 0x26a   :  { %v11018_v48 = vpop.permute.xlu1 %4027  ;;  %5751 = vmatpush1.msra.mxu1 %v4578_v25  ;;  %4332 = vperm.xlu1 %8051, %v8721_v26   ;;  %v4108_v49 = vpop.permute.xlu0 %4107  ;;  %v2972_v50 = vadd.f32 1.0, %v8727_v13  ;;  %v4575_v26 = vmul.f32 %v10572_v51, %v3423_v39  ;;  %8750 = vrcp.f32 %v2931_v44  ;;  %v4574_v25 = vmul.f32 %v10594_v18, %v3422_v40  ;;  %v597_v51 = vld [vmem:[%s12670_s2 + $0x5c8] sm:$0xff]  ;;  %v3452_v13 = vld [vmem:[%s12672_s3 + $0x2f0] sm:$0xff] }
 0x26b   :  { %5752 = vmatprep.subr.mxu1 %v12683_v20  ;;  %5598 = vmatmul.mubr.f32.gmra.mxu1 %v4968_v56  ;;  %v8729_v16 = vpop.eup %8728  ;;  %v4621_v23 = vmul.f32 %v4108_v49, %v3469_v58  ;;  %8752 = vpow2.f32 %v7044_v60  ;;  %v4992_v58 = vunpack.c.l.bf16 %v11033_v19  ;;  %v3467_v18 = vld [vmem:[%s12672_s3 + $0x368] sm:$0xff]  ;;  %v2173_v44 = vadd.f32 %v10746_v3, %v597_v51 }
 0x26c   :  { %5753 = vmatpush1.msra.mxu1 %v4577_v34  ;;  %4357 = vperm.xlu0 %8050, %v8725_v32   ;;  %v8731_v9 = vpop.eup %8730  ;;  %v7043_v32 = vmul.f32 -1.442695, %v2178_v61  ;;  %8754 = vrcp.f32 %v2972_v50  ;;  %v4757_v34 = vld [vmem:[%s12671_s4 + $0x1b8] sm:$0xff]  ;;  %v4605_v49 = vmul.f32 %v11018_v48, %v3453_v46  ;;  %v596_v50 = vld [vmem:[%s12670_s2 + $0x5c0] sm:$0xff] }
 0x26d   :  { %5754 = vmatprep.subr.mxu1 %v12683_v20  ;;  %5602 = vmatprep.mubr.f32.mxu1 %v4981_v54  ;;  %v8733_v47 = vpop.eup %8732  ;;  %v1968_v54 = vadd.f32 %v10535_v29, %v556_v1  ;;  %8756 = vpow2.f32 %v7002_v63  ;;  %v5005_v3 = vunpack.c.h.bf16 %v4757_v34  ;;  %v5004_v40 = vunpack.c.l.bf16 %v4757_v34  ;;  %v3450_v63 = vld [vmem:[%s12672_s3 + $0x2e0] sm:$0xff] }
 0x26e   :  { %v4023_v43 = vpop.permute.xlu1 %4022  ;;  %5755 = vmatpush1.msra.mxu1 %v4576_v33  ;;  %5954 = vmatpush1.msra.mxu0 %v4621_v23  ;;  %v4103_v56 = vpop.permute.xlu0 %4102  ;;  %v2930_v45 = vadd.f32 1.0, %v8733_v47  ;;  %v4618_v47 = vmul.f32 %v11007_v53, %v3466_v37  ;;  %v4763_v53 = vld [vmem:[%s12671_s4 + $0x1e8] sm:$0xff]  ;;  %v3448_v37 = vld [vmem:[%s12672_s3 + $0x2d0] sm:$0xff] }
 0x26f   :  { %4347 = vperm.xlu1 %8051, %v8729_v16   ;;  %5756 = vmatprep.subr.mxu1 %v12683_v20  ;;  %v8735_v0 = vpop.eup %8734  ;;  %v4620_v2 = vmul.f32 %v4103_v56, %v3468_v6  ;;  %v4619_v16 = vmul.f32 %v10981_v5, %v3467_v18  ;;  %v7001_v23 = vmul.f32 -1.442695, %v1968_v54  ;;  %v588_v6 = vld [vmem:[%s12670_s2 + $0x580] sm:$0xff]  ;;  %v3451_v5 = vld [vmem:[%s12672_s3 + $0x2e8] sm:$0xff]  ;;  %v5017_v46 = vunpack.c.h.bf16 %v4763_v53 }
 0x270   :  { %5603 = vmatmul.mubr.f32.gmra.mxu1 %v4980_v41  ;;  %4267 = vperm.xlu0 %8050, %v8731_v9   ;;  %v8737_v21 = vpop.eup %8736  ;;  %v2971_v60 = vadd.f32 1.0, %v8735_v0  ;;  %8758 = vrcp.f32 %v2930_v45  ;;  %v4604_v41 = vmul.f32 %v4023_v43, %v3452_v13  ;;  %v7042_v43 = vmul.f32 -1.442695, %v2173_v44  ;;  %v4769_v44 = vld [vmem:[%s12671_s4 + $0x218] sm:$0xff] }
 0x271   :  { %5757 = vmatpush1.msra.mxu1 %v4575_v26  ;;  %5955 = vmatprep.subr.mxu0 %v12683_v20  ;;  %v8739_v62 = vpop.eup %8738  ;;  %8760 = vpow2.f32 %v7043_v32  ;;  %v2128_v0 = vadd.f32 %v10613_v28, %v588_v6  ;;  %v2168_v45 = vadd.f32 %v10766_v30, %v596_v50  ;;  %v4602_v54 = vmul.f32 %v10993_v57, %v3450_v63  ;;  %v595_v30 = vld [vmem:[%s12670_s2 + $0x5b8] sm:$0xff] }
 0x272   :  { %v11062_v38 = vpop.permute.xlu1 %3982  ;;  %5758 = vmatprep.subr.mxu1 %v12683_v20  ;;  %5607 = vmatprep.mubr.f32.mxu1 %v4993_v59  ;;  %v11076_v29 = vpop.permute.xlu0 %4157  ;;  %v2929_v9 = vadd.f32 1.0, %v8739_v62  ;;  %8762 = vrcp.f32 %v2971_v60  ;;  %v3465_v59 = vld [vmem:[%s12672_s3 + $0x358] sm:$0xff]  ;;  %v5016_v34 = vunpack.c.l.bf16 %v4763_v53  ;;  %v3463_v62 = vld [vmem:[%s12672_s3 + $0x348] sm:$0xff] }
 0x273   :  { %5759 = vmatpush1.msra.mxu1 %v4574_v25  ;;  %5956 = vmatpush1.msra.mxu0 %v4620_v2  ;;  %v8741_v19 = vpop.eup %8740  ;;  %8764 = vpow2.f32 %v7001_v23  ;;  %v4603_v25 = vmul.f32 %v10964_v55, %v3451_v5  ;;  %v4617_v51 = vmul.f32 %v10928_v36, %v3465_v59  ;;  %v3449_v36 = vld [vmem:[%s12672_s3 + $0x2d8] sm:$0xff]  ;;  %v7033_v57 = vmul.f32 -1.442695, %v2128_v0 }
 0x274   :  { %4342 = vperm.xlu1 %8051, %v8737_v21   ;;  %5760 = vmatprep.subr.mxu1 %v12683_v20  ;;  %v8743_v33 = vpop.eup %8742  ;;  %v3464_v21 = vld [vmem:[%s12672_s3 + $0x350] sm:$0xff]  ;;  %8766 = vrcp.f32 %v2929_v9  ;;  %v7041_v60 = vmul.f32 -1.442695, %v2168_v45  ;;  %v4601_v23 = vmul.f32 %v10914_v14, %v3449_v36  ;;  %v4600_v14 = vmul.f32 %v10939_v10, %v3448_v37  ;;  %v593_v10 = vld [vmem:[%s12670_s2 + $0x5a8] sm:$0xff]  ;;  %v3458_v37 = vld [vmem:[%s12672_s3 + $0x320] sm:$0xff] }
 0x275   :  { %5957 = vmatprep.subr.mxu0 %v12683_v20  ;;  %5608 = vmatmul.mubr.f32.gmra.mxu1 %v4992_v58  ;;  %v8745_v48 = vpop.eup %8744  ;;  %8768 = vpow2.f32 %v7042_v43  ;;  %v4616_v18 = vmul.f32 %v10956_v27, %v3464_v21  ;;  %v5028_v43 = vunpack.c.l.bf16 %v4769_v44  ;;  %v2153_v45 = vadd.f32 %v10671_v7, %v593_v10  ;;  %v592_v7 = vld [vmem:[%s12670_s2 + $0x5a0] sm:$0xff] }
 0x276   :  { %v11086_v39 = vpop.permute.xlu1 %3977  ;;  %5761 = vmatpush2.msra.mxu1 %v4605_v49  ;;  %4352 = vperm.xlu0 %8050, %v8741_v19   ;;  %v11096_v61 = vpop.permute.xlu0 %4152  ;;  %v2970_v2 = vadd.f32 1.0, %v8745_v48  ;;  %v4615_v48 = vmul.f32 %v10876_v24, %v3463_v62 }
 0x277   :  { %5762 = vmatprep.subr.mxu1 %v12683_v20  ;;  %5958 = vmatpush1.msra.mxu0 %v4619_v16  ;;  %v8747_v26 = vpop.eup %8746  ;;  %v2163_v16 = vadd.f32 %v10706_v8, %v595_v30  ;;  %v5029_v8 = vunpack.c.h.bf16 %v4769_v44  ;;  %v7038_v62 = vmul.f32 -1.442695, %v2153_v45  ;;  %v3444_v44 = vld [vmem:[%s12672_s3 + $0x2b0] sm:$0xff] }
 0x278   :  { %5763 = vmatpush2.msra.mxu1 %v4604_v41  ;;  %5959 = vmatprep.subr.mxu0 %v12683_v20  ;;  %v8749_v56 = vpop.eup %8748  ;;  %8770 = vrcp.f32 %v2970_v2  ;;  %v594_v41 = vld [vmem:[%s12670_s2 + $0x5b0] sm:$0xff] }
 0x279   :  { %5612 = vmatprep.mubr.f32.mxu1 %v5005_v3  ;;  %5960 = vmatpush1.msra.mxu0 %v4618_v47  ;;  %v8751_v58 = vpop.eup %8750  ;;  %v2928_v32 = vadd.f32 1.0, %v8749_v56  ;;  %v7040_v59 = vmul.f32 -1.442695, %v2163_v16  ;;  %v2158_v53 = vadd.f32 %v10726_v52, %v594_v41  ;;  %v3446_v56 = vld [vmem:[%s12672_s3 + $0x2c0] sm:$0xff]  ;;  %v3460_v2 = vld [vmem:[%s12672_s3 + $0x330] sm:$0xff] }
 0x27a   :  { %v11111_v1 = vpop.permute.xlu1 %3972  ;;  %4302 = vperm.xlu1 %8051, %v8743_v33   ;;  %5764 = vmatprep.subr.mxu1 %v12683_v20  ;;  %v11122_v28 = vpop.permute.xlu0 %4167  ;;  %v3462_v33 = vld [vmem:[%s12672_s3 + $0x340] sm:$0xff]  ;;  %v4612_v30 = vmul.f32 %v10856_v22, %v3460_v2  ;;  %v12686_v2 = vld [vmem:[#allocation4_spill] sm:$0xff] }
 0x27b   :  { %5961 = vmatprep.subr.mxu0 %v12683_v20  ;;  %5613 = vmatmul.mubr.f32.gmra.mxu1 %v5004_v40  ;;  %v8753_v55 = vpop.eup %8752  ;;  %8772 = vrcp.f32 %v2928_v32  ;;  %v3447_v40 = vld [vmem:[%s12672_s3 + $0x2c8] sm:$0xff]  ;;  %v4614_v24 = vmul.f32 %v10902_v12, %v3462_v33 }
 0x27c   :  { %5765 = vmatpush2.msra.mxu1 %v4603_v25  ;;  %4507 = vperm.xlu0 %8050, %v8747_v26   ;;  %v8755_v27 = vpop.eup %8754  ;;  %v2969_v3 = vadd.f32 1.0, %v8753_v55  ;;  %8774 = vpow2.f32 %v7033_v57  ;;  %v3461_v26 = vld [vmem:[%s12672_s3 + $0x338] sm:$0xff]  ;;  %v4775_v12 = vld [vmem:[%s12671_s4 + $0x248] sm:$0xff]  ;;  %v4599_v21 = vmul.f32 %v10864_v11, %v3447_v40  ;;  %v7039_v55 = vmul.f32 -1.442695, %v2158_v53 }
 0x27d   :  { %5766 = vmatprep.subr.mxu1 %v12683_v20  ;;  %5962 = vmatpush1.msra.mxu0 %v4617_v51  ;;  %v8757_v19 = vpop.eup %8756  ;;  %8776 = vpow2.f32 %v7041_v60  ;;  %v4613_v51 = vmul.f32 %v10841_v42, %v3461_v26  ;;  %v4598_v11 = vmul.f32 %v10886_v15, %v3446_v56  ;;  %v3445_v42 = vld [vmem:[%s12672_s3 + $0x2b8] sm:$0xff]  ;;  %v5040_v36 = vunpack.c.l.bf16 %v4775_v12  ;;  %v12685_v56 = vld [vmem:[#allocation7_spill] sm:$0xff] }
 0x27e   :  { %v11133_v13 = vpop.permute.xlu1 %3967  ;;  %5767 = vmatpush2.msra.mxu1 %v4602_v54  ;;  %5963 = vmatprep.subr.mxu0 %v12683_v20  ;;  %v11145_v49 = vpop.permute.xlu0 %4162  ;;  %v2927_v47 = vadd.f32 1.0, %v8757_v19  ;;  %8778 = vrcp.f32 %v2969_v3  ;;  %v4781_v57 = vld [vmem:[%s12671_s4 + $0x278] sm:$0xff]  ;;  %v2148_v60 = vadd.f32 %v10688_v35, %v592_v7  ;;  %v4597_v16 = vmul.f32 %v10845_v31, %v3445_v42  ;;  %v12687_v7 = vld [vmem:[#allocation8_spill] sm:$0xff] }
 0x27f   :  { %5617 = vmatprep.mubr.f32.mxu1 %v5017_v46  ;;  %5964 = vmatpush1.msra.mxu0 %v4616_v18  ;;  %v8759_v6 = vpop.eup %8758  ;;  %v5041_v46 = vunpack.c.h.bf16 %v4775_v12  ;;  %v591_v3 = vld [vmem:[%s12670_s2 + $0x598] sm:$0xff]  ;;  %v5053_v35 = vunpack.c.h.bf16 %v4781_v57  ;;  %v3456_v12 = vld [vmem:[%s12672_s3 + $0x310] sm:$0xff] }
 0x280   :  { %4297 = vperm.xlu1 %8051, %v8751_v58   ;;  %5768 = vmatprep.subr.mxu1 %v12683_v20  ;;  %v8761_v5 = vpop.eup %8760  ;;  %8780 = vrcp.f32 %v2927_v47  ;;  %v12684_v47 = vld [vmem:[#allocation3_spill] sm:$0xff]  ;;  %v4608_v42 = vmul.f32 %v12687_v7, %v3456_v12  ;;  %v3484_v12 = vld [vmem:[%s12672_s3 + $0x3f0] sm:$0xff] }
 0x281   :  { %5965 = vmatprep.subr.mxu0 %v12683_v20  ;;  %5618 = vmatmul.mubr.f32.gmra.mxu1 %v5016_v34  ;;  %v8763_v63 = vpop.eup %8762  ;;  %v2968_v0 = vadd.f32 1.0, %v8761_v5  ;;  %8782 = vpow2.f32 %v7040_v59  ;;  %v3459_v34 = vld [vmem:[%s12672_s3 + $0x328] sm:$0xff]  ;;  %v2143_v40 = vadd.f32 %v12684_v47, %v591_v3  ;;  %v3442_v59 = vld [vmem:[%s12672_s3 + $0x2a0] sm:$0xff] }
 0x282   :  { %v11158_v9 = vpop.permute.xlu1 %3962  ;;  %5769 = vmatpush2.msra.mxu1 %v4601_v23  ;;  %4502 = vperm.xlu0 %8050, %v8755_v27   ;;  %v11166_v50 = vpop.permute.xlu0 %4177  ;;  %v4611_v33 = vmul.f32 %v10813_v17, %v3459_v34  ;;  %v3443_v17 = vld [vmem:[%s12672_s3 + $0x2a8] sm:$0xff]  ;;  %v3454_v3 = vld [vmem:[%s12672_s3 + $0x300] sm:$0xff] }
 0x283   :  { %5770 = vmatprep.subr.mxu1 %v12683_v20  ;;  %5966 = vmatpush1.msra.mxu0 %v4615_v48  ;;  %v8765_v25 = vpop.eup %8764  ;;  %8784 = vrcp.f32 %v2968_v0  ;;  %v4596_v48 = vmul.f32 %v11062_v38, %v3444_v44  ;;  %v3457_v38 = vld [vmem:[%s12672_s3 + $0x318] sm:$0xff]  ;;  %v12690_v47 = vld [vmem:[#allocation6_spill] sm:$0xff] }
 0x284   :  { %5771 = vmatpush2.msra.mxu1 %v4600_v14  ;;  %5967 = vmatprep.subr.mxu0 %v12683_v20  ;;  %v8767_v54 = vpop.eup %8766  ;;  %v2926_v15 = vadd.f32 1.0, %v8765_v25  ;;  %8786 = vpow2.f32 %v7039_v55  ;;  %v4609_v0 = vmul.f32 %v12685_v56, %v3457_v38  ;;  %v7036_v55 = vmul.f32 -1.442695, %v2143_v40 }
 0x285   :  { %5622 = vmatprep.mubr.f32.mxu1 %v5029_v8  ;;  %5968 = vmatpush1.msra.mxu0 %v4614_v24  ;;  %v8769_v32 = vpop.eup %8768  ;;  %v4610_v8 = vmul.f32 %v10826_v4, %v3458_v37  ;;  %v590_v4 = vld [vmem:[%s12670_s2 + $0x590] sm:$0xff]  ;;  %v7037_v24 = vmul.f32 -1.442695, %v2148_v60 }
 0x286   :  { %v11182_v52 = vpop.permute.xlu1 %3957  ;;  %4292 = vperm.xlu1 %8051, %v8759_v6   ;;  %5772 = vmatprep.subr.mxu1 %v12683_v20  ;;  %v11192_v58 = vpop.permute.xlu0 %4172  ;;  %v2967_v19 = vadd.f32 1.0, %v8769_v32  ;;  %8788 = vrcp.f32 %v2926_v15  ;;  %v5052_v6 = vunpack.c.l.bf16 %v4781_v57  ;;  %v4793_v57 = vld [vmem:[%s12671_s4 + $0x2d8] sm:$0xff]  ;;  %v3440_v37 = vld [vmem:[%s12672_s3 + $0x290] sm:$0xff] }
 0x287   :  { %5969 = vmatprep.subr.mxu0 %v12683_v20  ;;  %5623 = vmatmul.mubr.f32.gmra.mxu1 %v5028_v43  ;;  %v8771_v22 = vpop.eup %8770  ;;  %8790 = vpow2.f32 %v7038_v62  ;;  %v4787_v43 = vld [vmem:[%s12671_s4 + $0x2a8] sm:$0xff]  ;;  %v12688_v62 = vld [vmem:[#allocation2_spill] sm:$0xff] }
 0x288   :  { %5773 = vmatpush2.msra.mxu1 %v4599_v21  ;;  %4497 = vperm.xlu0 %8050, %v8763_v63   ;;  %v8773_v41 = vpop.eup %8772  ;;  %8792 = vrcp.f32 %v2967_v19  ;;  %v4595_v63 = vmul.f32 %v11086_v39, %v3443_v17  ;;  %v2138_v21 = vadd.f32 %v12686_v2, %v590_v4  ;;  %v5065_v45 = vunpack.c.h.bf16 %v4787_v43  ;;  %v589_v39 = vld [vmem:[%s12670_s2 + $0x588] sm:$0xff] }
 0x289   :  { %5774 = vmatprep.subr.mxu1 %v12683_v20  ;;  %5970 = vmatpush1.msra.mxu0 %v4613_v51  ;;  %v8775_v31 = vpop.eup %8774  ;;  %8794 = vpow2.f32 %v7037_v24  ;;  %v2133_v44 = vadd.f32 %v12688_v62, %v589_v39  ;;  %v3439_v4 = vld [vmem:[%s12672_s3 + $0x288] sm:$0xff]  ;;  %v5076_v24 = vunpack.c.l.bf16 %v4793_v57 }
 0x28a   :  { %v11203_v18 = vpop.permute.xlu1 %3952  ;;  %5775 = vmatpush2.msra.mxu1 %v4598_v11  ;;  %5971 = vmatprep.subr.mxu0 %v12683_v20  ;;  %v11215_v27 = vpop.permute.xlu0 %4187  ;;  %v2958_v26 = vadd.f32 1.0, %v8775_v31  ;;  %v4594_v11 = vmul.f32 %v11111_v1, %v3442_v59  ;;  %v3455_v1 = vld [vmem:[%s12672_s3 + $0x308] sm:$0xff]  ;;  %v7035_v60 = vmul.f32 -1.442695, %v2138_v21 }
 0x28b   :  { %5627 = vmatprep.mubr.f32.mxu1 %v5041_v46  ;;  %5972 = vmatpush1.msra.mxu0 %v4612_v30  ;;  %v8777_v5 = vpop.eup %8776  ;;  %v3441_v30 = vld [vmem:[%s12672_s3 + $0x298] sm:$0xff]  ;;  %v7034_v40 = vmul.f32 -1.442695, %v2133_v44 }
 0x28c   :  { %4287 = vperm.xlu1 %8051, %v8767_v54   ;;  %5776 = vmatprep.subr.mxu1 %v12683_v20  ;;  %v8779_v10 = vpop.eup %8778  ;;  %v2966_v25 = vadd.f32 1.0, %v8777_v5  ;;  %8796 = vrcp.f32 %v2958_v26  ;;  %v4592_v5 = vmul.f32 %v11158_v9, %v3440_v37  ;;  %v3485_v26 = vld [vmem:[%s12672_s3 + $0x3f8] sm:$0xff]  ;;  %v4811_v37 = vld [vmem:[%s12671_s4 + $0x368] sm:$0xff] }
 0x28d   :  { %5973 = vmatprep.subr.mxu0 %v12683_v20  ;;  %5628 = vmatmul.mubr.f32.gmra.mxu1 %v5040_v36  ;;  %v8781_v54 = vpop.eup %8780  ;;  %v5064_v36 = vunpack.c.l.bf16 %v4787_v43 }
 0x28e   :  { %v11228_v23 = vpop.permute.xlu1 %4112  ;;  %5777 = vmatpush2.msra.mxu1 %v4597_v16  ;;  %4492 = vperm.xlu0 %8050, %v8771_v22   ;;  %v11236_v14 = vpop.permute.xlu0 %4182  ;;  %8798 = vrcp.f32 %v2966_v25  ;;  %v4591_v25 = vmul.f32 %v11182_v52, %v3439_v4  ;;  %v3479_v4 = vld [vmem:[%s12672_s3 + $0x3c8] sm:$0xff] }
 0x28f   :  { %5778 = vmatprep.subr.mxu1 %v12683_v20  ;;  %5974 = vmatpush1.msra.mxu0 %v4611_v33  ;;  %v8783_v32 = vpop.eup %8782  ;;  %8800 = vpow2.f32 %v7036_v55  ;;  %v4805_v55 = vld [vmem:[%s12671_s4 + $0x338] sm:$0xff] }
 0x290   :  { %5779 = vmatpush2.msra.mxu1 %v4596_v48  ;;  %5975 = vmatprep.subr.mxu0 %v12683_v20  ;;  %v8785_v22 = vpop.eup %8784  ;;  %v2965_v33 = vadd.f32 1.0, %v8783_v32  ;;  %v12689_v48 = vld [vmem:[#allocation5_spill] sm:$0xff]  ;;  %8802 = vpow2.f32 %v7035_v60 }
 0x291   :  { %5632 = vmatprep.mubr.f32.mxu1 %v5053_v35  ;;  %5976 = vmatpush1.msra.mxu0 %v4610_v8  ;;  %v11264_v46 = vpop.f32.mrf.mxu1  ;;  %v4593_v35 = vmul.f32 %v11133_v13, %v3441_v30  ;;  %v4607_v31 = vmul.f32 %v12689_v48, %v3455_v1  ;;  %v5077_v8 = vunpack.c.h.bf16 %v4793_v57  ;;  %v4606_v13 = vmul.f32 %v12690_v47, %v3454_v3 }
 0x292   :  { %v11252_v53 = vpop.permute.xlu1 %4197  ;;  %4282 = vperm.xlu1 %8051, %v8773_v41   ;;  %5780 = vmatprep.subr.mxu1 %v12683_v20  ;;  %v11262_v51 = vpop.permute.xlu0 %4147  ;;  %8804 = vrcp.f32 %v2965_v33  ;;  %v3481_v33 = vld [vmem:[%s12672_s3 + $0x3d8] sm:$0xff] }
 0x293   :  { %5977 = vmatprep.subr.mxu0 %v12683_v20  ;;  %5633 = vmatmul.mubr.f32.gmra.mxu1 %v5052_v6  ;;  %v5346_v15 = vpop.f32.mrf.mxu1  ;;  %v8787_v41 = vpop.eup %8786  ;;  %8806 = vpow2.f32 %v7034_v40 }
 0x294   :  { %5781 = vmatpush2.msra.mxu1 %v4595_v63  ;;  %4487 = vperm.xlu0 %8050, %v8779_v10   ;;  %v8789_v38 = vpop.eup %8788  ;;  %v2964_v59 = vadd.f32 1.0, %v8787_v41  ;;  %v4799_v63 = vld [vmem:[%s12671_s4 + $0x308] sm:$0xff]  ;;  %v5101_v15 = vunpack.c.h.bf16 %v4805_v55 }
 0x295   :  { %5782 = vmatprep.subr.mxu1 %v12683_v20  ;;  %5978 = vmatpush1.msra.mxu0 %v4609_v0  ;;  %v11290_v16 = vpop.f32.mrf.mxu1  ;;  %v8791_v9 = vpop.eup %8790  ;;  %v3438_v0 = vld [vmem:[%s12672_s3 + $0x280] sm:$0xff]  ;;  %v5089_v39 = vunpack.c.h.bf16 %v4799_v63 }
 0x296   :  { %v11275_v34 = vpop.permute.xlu1 %4192  ;;  %5783 = vmatpush2.msra.mxu1 %v4594_v11  ;;  %5979 = vmatprep.subr.mxu0 %v12683_v20  ;;  %v11288_v19 = vpop.permute.xlu0 %4142  ;;  %v2963_v52 = vadd.f32 1.0, %v8791_v9  ;;  %8808 = vrcp.f32 %v2964_v59  ;;  %v4590_v7 = vmul.f32 %v11203_v18, %v3438_v0  ;;  %v3482_v18 = vld [vmem:[%s12672_s3 + $0x3e0] sm:$0xff] }
 0x297   :  { %5637 = vmatprep.mubr.f32.mxu1 %v5065_v45  ;;  %5980 = vmatpush1.msra.mxu0 %v4608_v42  ;;  %v5351_v17 = vpop.f32.mrf.mxu1  ;;  %v8793_v56 = vpop.eup %8792  ;;  %v4637_v45 = vmul.f32 %v11215_v27, %v3485_v26  ;;  %v5088_v42 = vunpack.c.l.bf16 %v4799_v63 }
 0x298   :  { %4277 = vperm.xlu1 %8051, %v8781_v54   ;;  %5784 = vmatprep.subr.mxu1 %v12683_v20  ;;  %v4636_v54 = vmul.f32 %v11236_v14, %v3484_v12  ;;  %v8795_v27 = vpop.eup %8794  ;;  %v3483_v14 = vld [vmem:[%s12672_s3 + $0x3e8] sm:$0xff]  ;;  %8810 = vrcp.f32 %v2963_v52 }
 0x299   :  { %5981 = vmatprep.subr.mxu0 %v12683_v20  ;;  %5638 = vmatmul.mubr.f32.gmra.mxu1 %v5064_v36  ;;  %v11309_v10 = vpop.f32.mrf.mxu1  ;;  %v8797_v1 = vpop.eup %8796  ;;  %v2962_v44 = vadd.f32 1.0, %v8795_v27  ;;  %v4635_v60 = vmul.f32 %v11166_v50, %v3483_v14  ;;  %v4634_v50 = vmul.f32 %v11192_v58, %v3482_v18  ;;  %v4633_v58 = vmul.f32 %v11122_v28, %v3481_v33  ;;  %v3478_v28 = vld [vmem:[%s12672_s3 + $0x3c0] sm:$0xff]  ;;  %v3475_v18 = vld [vmem:[%s12672_s3 + $0x3a8] sm:$0xff] }
 0x29a   :  { %v11299_v6 = vpop.permute.xlu1 %4207  ;;  %5785 = vmatpush2.msra.mxu1 %v4593_v35  ;;  %4482 = vperm.xlu0 %8050, %v8785_v22   ;;  %v11307_v43 = vpop.permute.xlu0 %4137  ;;  %v5100_v35 = vunpack.c.l.bf16 %v4805_v55 }
 0x29b   :  { %5786 = vmatprep.subr.mxu1 %v12683_v20  ;;  %5982 = vmatpush1.msra.mxu0 %v4607_v31  ;;  %v5356_v2 = vpop.f32.mrf.mxu1  ;;  %v8799_v62 = vpop.eup %8798  ;;  %v3480_v31 = vld [vmem:[%s12672_s3 + $0x3d0] sm:$0xff]  ;;  %8812 = vrcp.f32 %v2962_v44 }
 0x29c   :  { %5787 = vmatpush2.msra.mxu1 %v4592_v5  ;;  %5983 = vmatprep.subr.mxu0 %v12683_v20  ;;  %v8801_v3 = vpop.eup %8800  ;;  %v4632_v26 = vmul.f32 %v11145_v49, %v3480_v31  ;;  %v4823_v49 = vld [vmem:[%s12671_s4 + $0x3c8] sm:$0xff]  ;;  %v3473_v31 = vld [vmem:[%s12672_s3 + $0x398] sm:$0xff] }
 0x29d   :  { %5642 = vmatprep.mubr.f32.mxu1 %v5077_v8  ;;  %5984 = vmatpush1.msra.mxu0 %v4606_v13  ;;  %v11336_v32 = vpop.f32.mrf.mxu1  ;;  %v5113_v8 = vunpack.c.h.bf16 %v4811_v37  ;;  %v2961_v47 = vadd.f32 1.0, %v8801_v3  ;;  %v4817_v13 = vld [vmem:[%s12671_s4 + $0x398] sm:$0xff]  ;;  %v5137_v27 = vunpack.c.h.bf16 %v4823_v49 }
 0x29e   :  { %v11324_v21 = vpop.permute.xlu1 %4202  ;;  %4272 = vperm.xlu1 %8051, %v8789_v38   ;;  %5788 = vmatprep.subr.mxu1 %v12683_v20  ;;  %v11334_v11 = vpop.permute.xlu0 %4132  ;;  %v5125_v12 = vunpack.c.h.bf16 %v4817_v13 }
 0x29f   :  { %5985 = vmatprep.subr.mxu0 %v12683_v20  ;;  %5643 = vmatmul.mubr.f32.gmra.mxu1 %v5076_v24  ;;  %v5361_v30 = vpop.f32.mrf.mxu1  ;;  %v8803_v38 = vpop.eup %8802  ;;  %v5112_v24 = vunpack.c.l.bf16 %v4811_v37  ;;  %8814 = vrcp.f32 %v2961_v47  ;;  %v3474_v37 = vld [vmem:[%s12672_s3 + $0x3a0] sm:$0xff] }
 0x2a0   :  { %5789 = vmatpush2.msra.mxu1 %v4591_v25  ;;  %4477 = vperm.xlu0 %8050, %v8793_v56   ;;  %v8805_v40 = vpop.eup %8804  ;;  %v2960_v2 = vadd.f32 1.0, %v8803_v38  ;;  %v4631_v25 = vmul.f32 %v11076_v29, %v3479_v4  ;;  %v3476_v29 = vld [vmem:[%s12672_s3 + $0x3b0] sm:$0xff] }
 0x2a1   :  { %5790 = vmatprep.subr.mxu1 %v12683_v20  ;;  %5986 = vmatpush2.msra.mxu0 %v4637_v45  ;;  %v11351_v22 = vpop.f32.mrf.mxu1  ;;  %v8807_v0 = vpop.eup %8806  ;;  %v3472_v38 = vld [vmem:[%s12672_s3 + $0x390] sm:$0xff] }
 0x2a2   :  { %v11343_v36 = vpop.permute.xlu1 %4217  ;;  %5791 = vmatpush2.msra.mxu1 %v4590_v7  ;;  %5987 = vmatprep.subr.mxu0 %v12683_v20  ;;  %v11349_v57 = vpop.permute.xlu0 %4127  ;;  %v4630_v7 = vmul.f32 %v11096_v61, %v3478_v28  ;;  %v2959_v30 = vadd.f32 1.0, %v8807_v0  ;;  %8816 = vrcp.f32 %v2960_v2  ;;  %v4829_v61 = vld [vmem:[%s12671_s4 + $0x3f8] sm:$0xff] }
 0x2a3   :  { %5647 = vmatprep.mubr.f32.mxu1 %v5089_v39  ;;  %5988 = vmatpush2.msra.mxu0 %v4636_v54  ;;  %v5366_v41 = vpop.f32.mrf.mxu1  ;;  %v8809_v45 = vpop.eup %8808  ;;  %v3477_v54 = vld [vmem:[%s12672_s3 + $0x3b8] sm:$0xff]  ;;  %v5124_v39 = vunpack.c.l.bf16 %v4817_v13  ;;  %v5149_v3 = vunpack.c.h.bf16 %v4829_v61 }
 0x2a4   :  { %4432 = vperm.xlu1 %8051, %v8797_v1   ;;  %5989 = vmatprep.subr.mxu0 %v12683_v20  ;;  %8818 = vrcp.f32 %v2959_v30  ;;  %v4627_v41 = vmul.f32 %v11307_v43, %v3475_v18  ;;  %v4626_v43 = vmul.f32 %v11334_v11, %v3474_v37  ;;  %v4841_v13 = vld [vmem:[%s12671_s4 + $0x458] sm:$0xff]  ;;  %v3471_v11 = vld [vmem:[%s12672_s3 + $0x388] sm:$0xff] }
 0x2a5   :  { %5648 = vmatmul.mubr.f32.gmra.mxu1 %v5088_v42  ;;  %4472 = vperm.xlu0 %8050, %v8799_v62   ;;  %v11370_v5 = vpop.f32.mrf.mxu1  ;;  %v8811_v1 = vpop.eup %8810  ;;  %v5136_v62 = vunpack.c.l.bf16 %v4823_v49  ;;  %v5173_v2 = vunpack.c.h.bf16 %v4841_v13  ;;  %v3470_v49 = vld [vmem:[%s12672_s3 + $0x380] sm:$0xff]  ;;  %v8821_v30 = vld [vmem:[%s12671_s4 + $0x18] sm:$0xff] }
 0x2a6   :  { %v11361_v48 = vpop.permute.xlu1 %4212  ;;  %5990 = vmatpush2.msra.mxu0 %v4635_v60  ;;  %5652 = vmatprep.mubr.f32.mxu1 %v5101_v15  ;;  %v11368_v17 = vpop.permute.xlu0 %4122  ;;  %v4629_v15 = vmul.f32 %v11262_v51, %v3477_v54  ;;  %v4628_v60 = vmul.f32 %v11288_v19, %v3476_v29  ;;  %v4835_v19 = vld [vmem:[%s12671_s4 + $0x428] sm:$0xff]  ;;  %v4853_v18 = vld [vmem:[%s12671_s4 + $0x4b8] sm:$0xff] }
 0x2a7   :  { %5991 = vmatprep.subr.mxu0 %v12683_v20  ;;  %6178 = vmatprep.subr.mxu1 %v12683_v20  ;;  %v5371_v9 = vpop.f32.mrf.mxu1 }
 0x2a8   :  { %5992 = vmatpush2.msra.mxu0 %v4634_v50  ;;  %v8813_v50 = vpop.eup %8812  ;;  %v4624_v9 = vmul.f32 %v11368_v17, %v3472_v38  ;;  %v3530_v38 = vld [vmem:[%s12672_s3 + $0x560] sm:$0xff] }
 0x2a9   :  { %5993 = vmatprep.subr.mxu0 %v12683_v20  ;;  %5653 = vmatmul.mubr.f32.gmra.mxu1 %v5100_v35 }
 0x2aa   :  { %v11381_v59 = vpop.permute.xlu1 %4227  ;;  %4467 = vperm.xlu0 %8050, %v8805_v40   ;;  %5994 = vmatpush2.msra.mxu0 %v4633_v58  ;;  %v11388_v63 = vpop.permute.xlu0 %4117  ;;  %v5161_v58 = vunpack.c.h.bf16 %v4835_v19 }
 0x2ab   :  { %5995 = vmatprep.subr.mxu0 %v12683_v20  ;;  %5657 = vmatprep.mubr.f32.mxu1 %v5113_v8  ;;  %v11390_v56 = vpop.f32.mrf.mxu1  ;;  %v5148_v8 = vunpack.c.l.bf16 %v4829_v61 }
 0x2ac   :  { %5996 = vmatpush2.msra.mxu0 %v4632_v26  ;;  %v8815_v28 = vpop.eup %8814 }
 0x2ad   :  { %5997 = vmatprep.subr.mxu0 %v12683_v20  ;;  %5658 = vmatmul.mubr.f32.gmra.mxu1 %v5112_v24  ;;  %v5376_v55 = vpop.f32.mrf.mxu1  ;;  %v4625_v24 = vmul.f32 %v11349_v57, %v3473_v31  ;;  %v4623_v57 = vmul.f32 %v11388_v63, %v3471_v11  ;;  %v3533_v63 = vld [vmem:[%s12672_s3 + $0x578] sm:$0xff] }
 0x2ae   :  { %v11400_v52 = vpop.permute.xlu1 %4222  ;;  %4462 = vperm.xlu0 %8050, %v8809_v45   ;;  %5998 = vmatpush2.msra.mxu0 %v4631_v25  ;;  %v11407_v14 = vpop.permute.xlu0 %4427  ;;  %v4847_v45 = vld [vmem:[%s12671_s4 + $0x488] sm:$0xff]  ;;  %v3529_v11 = vld [vmem:[%s12672_s3 + $0x558] sm:$0xff] }
 0x2af   :  { %5999 = vmatprep.subr.mxu0 %v12683_v20  ;;  %5662 = vmatprep.mubr.f32.mxu1 %v5125_v12  ;;  %v11409_v42 = vpop.f32.mrf.mxu1  ;;  %v5160_v12 = vunpack.c.l.bf16 %v4835_v19  ;;  %v8817_v54 = vpop.eup %8816  ;;  %v5185_v61 = vunpack.c.h.bf16 %v4847_v45 }
 0x2b0   :  { %6000 = vmatpush2.msra.mxu0 %v4630_v7  ;;  %v4711_v7 = vld [vmem:[%s12671_s4 + $0x48] sm:$0xff] }
 0x2b1   :  { %6001 = vmatprep.subr.mxu0 %v12683_v20  ;;  %5663 = vmatmul.mubr.f32.gmra.mxu1 %v5124_v39  ;;  %v5381_v44 = vpop.f32.mrf.mxu1  ;;  %v5172_v39 = vunpack.c.l.bf16 %v4841_v13  ;;  %v8819_v37 = vpop.eup %8818 }
 0x2b2   :  { %4457 = vperm.xlu0 %8050, %v8811_v1   ;;  %6002 = vmatpush2.msra.mxu0 %v4629_v15  ;;  %v11420_v51 = vpop.permute.xlu1 %4237  ;;  %v11426_v33 = vpop.permute.xlu0 %4422  ;;  %v4900_v15 = vunpack.c.l.bf16 %v8821_v30  ;;  %v3532_v1 = vld [vmem:[%s12672_s3 + $0x570] sm:$0xff] }
 0x2b3   :  { %6003 = vmatprep.subr.mxu0 %v12683_v20  ;;  %5667 = vmatprep.mubr.f32.mxu1 %v5137_v27  ;;  %v11428_v35 = vpop.f32.mrf.mxu1  ;;  %v4622_v27 = vmul.f32 %v11228_v23, %v3470_v49  ;;  %v4685_v23 = vmul.f32 %v11407_v14, %v3533_v63  ;;  %v4684_v31 = vmul.f32 %v11426_v33, %v3532_v1  ;;  %v5197_v14 = vunpack.c.h.bf16 %v4853_v18  ;;  %v4871_v1 = vld [vmem:[%s12671_s4 + $0x548] sm:$0xff] }
 0x2b4   :  { %6004 = vmatpush2.msra.mxu0 %v4628_v60  ;;  %v4913_v60 = vunpack.c.h.bf16 %v4711_v7 }
 0x2b5   :  { %6005 = vmatprep.subr.mxu0 %v12683_v20  ;;  %5668 = vmatmul.mubr.f32.gmra.mxu1 %v5136_v62  ;;  %v5386_v47 = vpop.f32.mrf.mxu1 }
 0x2b6   :  { %4452 = vperm.xlu0 %8050, %v8813_v50   ;;  %6006 = vmatpush2.msra.mxu0 %v4627_v41  ;;  %v11446_v40 = vpop.permute.xlu0 %4417  ;;  %v11455_v26 = vpop.permute.xlu1 %4232  ;;  %v3531_v41 = vld [vmem:[%s12672_s3 + $0x568] sm:$0xff]  ;;  %v4717_v50 = vld [vmem:[%s12671_s4 + $0x78] sm:$0xff] }
 0x2b7   :  { %6007 = vmatprep.subr.mxu0 %v12683_v20  ;;  %5672 = vmatprep.mubr.f32.mxu1 %v5149_v3  ;;  %v11448_v4 = vpop.f32.mrf.mxu1  ;;  %v5184_v3 = vunpack.c.l.bf16 %v4847_v45  ;;  %v4683_v13 = vmul.f32 %v11446_v40, %v3531_v41  ;;  %v4925_v33 = vunpack.c.h.bf16 %v4717_v50 }
 0x2b8   :  { %6008 = vmatpush2.msra.mxu0 %v4626_v43 }
 0x2b9   :  { %6009 = vmatprep.subr.mxu0 %v12683_v20  ;;  %5673 = vmatmul.mubr.f32.gmra.mxu1 %v5148_v8  ;;  %v5391_v0 = vpop.f32.mrf.mxu1  ;;  %v4859_v8 = vld [vmem:[%s12671_s4 + $0x4e8] sm:$0xff] }
 0x2ba   :  { %4447 = vperm.xlu0 %8050, %v8815_v28   ;;  %6010 = vmatpush2.msra.mxu0 %v4625_v24  ;;  %v4413_v17 = vpop.permute.xlu0 %4412  ;;  %v11475_v29 = vpop.permute.xlu1 %4247  ;;  %v5209_v40 = vunpack.c.h.bf16 %v4859_v8 }
 0x2bb   :  { %6011 = vmatprep.subr.mxu0 %v12683_v20  ;;  %5677 = vmatprep.mubr.f32.mxu1 %v5161_v58  ;;  %v11460_v25 = vpop.f32.mrf.mxu1  ;;  %v4912_v58 = vunpack.c.l.bf16 %v4711_v7  ;;  %v4682_v0 = vmul.f32 %v4413_v17, %v3530_v38  ;;  %v5208_v17 = vunpack.c.l.bf16 %v4859_v8  ;;  %v4877_v38 = vld [vmem:[%s12671_s4 + $0x578] sm:$0xff] }
 0x2bc   :  { %6012 = vmatpush2.msra.mxu0 %v4624_v9  ;;  %v5196_v9 = vunpack.c.l.bf16 %v4853_v18  ;;  %v3526_v18 = vld [vmem:[%s12672_s3 + $0x540] sm:$0xff] }
 0x2bd   :  { %5678 = vmatmul.mubr.f32.gmra.mxu1 %v5160_v12  ;;  %6013 = vmatprep.subr.mxu0 %v12683_v20  ;;  %v5396_v55 = vpop.f32.mrf.mxu1  ;;  %v4723_v12 = vld [vmem:[%s12671_s4 + $0xa8] sm:$0xff] }
 0x2be   :  { %4442 = vperm.xlu0 %8050, %v8817_v54   ;;  %5682 = vmatprep.mubr.f32.mxu1 %v5173_v2  ;;  %v4408_v62 = vpop.permute.xlu0 %4407  ;;  %v11508_v24 = vpop.permute.xlu1 %4242  ;;  %v4865_v2 = vld [vmem:[%s12671_s4 + $0x518] sm:$0xff]  ;;  %v4924_v54 = vunpack.c.l.bf16 %v4717_v50  ;;  %v4937_v63 = vunpack.c.h.bf16 %v4723_v12  ;;  %v3527_v55 = vld [vmem:[%s12672_s3 + $0x548] sm:$0xff] }
 0x2bf   :  { %6014 = vmatpush2.msra.mxu0 %v4623_v57  ;;  %v11487_v44 = vpop.f32.mrf.mxu1  ;;  %v3528_v57 = vld [vmem:[%s12672_s3 + $0x550] sm:$0xff]  ;;  %v5221_v30 = vunpack.c.h.bf16 %v4865_v2  ;;  %v5220_v41 = vunpack.c.l.bf16 %v4865_v2  ;;  %v3525_v50 = vld [vmem:[%s12672_s3 + $0x538] sm:$0xff]  ;;  %v5245_v2 = vunpack.c.h.bf16 %v4877_v38 }
 0x2c0   :  { %6015 = vmatprep.subr.mxu0 %v12683_v20 }
 0x2c1   :  { %5683 = vmatmul.mubr.f32.gmra.mxu1 %v5172_v39  ;;  %6016 = vmatpush2.msra.mxu0 %v4622_v27  ;;  %v5401_v19 = vpop.f32.mrf.mxu1  ;;  %v4681_v39 = vmul.f32 %v4408_v62, %v3529_v11  ;;  %v4729_v27 = vld [vmem:[%s12671_s4 + $0xd8] sm:$0xff] }
 0x2c2   :  { %4437 = vperm.xlu0 %8050, %v8819_v37   ;;  %6403 = vmatprep.subr.mxu0 %v12683_v20  ;;  %v4403_v47 = vpop.permute.xlu0 %4402 }
 0x2c3   :  { %5687 = vmatprep.mubr.f32.mxu1 %v5185_v61  ;;  %6018 = vmatmul.mubr.f32.vlgmr.msra.gmra.mxu0 %v4900_v15  ;;  %v11505_v43 = vpop.f32.mrf.mxu1  ;;  %v11533_v15 = vpop.permute.xlu1 %4257  ;;  %v4680_v61 = vmul.f32 %v4403_v47, %v3528_v57  ;;  %v4883_v57 = vld [vmem:[%s12671_s4 + $0x5a8] sm:$0xff] }
 0x2c4   :  { %6404 = vmatpush1.msra.mxu0 %v4685_v23  ;;  %6022 = vmatprep.mubr.f32.mxu0 %v4913_v60  ;;  %v4936_v60 = vunpack.c.l.bf16 %v4723_v12 }
 0x2c5   :  { %5688 = vmatmul.mubr.f32.gmra.mxu1 %v5184_v3  ;;  %6405 = vmatprep.subr.mxu0 %v12683_v20  ;;  %v5406_v28 = vpop.f32.mrf.mxu1  ;;  %v4949_v3 = vunpack.c.h.bf16 %v4729_v27 }
 0x2c6   :  { %5692 = vmatprep.mubr.f32.mxu1 %v5197_v14  ;;  %6406 = vmatpush1.msra.mxu0 %v4684_v31  ;;  %v4398_v49 = vpop.permute.xlu0 %4397  ;;  %v4735_v31 = vld [vmem:[%s12671_s4 + $0x108] sm:$0xff]  ;;  %v5233_v14 = vunpack.c.h.bf16 %v4871_v1  ;;  %v5232_v28 = vunpack.c.l.bf16 %v4871_v1  ;;  %v5257_v1 = vunpack.c.h.bf16 %v4883_v57 }
 0x2c7   :  { %6407 = vmatprep.subr.mxu0 %v12683_v20  ;;  %v11524_v45 = vpop.f32.mrf.mxu1  ;;  %6023 = vmatmul.mubr.f32.gmra.mxu0 %v4912_v58  ;;  %v4679_v37 = vmul.f32 %v4398_v49, %v3527_v55  ;;  %v4961_v11 = vunpack.c.h.bf16 %v4735_v31  ;;  %v5244_v55 = vunpack.c.l.bf16 %v4877_v38  ;;  %v4704_v38 = vld [vmem:[%s12671_s4 + $0x10] sm:$0xff] }
 0x2c8   :  { %6408 = vmatpush1.msra.mxu0 %v4683_v13  ;;  %6027 = vmatprep.mubr.f32.mxu0 %v4925_v33  ;;  %v4948_v13 = vunpack.c.l.bf16 %v4729_v27  ;;  %v11557_v33 = vpop.permute.xlu1 %4252  ;;  %v3523_v27 = vld [vmem:[%s12672_s3 + $0x528] sm:$0xff] }
 0x2c9   :  { %5693 = vmatmul.mubr.f32.gmra.mxu1 %v5196_v9  ;;  %6409 = vmatprep.subr.mxu0 %v12683_v20  ;;  %v5411_v7 = vpop.f32.mrf.mxu1 }
 0x2ca   :  { %5697 = vmatprep.mubr.f32.mxu1 %v5209_v40  ;;  %6410 = vmatpush1.msra.mxu0 %v4682_v0  ;;  %v4393_v62 = vpop.permute.xlu0 %4392  ;;  %v3524_v40 = vld [vmem:[%s12672_s3 + $0x530] sm:$0xff]  ;;  %v4741_v0 = vld [vmem:[%s12671_s4 + $0x138] sm:$0xff] }
 0x2cb   :  { %6411 = vmatprep.subr.mxu0 %v12683_v20  ;;  %v11542_v23 = vpop.f32.mrf.mxu1  ;;  %6028 = vmatmul.mubr.f32.gmra.mxu0 %v4924_v54  ;;  %v4678_v8 = vmul.f32 %v4393_v62, %v3526_v18  ;;  %v4889_v18 = vld [vmem:[%s12671_s4 + $0x5d8] sm:$0xff] }
 0x2cc   :  { %6412 = vmatpush1.msra.mxu0 %v4681_v39  ;;  %6032 = vmatprep.mubr.f32.mxu0 %v4937_v63  ;;  %v4960_v39 = vunpack.c.l.bf16 %v4735_v31  ;;  %v3522_v31 = vld [vmem:[%s12672_s3 + $0x520] sm:$0xff] }
 0x2cd   :  { %5698 = vmatmul.mubr.f32.gmra.mxu1 %v5208_v17  ;;  %6413 = vmatprep.subr.mxu0 %v12683_v20  ;;  %v5416_v19 = vpop.f32.mrf.mxu1  ;;  %v4973_v17 = vunpack.c.h.bf16 %v4741_v0 }
 0x2ce   :  { %5702 = vmatprep.mubr.f32.mxu1 %v5221_v30  ;;  %6414 = vmatpush1.msra.mxu0 %v4680_v61  ;;  %v4388_v47 = vpop.permute.xlu0 %4387  ;;  %v4747_v30 = vld [vmem:[%s12671_s4 + $0x168] sm:$0xff]  ;;  %v11579_v61 = vpop.permute.xlu1 %4262  ;;  %v5256_v19 = vunpack.c.l.bf16 %v4883_v57 }
 0x2cf   :  { %6415 = vmatprep.subr.mxu0 %v12683_v20  ;;  %v11555_v58 = vpop.f32.mrf.mxu1  ;;  %6033 = vmatmul.mubr.f32.gmra.mxu0 %v4936_v60  ;;  %v4677_v9 = vmul.f32 %v4388_v47, %v3525_v50  ;;  %v4759_v57 = vld [vmem:[%s12671_s4 + $0x1c8] sm:$0xff] }
 0x2d0   :  { %6416 = vmatpush1.msra.mxu0 %v4679_v37  ;;  %6037 = vmatprep.mubr.f32.mxu0 %v4949_v3  ;;  %v4972_v37 = vunpack.c.l.bf16 %v4741_v0 }
 0x2d1   :  { %5703 = vmatmul.mubr.f32.gmra.mxu1 %v5220_v41  ;;  %6417 = vmatprep.subr.mxu0 %v12683_v20  ;;  %v5421_v12 = vpop.f32.mrf.mxu1  ;;  %v4985_v41 = vunpack.c.h.bf16 %v4747_v30 }
 0x2d2   :  { %5707 = vmatprep.mubr.f32.mxu1 %v5233_v14  ;;  %6418 = vmatpush1.msra.mxu0 %v4678_v8  ;;  %v4383_v49 = vpop.permute.xlu0 %4382  ;;  %v4753_v14 = vld [vmem:[%s12671_s4 + $0x198] sm:$0xff]  ;;  %v5269_v8 = vunpack.c.h.bf16 %v4889_v18 }
 0x2d3   :  { %6419 = vmatprep.subr.mxu0 %v12683_v20  ;;  %v11570_v54 = vpop.f32.mrf.mxu1  ;;  %6038 = vmatmul.mubr.f32.gmra.mxu0 %v4948_v13  ;;  %v4676_v63 = vmul.f32 %v4383_v49, %v3524_v40  ;;  %v4997_v12 = vunpack.c.h.bf16 %v4753_v14  ;;  %v5268_v40 = vunpack.c.l.bf16 %v4889_v18  ;;  %v4899_v49 = vunpack.c.h.bf16 %v4704_v38  ;;  %v3520_v18 = vld [vmem:[%s12672_s3 + $0x510] sm:$0xff] }
 0x2d4   :  { %6420 = vmatpush1.msra.mxu0 %v4677_v9  ;;  %6042 = vmatprep.mubr.f32.mxu0 %v4961_v11  ;;  %v4984_v9 = vunpack.c.l.bf16 %v4747_v30  ;;  %v11599_v11 = vpop.permute.xlu1 %4307  ;;  %v4898_v30 = vunpack.c.l.bf16 %v4704_v38 }
 0x2d5   :  { %5708 = vmatmul.mubr.f32.gmra.mxu1 %v5232_v28  ;;  %v5426_v7 = vpop.f32.mrf.mxu1  ;;  %6421 = vmatprep.subr.mxu0 %v12683_v20 }
 0x2d6   :  { %5712 = vmatprep.mubr.f32.mxu1 %v5245_v2  ;;  %6422 = vmatpush1.msra.mxu0 %v4676_v63  ;;  %v3521_v2 = vld [vmem:[%s12672_s3 + $0x518] sm:$0xff] }
 0x2d7   :  { %v4378_v62 = vpop.permute.xlu0 %4377  ;;  %v11584_v60 = vpop.f32.mrf.mxu1  ;;  %6423 = vmatprep.subr.mxu0 %v12683_v20  ;;  %6043 = vmatmul.mubr.f32.gmra.mxu0 %v4960_v39  ;;  %v4710_v39 = vld [vmem:[%s12671_s4 + $0x40] sm:$0xff] }
 0x2d8   :  { %v4675_v3 = vmul.f32 %v4378_v62, %v3523_v27  ;;  %6047 = vmatprep.mubr.f32.mxu0 %v4973_v17  ;;  %v5009_v27 = vunpack.c.h.bf16 %v4759_v57  ;;  %v4765_v62 = vld [vmem:[%s12671_s4 + $0x1f8] sm:$0xff]  ;;  %v4910_v38 = vunpack.c.l.bf16 %v4710_v39 }
 0x2d9   :  { %5713 = vmatmul.mubr.f32.gmra.mxu1 %v5244_v55  ;;  %v5431_v50 = vpop.f32.mrf.mxu1  ;;  %v4996_v55 = vunpack.c.l.bf16 %v4753_v14 }
 0x2da   :  { %5717 = vmatprep.mubr.f32.mxu1 %v5257_v1  ;;  %6424 = vmatpush1.msra.mxu0 %v4675_v3  ;;  %v4911_v3 = vunpack.c.h.bf16 %v4710_v39 }
 0x2db   :  { %v4373_v47 = vpop.permute.xlu0 %4372  ;;  %v11596_v13 = vpop.f32.mrf.mxu1  ;;  %6425 = vmatprep.subr.mxu0 %v12683_v20  ;;  %6048 = vmatmul.mubr.f32.gmra.mxu0 %v4972_v37 }
 0x2dc   :  { %v4674_v28 = vmul.f32 %v4373_v47, %v3522_v31  ;;  %6052 = vmatprep.mubr.f32.mxu0 %v4985_v41  ;;  %v11619_v37 = vpop.permute.xlu1 %4317  ;;  %v4716_v41 = vld [vmem:[%s12671_s4 + $0x70] sm:$0xff]  ;;  %v5008_v31 = vunpack.c.l.bf16 %v4759_v57  ;;  %v5020_v57 = vunpack.c.l.bf16 %v4765_v62 }
 0x2dd   :  { %5718 = vmatmul.mubr.f32.gmra.mxu1 %v5256_v19  ;;  %v5436_v0 = vpop.f32.mrf.mxu1 }
 0x2de   :  { %5722 = vmatprep.mubr.f32.mxu1 %v5269_v8  ;;  %6426 = vmatpush1.msra.mxu0 %v4674_v28  ;;  %v5021_v8 = vunpack.c.h.bf16 %v4765_v62  ;;  %v4771_v28 = vld [vmem:[%s12671_s4 + $0x228] sm:$0xff]  ;;  %v4728_v62 = vld [vmem:[%s12671_s4 + $0xd0] sm:$0xff] }
 0x2df   :  { %v4368_v63 = vpop.permute.xlu0 %4367  ;;  %v11610_v17 = vpop.f32.mrf.mxu1  ;;  %6427 = vmatprep.subr.mxu0 %v12683_v20  ;;  %6053 = vmatmul.mubr.f32.gmra.mxu0 %v4984_v9  ;;  %v3519_v9 = vld [vmem:[%s12672_s3 + $0x508] sm:$0xff] }
 0x2e0   :  { %12691 = vst [vmem:[#allocation3_spill] sm:$0xff] %v11610_v17  ;;  %v4673_v7 = vmul.f32 %v4368_v63, %v3521_v2  ;;  %6057 = vmatprep.mubr.f32.mxu0 %v4997_v12  ;;  %v4923_v12 = vunpack.c.h.bf16 %v4716_v41  ;;  %v5033_v63 = vunpack.c.h.bf16 %v4771_v28 }
 0x2e1   :  { %5723 = vmatmul.mubr.f32.gmra.mxu1 %v5268_v40  ;;  %v5441_v1 = vpop.f32.mrf.mxu1  ;;  %v4722_v40 = vld [vmem:[%s12671_s4 + $0xa0] sm:$0xff] }
 0x2e2   :  { %5792 = vmatprep.mubr.f32.mxu1 %v4899_v49  ;;  %6428 = vmatpush1.msra.mxu0 %v4673_v7  ;;  %v11639_v49 = vpop.permute.xlu1 %4312  ;;  %v4935_v1 = vunpack.c.h.bf16 %v4722_v40 }
 0x2e3   :  { %v4363_v19 = vpop.permute.xlu0 %4362  ;;  %v11624_v50 = vpop.f32.mrf.mxu1  ;;  %6429 = vmatprep.subr.mxu0 %v12683_v20  ;;  %6058 = vmatmul.mubr.f32.gmra.mxu0 %v4996_v55  ;;  %v4922_v55 = vunpack.c.l.bf16 %v4716_v41 }
 0x2e4   :  { %12692 = vst [vmem:[#allocation7_spill] sm:$0xff] %v11624_v50  ;;  %v4672_v14 = vmul.f32 %v4363_v19, %v3520_v18  ;;  %6062 = vmatprep.mubr.f32.mxu0 %v5009_v27  ;;  %v3501_v27 = vld [vmem:[%s12672_s3 + $0x478] sm:$0xff]  ;;  %v3500_v18 = vld [vmem:[%s12672_s3 + $0x470] sm:$0xff]  ;;  %v5032_v19 = vunpack.c.l.bf16 %v4771_v28  ;;  %v3498_v28 = vld [vmem:[%s12672_s3 + $0x460] sm:$0xff] }
 0x2e5   :  { %5793 = vmatmul.mubr.f32.vlgmr.msra.gmra.mxu1 %v4898_v30  ;;  %v5446_v47 = vpop.f32.mrf.mxu1  ;;  %v4777_v30 = vld [vmem:[%s12671_s4 + $0x258] sm:$0xff]  ;;  %v4814_v50 = vld [vmem:[%s12671_s4 + $0x380] sm:$0xff] }
 0x2e6   :  { %5797 = vmatprep.mubr.f32.mxu1 %v4911_v3  ;;  %6430 = vmatpush1.msra.mxu0 %v4672_v14  ;;  %v5045_v14 = vunpack.c.h.bf16 %v4777_v30 }
 0x2e7   :  { %v4358_v0 = vpop.permute.xlu0 %4357  ;;  %v11636_v2 = vpop.f32.mrf.mxu1  ;;  %6431 = vmatprep.subr.mxu0 %v12683_v20  ;;  %6063 = vmatmul.mubr.f32.gmra.mxu0 %v5008_v31 }
 0x2e8   :  { %12693 = vst [vmem:[#allocation4_spill] sm:$0xff] %v11636_v2  ;;  %v4671_v39 = vmul.f32 %v4358_v0, %v3519_v9  ;;  %6067 = vmatprep.mubr.f32.mxu0 %v5021_v8  ;;  %v3499_v8 = vld [vmem:[%s12672_s3 + $0x468] sm:$0xff]  ;;  %v4652_v9 = vmul.f32 %v11579_v61, %v3500_v18  ;;  %v4947_v0 = vunpack.c.h.bf16 %v4728_v62  ;;  %v5044_v61 = vunpack.c.l.bf16 %v4777_v30  ;;  %v3497_v18 = vld [vmem:[%s12672_s3 + $0x458] sm:$0xff]  ;;  %v4802_v2 = vld [vmem:[%s12671_s4 + $0x320] sm:$0xff] }
 0x2e9   :  { %5798 = vmatmul.mubr.f32.gmra.mxu1 %v4910_v38  ;;  %v5451_v7 = vpop.f32.mrf.mxu1  ;;  %v4934_v38 = vunpack.c.l.bf16 %v4722_v40  ;;  %v3518_v40 = vld [vmem:[%s12672_s3 + $0x500] sm:$0xff]  ;;  %v4650_v30 = vmul.f32 %v11557_v33, %v3498_v28 }
 0x2ea   :  { %5802 = vmatprep.mubr.f32.mxu1 %v4923_v12  ;;  %6432 = vmatpush1.msra.mxu0 %v4671_v39  ;;  %v11660_v12 = vpop.permute.xlu1 %4327  ;;  %v4946_v7 = vunpack.c.l.bf16 %v4728_v62  ;;  %v4740_v62 = vld [vmem:[%s12671_s4 + $0x130] sm:$0xff] }
 0x2eb   :  { %v4268_v3 = vpop.permute.xlu0 %4267  ;;  %v11653_v41 = vpop.f32.mrf.mxu1  ;;  %6433 = vmatprep.subr.mxu0 %v12683_v20  ;;  %6068 = vmatmul.mubr.f32.gmra.mxu0 %v5020_v57  ;;  %v4734_v57 = vld [vmem:[%s12671_s4 + $0x100] sm:$0xff] }
 0x2ec   :  { %12694 = vst [vmem:[#allocation8_spill] sm:$0xff] %v11653_v41  ;;  %v4653_v31 = vmul.f32 %v4268_v3, %v3501_v27  ;;  %6072 = vmatprep.mubr.f32.mxu0 %v5033_v63  ;;  %v4651_v63 = vmul.f32 %v11533_v15, %v3499_v8  ;;  %v4959_v15 = vunpack.c.h.bf16 %v4734_v57  ;;  %v4790_v41 = vld [vmem:[%s12671_s4 + $0x2c0] sm:$0xff] }
 0x2ed   :  { %5803 = vmatmul.mubr.f32.gmra.mxu1 %v4922_v55  ;;  %v5456_v47 = vpop.f32.mrf.mxu1  ;;  %v4783_v55 = vld [vmem:[%s12671_s4 + $0x288] sm:$0xff] }
 0x2ee   :  { %5807 = vmatprep.mubr.f32.mxu1 %v4935_v1  ;;  %6179 = vmatpush1.msra.mxu1 %v4653_v31  ;;  %v11692_v8 = vpop.permute.xlu1 %4322  ;;  %v5056_v33 = vunpack.c.l.bf16 %v4783_v55  ;;  %v4958_v47 = vunpack.c.l.bf16 %v4734_v57  ;;  %v4746_v57 = vld [vmem:[%s12671_s4 + $0x160] sm:$0xff] }
 0x2ef   :  { %v11671_v39 = vpop.f32.mrf.mxu1  ;;  %6180 = vmatprep.subr.mxu1 %v12683_v20  ;;  %6073 = vmatmul.mubr.f32.gmra.mxu0 %v5032_v19  ;;  %v4789_v19 = vld [vmem:[%s12671_s4 + $0x2b8] sm:$0xff] }
 0x2f0   :  { %12695 = vst [vmem:[#allocation2_spill] sm:$0xff] %v11671_v39  ;;  %6181 = vmatpush1.msra.mxu1 %v4652_v9  ;;  %6077 = vmatprep.mubr.f32.mxu0 %v5045_v14  ;;  %v5057_v14 = vunpack.c.h.bf16 %v4783_v55  ;;  %v3549_v9 = vld [vmem:[%s12672_s3 + $0x5f8] sm:$0xff]  ;;  %v5069_v28 = vunpack.c.h.bf16 %v4789_v19  ;;  %v4778_v39 = vld [vmem:[%s12671_s4 + $0x260] sm:$0xff] }
 0x2f1   :  { %5808 = vmatmul.mubr.f32.gmra.mxu1 %v4934_v38  ;;  %v4353_v27 = vpop.permute.xlu0 %4352  ;;  %v5461_v1 = vpop.f32.mrf.mxu1  ;;  %6182 = vmatprep.subr.mxu1 %v12683_v20  ;;  %v4649_v38 = vmul.f32 %v11475_v29, %v3497_v18  ;;  %v11706_v29 = vld [vmem:[%s12671_s4 + $0x2e8] sm:$0xff] }
 0x2f2   :  { %5812 = vmatprep.mubr.f32.mxu1 %v4947_v0  ;;  %v4670_v3 = vmul.f32 %v4353_v27, %v3518_v40  ;;  %6183 = vmatpush1.msra.mxu1 %v4651_v63  ;;  %v3496_v40 = vld [vmem:[%s12672_s3 + $0x450] sm:$0xff]  ;;  %v5068_v27 = vunpack.c.l.bf16 %v4789_v19  ;;  %v3495_v1 = vld [vmem:[%s12672_s3 + $0x448] sm:$0xff]  ;;  %v3494_v19 = vld [vmem:[%s12672_s3 + $0x440] sm:$0xff] }
 0x2f3   :  { %v11689_v31 = vpop.f32.mrf.mxu1  ;;  %6184 = vmatprep.subr.mxu1 %v12683_v20  ;;  %6078 = vmatmul.mubr.f32.gmra.mxu0 %v5044_v61  ;;  %v4971_v61 = vunpack.c.h.bf16 %v4740_v62  ;;  %v4648_v18 = vmul.f32 %v11508_v24, %v3496_v40  ;;  %v3548_v24 = vld [vmem:[%s12672_s3 + $0x5f0] sm:$0xff]  ;;  %v4801_v40 = vld [vmem:[%s12671_s4 + $0x318] sm:$0xff] }
 0x2f4   :  { %12696 = vst [vmem:[#allocation5_spill] sm:$0xff] %v11689_v31  ;;  %6434 = vmatpush1.msra.mxu0 %v4670_v3  ;;  %6185 = vmatpush1.msra.mxu1 %v4650_v30  ;;  %v4970_v30 = vunpack.c.l.bf16 %v4740_v62  ;;  %v5081_v3 = vunpack.c.h.bf16 %v11706_v29 }
 0x2f5   :  { %5813 = vmatmul.mubr.f32.gmra.mxu1 %v4946_v7  ;;  %v5466_v0 = vpop.f32.mrf.mxu1  ;;  %6186 = vmatprep.subr.mxu1 %v12683_v20 }
 0x2f6   :  { %5817 = vmatprep.mubr.f32.mxu1 %v4959_v15  ;;  %6435 = vmatprep.subr.mxu0 %v12683_v20 }
 0x2f7   :  { %v4508_v63 = vpop.permute.xlu0 %4507  ;;  %6187 = vmatpush1.msra.mxu1 %v4649_v38  ;;  %v11711_v55 = vpop.f32.mrf.mxu1  ;;  %6082 = vmatprep.mubr.f32.mxu0 %v5057_v14  ;;  %v4983_v14 = vunpack.c.h.bf16 %v4746_v57 }
 0x2f8   :  { %12697 = vst [vmem:[#allocation6_spill] sm:$0xff] %v11711_v55  ;;  %v4701_v7 = vmul.f32 %v4508_v63, %v3549_v9  ;;  %6188 = vmatprep.subr.mxu1 %v12683_v20  ;;  %6083 = vmatmul.mubr.f32.gmra.mxu0 %v5056_v33  ;;  %v11719_v38 = vpop.permute.xlu1 %4337  ;;  %v4752_v33 = vld [vmem:[%s12671_s4 + $0x190] sm:$0xff]  ;;  %v4982_v9 = vunpack.c.l.bf16 %v4746_v57  ;;  %v4646_v63 = vmul.f32 %v11455_v26, %v3494_v19  ;;  %v4758_v57 = vld [vmem:[%s12671_s4 + $0x1c0] sm:$0xff] }
 0x2f9   :  { %5818 = vmatmul.mubr.f32.gmra.mxu1 %v4958_v47  ;;  %v5471_v15 = vpop.f32.mrf.mxu1  ;;  %6087 = vmatprep.mubr.f32.mxu0 %v5069_v28  ;;  %v4647_v47 = vmul.f32 %v11420_v51, %v3495_v1  ;;  %v4995_v51 = vunpack.c.h.bf16 %v4752_v33  ;;  %v5080_v1 = vunpack.c.l.bf16 %v11706_v29  ;;  %v3492_v29 = vld [vmem:[%s12672_s3 + $0x430] sm:$0xff]  ;;  %v5007_v19 = vunpack.c.h.bf16 %v4758_v57 }
 0x2fa   :  { %5822 = vmatprep.mubr.f32.mxu1 %v4971_v61  ;;  %6436 = vmatpush2.msra.mxu0 %v4701_v7  ;;  %v3493_v61 = vld [vmem:[%s12672_s3 + $0x438] sm:$0xff]  ;;  %v4994_v15 = vunpack.c.l.bf16 %v4752_v33  ;;  %v4764_v33 = vld [vmem:[%s12671_s4 + $0x1f0] sm:$0xff] }
 0x2fb   :  { %6189 = vmatpush1.msra.mxu1 %v4648_v18  ;;  %6437 = vmatprep.subr.mxu0 %v12683_v20  ;;  %v11731_v62 = vpop.f32.mrf.mxu1  ;;  %v4645_v26 = vmul.f32 %v11381_v59, %v3493_v61  ;;  %v11763_v59 = vld [vmem:[%s12671_s4 + $0x348] sm:$0xff]  ;;  %v4644_v61 = vmul.f32 %v11400_v52, %v3492_v29  ;;  %v3546_v52 = vld [vmem:[%s12672_s3 + $0x5e0] sm:$0xff] }
 0x2fc   :  { %12698 = vst [vmem:[#allocation9_spill] sm:$0xff] %v11731_v62  ;;  %6190 = vmatprep.subr.mxu1 %v12683_v20  ;;  %6088 = vmatmul.mubr.f32.gmra.mxu0 %v5068_v27  ;;  %v11749_v18 = vpop.permute.xlu1 %4332 }
 0x2fd   :  { %5823 = vmatmul.mubr.f32.gmra.mxu1 %v4970_v30  ;;  %v4503_v0 = vpop.permute.xlu0 %4502  ;;  %v5476_v28 = vpop.f32.mrf.mxu1  ;;  %6092 = vmatprep.mubr.f32.mxu0 %v5081_v3  ;;  %v5093_v30 = vunpack.c.h.bf16 %v4801_v40  ;;  %v3547_v3 = vld [vmem:[%s12672_s3 + $0x5e8] sm:$0xff] }
 0x2fe   :  { %5827 = vmatprep.mubr.f32.mxu1 %v4983_v14  ;;  %v4700_v7 = vmul.f32 %v4503_v0, %v3548_v24  ;;  %6191 = vmatpush1.msra.mxu1 %v4647_v47  ;;  %v5092_v0 = vunpack.c.l.bf16 %v4801_v40  ;;  %v3491_v28 = vld [vmem:[%s12672_s3 + $0x428] sm:$0xff]  ;;  %v3490_v40 = vld [vmem:[%s12672_s3 + $0x420] sm:$0xff] }
 0x2ff   :  { %6192 = vmatprep.subr.mxu1 %v12683_v20  ;;  %v11746_v27 = vpop.f32.mrf.mxu1 }
 0x300   :  { %12699 = vst [vmem:[#allocation10_spill] sm:$0xff] %v11746_v27  ;;  %6438 = vmatpush2.msra.mxu0 %v4700_v7  ;;  %6193 = vmatpush1.msra.mxu1 %v4646_v63  ;;  %v5006_v63 = vunpack.c.l.bf16 %v4758_v57  ;;  %v5105_v7 = vunpack.c.h.bf16 %v11763_v59 }
 0x301   :  { %5828 = vmatmul.mubr.f32.gmra.mxu1 %v4982_v9  ;;  %6194 = vmatprep.subr.mxu1 %v12683_v20  ;;  %v5481_v14 = vpop.f32.mrf.mxu1 }
 0x302   :  { %5832 = vmatprep.mubr.f32.mxu1 %v4995_v51  ;;  %6439 = vmatprep.subr.mxu0 %v12683_v20 }
 0x303   :  { %v4498_v24 = vpop.permute.xlu0 %4497  ;;  %6195 = vmatpush1.msra.mxu1 %v4645_v26  ;;  %v11768_v47 = vpop.f32.mrf.mxu1  ;;  %6093 = vmatmul.mubr.f32.gmra.mxu0 %v5080_v1  ;;  %v5019_v1 = vunpack.c.h.bf16 %v4764_v33 }
 0x304   :  { %12700 = vst [vmem:[#allocation11_spill] sm:$0xff] %v11768_v47  ;;  %v4699_v9 = vmul.f32 %v4498_v24, %v3547_v3  ;;  %6196 = vmatprep.subr.mxu1 %v12683_v20  ;;  %6097 = vmatprep.mubr.f32.mxu0 %v5093_v30  ;;  %v11776_v26 = vpop.permute.xlu1 %4347  ;;  %v4770_v30 = vld [vmem:[%s12671_s4 + $0x220] sm:$0xff]  ;;  %v5018_v3 = vunpack.c.l.bf16 %v4764_v33  ;;  %v3489_v24 = vld [vmem:[%s12672_s3 + $0x418] sm:$0xff]  ;;  %v4776_v33 = vld [vmem:[%s12671_s4 + $0x250] sm:$0xff] }
 0x305   :  { %5833 = vmatmul.mubr.f32.gmra.mxu1 %v4994_v15  ;;  %v5486_v51 = vpop.f32.mrf.mxu1  ;;  %v4643_v15 = vmul.f32 %v11343_v36, %v3491_v28  ;;  %v5031_v36 = vunpack.c.h.bf16 %v4770_v30 }
 0x306   :  { %5837 = vmatprep.mubr.f32.mxu1 %v5007_v19  ;;  %6440 = vmatpush2.msra.mxu0 %v4699_v9  ;;  %v4813_v19 = vld [vmem:[%s12671_s4 + $0x378] sm:$0xff]  ;;  %v4642_v9 = vmul.f32 %v11361_v48, %v3490_v40  ;;  %v4641_v48 = vmul.f32 %v11299_v6, %v3489_v24  ;;  %v11820_v6 = vld [vmem:[%s12671_s4 + $0x3a8] sm:$0xff] }
 0x307   :  { %6197 = vmatpush1.msra.mxu1 %v4644_v61  ;;  %6441 = vmatprep.subr.mxu0 %v12683_v20  ;;  %v11788_v57 = vpop.f32.mrf.mxu1  ;;  %v5104_v61 = vunpack.c.l.bf16 %v11763_v59  ;;  %v5117_v51 = vunpack.c.h.bf16 %v4813_v19  ;;  %v3488_v59 = vld [vmem:[%s12672_s3 + $0x410] sm:$0xff]  ;;  %v3487_v24 = vld [vmem:[%s12672_s3 + $0x408] sm:$0xff] }
 0x308   :  { %12701 = vst [vmem:[#allocation12_spill] sm:$0xff] %v11788_v57  ;;  %6198 = vmatprep.subr.mxu1 %v12683_v20  ;;  %6098 = vmatmul.mubr.f32.gmra.mxu0 %v5092_v0 }
 0x309   :  { %5838 = vmatmul.mubr.f32.gmra.mxu1 %v5006_v63  ;;  %v4493_v14 = vpop.permute.xlu0 %4492  ;;  %v5491_v29 = vpop.f32.mrf.mxu1  ;;  %6102 = vmatprep.mubr.f32.mxu0 %v5105_v7  ;;  %v5030_v7 = vunpack.c.l.bf16 %v4770_v30 }
 0x30a   :  { %5842 = vmatprep.mubr.f32.mxu1 %v5019_v1  ;;  %v4698_v28 = vmul.f32 %v4493_v14, %v3546_v52  ;;  %6199 = vmatpush1.msra.mxu1 %v4643_v15  ;;  %v11806_v63 = vpop.permute.xlu1 %4342  ;;  %v3545_v1 = vld [vmem:[%s12672_s3 + $0x5d8] sm:$0xff]  ;;  %v5043_v52 = vunpack.c.h.bf16 %v4776_v33  ;;  %v4782_v15 = vld [vmem:[%s12671_s4 + $0x280] sm:$0xff]  ;;  %v5116_v29 = vunpack.c.l.bf16 %v4813_v19 }
 0x30b   :  { %6200 = vmatprep.subr.mxu1 %v12683_v20  ;;  %v11803_v0 = vpop.f32.mrf.mxu1  ;;  %v3486_v19 = vld [vmem:[%s12672_s3 + $0x400] sm:$0xff] }
 0x30c   :  { %12702 = vst [vmem:[#allocation13_spill] sm:$0xff] %v11803_v0  ;;  %6442 = vmatpush2.msra.mxu0 %v4698_v28  ;;  %6201 = vmatpush1.msra.mxu1 %v4642_v9  ;;  %v4640_v9 = vmul.f32 %v11324_v21, %v3488_v59  ;;  %v4788_v21 = vld [vmem:[%s12671_s4 + $0x2b0] sm:$0xff] }
 0x30d   :  { %5843 = vmatmul.mubr.f32.gmra.mxu1 %v5018_v3  ;;  %6202 = vmatprep.subr.mxu1 %v12683_v20  ;;  %v5496_v40 = vpop.f32.mrf.mxu1 }
 0x30e   :  { %5847 = vmatprep.mubr.f32.mxu1 %v5031_v36  ;;  %6443 = vmatprep.subr.mxu0 %v12683_v20  ;;  %v5042_v36 = vunpack.c.l.bf16 %v4776_v33  ;;  %v5129_v40 = vunpack.c.h.bf16 %v11820_v6 }
 0x30f   :  { %v4488_v30 = vpop.permute.xlu0 %4487  ;;  %6203 = vmatpush1.msra.mxu1 %v4641_v48  ;;  %v11825_v3 = vpop.f32.mrf.mxu1  ;;  %6103 = vmatmul.mubr.f32.gmra.mxu0 %v5104_v61  ;;  %v5055_v61 = vunpack.c.h.bf16 %v4782_v15 }
 0x310   :  { %12703 = vst [vmem:[#allocation14_spill] sm:$0xff] %v11825_v3  ;;  %v4697_v14 = vmul.f32 %v4488_v30, %v3545_v1  ;;  %6204 = vmatprep.subr.mxu1 %v12683_v20  ;;  %6107 = vmatprep.mubr.f32.mxu0 %v5117_v51  ;;  %v11833_v48 = vpop.permute.xlu1 %4302  ;;  %v3544_v51 = vld [vmem:[%s12672_s3 + $0x5d0] sm:$0xff]  ;;  %v5054_v1 = vunpack.c.l.bf16 %v4782_v15  ;;  %v4825_v30 = vld [vmem:[%s12671_s4 + $0x3d8] sm:$0xff]  ;;  %v4794_v15 = vld [vmem:[%s12671_s4 + $0x2e0] sm:$0xff] }
 0x311   :  { %5848 = vmatmul.mubr.f32.gmra.mxu1 %v5030_v7  ;;  %v5501_v28 = vpop.f32.mrf.mxu1  ;;  %v4639_v7 = vmul.f32 %v11252_v53, %v3487_v24  ;;  %v5067_v24 = vunpack.c.h.bf16 %v4788_v21 }
 0x312   :  { %5852 = vmatprep.mubr.f32.mxu1 %v5043_v52  ;;  %6444 = vmatpush2.msra.mxu0 %v4697_v14  ;;  %v4638_v14 = vmul.f32 %v11275_v34, %v3486_v19  ;;  %v5141_v34 = vunpack.c.h.bf16 %v4825_v30  ;;  %v3543_v19 = vld [vmem:[%s12672_s3 + $0x5c8] sm:$0xff] }
 0x313   :  { %6205 = vmatpush1.msra.mxu1 %v4640_v9  ;;  %6445 = vmatprep.subr.mxu0 %v12683_v20  ;;  %v11845_v33 = vpop.f32.mrf.mxu1  ;;  %v3517_v9 = vld [vmem:[%s12672_s3 + $0x4f8] sm:$0xff] }
 0x314   :  { %6206 = vmatprep.subr.mxu1 %v12683_v20  ;;  %6108 = vmatmul.mubr.f32.gmra.mxu0 %v5116_v29  ;;  %v11863_v28 = vpop.permute.xlu1 %4297 }
 0x315   :  { %5853 = vmatmul.mubr.f32.gmra.mxu1 %v5042_v36  ;;  %v4483_v59 = vpop.permute.xlu0 %4482  ;;  %v5571_v52 = vpop.f32.mrf.mxu1  ;;  %6112 = vmatprep.mubr.f32.mxu0 %v5129_v40  ;;  %v5128_v36 = vunpack.c.l.bf16 %v11820_v6  ;;  %v4669_v40 = vmul.f32 %v11776_v26, %v3517_v9  ;;  %v3516_v6 = vld [vmem:[%s12672_s3 + $0x4f0] sm:$0xff]  ;;  %v11877_v26 = vld [vmem:[%s12671_s4 + $0x408] sm:$0xff] }
 0x316   :  { %5857 = vmatprep.mubr.f32.mxu1 %v5055_v61  ;;  %v4696_v53 = vmul.f32 %v4483_v59, %v3544_v51  ;;  %6207 = vmatpush1.msra.mxu1 %v4639_v7  ;;  %v5066_v61 = vunpack.c.l.bf16 %v4788_v21  ;;  %v5079_v7 = vunpack.c.h.bf16 %v4794_v15  ;;  %v3515_v9 = vld [vmem:[%s12672_s3 + $0x4e8] sm:$0xff] }
 0x317   :  { %6208 = vmatprep.subr.mxu1 %v12683_v20  ;;  %v11860_v29 = vpop.f32.mrf.mxu1 }
 0x318   :  { %6446 = vmatpush2.msra.mxu0 %v4696_v53  ;;  %6209 = vmatpush1.msra.mxu1 %v4638_v14  ;;  %v5140_v14 = vunpack.c.l.bf16 %v4825_v30  ;;  %v4668_v53 = vmul.f32 %v11806_v63, %v3516_v6  ;;  %v11890_v3 = vpop.permute.xlu1 %4292  ;;  %v3542_v30 = vld [vmem:[%s12672_s3 + $0x5c0] sm:$0xff]  ;;  %v3513_v6 = vld [vmem:[%s12672_s3 + $0x4d8] sm:$0xff] }
 0x319   :  { %5858 = vmatmul.mubr.f32.gmra.mxu1 %v5054_v1  ;;  %6210 = vmatprep.subr.mxu1 %v12683_v20  ;;  %v5576_v51 = vpop.f32.mrf.mxu1  ;;  %v4800_v1 = vld [vmem:[%s12671_s4 + $0x310] sm:$0xff]  ;;  %v4806_v63 = vld [vmem:[%s12671_s4 + $0x340] sm:$0xff] }
 0x31a   :  { %5862 = vmatprep.mubr.f32.mxu1 %v5067_v24  ;;  %6447 = vmatprep.subr.mxu0 %v12683_v20  ;;  %v5078_v24 = vunpack.c.l.bf16 %v4794_v15  ;;  %v5153_v51 = vunpack.c.h.bf16 %v11877_v26 }
 0x31b   :  { %v4478_v21 = vpop.permute.xlu0 %4477  ;;  %6211 = vmatpush2.msra.mxu1 %v4669_v40  ;;  %v11882_v59 = vpop.f32.mrf.mxu1  ;;  %6113 = vmatmul.mubr.f32.gmra.mxu0 %v5128_v36  ;;  %v5091_v36 = vunpack.c.h.bf16 %v4800_v1 }
 0x31c   :  { %v4695_v52 = vmul.f32 %v4478_v21, %v3543_v19  ;;  %6212 = vmatprep.subr.mxu1 %v12683_v20  ;;  %6117 = vmatprep.mubr.f32.mxu0 %v5141_v34  ;;  %v3514_v34 = vld [vmem:[%s12672_s3 + $0x4e0] sm:$0xff]  ;;  %v5090_v21 = vunpack.c.l.bf16 %v4800_v1  ;;  %v4812_v1 = vld [vmem:[%s12671_s4 + $0x370] sm:$0xff] }
 0x31d   :  { %5863 = vmatmul.mubr.f32.gmra.mxu1 %v5066_v61  ;;  %v5581_v40 = vpop.f32.mrf.mxu1  ;;  %v4667_v61 = vmul.f32 %v11719_v38, %v3515_v9  ;;  %v3512_v38 = vld [vmem:[%s12672_s3 + $0x4d0] sm:$0xff] }
 0x31e   :  { %5867 = vmatprep.mubr.f32.mxu1 %v5079_v7  ;;  %6448 = vmatpush2.msra.mxu0 %v4695_v52  ;;  %v5103_v40 = vunpack.c.h.bf16 %v4806_v63 }
 0x31f   :  { %6213 = vmatpush2.msra.mxu1 %v4668_v53  ;;  %6449 = vmatprep.subr.mxu0 %v12683_v20  ;;  %v11902_v15 = vpop.f32.mrf.mxu1  ;;  %v4666_v53 = vmul.f32 %v11749_v18, %v3514_v34  ;;  %v5152_v18 = vunpack.c.l.bf16 %v11877_v26  ;;  %v5102_v34 = vunpack.c.l.bf16 %v4806_v63  ;;  %v3511_v26 = vld [vmem:[%s12672_s3 + $0x4c8] sm:$0xff]  ;;  %v4818_v63 = vld [vmem:[%s12671_s4 + $0x3a0] sm:$0xff] }
 0x320   :  { %v4473_v19 = vpop.permute.xlu0 %4472  ;;  %6214 = vmatprep.subr.mxu1 %v12683_v20  ;;  %6118 = vmatmul.mubr.f32.gmra.mxu0 %v5140_v14  ;;  %v3541_v14 = vld [vmem:[%s12672_s3 + $0x5b8] sm:$0xff] }
 0x321   :  { %v4694_v7 = vmul.f32 %v4473_v19, %v3542_v30  ;;  %5868 = vmatmul.mubr.f32.gmra.mxu1 %v5078_v24  ;;  %v5586_v52 = vpop.f32.mrf.mxu1  ;;  %6122 = vmatprep.mubr.f32.mxu0 %v5153_v51  ;;  %v4665_v24 = vmul.f32 %v11660_v12, %v3513_v6  ;;  %v11924_v51 = vpop.permute.xlu1 %4287  ;;  %v4837_v30 = vld [vmem:[%s12671_s4 + $0x438] sm:$0xff]  ;;  %v4664_v12 = vmul.f32 %v11692_v8, %v3512_v38  ;;  %v5115_v6 = vunpack.c.h.bf16 %v4812_v1 }
 0x322   :  { %5872 = vmatprep.mubr.f32.mxu1 %v5091_v36  ;;  %6215 = vmatpush2.msra.mxu1 %v4667_v61  ;;  %v5165_v52 = vunpack.c.h.bf16 %v4837_v30  ;;  %v4663_v8 = vmul.f32 %v11619_v37, %v3511_v26  ;;  %v5114_v38 = vunpack.c.l.bf16 %v4812_v1  ;;  %v3509_v37 = vld [vmem:[%s12672_s3 + $0x4b8] sm:$0xff]  ;;  %v5164_v1 = vunpack.c.l.bf16 %v4837_v30 }
 0x323   :  { %6450 = vmatpush2.msra.mxu0 %v4694_v7  ;;  %6216 = vmatprep.subr.mxu1 %v12683_v20  ;;  %v11920_v9 = vpop.f32.mrf.mxu1  ;;  %v3540_v7 = vld [vmem:[%s12672_s3 + $0x5b0] sm:$0xff] }
 0x324   :  { %6217 = vmatpush2.msra.mxu1 %v4666_v53  ;;  %6451 = vmatprep.subr.mxu0 %v12683_v20  ;;  %v3510_v53 = vld [vmem:[%s12672_s3 + $0x4c0] sm:$0xff] }
 0x325   :  { %v4468_v36 = vpop.permute.xlu0 %4467  ;;  %5873 = vmatmul.mubr.f32.gmra.mxu1 %v5090_v21  ;;  %6218 = vmatprep.subr.mxu1 %v12683_v20  ;;  %v5591_v61 = vpop.f32.mrf.mxu1  ;;  %v4662_v26 = vmul.f32 %v11639_v49, %v3510_v53  ;;  %v3538_v53 = vld [vmem:[%s12672_s3 + $0x5a0] sm:$0xff] }
 0x326   :  { %v4693_v19 = vmul.f32 %v4468_v36, %v3541_v14  ;;  %5877 = vmatprep.mubr.f32.mxu1 %v5103_v40  ;;  %6219 = vmatpush2.msra.mxu1 %v4665_v24  ;;  %v11949_v24 = vpop.permute.xlu1 %4282 }
 0x327   :  { %6220 = vmatprep.subr.mxu1 %v12683_v20  ;;  %v11942_v21 = vpop.f32.mrf.mxu1  ;;  %6123 = vmatmul.mubr.f32.gmra.mxu0 %v5152_v18  ;;  %v5127_v18 = vunpack.c.h.bf16 %v4818_v63 }
 0x328   :  { %6452 = vmatpush2.msra.mxu0 %v4693_v19  ;;  %6221 = vmatpush2.msra.mxu1 %v4664_v12  ;;  %v4824_v12 = vld [vmem:[%s12671_s4 + $0x3d0] sm:$0xff] }
 0x329   :  { %v4463_v40 = vpop.permute.xlu0 %4462  ;;  %5878 = vmatmul.mubr.f32.gmra.mxu1 %v5102_v34  ;;  %6222 = vmatprep.subr.mxu1 %v12683_v20  ;;  %v5596_v14 = vpop.f32.mrf.mxu1  ;;  %v3539_v34 = vld [vmem:[%s12672_s3 + $0x5a8] sm:$0xff]  ;;  %v3508_v19 = vld [vmem:[%s12672_s3 + $0x4b0] sm:$0xff] }
 0x32a   :  { %v4692_v36 = vmul.f32 %v4463_v40, %v3540_v7  ;;  %6453 = vmatprep.subr.mxu0 %v12683_v20  ;;  %5882 = vmatprep.mubr.f32.mxu1 %v5115_v6  ;;  %v5126_v7 = vunpack.c.l.bf16 %v4818_v63  ;;  %v5139_v40 = vunpack.c.h.bf16 %v4824_v12  ;;  %v4660_v63 = vmul.f32 %v11833_v48, %v3508_v19  ;;  %v3537_v19 = vld [vmem:[%s12672_s3 + $0x598] sm:$0xff] }
 0x32b   :  { %6223 = vmatpush2.msra.mxu1 %v4663_v8  ;;  %v11958_v61 = vpop.f32.mrf.mxu1  ;;  %6127 = vmatprep.mubr.f32.mxu0 %v5165_v52  ;;  %v4661_v52 = vmul.f32 %v11599_v11, %v3509_v37  ;;  %v3507_v8 = vld [vmem:[%s12672_s3 + $0x4a8] sm:$0xff]  ;;  %v4830_v11 = vld [vmem:[%s12671_s4 + $0x400] sm:$0xff]  ;;  %v5138_v37 = vunpack.c.l.bf16 %v4824_v12 }
 0x32c   :  { %6454 = vmatpush2.msra.mxu0 %v4692_v36  ;;  %6224 = vmatprep.subr.mxu1 %v12683_v20  ;;  %v3506_v36 = vld [vmem:[%s12672_s3 + $0x4a0] sm:$0xff]  ;;  %v4659_v48 = vmul.f32 %v11863_v28, %v3507_v8  ;;  %v4836_v28 = vld [vmem:[%s12671_s4 + $0x430] sm:$0xff] }
 0x32d   :  { %v4458_v6 = vpop.permute.xlu0 %4457  ;;  %5883 = vmatmul.mubr.f32.gmra.mxu1 %v5114_v38  ;;  %6455 = vmatprep.subr.mxu0 %v12683_v20  ;;  %v5601_v30 = vpop.f32.mrf.mxu1  ;;  %v4658_v12 = vmul.f32 %v11890_v3, %v3506_v36 }
 0x32e   :  { %v4691_v49 = vmul.f32 %v4458_v6, %v3539_v34  ;;  %6225 = vmatpush2.msra.mxu1 %v4662_v26  ;;  %5887 = vmatprep.mubr.f32.mxu1 %v5127_v18  ;;  %v4278_v38 = vpop.permute.xlu1 %4277  ;;  %v3505_v26 = vld [vmem:[%s12672_s3 + $0x498] sm:$0xff]  ;;  %v5151_v6 = vunpack.c.h.bf16 %v4830_v11 }
 0x32f   :  { %6226 = vmatprep.subr.mxu1 %v12683_v20  ;;  %6128 = vmatmul.mubr.f32.gmra.mxu0 %v5164_v1  ;;  %v4657_v8 = vmul.f32 %v11924_v51, %v3505_v26 }
 0x330   :  { %6227 = vmatpush2.msra.mxu1 %v4661_v52  ;;  %6456 = vmatpush2.msra.mxu0 %v4691_v49  ;;  %v11981_v14 = vpop.f32.mrf.mxu1  ;;  %v5150_v52 = vunpack.c.l.bf16 %v4830_v11  ;;  %v5163_v11 = vunpack.c.h.bf16 %v4836_v28 }
 0x331   :  { %v4453_v18 = vpop.permute.xlu0 %4452  ;;  %5888 = vmatmul.mubr.f32.gmra.mxu1 %v5126_v7  ;;  %6228 = vmatprep.subr.mxu1 %v12683_v20  ;;  %v3504_v7 = vld [vmem:[%s12672_s3 + $0x490] sm:$0xff] }
 0x332   :  { %v4690_v34 = vmul.f32 %v4453_v18, %v3538_v53  ;;  %6229 = vmatpush2.msra.mxu1 %v4660_v63  ;;  %6457 = vmatprep.subr.mxu0 %v12683_v20  ;;  %v5606_v1 = vpop.f32.mrf.mxu1  ;;  %v4273_v3 = vpop.permute.xlu1 %4272  ;;  %v3536_v63 = vld [vmem:[%s12672_s3 + $0x590] sm:$0xff]  ;;  %v4656_v51 = vmul.f32 %v11949_v24, %v3504_v7  ;;  %v4842_v18 = vld [vmem:[%s12671_s4 + $0x460] sm:$0xff] }
 0x333   :  { %6230 = vmatprep.subr.mxu1 %v12683_v20  ;;  %5892 = vmatprep.mubr.f32.mxu1 %v5139_v40  ;;  %v3503_v40 = vld [vmem:[%s12672_s3 + $0x488] sm:$0xff]  ;;  %v5162_v1 = vunpack.c.l.bf16 %v4836_v28  ;;  %v4848_v7 = vld [vmem:[%s12671_s4 + $0x490] sm:$0xff] }
 0x334   :  { %6231 = vmatpush2.msra.mxu1 %v4659_v48  ;;  %6458 = vmatpush2.msra.mxu0 %v4690_v34  ;;  %v3502_v48 = vld [vmem:[%s12672_s3 + $0x480] sm:$0xff]  ;;  %v4655_v24 = vmul.f32 %v4278_v38, %v3503_v40  ;;  %v4849_v40 = vld [vmem:[%s12671_s4 + $0x498] sm:$0xff] }
 0x335   :  { %v4448_v30 = vpop.permute.xlu0 %4447  ;;  %5893 = vmatmul.mubr.f32.gmra.mxu1 %v5138_v37  ;;  %6232 = vmatprep.subr.mxu1 %v12683_v20  ;;  %v12004_v49 = vpop.f32.mrf.mxu1  ;;  %v4843_v37 = vld [vmem:[%s12671_s4 + $0x468] sm:$0xff]  ;;  %v4654_v38 = vmul.f32 %v4273_v3, %v3502_v48  ;;  %v5187_v3 = vunpack.c.h.bf16 %v4848_v7 }
 0x336   :  { %v4689_v53 = vmul.f32 %v4448_v30, %v3537_v19  ;;  %6233 = vmatpush2.msra.mxu1 %v4658_v12  ;;  %6459 = vmatprep.subr.mxu0 %v12683_v20  ;;  %v3535_v19 = vld [vmem:[%s12672_s3 + $0x588] sm:$0xff]  ;;  %v5177_v12 = vunpack.c.h.bf16 %v4843_v37  ;;  %v4433_v28 = vpop.permute.xlu1 %4432 }
 0x337   :  { %6234 = vmatprep.subr.mxu1 %v12683_v20  ;;  %5897 = vmatprep.mubr.f32.mxu1 %v5151_v6  ;;  %v5611_v36 = vpop.f32.mrf.mxu1  ;;  %v5175_v6 = vunpack.c.h.bf16 %v4842_v18 }
 0x338   :  { %6235 = vmatpush2.msra.mxu1 %v4657_v8  ;;  %6460 = vmatpush2.msra.mxu0 %v4689_v53  ;;  %v5174_v53 = vunpack.c.l.bf16 %v4842_v18  ;;  %v5176_v36 = vunpack.c.l.bf16 %v4843_v37  ;;  %v5189_v18 = vunpack.c.h.bf16 %v4849_v40 }
 0x339   :  { %v4443_v34 = vpop.permute.xlu0 %4442  ;;  %5898 = vmatmul.mubr.f32.gmra.mxu1 %v5150_v52  ;;  %6236 = vmatprep.subr.mxu1 %v12683_v20  ;;  %v3534_v52 = vld [vmem:[%s12672_s3 + $0x580] sm:$0xff] }
 0x33a   :  { %v4688_v26 = vmul.f32 %v4443_v34, %v3536_v63  ;;  %6237 = vmatpush2.msra.mxu1 %v4656_v51  ;;  %6461 = vmatprep.subr.mxu0 %v12683_v20  ;;  %v4854_v51 = vld [vmem:[%s12671_s4 + $0x4c0] sm:$0xff]  ;;  %v4686_v48 = vmul.f32 %v4433_v28, %v3534_v52  ;;  %v5186_v34 = vunpack.c.l.bf16 %v4848_v7  ;;  %v4861_v7 = vld [vmem:[%s12671_s4 + $0x4f8] sm:$0xff] }
 0x33b   :  { %6238 = vmatprep.subr.mxu1 %v12683_v20  ;;  %5902 = vmatprep.mubr.f32.mxu1 %v5163_v11  ;;  %v12034_v30 = vpop.f32.mrf.mxu1  ;;  %v5199_v37 = vunpack.c.h.bf16 %v4854_v51  ;;  %v4866_v52 = vld [vmem:[%s12671_s4 + $0x520] sm:$0xff] }
 0x33c   :  { %6239 = vmatpush2.msra.mxu1 %v4655_v24  ;;  %6462 = vmatpush2.msra.mxu0 %v4688_v26  ;;  %v5188_v26 = vunpack.c.l.bf16 %v4849_v40 }
 0x33d   :  { %v4438_v8 = vpop.permute.xlu0 %4437  ;;  %5903 = vmatmul.mubr.f32.gmra.mxu1 %v5162_v1  ;;  %6240 = vmatprep.subr.mxu1 %v12683_v20  ;;  %v5616_v63 = vpop.f32.mrf.mxu1  ;;  %v4855_v1 = vld [vmem:[%s12671_s4 + $0x4c8] sm:$0xff] }
 0x33e   :  { %v4687_v11 = vmul.f32 %v4438_v8, %v3535_v19  ;;  %6241 = vmatpush2.msra.mxu1 %v4654_v38  ;;  %6463 = vmatprep.subr.mxu0 %v12683_v20  ;;  %v4860_v19 = vld [vmem:[%s12671_s4 + $0x4f0] sm:$0xff]  ;;  %v5200_v28 = vunpack.c.l.bf16 %v4855_v1  ;;  %v4867_v63 = vld [vmem:[%s12671_s4 + $0x528] sm:$0xff] }
 0x33f   :  { %5907 = vmatprep.mubr.f32.mxu1 %v5175_v6  ;;  %6132 = vmatprep.mubr.f32.mxu0 %v5177_v12  ;;  %v5201_v12 = vunpack.c.h.bf16 %v4855_v1  ;;  %v5211_v38 = vunpack.c.h.bf16 %v4860_v19  ;;  %v5210_v40 = vunpack.c.l.bf16 %v4860_v19  ;;  %v4873_v1 = vld [vmem:[%s12671_s4 + $0x558] sm:$0xff] }
 0x340   :  { %6464 = vmatpush2.msra.mxu0 %v4687_v11 }
 0x341   :  { %5908 = vmatmul.mubr.f32.gmra.mxu1 %v5174_v53  ;;  %6465 = vmatprep.subr.mxu0 %v12683_v20  ;;  %v12051_v24 = vpop.f32.mrf.mxu1  ;;  %v5198_v20 = vunpack.c.l.bf16 %v4854_v51  ;;  %v5213_v53 = vunpack.c.h.bf16 %v4861_v7  ;;  %v4872_v51 = vld [vmem:[%s12671_s4 + $0x550] sm:$0xff] }
 0x342   :  { %6466 = vmatpush2.msra.mxu0 %v4686_v48  ;;  %5912 = vmatprep.mubr.f32.mxu1 %v5187_v3  ;;  %v5223_v3 = vunpack.c.h.bf16 %v4866_v52  ;;  %v5225_v48 = vunpack.c.h.bf16 %v4867_v63 }
 0x343   :  { %6133 = vmatmul.mubr.f32.gmra.mxu0 %v5176_v36  ;;  %v5621_v6 = vpop.f32.mrf.mxu1  ;;  %v5212_v36 = vunpack.c.l.bf16 %v4861_v7  ;;  %v4879_v7 = vld [vmem:[%s12671_s4 + $0x588] sm:$0xff] }
 0x344   :  { %6137 = vmatprep.mubr.f32.mxu0 %v5189_v18  ;;  %v5222_v18 = vunpack.c.l.bf16 %v4866_v52  ;;  %v4878_v6 = vld [vmem:[%s12671_s4 + $0x580] sm:$0xff] }
 0x345   :  { %5913 = vmatmul.mubr.f32.gmra.mxu1 %v5186_v34 }
 0x346   :  { %5917 = vmatprep.mubr.f32.mxu1 %v5199_v37  ;;  %v5235_v37 = vunpack.c.h.bf16 %v4872_v51 }
 0x347   :  { %6138 = vmatmul.mubr.f32.gmra.mxu0 %v5188_v26  ;;  %v12062_v8 = vpop.f32.mrf.mxu1  ;;  %v5224_v26 = vunpack.c.l.bf16 %v4867_v63  ;;  %v5246_v63 = vunpack.c.l.bf16 %v4878_v6 }
 0x348   :  { %6142 = vmatprep.mubr.f32.mxu0 %v5201_v12  ;;  %v5237_v12 = vunpack.c.h.bf16 %v4873_v1 }
 0x349   :  { %5918 = vmatmul.mubr.f32.gmra.mxu1 %v5198_v20  ;;  %v5626_v11 = vpop.f32.mrf.mxu1  ;;  %v5234_v20 = vunpack.c.l.bf16 %v4872_v51  ;;  %v5248_v51 = vunpack.c.l.bf16 %v4879_v7 }
 0x34a   :  { %5922 = vmatprep.mubr.f32.mxu1 %v5211_v38  ;;  %v5247_v38 = vunpack.c.h.bf16 %v4878_v6 }
 0x34b   :  { %6143 = vmatmul.mubr.f32.gmra.mxu0 %v5200_v28  ;;  %v5236_v28 = vunpack.c.l.bf16 %v4873_v1 }
 0x34c   :  { %6147 = vmatprep.mubr.f32.mxu0 %v5213_v53  ;;  %v4884_v53 = vld [vmem:[%s12671_s4 + $0x5b0] sm:$0xff] }
 0x34d   :  { %5923 = vmatmul.mubr.f32.gmra.mxu1 %v5210_v40  ;;  %v12070_v34 = vpop.f32.mrf.mxu1  ;;  %v5249_v40 = vunpack.c.h.bf16 %v4879_v7  ;;  %v5258_v1 = vunpack.c.l.bf16 %v4884_v53 }
 0x34e   :  { %5927 = vmatprep.mubr.f32.mxu1 %v5223_v3  ;;  %v4885_v3 = vld [vmem:[%s12671_s4 + $0x5b8] sm:$0xff] }
 0x34f   :  { %6148 = vmatmul.mubr.f32.gmra.mxu0 %v5212_v36  ;;  %v5631_v19 = vpop.f32.mrf.mxu1  ;;  %v5259_v36 = vunpack.c.h.bf16 %v4884_v53  ;;  %v5260_v6 = vunpack.c.l.bf16 %v4885_v3 }
 0x350   :  { %6152 = vmatprep.mubr.f32.mxu0 %v5225_v48  ;;  %v4890_v48 = vld [vmem:[%s12671_s4 + $0x5e0] sm:$0xff] }
 0x351   :  { %5928 = vmatmul.mubr.f32.gmra.mxu1 %v5222_v18  ;;  %v5261_v18 = vunpack.c.h.bf16 %v4885_v3  ;;  %v5271_v19 = vunpack.c.h.bf16 %v4890_v48 }
 0x352   :  { %5932 = vmatprep.mubr.f32.mxu1 %v5235_v37 }
 0x353   :  { %6153 = vmatmul.mubr.f32.gmra.mxu0 %v5224_v26  ;;  %v12081_v52 = vpop.f32.mrf.mxu1  ;;  %v4891_v26 = vld [vmem:[%s12671_s4 + $0x5e8] sm:$0xff] }
 0x354   :  { %6157 = vmatprep.mubr.f32.mxu0 %v5237_v12  ;;  %v5273_v7 = vunpack.c.h.bf16 %v4891_v26 }
 0x355   :  { %5933 = vmatmul.mubr.f32.gmra.mxu1 %v5234_v20  ;;  %v5636_v11 = vpop.f32.mrf.mxu1  ;;  %v4706_v20 = vld [vmem:[%s12671_s4 + $0x20] sm:$0xff] }
 0x356   :  { %5937 = vmatprep.mubr.f32.mxu1 %v5247_v38  ;;  %v5270_v38 = vunpack.c.l.bf16 %v4890_v48  ;;  %v4903_v53 = vunpack.c.h.bf16 %v4706_v20  ;;  %v4712_v11 = vld [vmem:[%s12671_s4 + $0x50] sm:$0xff]  ;;  %v4713_v48 = vld [vmem:[%s12671_s4 + $0x58] sm:$0xff] }
 0x357   :  { %6158 = vmatmul.mubr.f32.gmra.mxu0 %v5236_v28  ;;  %v4707_v28 = vld [vmem:[%s12671_s4 + $0x28] sm:$0xff] }
 0x358   :  { %6162 = vmatprep.mubr.f32.mxu0 %v5249_v40  ;;  %v4905_v3 = vunpack.c.h.bf16 %v4707_v28 }
 0x359   :  { %5938 = vmatmul.mubr.f32.gmra.mxu1 %v5246_v63  ;;  %v12092_v37 = vpop.f32.mrf.mxu1  ;;  %v5272_v63 = vunpack.c.l.bf16 %v4891_v26  ;;  %v4718_v26 = vld [vmem:[%s12671_s4 + $0x80] sm:$0xff] }
 0x35a   :  { %5942 = vmatprep.mubr.f32.mxu1 %v5259_v36 }
 0x35b   :  { %6163 = vmatmul.mubr.f32.gmra.mxu0 %v5248_v51  ;;  %v5641_v12 = vpop.f32.mrf.mxu1  ;;  %v4902_v51 = vunpack.c.l.bf16 %v4706_v20  ;;  %v4719_v20 = vld [vmem:[%s12671_s4 + $0x88] sm:$0xff] }
 0x35c   :  { %6167 = vmatprep.mubr.f32.mxu0 %v5261_v18  ;;  %v4915_v18 = vunpack.c.h.bf16 %v4712_v11  ;;  %v4914_v12 = vunpack.c.l.bf16 %v4712_v11  ;;  %v4725_v11 = vld [vmem:[%s12671_s4 + $0xb8] sm:$0xff] }
 0x35d   :  { %5943 = vmatmul.mubr.f32.gmra.mxu1 %v5258_v1  ;;  %v4904_v1 = vunpack.c.l.bf16 %v4707_v28  ;;  %v4724_v28 = vld [vmem:[%s12671_s4 + $0xb0] sm:$0xff] }
 0x35e   :  { %5947 = vmatprep.mubr.f32.mxu1 %v5271_v19  ;;  %v4917_v19 = vunpack.c.h.bf16 %v4713_v48 }
 0x35f   :  { %6168 = vmatmul.mubr.f32.gmra.mxu0 %v5260_v6  ;;  %v12103_v40 = vpop.f32.mrf.mxu1 }
 0x360   :  { %6172 = vmatprep.mubr.f32.mxu0 %v5273_v7  ;;  %v4927_v7 = vunpack.c.h.bf16 %v4718_v26 }
 0x361   :  { %5948 = vmatmul.mubr.f32.gmra.mxu1 %v5270_v38  ;;  %v5646_v36 = vpop.f32.mrf.mxu1 }
 0x362   :  { %6242 = vmatprep.mubr.f32.mxu1 %v4903_v53  ;;  %v4916_v53 = vunpack.c.l.bf16 %v4713_v48  ;;  %v4926_v36 = vunpack.c.l.bf16 %v4718_v26  ;;  %v4730_v48 = vld [vmem:[%s12671_s4 + $0xe0] sm:$0xff]  ;;  %v4731_v26 = vld [vmem:[%s12671_s4 + $0xe8] sm:$0xff] }
 0x363   :  { %6173 = vmatmul.mubr.f32.gmra.mxu0 %v5272_v63  ;;  %v4929_v63 = vunpack.c.h.bf16 %v4719_v20 }
 0x364   :  { %6467 = vmatprep.mubr.f32.mxu0 %v4905_v3 }
 0x365   :  { %v12114_v6 = vpop.f32.mrf.mxu1  ;;  %6243 = vmatmul.mubr.f32.vlgmr.msra.gmra.mxu1 %v4902_v51  ;;  %v4939_v51 = vunpack.c.h.bf16 %v4724_v28 }
 0x366   :  { %6247 = vmatprep.mubr.f32.mxu1 %v4915_v18 }
 0x367   :  { %v5651_v38 = vpop.f32.mrf.mxu1  ;;  %6468 = vmatmul.mubr.f32.vlgmr.msra.gmra.mxu0 %v4904_v1  ;;  %v4928_v1 = vunpack.c.l.bf16 %v4719_v20  ;;  %v4736_v20 = vld [vmem:[%s12671_s4 + $0x110] sm:$0xff] }
 0x368   :  { %6472 = vmatprep.mubr.f32.mxu0 %v4917_v19  ;;  %v4941_v19 = vunpack.c.h.bf16 %v4725_v11 }
 0x369   :  { %v12122_v3 = vpop.f32.mrf.mxu1  ;;  %6248 = vmatmul.mubr.f32.gmra.mxu1 %v4914_v12  ;;  %v4938_v12 = vunpack.c.l.bf16 %v4724_v28  ;;  %v4737_v28 = vld [vmem:[%s12671_s4 + $0x118] sm:$0xff] }
 0x36a   :  { %6252 = vmatprep.mubr.f32.mxu1 %v4927_v7  ;;  %v4951_v7 = vunpack.c.h.bf16 %v4730_v48 }
 0x36b   :  { %v5656_v18 = vpop.f32.mrf.mxu1  ;;  %6473 = vmatmul.mubr.f32.gmra.mxu0 %v4916_v53  ;;  %v4940_v53 = vunpack.c.l.bf16 %v4725_v11  ;;  %v4742_v11 = vld [vmem:[%s12671_s4 + $0x140] sm:$0xff] }
 0x36c   :  { %6477 = vmatprep.mubr.f32.mxu0 %v4929_v63  ;;  %v4953_v63 = vunpack.c.h.bf16 %v4731_v26 }
 0x36d   :  { %v12130_v38 = vpop.f32.mrf.mxu1  ;;  %6253 = vmatmul.mubr.f32.gmra.mxu1 %v4926_v36  ;;  %v4950_v36 = vunpack.c.l.bf16 %v4730_v48  ;;  %v4743_v48 = vld [vmem:[%s12671_s4 + $0x148] sm:$0xff] }
 0x36e   :  { %12704 = vst [vmem:[#allocation15_spill] sm:$0xff] %v12130_v38  ;;  %6257 = vmatprep.mubr.f32.mxu1 %v4939_v51  ;;  %v4963_v51 = vunpack.c.h.bf16 %v4736_v20 }
 0x36f   :  { %v5661_v0 = vpop.f32.mrf.mxu1  ;;  %6478 = vmatmul.mubr.f32.gmra.mxu0 %v4928_v1  ;;  %v4965_v1 = vunpack.c.h.bf16 %v4737_v28 }
 0x370   :  { %6482 = vmatprep.mubr.f32.mxu0 %v4941_v19  ;;  %v4952_v0 = vunpack.c.l.bf16 %v4731_v26  ;;  %v4748_v26 = vld [vmem:[%s12671_s4 + $0x170] sm:$0xff] }
 0x371   :  { %v12138_v18 = vpop.f32.mrf.mxu1  ;;  %6258 = vmatmul.mubr.f32.gmra.mxu1 %v4938_v12  ;;  %v4962_v12 = vunpack.c.l.bf16 %v4736_v20  ;;  %v4749_v20 = vld [vmem:[%s12671_s4 + $0x178] sm:$0xff] }
 0x372   :  { %12705 = vst [vmem:[#allocation16_spill] sm:$0xff] %v12138_v18  ;;  %6262 = vmatprep.mubr.f32.mxu1 %v4951_v7  ;;  %v4975_v7 = vunpack.c.h.bf16 %v4742_v11 }
 0x373   :  { %v5666_v57 = vpop.f32.mrf.mxu1  ;;  %6483 = vmatmul.mubr.f32.gmra.mxu0 %v4940_v53  ;;  %v4977_v53 = vunpack.c.h.bf16 %v4743_v48 }
 0x374   :  { %6487 = vmatprep.mubr.f32.mxu0 %v4953_v63  ;;  %v4964_v57 = vunpack.c.l.bf16 %v4737_v28  ;;  %v4754_v28 = vld [vmem:[%s12671_s4 + $0x1a0] sm:$0xff] }
 0x375   :  { %v12146_v19 = vpop.f32.mrf.mxu1  ;;  %6263 = vmatmul.mubr.f32.gmra.mxu1 %v4950_v36  ;;  %v4974_v36 = vunpack.c.l.bf16 %v4742_v11  ;;  %v4755_v11 = vld [vmem:[%s12671_s4 + $0x1a8] sm:$0xff] }
 0x376   :  { %12706 = vst [vmem:[#allocation17_spill] sm:$0xff] %v12146_v19  ;;  %6267 = vmatprep.mubr.f32.mxu1 %v4963_v51  ;;  %v4987_v51 = vunpack.c.h.bf16 %v4748_v26  ;;  %v4808_v19 = vld [vmem:[%s12671_s4 + $0x350] sm:$0xff] }
 0x377   :  { %v5671_v47 = vpop.f32.mrf.mxu1  ;;  %6488 = vmatmul.mubr.f32.gmra.mxu0 %v4952_v0  ;;  %v4989_v0 = vunpack.c.h.bf16 %v4749_v20  ;;  %v5106_v18 = vunpack.c.l.bf16 %v4808_v19 }
 0x378   :  { %6492 = vmatprep.mubr.f32.mxu0 %v4965_v1  ;;  %v4976_v47 = vunpack.c.l.bf16 %v4743_v48  ;;  %v4760_v48 = vld [vmem:[%s12671_s4 + $0x1d0] sm:$0xff] }
 0x379   :  { %v12154_v63 = vpop.f32.mrf.mxu1  ;;  %6268 = vmatmul.mubr.f32.gmra.mxu1 %v4962_v12  ;;  %v4986_v12 = vunpack.c.l.bf16 %v4748_v26  ;;  %v4761_v26 = vld [vmem:[%s12671_s4 + $0x1d8] sm:$0xff] }
 0x37a   :  { %12707 = vst [vmem:[#allocation18_spill] sm:$0xff] %v12154_v63  ;;  %6272 = vmatprep.mubr.f32.mxu1 %v4975_v7  ;;  %v4999_v7 = vunpack.c.h.bf16 %v4754_v28  ;;  %v4796_v63 = vld [vmem:[%s12671_s4 + $0x2f0] sm:$0xff] }
 0x37b   :  { %v5676_v27 = vpop.f32.mrf.mxu1  ;;  %6493 = vmatmul.mubr.f32.gmra.mxu0 %v4964_v57  ;;  %v5001_v57 = vunpack.c.h.bf16 %v4755_v11 }
 0x37c   :  { %6497 = vmatprep.mubr.f32.mxu0 %v4977_v53  ;;  %v4988_v27 = vunpack.c.l.bf16 %v4749_v20  ;;  %v4766_v20 = vld [vmem:[%s12671_s4 + $0x200] sm:$0xff] }
 0x37d   :  { %v12162_v1 = vpop.f32.mrf.mxu1  ;;  %6273 = vmatmul.mubr.f32.gmra.mxu1 %v4974_v36  ;;  %v4998_v36 = vunpack.c.l.bf16 %v4754_v28  ;;  %v5010_v28 = vunpack.c.l.bf16 %v4760_v48 }
 0x37e   :  { %12708 = vst [vmem:[#allocation19_spill] sm:$0xff] %v12162_v1  ;;  %6277 = vmatprep.mubr.f32.mxu1 %v4987_v51  ;;  %v5011_v51 = vunpack.c.h.bf16 %v4760_v48  ;;  %v5022_v48 = vunpack.c.l.bf16 %v4766_v20  ;;  %v4784_v1 = vld [vmem:[%s12671_s4 + $0x290] sm:$0xff] }
 0x37f   :  { %v5681_v62 = vpop.f32.mrf.mxu1  ;;  %6498 = vmatmul.mubr.f32.gmra.mxu0 %v4976_v47 }
 0x380   :  { %6502 = vmatprep.mubr.f32.mxu0 %v4989_v0  ;;  %v5000_v62 = vunpack.c.l.bf16 %v4755_v11  ;;  %v5013_v0 = vunpack.c.h.bf16 %v4761_v26 }
 0x381   :  { %v12170_v53 = vpop.f32.mrf.mxu1  ;;  %6278 = vmatmul.mubr.f32.gmra.mxu1 %v4986_v12  ;;  %v4767_v12 = vld [vmem:[%s12671_s4 + $0x208] sm:$0xff] }
 0x382   :  { %12709 = vst [vmem:[#allocation20_spill] sm:$0xff] %v12170_v53  ;;  %6282 = vmatprep.mubr.f32.mxu1 %v4999_v7  ;;  %v4772_v53 = vld [vmem:[%s12671_s4 + $0x230] sm:$0xff] }
 0x383   :  { %v5686_v55 = vpop.f32.mrf.mxu1  ;;  %6503 = vmatmul.mubr.f32.gmra.mxu0 %v4988_v27  ;;  %v12178_v47 = vpop.f32.mrf.mxu0  ;;  %v5012_v27 = vunpack.c.l.bf16 %v4761_v26 }
 0x384   :  { %6507 = vmatprep.mubr.f32.mxu0 %v5001_v57  ;;  %v5023_v55 = vunpack.c.h.bf16 %v4766_v20  ;;  %v5034_v20 = vunpack.c.l.bf16 %v4772_v53 }
 0x385   :  { %v12180_v31 = vpop.f32.mrf.mxu1  ;;  %6283 = vmatmul.mubr.f32.gmra.mxu1 %v4998_v36  ;;  %v6021_v7 = vpop.f32.mrf.mxu0 }
 0x386   :  { %12710 = vst [vmem:[#allocation21_spill] sm:$0xff] %v12180_v31  ;;  %6287 = vmatprep.mubr.f32.mxu1 %v5011_v51  ;;  %v5025_v31 = vunpack.c.h.bf16 %v4767_v12  ;;  %v4773_v51 = vld [vmem:[%s12671_s4 + $0x238] sm:$0xff] }
 0x387   :  { %v5691_v11 = vpop.f32.mrf.mxu1  ;;  %6508 = vmatmul.mubr.f32.gmra.mxu0 %v5000_v62  ;;  %v12188_v57 = vpop.f32.mrf.mxu0  ;;  %v5035_v62 = vunpack.c.h.bf16 %v4772_v53  ;;  %v5046_v53 = vunpack.c.l.bf16 %v4778_v39 }
 0x388   :  { %6512 = vmatprep.mubr.f32.mxu0 %v5013_v0  ;;  %v5024_v11 = vunpack.c.l.bf16 %v4767_v12 }
 0x389   :  { %v12190_v36 = vpop.f32.mrf.mxu1  ;;  %6288 = vmatmul.mubr.f32.gmra.mxu1 %v5010_v28  ;;  %v6026_v7 = vpop.f32.mrf.mxu0 }
 0x38a   :  { %12711 = vst [vmem:[#allocation22_spill] sm:$0xff] %v12190_v36  ;;  %6292 = vmatprep.mubr.f32.mxu1 %v5023_v55  ;;  %v5037_v36 = vunpack.c.h.bf16 %v4773_v51  ;;  %v4779_v55 = vld [vmem:[%s12671_s4 + $0x268] sm:$0xff] }
 0x38b   :  { %v5696_v26 = vpop.f32.mrf.mxu1  ;;  %6513 = vmatmul.mubr.f32.gmra.mxu0 %v5012_v27  ;;  %v12198_v0 = vpop.f32.mrf.mxu0  ;;  %v5047_v27 = vunpack.c.h.bf16 %v4778_v39  ;;  %v5058_v39 = vunpack.c.l.bf16 %v4784_v1 }
 0x38c   :  { %6517 = vmatprep.mubr.f32.mxu0 %v5025_v31  ;;  %v5036_v26 = vunpack.c.l.bf16 %v4773_v51 }
 0x38d   :  { %v12200_v28 = vpop.f32.mrf.mxu1  ;;  %6293 = vmatmul.mubr.f32.gmra.mxu1 %v5022_v48  ;;  %v6031_v7 = vpop.f32.mrf.mxu0 }
 0x38e   :  { %12712 = vst [vmem:[#allocation23_spill] sm:$0xff] %v12200_v28  ;;  %6297 = vmatprep.mubr.f32.mxu1 %v5035_v62  ;;  %v5049_v28 = vunpack.c.h.bf16 %v4779_v55  ;;  %v4785_v62 = vld [vmem:[%s12671_s4 + $0x298] sm:$0xff] }
 0x38f   :  { %v5701_v12 = vpop.f32.mrf.mxu1  ;;  %6518 = vmatmul.mubr.f32.gmra.mxu0 %v5024_v11  ;;  %v12208_v31 = vpop.f32.mrf.mxu0  ;;  %v5059_v11 = vunpack.c.h.bf16 %v4784_v1  ;;  %v5070_v1 = vunpack.c.l.bf16 %v4790_v41 }
 0x390   :  { %6522 = vmatprep.mubr.f32.mxu0 %v5037_v36  ;;  %v5048_v12 = vunpack.c.l.bf16 %v4779_v55 }
 0x391   :  { %v12210_v48 = vpop.f32.mrf.mxu1  ;;  %6298 = vmatmul.mubr.f32.gmra.mxu1 %v5034_v20  ;;  %v6036_v7 = vpop.f32.mrf.mxu0 }
 0x392   :  { %12713 = vst [vmem:[#allocation24_spill] sm:$0xff] %v12210_v48  ;;  %6302 = vmatprep.mubr.f32.mxu1 %v5047_v27  ;;  %v5061_v48 = vunpack.c.h.bf16 %v4785_v62  ;;  %v4791_v27 = vld [vmem:[%s12671_s4 + $0x2c8] sm:$0xff] }
 0x393   :  { %v5706_v51 = vpop.f32.mrf.mxu1  ;;  %6523 = vmatmul.mubr.f32.gmra.mxu0 %v5036_v26  ;;  %v12218_v36 = vpop.f32.mrf.mxu0  ;;  %v5071_v26 = vunpack.c.h.bf16 %v4790_v41  ;;  %v5082_v41 = vunpack.c.l.bf16 %v4796_v63 }
 0x394   :  { %6527 = vmatprep.mubr.f32.mxu0 %v5049_v28  ;;  %v5060_v51 = vunpack.c.l.bf16 %v4785_v62 }
 0x395   :  { %v12220_v20 = vpop.f32.mrf.mxu1  ;;  %6303 = vmatmul.mubr.f32.gmra.mxu1 %v5046_v53  ;;  %v6041_v7 = vpop.f32.mrf.mxu0 }
 0x396   :  { %12714 = vst [vmem:[#allocation25_spill] sm:$0xff] %v12220_v20  ;;  %6307 = vmatprep.mubr.f32.mxu1 %v5059_v11  ;;  %v5073_v20 = vunpack.c.h.bf16 %v4791_v27  ;;  %v4797_v11 = vld [vmem:[%s12671_s4 + $0x2f8] sm:$0xff] }
 0x397   :  { %v5711_v55 = vpop.f32.mrf.mxu1  ;;  %6528 = vmatmul.mubr.f32.gmra.mxu0 %v5048_v12  ;;  %v12228_v28 = vpop.f32.mrf.mxu0  ;;  %v5083_v12 = vunpack.c.h.bf16 %v4796_v63  ;;  %v5094_v63 = vunpack.c.l.bf16 %v4802_v2 }
 0x398   :  { %6532 = vmatprep.mubr.f32.mxu0 %v5061_v48  ;;  %v5072_v55 = vunpack.c.l.bf16 %v4791_v27 }
 0x399   :  { %v12230_v53 = vpop.f32.mrf.mxu1  ;;  %6308 = vmatmul.mubr.f32.gmra.mxu1 %v5058_v39  ;;  %v6046_v7 = vpop.f32.mrf.mxu0 }
 0x39a   :  { %12715 = vst [vmem:[#allocation26_spill] sm:$0xff] %v12230_v53  ;;  %6312 = vmatprep.mubr.f32.mxu1 %v5071_v26  ;;  %v5085_v53 = vunpack.c.h.bf16 %v4797_v11  ;;  %v4803_v26 = vld [vmem:[%s12671_s4 + $0x328] sm:$0xff] }
 0x39b   :  { %v5716_v62 = vpop.f32.mrf.mxu1  ;;  %6533 = vmatmul.mubr.f32.gmra.mxu0 %v5060_v51  ;;  %v12238_v48 = vpop.f32.mrf.mxu0  ;;  %v5095_v51 = vunpack.c.h.bf16 %v4802_v2 }
 0x39c   :  { %6537 = vmatprep.mubr.f32.mxu0 %v5073_v20  ;;  %v5084_v62 = vunpack.c.l.bf16 %v4797_v11 }
 0x39d   :  { %v12240_v39 = vpop.f32.mrf.mxu1  ;;  %6313 = vmatmul.mubr.f32.gmra.mxu1 %v5070_v1  ;;  %v6051_v7 = vpop.f32.mrf.mxu0 }
 0x39e   :  { %12716 = vst [vmem:[#allocation27_spill] sm:$0xff] %v12240_v39  ;;  %6317 = vmatprep.mubr.f32.mxu1 %v5083_v12  ;;  %v5097_v39 = vunpack.c.h.bf16 %v4803_v26  ;;  %v4809_v12 = vld [vmem:[%s12671_s4 + $0x358] sm:$0xff] }
 0x39f   :  { %v5721_v27 = vpop.f32.mrf.mxu1  ;;  %6538 = vmatmul.mubr.f32.gmra.mxu0 %v5072_v55  ;;  %v12248_v20 = vpop.f32.mrf.mxu0  ;;  %v5107_v55 = vunpack.c.h.bf16 %v4808_v19  ;;  %v5109_v2 = vunpack.c.h.bf16 %v4809_v12  ;;  %v5108_v17 = vunpack.c.l.bf16 %v4809_v12  ;;  %v5575_v19 = vadd.f32 %v11860_v29, %v11290_v16  ;;  %v4821_v12 = vld [vmem:[%s12671_s4 + $0x3b8] sm:$0xff]  ;;  %v4826_v16 = vld [vmem:[%s12671_s4 + $0x3e0] sm:$0xff] }
 0x3a0   :  { %6542 = vmatprep.mubr.f32.mxu0 %v5085_v53  ;;  %v5096_v27 = vunpack.c.l.bf16 %v4803_v26 }
 0x3a1   :  { %v12250_v1 = vpop.f32.mrf.mxu1  ;;  %6318 = vmatmul.mubr.f32.gmra.mxu1 %v5082_v41  ;;  %v6056_v7 = vpop.f32.mrf.mxu0  ;;  %v5570_v41 = vadd.f32 %v11845_v33, %v11264_v46  ;;  %v4820_v46 = vld [vmem:[%s12671_s4 + $0x3b0] sm:$0xff] }
 0x3a2   :  { %12717 = vst [vmem:[#allocation28_spill] sm:$0xff] %v12250_v1  ;;  %6322 = vmatprep.mubr.f32.mxu1 %v5095_v51  ;;  %v4815_v51 = vld [vmem:[%s12671_s4 + $0x388] sm:$0xff]  ;;  %v5119_v7 = vunpack.c.h.bf16 %v4814_v50 }
 0x3a3   :  { %v5726_v11 = vpop.f32.mrf.mxu1  ;;  %6543 = vmatmul.mubr.f32.gmra.mxu0 %v5084_v62  ;;  %v12258_v53 = vpop.f32.mrf.mxu0  ;;  %v5120_v38 = vunpack.c.l.bf16 %v4815_v51 }
 0x3a4   :  { %6547 = vmatprep.mubr.f32.mxu0 %v5097_v39 }
 0x3a5   :  { %v5794_v1 = vpop.f32.mrf.mxu1  ;;  %6323 = vmatmul.mubr.f32.gmra.mxu1 %v5094_v63  ;;  %v6061_v62 = vpop.f32.mrf.mxu0  ;;  %v5121_v63 = vunpack.c.h.bf16 %v4815_v51 }
 0x3a6   :  { %v5795_v26 = vadd.f32 %v5794_v1, %v5570_v41  ;;  %6327 = vmatprep.mubr.f32.mxu1 %v5107_v55  ;;  %v5118_v55 = vunpack.c.l.bf16 %v4814_v50  ;;  %v5131_v62 = vunpack.c.h.bf16 %v4820_v46  ;;  %v5580_v50 = vadd.f32 %v11882_v59, %v11309_v10  ;;  %v4832_v10 = vld [vmem:[%s12671_s4 + $0x410] sm:$0xff] }
 0x3a7   :  { %v5796_v11 = vpop.f32.mrf.mxu1  ;;  %6548 = vmatmul.mubr.f32.gmra.mxu0 %v5096_v27  ;;  %v12268_v33 = vpop.f32.mrf.mxu0 }
 0x3a8   :  { %v12273_v39 = vadd.f32 %v12178_v47, %v5795_v26  ;;  %6552 = vmatprep.mubr.f32.mxu0 %v5109_v2  ;;  %v5133_v47 = vunpack.c.h.bf16 %v4821_v12  ;;  %v5130_v26 = vunpack.c.l.bf16 %v4820_v46 }
 0x3a9   :  { %v5799_v1 = vpop.f32.mrf.mxu1  ;;  %6328 = vmatmul.mubr.f32.gmra.mxu1 %v5106_v18  ;;  %v6066_v27 = vpop.f32.mrf.mxu0 }
 0x3aa   :  { %v5800_v41 = vadd.f32 %v5799_v1, %v5575_v19  ;;  %6332 = vmatprep.mubr.f32.mxu1 %v5119_v7  ;;  %v5143_v19 = vunpack.c.h.bf16 %v4826_v16  ;;  %v5132_v27 = vunpack.c.l.bf16 %v4821_v12 }
 0x3ab   :  { %v5801_v11 = vpop.f32.mrf.mxu1  ;;  %6553 = vmatmul.mubr.f32.gmra.mxu0 %v5108_v17  ;;  %v12281_v29 = vpop.f32.mrf.mxu0  ;;  %v4827_v17 = vld [vmem:[%s12671_s4 + $0x3e8] sm:$0xff] }
 0x3ac   :  { %v12286_v18 = vadd.f32 %v12188_v57, %v5800_v41  ;;  %6557 = vmatprep.mubr.f32.mxu0 %v5121_v63  ;;  %v5585_v57 = vadd.f32 %v11902_v15, %v11336_v32  ;;  %v5145_v63 = vunpack.c.h.bf16 %v4827_v17  ;;  %v5142_v41 = vunpack.c.l.bf16 %v4826_v16  ;;  %v4838_v32 = vld [vmem:[%s12671_s4 + $0x440] sm:$0xff] }
 0x3ad   :  { %v5804_v2 = vpop.f32.mrf.mxu1  ;;  %6333 = vmatmul.mubr.f32.gmra.mxu1 %v5118_v55  ;;  %v6071_v51 = vpop.f32.mrf.mxu0  ;;  %v5155_v11 = vunpack.c.h.bf16 %v4832_v10 }
 0x3ae   :  { %v5805_v7 = vadd.f32 %v5804_v2, %v5580_v50  ;;  %6337 = vmatprep.mubr.f32.mxu1 %v5131_v62  ;;  %v5144_v2 = vunpack.c.l.bf16 %v4827_v17  ;;  %v5154_v51 = vunpack.c.l.bf16 %v4832_v10  ;;  %v4839_v17 = vld [vmem:[%s12671_s4 + $0x448] sm:$0xff] }
 0x3af   :  { %v5806_v1 = vpop.f32.mrf.mxu1  ;;  %6558 = vmatmul.mubr.f32.gmra.mxu0 %v5120_v38  ;;  %v12294_v59 = vpop.f32.mrf.mxu0  ;;  %v4833_v38 = vld [vmem:[%s12671_s4 + $0x418] sm:$0xff]  ;;  %v5169_v10 = vunpack.c.h.bf16 %v4839_v17 }
 0x3b0   :  { %v12299_v46 = vadd.f32 %v12198_v0, %v5805_v7  ;;  %6562 = vmatprep.mubr.f32.mxu0 %v5133_v47  ;;  %v5590_v0 = vadd.f32 %v11920_v9, %v11351_v22  ;;  %v5157_v47 = vunpack.c.h.bf16 %v4833_v38  ;;  %v5167_v1 = vunpack.c.h.bf16 %v4838_v32  ;;  %v4844_v22 = vld [vmem:[%s12671_s4 + $0x470] sm:$0xff] }
 0x3b1   :  { %v5809_v55 = vpop.f32.mrf.mxu1  ;;  %6338 = vmatmul.mubr.f32.gmra.mxu1 %v5130_v26  ;;  %v6076_v12 = vpop.f32.mrf.mxu0  ;;  %v5595_v9 = vadd.f32 %v11942_v21, %v11370_v5  ;;  %v5168_v5 = vunpack.c.l.bf16 %v4839_v17  ;;  %v4850_v21 = vld [vmem:[%s12671_s4 + $0x4a0] sm:$0xff] }
 0x3b2   :  { %v5810_v62 = vadd.f32 %v5809_v55, %v5585_v57  ;;  %6342 = vmatprep.mubr.f32.mxu1 %v5143_v19  ;;  %v5156_v57 = vunpack.c.l.bf16 %v4833_v38  ;;  %v4845_v38 = vld [vmem:[%s12671_s4 + $0x478] sm:$0xff] }
 0x3b3   :  { %v5811_v50 = vpop.f32.mrf.mxu1  ;;  %6563 = vmatmul.mubr.f32.gmra.mxu0 %v5132_v27  ;;  %v12307_v15 = vpop.f32.mrf.mxu0 }
 0x3b4   :  { %v12312_v16 = vadd.f32 %v12208_v31, %v5810_v62  ;;  %6567 = vmatprep.mubr.f32.mxu0 %v5145_v63  ;;  %v5179_v62 = vunpack.c.h.bf16 %v4844_v22 }
 0x3b5   :  { %v5814_v26 = vpop.f32.mrf.mxu1  ;;  %6343 = vmatmul.mubr.f32.gmra.mxu1 %v5142_v41  ;;  %v6081_v7 = vpop.f32.mrf.mxu0  ;;  %v5166_v41 = vunpack.c.l.bf16 %v4838_v32  ;;  %v5181_v32 = vunpack.c.h.bf16 %v4845_v38 }
 0x3b6   :  { %v5815_v19 = vadd.f32 %v5814_v26, %v5590_v0  ;;  %6347 = vmatprep.mubr.f32.mxu1 %v5155_v11  ;;  %v5178_v26 = vunpack.c.l.bf16 %v4844_v22  ;;  %v5191_v7 = vunpack.c.h.bf16 %v4850_v21 }
 0x3b7   :  { %v5816_v27 = vpop.f32.mrf.mxu1  ;;  %6568 = vmatmul.mubr.f32.gmra.mxu0 %v5144_v2 }
 0x3b8   :  { %v12323_v31 = vadd.f32 %v12218_v36, %v5815_v19  ;;  %6572 = vmatprep.mubr.f32.mxu0 %v5157_v47  ;;  %v12325_v63 = vpop.f32.mrf.mxu0  ;;  %v5600_v36 = vadd.f32 %v11958_v61, %v11390_v56  ;;  %v5180_v56 = vunpack.c.l.bf16 %v4845_v38  ;;  %v4856_v61 = vld [vmem:[%s12671_s4 + $0x4d0] sm:$0xff] }
 0x3b9   :  { %v5819_v55 = vpop.f32.mrf.mxu1  ;;  %6348 = vmatmul.mubr.f32.gmra.mxu1 %v5154_v51  ;;  %v4851_v51 = vld [vmem:[%s12671_s4 + $0x4a8] sm:$0xff] }
 0x3ba   :  { %v5820_v12 = vadd.f32 %v5819_v55, %v5595_v9  ;;  %6352 = vmatprep.mubr.f32.mxu1 %v5167_v1  ;;  %v6086_v11 = vpop.f32.mrf.mxu0  ;;  %v5190_v9 = vunpack.c.l.bf16 %v4850_v21  ;;  %v4863_v21 = vld [vmem:[%s12671_s4 + $0x508] sm:$0xff] }
 0x3bb   :  { %v5821_v50 = vpop.f32.mrf.mxu1  ;;  %6573 = vmatmul.mubr.f32.gmra.mxu0 %v5156_v57  ;;  %v5193_v57 = vunpack.c.h.bf16 %v4851_v51 }
 0x3bc   :  { %v12336_v2 = vadd.f32 %v12228_v28, %v5820_v12  ;;  %6577 = vmatprep.mubr.f32.mxu0 %v5169_v10  ;;  %v12338_v0 = vpop.f32.mrf.mxu0  ;;  %v5605_v28 = vadd.f32 %v11981_v14, %v11409_v42  ;;  %v4857_v10 = vld [vmem:[%s12671_s4 + $0x4d8] sm:$0xff]  ;;  %v5192_v12 = vunpack.c.l.bf16 %v4851_v51  ;;  %v4862_v42 = vld [vmem:[%s12671_s4 + $0x500] sm:$0xff] }
 0x3bd   :  { %v5824_v47 = vpop.f32.mrf.mxu1  ;;  %6353 = vmatmul.mubr.f32.gmra.mxu1 %v5166_v41  ;;  %v5203_v41 = vunpack.c.h.bf16 %v4856_v61  ;;  %v5205_v11 = vunpack.c.h.bf16 %v4857_v10  ;;  %v5204_v51 = vunpack.c.l.bf16 %v4857_v10 }
 0x3be   :  { %v5825_v17 = vadd.f32 %v5824_v47, %v5600_v36  ;;  %6357 = vmatprep.mubr.f32.mxu1 %v5179_v62  ;;  %v6091_v19 = vpop.f32.mrf.mxu0  ;;  %v5215_v47 = vunpack.c.h.bf16 %v4862_v42 }
 0x3bf   :  { %v5826_v1 = vpop.f32.mrf.mxu1  ;;  %6578 = vmatmul.mubr.f32.gmra.mxu0 %v5168_v5  ;;  %v5202_v5 = vunpack.c.l.bf16 %v4856_v61 }
 0x3c0   :  { %v12349_v27 = vadd.f32 %v12238_v48, %v5825_v17  ;;  %6582 = vmatprep.mubr.f32.mxu0 %v5181_v32  ;;  %v5610_v48 = vadd.f32 %v12004_v49, %v11428_v35  ;;  %v4868_v35 = vld [vmem:[%s12671_s4 + $0x530] sm:$0xff]  ;;  %v5615_v49 = vadd.f32 %v12034_v30, %v11448_v4  ;;  %v5217_v17 = vunpack.c.h.bf16 %v4863_v21  ;;  %v4874_v30 = vld [vmem:[%s12671_s4 + $0x560] sm:$0xff] }
 0x3c1   :  { %v5829_v22 = vpop.f32.mrf.mxu1  ;;  %6358 = vmatmul.mubr.f32.gmra.mxu1 %v5178_v26  ;;  %v5214_v1 = vunpack.c.l.bf16 %v4862_v42  ;;  %v5216_v4 = vunpack.c.l.bf16 %v4863_v21  ;;  %v5239_v42 = vunpack.c.h.bf16 %v4874_v30 }
 0x3c2   :  { %v5830_v55 = vadd.f32 %v5829_v22, %v5605_v28  ;;  %6362 = vmatprep.mubr.f32.mxu1 %v5191_v7  ;;  %v5227_v28 = vunpack.c.h.bf16 %v4868_v35 }
 0x3c3   :  { %v5831_v38 = vpop.f32.mrf.mxu1  ;;  %6583 = vmatmul.mubr.f32.gmra.mxu0 %v5180_v56  ;;  %v12357_v14 = vpop.f32.mrf.mxu0  ;;  %v4869_v56 = vld [vmem:[%s12671_s4 + $0x538] sm:$0xff] }
 0x3c4   :  { %v12362_v62 = vadd.f32 %v12248_v20, %v5830_v55  ;;  %6587 = vmatprep.mubr.f32.mxu0 %v5193_v57  ;;  %v5229_v10 = vunpack.c.h.bf16 %v4869_v56  ;;  %v4875_v38 = vld [vmem:[%s12671_s4 + $0x568] sm:$0xff] }
 0x3c5   :  { %v5834_v50 = vpop.f32.mrf.mxu1  ;;  %6363 = vmatmul.mubr.f32.gmra.mxu1 %v5190_v9  ;;  %v6096_v36 = vpop.f32.mrf.mxu0 }
 0x3c6   :  { %v5835_v32 = vadd.f32 %v5834_v50, %v5610_v48  ;;  %6367 = vmatprep.mubr.f32.mxu1 %v5203_v41  ;;  %v5226_v41 = vunpack.c.l.bf16 %v4868_v35  ;;  %v5238_v36 = vunpack.c.l.bf16 %v4874_v30 }
 0x3c7   :  { %v5836_v26 = vpop.f32.mrf.mxu1  ;;  %6588 = vmatmul.mubr.f32.gmra.mxu0 %v5192_v12 }
 0x3c8   :  { %v12373_v20 = vadd.f32 %v12258_v53, %v5835_v32  ;;  %6592 = vmatprep.mubr.f32.mxu0 %v5205_v11  ;;  %v12375_v7 = vpop.f32.mrf.mxu0  ;;  %v5620_v53 = vadd.f32 %v12051_v24, %v11460_v25  ;;  %v5228_v11 = vunpack.c.l.bf16 %v4869_v56  ;;  %v4880_v25 = vld [vmem:[%s12671_s4 + $0x590] sm:$0xff]  ;;  %v4881_v32 = vld [vmem:[%s12671_s4 + $0x598] sm:$0xff] }
 0x3c9   :  { %v5839_v19 = vpop.f32.mrf.mxu1  ;;  %6368 = vmatmul.mubr.f32.gmra.mxu1 %v5202_v5  ;;  %v5241_v5 = vunpack.c.h.bf16 %v4875_v38  ;;  %v5250_v56 = vunpack.c.l.bf16 %v4880_v25 }
 0x3ca   :  { %v5840_v61 = vadd.f32 %v5839_v19, %v5615_v49  ;;  %6372 = vmatprep.mubr.f32.mxu1 %v5215_v47  ;;  %v6101_v57 = vpop.f32.mrf.mxu0  ;;  %v5240_v49 = vunpack.c.l.bf16 %v4875_v38 }
 0x3cb   :  { %v5841_v22 = vpop.f32.mrf.mxu1  ;;  %6593 = vmatmul.mubr.f32.gmra.mxu0 %v5204_v51  ;;  %v5251_v51 = vunpack.c.h.bf16 %v4880_v25 }
 0x3cc   :  { %v12386_v9 = vadd.f32 %v12268_v33, %v5840_v61  ;;  %6597 = vmatprep.mubr.f32.mxu0 %v5217_v17  ;;  %v5625_v33 = vadd.f32 %v12062_v8, %v11487_v44  ;;  %v4886_v44 = vld [vmem:[%s12671_s4 + $0x5c0] sm:$0xff]  ;;  %v5630_v8 = vadd.f32 %v12070_v34, %v11505_v43  ;;  %v5253_v17 = vunpack.c.h.bf16 %v4881_v32  ;;  %v4887_v61 = vld [vmem:[%s12671_s4 + $0x5c8] sm:$0xff]  ;;  %v4892_v34 = vld [vmem:[%s12671_s4 + $0x5f0] sm:$0xff] }
 0x3cd   :  { %v5844_v55 = vpop.f32.mrf.mxu1  ;;  %6373 = vmatmul.mubr.f32.gmra.mxu1 %v5214_v1  ;;  %v5263_v57 = vunpack.c.h.bf16 %v4886_v44  ;;  %v5252_v43 = vunpack.c.l.bf16 %v4881_v32 }
 0x3ce   :  { %v5845_v12 = vadd.f32 %v5844_v55, %v5620_v53  ;;  %6377 = vmatprep.mubr.f32.mxu1 %v5227_v28  ;;  %v5265_v53 = vunpack.c.h.bf16 %v4887_v61  ;;  %v5262_v55 = vunpack.c.l.bf16 %v4886_v44 }
 0x3cf   :  { %v5846_v48 = vpop.f32.mrf.mxu1  ;;  %6598 = vmatmul.mubr.f32.gmra.mxu0 %v5216_v4  ;;  %v12394_v24 = vpop.f32.mrf.mxu0 }
 0x3d0   :  { %v12399_v50 = vadd.f32 %v12281_v29, %v5845_v12  ;;  %6602 = vmatprep.mubr.f32.mxu0 %v5229_v10  ;;  %v5275_v12 = vunpack.c.h.bf16 %v4892_v34  ;;  %v5264_v48 = vunpack.c.l.bf16 %v4887_v61 }
 0x3d1   :  { %v5849_v21 = vpop.f32.mrf.mxu1  ;;  %6378 = vmatmul.mubr.f32.gmra.mxu1 %v5226_v41  ;;  %v6106_v47 = vpop.f32.mrf.mxu0  ;;  %v4893_v41 = vld [vmem:[%s12671_s4 + $0x5f8] sm:$0xff] }
 0x3d2   :  { %v5850_v26 = vadd.f32 %v5849_v21, %v5625_v33  ;;  %6382 = vmatprep.mubr.f32.mxu1 %v5239_v42  ;;  %v5274_v33 = vunpack.c.l.bf16 %v4892_v34  ;;  %v5276_v32 = vunpack.c.l.bf16 %v4893_v41  ;;  %v5645_v47 = vadd.f32 %v12103_v40, %v11555_v58 }
 0x3d3   :  { %v5851_v35 = vpop.f32.mrf.mxu1  ;;  %6603 = vmatmul.mubr.f32.gmra.mxu0 %v5228_v11 }
 0x3d4   :  { %v12410_v29 = vadd.f32 %v12294_v59, %v5850_v26  ;;  %6607 = vmatprep.mubr.f32.mxu0 %v5241_v5  ;;  %v12412_v19 = vpop.f32.mrf.mxu0  ;;  %v5635_v59 = vadd.f32 %v12081_v52, %v11524_v45  ;;  %v5640_v45 = vadd.f32 %v12092_v37, %v11542_v23 }
 0x3d5   :  { %v5854_v1 = vpop.f32.mrf.mxu1  ;;  %6383 = vmatmul.mubr.f32.gmra.mxu1 %v5238_v36 }
 0x3d6   :  { %v5855_v28 = vadd.f32 %v5854_v1, %v5630_v8  ;;  %6387 = vmatprep.mubr.f32.mxu1 %v5251_v51  ;;  %v6111_v22 = vpop.f32.mrf.mxu0 }
 0x3d7   :  { %v5856_v4 = vpop.f32.mrf.mxu1  ;;  %6608 = vmatmul.mubr.f32.gmra.mxu0 %v5240_v49  ;;  %v5650_v49 = vadd.f32 %v12114_v6, %v11570_v54  ;;  %v12718_v22 = vld [vmem:[#allocation15_spill] sm:$0xff] }
 0x3d8   :  { %v12423_v30 = vadd.f32 %v12307_v15, %v5855_v28  ;;  %6612 = vmatprep.mubr.f32.mxu0 %v5253_v17  ;;  %v5277_v15 = vunpack.c.h.bf16 %v4893_v41  ;;  %v5660_v54 = vadd.f32 %v12718_v22, %v11596_v13 }
 0x3d9   :  { %v5859_v10 = vpop.f32.mrf.mxu1  ;;  %6388 = vmatmul.mubr.f32.gmra.mxu1 %v5250_v56 }
 0x3da   :  { %v5860_v38 = vadd.f32 %v5859_v10, %v5635_v59  ;;  %6392 = vmatprep.mubr.f32.mxu1 %v5263_v57  ;;  %v12719_v59 = vld [vmem:[#allocation3_spill] sm:$0xff] }
 0x3db   :  { %v5861_v42 = vpop.f32.mrf.mxu1  ;;  %6613 = vmatmul.mubr.f32.gmra.mxu0 %v5252_v43  ;;  %v6114_v11 = vpop.f32.mrf.mxu0 }
 0x3dc   :  { %v12431_v52 = vadd.f32 %v12325_v63, %v5860_v38  ;;  %6617 = vmatprep.mubr.f32.mxu0 %v5265_v53  ;;  %v12720_v53 = vld [vmem:[#allocation16_spill] sm:$0xff]  ;;  %v12721_v38 = vld [vmem:[#allocation7_spill] sm:$0xff] }
 0x3dd   :  { %v5864_v25 = vpop.f32.mrf.mxu1  ;;  %6393 = vmatmul.mubr.f32.gmra.mxu1 %v5262_v55  ;;  %v6116_v5 = vpop.f32.mrf.mxu0 }
 0x3de   :  { %v5865_v21 = vadd.f32 %v5864_v25, %v5640_v45  ;;  %6397 = vmatprep.mubr.f32.mxu1 %v5275_v12  ;;  %v12722_v12 = vld [vmem:[#allocation17_spill] sm:$0xff]  ;;  %v12724_v25 = vld [vmem:[#allocation18_spill] sm:$0xff] }
 0x3df   :  { %v5866_v36 = vpop.f32.mrf.mxu1  ;;  %6618 = vmatmul.mubr.f32.gmra.mxu0 %v5264_v48  ;;  %v5670_v13 = vadd.f32 %v12722_v12, %v12721_v38 }
 0x3e0   :  { %v12436_v26 = vadd.f32 %v12338_v0, %v5865_v21  ;;  %6622 = vmatprep.mubr.f32.mxu0 %v5277_v15  ;;  %v6119_v23 = vpop.f32.mrf.mxu0  ;;  %v5655_v0 = vadd.f32 %v12122_v3, %v11584_v60  ;;  %v5665_v60 = vadd.f32 %v12720_v53, %v12719_v59  ;;  %v12723_v15 = vld [vmem:[#allocation4_spill] sm:$0xff]  ;;  %v12731_v53 = vld [vmem:[#allocation6_spill] sm:$0xff] }
 0x3e1   :  { %v5869_v37 = vpop.f32.mrf.mxu1  ;;  %6398 = vmatmul.mubr.f32.gmra.mxu1 %v5274_v33  ;;  %v5675_v33 = vadd.f32 %v12724_v25, %v12723_v15 }
 0x3e2   :  { %v5870_v63 = vadd.f32 %v5869_v37, %v5645_v47  ;;  %v6121_v51 = vpop.f32.mrf.mxu0  ;;  %v12726_v47 = vld [vmem:[#allocation19_spill] sm:$0xff] }
 0x3e3   :  { %v5871_v35 = vpop.f32.mrf.mxu1  ;;  %6623 = vmatmul.mubr.f32.gmra.mxu0 %v5276_v32  ;;  %v12725_v32 = vld [vmem:[#allocation8_spill] sm:$0xff] }
 0x3e4   :  { %v12441_v44 = vadd.f32 %v12357_v14, %v5870_v63  ;;  %v5680_v37 = vadd.f32 %v12726_v47, %v12725_v32  ;;  %v12736_v32 = vld [vmem:[#allocation24_spill] sm:$0xff] }
 0x3e5   :  { %v5874_v8 = vpop.f32.mrf.mxu1 }
 0x3e6   :  { %v5875_v17 = vadd.f32 %v5874_v8, %v5650_v49  ;;  %v12727_v49 = vld [vmem:[#allocation2_spill] sm:$0xff]  ;;  %v12728_v8 = vld [vmem:[#allocation20_spill] sm:$0xff] }
 0x3e7   :  { %v5876_v58 = vpop.f32.mrf.mxu1  ;;  %v6124_v40 = vpop.f32.mrf.mxu0 }
 0x3e8   :  { %v12446_v1 = vadd.f32 %v12375_v7, %v5875_v17  ;;  %v5685_v17 = vadd.f32 %v12728_v8, %v12727_v49 }
 0x3e9   :  { %v5879_v56 = vpop.f32.mrf.mxu1  ;;  %v6126_v61 = vpop.f32.mrf.mxu0 }
 0x3ea   :  { %v5880_v28 = vadd.f32 %v5879_v56, %v5655_v0 }
 0x3eb   :  { %v5881_v57 = vpop.f32.mrf.mxu1 }
 0x3ec   :  { %v12451_v6 = vadd.f32 %v12394_v24, %v5880_v28  ;;  %v12729_v28 = vld [vmem:[#allocation5_spill] sm:$0xff] }
 0x3ed   :  { %v5884_v14 = vpop.f32.mrf.mxu1  ;;  %v12730_v57 = vld [vmem:[#allocation21_spill] sm:$0xff] }
 0x3ee   :  { %v5885_v4 = vadd.f32 %v5884_v14, %v5660_v54  ;;  %v5690_v22 = vadd.f32 %v12730_v57, %v12729_v28 }
 0x3ef   :  { %v5886_v43 = vpop.f32.mrf.mxu1  ;;  %v6129_v34 = vpop.f32.mrf.mxu0 }
 0x3f0   :  { %v12456_v3 = vadd.f32 %v12412_v19, %v5885_v4 }
 0x3f1   :  { %v5889_v7 = vpop.f32.mrf.mxu1  ;;  %v6131_v10 = vpop.f32.mrf.mxu0 }
 0x3f2   :  { %v5890_v55 = vadd.f32 %v5889_v7, %v5665_v60  ;;  %v12732_v60 = vld [vmem:[#allocation22_spill] sm:$0xff] }
 0x3f3   :  { %v5891_v41 = vpop.f32.mrf.mxu1  ;;  %v5695_v7 = vadd.f32 %v12732_v60, %v12731_v53 }
 0x3f4   :  { %v12460_v42 = vadd.f32 %v6114_v11, %v5890_v55 }
 0x3f5   :  { %v5894_v24 = vpop.f32.mrf.mxu1 }
 0x3f6   :  { %v5895_v48 = vadd.f32 %v5894_v24, %v5670_v13  ;;  %v12733_v13 = vld [vmem:[#allocation9_spill] sm:$0xff]  ;;  %v12734_v24 = vld [vmem:[#allocation23_spill] sm:$0xff] }
 0x3f7   :  { %v5896_v45 = vpop.f32.mrf.mxu1 }
 0x3f8   :  { %v12464_v5 = vadd.f32 %v6119_v23, %v5895_v48  ;;  %v5700_v48 = vadd.f32 %v12734_v24, %v12733_v13 }
 0x3f9   :  { %v5899_v21 = vpop.f32.mrf.mxu1 }
 0x3fa   :  { %v5900_v19 = vadd.f32 %v5899_v21, %v5675_v33 }
 0x3fb   :  { %v5901_v36 = vpop.f32.mrf.mxu1 }
 0x3fc   :  { %v12468_v63 = vadd.f32 %v6124_v40, %v5900_v19  ;;  %v12735_v36 = vld [vmem:[#allocation10_spill] sm:$0xff] }
 0x3fd   :  { %v5904_v51 = vpop.f32.mrf.mxu1  ;;  %v5705_v47 = vadd.f32 %v12736_v32, %v12735_v36 }
 0x3fe   :  { %v5905_v35 = vadd.f32 %v5904_v51, %v5680_v37 }
 0x3ff   :  { %v5906_v11 = vpop.f32.mrf.mxu1 }
 0x400   :  { %v12472_v58 = vadd.f32 %v6129_v34, %v5905_v35 }
 0x401   :  { %v5909_v0 = vpop.f32.mrf.mxu1 }
 0x402   :  { %v5910_v56 = vadd.f32 %v5909_v0, %v5685_v17  ;;  %v12737_v17 = vld [vmem:[#allocation11_spill] sm:$0xff]  ;;  %v12738_v0 = vld [vmem:[#allocation25_spill] sm:$0xff] }
 0x403   :  { %v5911_v23 = vpop.f32.mrf.mxu1  ;;  %v6134_v61 = vpop.f32.mrf.mxu0 }
 0x404   :  { %v12476_v54 = vadd.f32 %v6134_v61, %v5910_v56  ;;  %v5710_v56 = vadd.f32 %v12738_v0, %v12737_v17 }
 0x405   :  { %v5914_v14 = vpop.f32.mrf.mxu1  ;;  %v6136_v40 = vpop.f32.mrf.mxu0 }
 0x406   :  { %v5915_v4 = vadd.f32 %v5914_v14, %v5690_v22  ;;  %v12739_v40 = vld [vmem:[#allocation12_spill] sm:$0xff] }
 0x407   :  { %v5916_v43 = vpop.f32.mrf.mxu1  ;;  %v6139_v59 = vpop.f32.mrf.mxu0 }
 0x408   :  { %v12480_v10 = vadd.f32 %v6139_v59, %v5915_v4  ;;  %v12740_v4 = vld [vmem:[#allocation26_spill] sm:$0xff] }
 0x409   :  { %v5919_v34 = vpop.f32.mrf.mxu1  ;;  %v6141_v55 = vpop.f32.mrf.mxu0  ;;  %v5715_v43 = vadd.f32 %v12740_v4, %v12739_v40 }
 0x40a   :  { %v5920_v41 = vadd.f32 %v5919_v34, %v5695_v7 }
 0x40b   :  { %v5921_v38 = vpop.f32.mrf.mxu1  ;;  %v6144_v12 = vpop.f32.mrf.mxu0 }
 0x40c   :  { %v12484_v45 = vadd.f32 %v6144_v12, %v5920_v41  ;;  %v12741_v41 = vld [vmem:[#allocation13_spill] sm:$0xff]  ;;  %v12742_v38 = vld [vmem:[#allocation27_spill] sm:$0xff] }
 0x40d   :  { %v5924_v15 = vpop.f32.mrf.mxu1  ;;  %v6146_v25 = vpop.f32.mrf.mxu0  ;;  %v5720_v12 = vadd.f32 %v12742_v38, %v12741_v41 }
 0x40e   :  { %v5925_v33 = vadd.f32 %v5924_v15, %v5700_v48 }
 0x40f   :  { %v5926_v21 = vpop.f32.mrf.mxu1  ;;  %v6149_v19 = vpop.f32.mrf.mxu0 }
 0x410   :  { %v12488_v37 = vadd.f32 %v6149_v19, %v5925_v33  ;;  %v12743_v21 = vld [vmem:[#allocation14_spill] sm:$0xff]  ;;  %v12744_v19 = vld [vmem:[#allocation28_spill] sm:$0xff] }
 0x411   :  { %v5929_v51 = vpop.f32.mrf.mxu1  ;;  %v6151_v35 = vpop.f32.mrf.mxu0  ;;  %v5725_v36 = vadd.f32 %v12744_v19, %v12743_v21 }
 0x412   :  { %v5930_v11 = vadd.f32 %v5929_v51, %v5705_v47 }
 0x413   :  { %v5931_v49 = vpop.f32.mrf.mxu1  ;;  %v6154_v8 = vpop.f32.mrf.mxu0 }
 0x414   :  { %v12492_v23 = vadd.f32 %v6154_v8, %v5930_v11 }
 0x415   :  { %v5934_v61 = vpop.f32.mrf.mxu1  ;;  %v6156_v28 = vpop.f32.mrf.mxu0 }
 0x416   :  { %v5935_v57 = vadd.f32 %v5934_v61, %v5710_v56 }
 0x417   :  { %v5936_v22 = vpop.f32.mrf.mxu1  ;;  %v6159_v14 = vpop.f32.mrf.mxu0 }
 0x418   :  { %v12496_v59 = vadd.f32 %v6159_v14, %v5935_v57 }
 0x419   :  { %v5939_v53 = vpop.f32.mrf.mxu1  ;;  %v6161_v60 = vpop.f32.mrf.mxu0 }
 0x41a   :  { %v5940_v7 = vadd.f32 %v5939_v53, %v5715_v43 }
 0x41b   :  { %v5941_v34 = vpop.f32.mrf.mxu1  ;;  %v6164_v55 = vpop.f32.mrf.mxu0 }
 0x41c   :  { %v12500_v13 = vadd.f32 %v6164_v55, %v5940_v7 }
 0x41d   :  { %v5944_v24 = vpop.f32.mrf.mxu1  ;;  %v6166_v48 = vpop.f32.mrf.mxu0 }
 0x41e   :  { %v5945_v15 = vadd.f32 %v5944_v24, %v5720_v12 }
 0x41f   :  { %v5946_v25 = vpop.f32.mrf.mxu1  ;;  %v6169_v33 = vpop.f32.mrf.mxu0 }
 0x420   :  { %v12504_v32 = vadd.f32 %v6169_v33, %v5945_v15 }
 0x421   :  { %v5949_v47 = vpop.f32.mrf.mxu1  ;;  %v6171_v51 = vpop.f32.mrf.mxu0 }
 0x422   :  { %v5950_v35 = vadd.f32 %v5949_v47, %v5725_v36 }
 0x423   :  { %v5951_v11 = vpop.f32.mrf.mxu1  ;;  %v6174_v49 = vpop.f32.mrf.mxu0 }
 0x424   :  { %v12506_v8 = vadd.f32 %v6174_v49, %v5950_v35 }
 0x425   :  { %v6176_v17 = vpop.f32.mrf.mxu0  ;;  %v6244_v0 = vpop.f32.mrf.mxu1 }
 0x426   :  { %v6245_v56 = vadd.f32 %v6244_v0, %v12273_v39 }
 0x427   :  { %v6246_v61 = vpop.f32.mrf.mxu1  ;;  %v6469_v28 = vpop.f32.mrf.mxu0 }
 0x428   :  { %v6470_v57 = vadd.f32 %v6469_v28, %v6245_v56 }
 0x429   :  { %v6249_v22 = vpop.f32.mrf.mxu1  ;;  %v6471_v14 = vpop.f32.mrf.mxu0 }
 0x42a   :  { %6629 = vst.msk [vmem:[%s12673_s5] sm:$0xff] %vm6628_vm1, %v6470_v57  ;;  %v6250_v40 = vadd.f32 %v6249_v22, %v12286_v18 }
 0x42b   :  { %v6251_v4 = vpop.f32.mrf.mxu1  ;;  %v6474_v43 = vpop.f32.mrf.mxu0 }
 0x42c   :  { %v6475_v53 = vadd.f32 %v6474_v43, %v6250_v40 }
 0x42d   :  { %v6254_v60 = vpop.f32.mrf.mxu1  ;;  %v6476_v7 = vpop.f32.mrf.mxu0 }
 0x42e   :  { %6630 = vst.msk [vmem:[%s12673_s5 + $0x8] sm:$0xff] %vm6628_vm1, %v6475_v53  ;;  %v6255_v39 = vadd.f32 %v6254_v60, %v12299_v46 }
 0x42f   :  { %v6256_v34 = vpop.f32.mrf.mxu1  ;;  %v6479_v55 = vpop.f32.mrf.mxu0 }
 0x430   :  { %v6480_v41 = vadd.f32 %v6479_v55, %v6255_v39 }
 0x431   :  { %v6259_v38 = vpop.f32.mrf.mxu1  ;;  %v6481_v12 = vpop.f32.mrf.mxu0 }
 0x432   :  { %6631 = vst.msk [vmem:[%s12673_s5 + $0x10] sm:$0xff] %vm6628_vm1, %v6480_v41  ;;  %v6260_v18 = vadd.f32 %v6259_v38, %v12312_v16 }
 0x433   :  { %v6261_v24 = vpop.f32.mrf.mxu1  ;;  %v6484_v48 = vpop.f32.mrf.mxu0 }
 0x434   :  { %v6485_v15 = vadd.f32 %v6484_v48, %v6260_v18 }
 0x435   :  { %v6264_v25 = vpop.f32.mrf.mxu1  ;;  %v6486_v33 = vpop.f32.mrf.mxu0 }
 0x436   :  { %6632 = vst.msk [vmem:[%s12673_s5 + $0x18] sm:$0xff] %vm6628_vm1, %v6485_v15  ;;  %v6265_v46 = vadd.f32 %v6264_v25, %v12323_v31 }
 0x437   :  { %v6266_v21 = vpop.f32.mrf.mxu1  ;;  %v6489_v19 = vpop.f32.mrf.mxu0 }
 0x438   :  { %v6490_v36 = vadd.f32 %v6489_v19, %v6265_v46 }
 0x439   :  { %v6269_v47 = vpop.f32.mrf.mxu1  ;;  %v6491_v51 = vpop.f32.mrf.mxu0 }
 0x43a   :  { %6633 = vst.msk [vmem:[%s12673_s5 + $0x20] sm:$0xff] %vm6628_vm1, %v6490_v36  ;;  %v6270_v16 = vadd.f32 %v6269_v47, %v12336_v2 }
 0x43b   :  { %v6271_v35 = vpop.f32.mrf.mxu1  ;;  %v6494_v11 = vpop.f32.mrf.mxu0 }
 0x43c   :  { %v6495_v49 = vadd.f32 %v6494_v11, %v6270_v16 }
 0x43d   :  { %v6274_v17 = vpop.f32.mrf.mxu1  ;;  %v6496_v0 = vpop.f32.mrf.mxu0 }
 0x43e   :  { %6634 = vst.msk [vmem:[%s12673_s5 + $0x28] sm:$0xff] %vm6628_vm1, %v6495_v49  ;;  %v6275_v31 = vadd.f32 %v6274_v17, %v12349_v27 }
 0x43f   :  { %v6276_v56 = vpop.f32.mrf.mxu1  ;;  %v6499_v61 = vpop.f32.mrf.mxu0 }
 0x440   :  { %v6500_v28 = vadd.f32 %v6499_v61, %v6275_v31 }
 0x441   :  { %v6279_v57 = vpop.f32.mrf.mxu1  ;;  %v6501_v22 = vpop.f32.mrf.mxu0 }
 0x442   :  { %6635 = vst.msk [vmem:[%s12673_s5 + $0x30] sm:$0xff] %vm6628_vm1, %v6500_v28  ;;  %v6280_v2 = vadd.f32 %v6279_v57, %v12362_v62 }
 0x443   :  { %v6281_v14 = vpop.f32.mrf.mxu1  ;;  %v6504_v40 = vpop.f32.mrf.mxu0 }
 0x444   :  { %v6505_v4 = vadd.f32 %v6504_v40, %v6280_v2 }
 0x445   :  { %v6284_v43 = vpop.f32.mrf.mxu1  ;;  %v6506_v53 = vpop.f32.mrf.mxu0 }
 0x446   :  { %6636 = vst.msk [vmem:[%s12673_s5 + $0x38] sm:$0xff] %vm6628_vm1, %v6505_v4  ;;  %v6285_v27 = vadd.f32 %v6284_v43, %v12373_v20 }
 0x447   :  { %v6286_v60 = vpop.f32.mrf.mxu1  ;;  %v6509_v7 = vpop.f32.mrf.mxu0 }
 0x448   :  { %v6510_v39 = vadd.f32 %v6509_v7, %v6285_v27 }
 0x449   :  { %v6289_v34 = vpop.f32.mrf.mxu1  ;;  %v6511_v55 = vpop.f32.mrf.mxu0 }
 0x44a   :  { %6637 = vst.msk [vmem:[%s12673_s5 + $0x40] sm:$0xff] %vm6628_vm1, %v6510_v39  ;;  %v6290_v62 = vadd.f32 %v6289_v34, %v12386_v9 }
 0x44b   :  { %v6291_v41 = vpop.f32.mrf.mxu1  ;;  %v6514_v38 = vpop.f32.mrf.mxu0 }
 0x44c   :  { %v6515_v12 = vadd.f32 %v6514_v38, %v6290_v62 }
 0x44d   :  { %v6294_v18 = vpop.f32.mrf.mxu1  ;;  %v6516_v24 = vpop.f32.mrf.mxu0 }
 0x44e   :  { %6638 = vst.msk [vmem:[%s12673_s5 + $0x48] sm:$0xff] %vm6628_vm1, %v6515_v12  ;;  %v6295_v20 = vadd.f32 %v6294_v18, %v12399_v50 }
 0x44f   :  { %v6296_v48 = vpop.f32.mrf.mxu1  ;;  %v6519_v15 = vpop.f32.mrf.mxu0 }
 0x450   :  { %v6520_v25 = vadd.f32 %v6519_v15, %v6295_v20 }
 0x451   :  { %v6299_v33 = vpop.f32.mrf.mxu1  ;;  %v6521_v46 = vpop.f32.mrf.mxu0 }
 0x452   :  { %6639 = vst.msk [vmem:[%s12673_s5 + $0x50] sm:$0xff] %vm6628_vm1, %v6520_v25  ;;  %v6300_v9 = vadd.f32 %v6299_v33, %v12410_v29 }
 0x453   :  { %v6301_v21 = vpop.f32.mrf.mxu1  ;;  %v6524_v19 = vpop.f32.mrf.mxu0 }
 0x454   :  { %v6525_v36 = vadd.f32 %v6524_v19, %v6300_v9 }
 0x455   :  { %v6304_v47 = vpop.f32.mrf.mxu1  ;;  %v6526_v51 = vpop.f32.mrf.mxu0 }
 0x456   :  { %6640 = vst.msk [vmem:[%s12673_s5 + $0x58] sm:$0xff] %vm6628_vm1, %v6525_v36  ;;  %v6305_v50 = vadd.f32 %v6304_v47, %v12423_v30 }
 0x457   :  { %v6306_v16 = vpop.f32.mrf.mxu1  ;;  %v6529_v35 = vpop.f32.mrf.mxu0 }
 0x458   :  { %v6530_v11 = vadd.f32 %v6529_v35, %v6305_v50 }
 0x459   :  { %v6309_v49 = vpop.f32.mrf.mxu1  ;;  %v6531_v17 = vpop.f32.mrf.mxu0 }
 0x45a   :  { %6641 = vst.msk [vmem:[%s12673_s5 + $0x60] sm:$0xff] %vm6628_vm1, %v6530_v11  ;;  %v6310_v29 = vadd.f32 %v6309_v49, %v12431_v52 }
 0x45b   :  { %v6311_v0 = vpop.f32.mrf.mxu1  ;;  %v6534_v31 = vpop.f32.mrf.mxu0 }
 0x45c   :  { %v6535_v56 = vadd.f32 %v6534_v31, %v6310_v29 }
 0x45d   :  { %v6314_v61 = vpop.f32.mrf.mxu1  ;;  %v6536_v28 = vpop.f32.mrf.mxu0 }
 0x45e   :  { %6642 = vst.msk [vmem:[%s12673_s5 + $0x68] sm:$0xff] %vm6628_vm1, %v6535_v56  ;;  %v6315_v30 = vadd.f32 %v6314_v61, %v12436_v26 }
 0x45f   :  { %v6316_v57 = vpop.f32.mrf.mxu1  ;;  %v6539_v22 = vpop.f32.mrf.mxu0 }
 0x460   :  { %v6540_v2 = vadd.f32 %v6539_v22, %v6315_v30 }
 0x461   :  { %v6319_v14 = vpop.f32.mrf.mxu1  ;;  %v6541_v40 = vpop.f32.mrf.mxu0 }
 0x462   :  { %6643 = vst.msk [vmem:[%s12673_s5 + $0x70] sm:$0xff] %vm6628_vm1, %v6540_v2  ;;  %v6320_v52 = vadd.f32 %v6319_v14, %v12441_v44 }
 0x463   :  { %v6321_v4 = vpop.f32.mrf.mxu1  ;;  %v6544_v43 = vpop.f32.mrf.mxu0 }
 0x464   :  { %v6545_v53 = vadd.f32 %v6544_v43, %v6320_v52 }
 0x465   :  { %v6324_v27 = vpop.f32.mrf.mxu1  ;;  %v6546_v60 = vpop.f32.mrf.mxu0 }
 0x466   :  { %6644 = vst.msk [vmem:[%s12673_s5 + $0x78] sm:$0xff] %vm6628_vm1, %v6545_v53  ;;  %v6325_v26 = vadd.f32 %v6324_v27, %v12446_v1 }
 0x467   :  { %v6326_v7 = vpop.f32.mrf.mxu1  ;;  %v6549_v39 = vpop.f32.mrf.mxu0 }
 0x468   :  { %v6550_v34 = vadd.f32 %v6549_v39, %v6325_v26 }
 0x469   :  { %v6329_v55 = vpop.f32.mrf.mxu1  ;;  %v6551_v62 = vpop.f32.mrf.mxu0 }
 0x46a   :  { %6645 = vst.msk [vmem:[%s12673_s5 + $0x80] sm:$0xff] %vm6628_vm1, %v6550_v34  ;;  %v6330_v44 = vadd.f32 %v6329_v55, %v12451_v6 }
 0x46b   :  { %v6331_v41 = vpop.f32.mrf.mxu1  ;;  %v6554_v38 = vpop.f32.mrf.mxu0 }
 0x46c   :  { %v6555_v12 = vadd.f32 %v6554_v38, %v6330_v44 }
 0x46d   :  { %v6334_v18 = vpop.f32.mrf.mxu1  ;;  %v6556_v24 = vpop.f32.mrf.mxu0 }
 0x46e   :  { %6646 = vst.msk [vmem:[%s12673_s5 + $0x88] sm:$0xff] %vm6628_vm1, %v6555_v12  ;;  %v6335_v1 = vadd.f32 %v6334_v18, %v12456_v3 }
 0x46f   :  { %v6336_v20 = vpop.f32.mrf.mxu1  ;;  %v6559_v48 = vpop.f32.mrf.mxu0 }
 0x470   :  { %v6560_v15 = vadd.f32 %v6559_v48, %v6335_v1 }
 0x471   :  { %v6339_v25 = vpop.f32.mrf.mxu1  ;;  %v6561_v33 = vpop.f32.mrf.mxu0 }
 0x472   :  { %6647 = vst.msk [vmem:[%s12673_s5 + $0x90] sm:$0xff] %vm6628_vm1, %v6560_v15  ;;  %v6340_v6 = vadd.f32 %v6339_v25, %v12460_v42 }
 0x473   :  { %v6341_v46 = vpop.f32.mrf.mxu1  ;;  %v6564_v9 = vpop.f32.mrf.mxu0 }
 0x474   :  { %v6565_v21 = vadd.f32 %v6564_v9, %v6340_v6 }
 0x475   :  { %v6344_v19 = vpop.f32.mrf.mxu1  ;;  %v6566_v36 = vpop.f32.mrf.mxu0 }
 0x476   :  { %6648 = vst.msk [vmem:[%s12673_s5 + $0x98] sm:$0xff] %vm6628_vm1, %v6565_v21  ;;  %v6345_v3 = vadd.f32 %v6344_v19, %v12464_v5 }
 0x477   :  { %v6346_v47 = vpop.f32.mrf.mxu1  ;;  %v6569_v51 = vpop.f32.mrf.mxu0 }
 0x478   :  { %v6570_v50 = vadd.f32 %v6569_v51, %v6345_v3 }
 0x479   :  { %v6349_v16 = vpop.f32.mrf.mxu1  ;;  %v6571_v35 = vpop.f32.mrf.mxu0 }
 0x47a   :  { %6649 = vst.msk [vmem:[%s12673_s5 + $0xa0] sm:$0xff] %vm6628_vm1, %v6570_v50  ;;  %v6350_v42 = vadd.f32 %v6349_v16, %v12468_v63 }
 0x47b   :  { %v6351_v11 = vpop.f32.mrf.mxu1  ;;  %v6574_v49 = vpop.f32.mrf.mxu0 }
 0x47c   :  { %v6575_v17 = vadd.f32 %v6574_v49, %v6350_v42 }
 0x47d   :  { %v6354_v29 = vpop.f32.mrf.mxu1  ;;  %v6576_v0 = vpop.f32.mrf.mxu0 }
 0x47e   :  { %6650 = vst.msk [vmem:[%s12673_s5 + $0xa8] sm:$0xff] %vm6628_vm1, %v6575_v17  ;;  %v6355_v5 = vadd.f32 %v6354_v29, %v12472_v58 }
 0x47f   :  { %v6356_v31 = vpop.f32.mrf.mxu1  ;;  %v6579_v56 = vpop.f32.mrf.mxu0 }
 0x480   :  { %v6580_v61 = vadd.f32 %v6579_v56, %v6355_v5 }
 0x481   :  { %v6359_v28 = vpop.f32.mrf.mxu1  ;;  %v6581_v30 = vpop.f32.mrf.mxu0 }
 0x482   :  { %6651 = vst.msk [vmem:[%s12673_s5 + $0xb0] sm:$0xff] %vm6628_vm1, %v6580_v61  ;;  %v6360_v63 = vadd.f32 %v6359_v28, %v12476_v54 }
 0x483   :  { %v6361_v57 = vpop.f32.mrf.mxu1  ;;  %v6584_v22 = vpop.f32.mrf.mxu0 }
 0x484   :  { %v6585_v2 = vadd.f32 %v6584_v22, %v6360_v63 }
 0x485   :  { %v6364_v14 = vpop.f32.mrf.mxu1  ;;  %v6586_v40 = vpop.f32.mrf.mxu0 }
 0x486   :  { %6652 = vst.msk [vmem:[%s12673_s5 + $0xb8] sm:$0xff] %vm6628_vm1, %v6585_v2  ;;  %v6365_v58 = vadd.f32 %v6364_v14, %v12480_v10 }
 0x487   :  { %v6366_v52 = vpop.f32.mrf.mxu1  ;;  %v6589_v4 = vpop.f32.mrf.mxu0 }
 0x488   :  { %v6590_v43 = vadd.f32 %v6589_v4, %v6365_v58 }
 0x489   :  { %v6369_v53 = vpop.f32.mrf.mxu1  ;;  %v6591_v27 = vpop.f32.mrf.mxu0 }
 0x48a   :  { %6653 = vst.msk [vmem:[%s12673_s5 + $0xc0] sm:$0xff] %vm6628_vm1, %v6590_v43  ;;  %v6370_v54 = vadd.f32 %v6369_v53, %v12484_v45 }
 0x48b   :  { %v6371_v60 = vpop.f32.mrf.mxu1  ;;  %v6594_v26 = vpop.f32.mrf.mxu0 }
 0x48c   :  { %v6595_v7 = vadd.f32 %v6594_v26, %v6370_v54 }
 0x48d   :  { %v6374_v39 = vpop.f32.mrf.mxu1  ;;  %v6596_v34 = vpop.f32.mrf.mxu0 }
 0x48e   :  { %6654 = vst.msk [vmem:[%s12673_s5 + $0xc8] sm:$0xff] %vm6628_vm1, %v6595_v7  ;;  %v6375_v10 = vadd.f32 %v6374_v39, %v12488_v37 }
 0x48f   :  { %v6376_v55 = vpop.f32.mrf.mxu1  ;;  %v6599_v62 = vpop.f32.mrf.mxu0 }
 0x490   :  { %v6600_v44 = vadd.f32 %v6599_v62, %v6375_v10 }
 0x491   :  { %v6379_v41 = vpop.f32.mrf.mxu1  ;;  %v6601_v38 = vpop.f32.mrf.mxu0 }
 0x492   :  { %6655 = vst.msk [vmem:[%s12673_s5 + $0xd0] sm:$0xff] %vm6628_vm1, %v6600_v44  ;;  %v6380_v45 = vadd.f32 %v6379_v41, %v12492_v23 }
 0x493   :  { %v6381_v12 = vpop.f32.mrf.mxu1  ;;  %v6604_v18 = vpop.f32.mrf.mxu0 }
 0x494   :  { %v6605_v24 = vadd.f32 %v6604_v18, %v6380_v45 }
 0x495   :  { %v6384_v1 = vpop.f32.mrf.mxu1  ;;  %v6606_v20 = vpop.f32.mrf.mxu0 }
 0x496   :  { %6656 = vst.msk [vmem:[%s12673_s5 + $0xd8] sm:$0xff] %vm6628_vm1, %v6605_v24  ;;  %v6385_v37 = vadd.f32 %v6384_v1, %v12496_v59 }
 0x497   :  { %v6386_v48 = vpop.f32.mrf.mxu1  ;;  %v6609_v15 = vpop.f32.mrf.mxu0 }
 0x498   :  { %v6610_v25 = vadd.f32 %v6609_v15, %v6385_v37 }
 0x499   :  { %v6389_v33 = vpop.f32.mrf.mxu1  ;;  %v6611_v6 = vpop.f32.mrf.mxu0 }
 0x49a   :  { %6657 = vst.msk [vmem:[%s12673_s5 + $0xe0] sm:$0xff] %vm6628_vm1, %v6610_v25  ;;  %v6390_v23 = vadd.f32 %v6389_v33, %v12500_v13 }
 0x49b   :  { %v6391_v46 = vpop.f32.mrf.mxu1  ;;  %v6614_v9 = vpop.f32.mrf.mxu0 }
 0x49c   :  { %v6615_v21 = vadd.f32 %v6614_v9, %v6390_v23 }
 0x49d   :  { %v6394_v19 = vpop.f32.mrf.mxu1  ;;  %v6616_v36 = vpop.f32.mrf.mxu0 }
 0x49e   :  { %6658 = vst.msk [vmem:[%s12673_s5 + $0xe8] sm:$0xff] %vm6628_vm1, %v6615_v21  ;;  %v6395_v59 = vadd.f32 %v6394_v19, %v12504_v32 }
 0x49f   :  { %v6396_v3 = vpop.f32.mrf.mxu1  ;;  %v6619_v47 = vpop.f32.mrf.mxu0 }
 0x4a0   :  { %v6620_v51 = vadd.f32 %v6619_v47, %v6395_v59 }
 0x4a1   :  { %v6399_v50 = vpop.f32.mrf.mxu1  ;;  %v6621_v16 = vpop.f32.mrf.mxu0 }
 0x4a2   :  { %6659 = vst.msk [vmem:[%s12673_s5 + $0xf0] sm:$0xff] %vm6628_vm1, %v6620_v51  ;;  %v6400_v13 = vadd.f32 %v6399_v50, %v12506_v8 }
 0x4a3   :  { %v6624_v35 = vpop.f32.mrf.mxu0  ;;  %v6401_v42 = vpop.f32.mrf.mxu1 }
 0x4a4   :  { %v6625_v11 = vadd.f32 %v6624_v35, %v6400_v13 }
 0x4a5   :  { %v6626_v49 = vpop.f32.mrf.mxu0 }
 0x4a6   :  { %6660 = vst.msk [vmem:[%s12673_s5 + $0xf8] sm:$0xff] %vm6628_vm1, %v6625_v11 }

</bundles_post_ra>
